<compile_context>
chip_gen: v5e
topology: v5e:2x2
jax: 0.10.0
libtpu: 0.0.40
codegen_flags: <defaults>
</compile_context>

<pallas_src>
import functools

import jax
import jax.numpy as jnp
from jax.experimental import pallas as pl
from jax.experimental.pallas import tpu as pltpu

SUB = 8          # f32 sublane tile
SUB_BF16 = 16    # bf16 sublane tile


def _round_up(v, m):
    return ((v + m - 1) // m) * m


# ----------------------------- Pallas kernel -------------------------------

def _basic_block_kernel(x_ref, w1_ref, b1_ref, w2_ref, b2_ref, o_ref, mid_ref,
                        *, H, W, mid_base):
    """conv1+bn1+relu -> conv2+bn2 + residual + relu, fused, implicit GEMM.

    x_ref  : [Rx, Cin]        f32  flat zero-haloed input slab (tail zero-padded)
    w1_ref : [9, Cin, Cmid]   bf16 per-tap weights, BN1 scale folded in
    b1_ref : [1, Cmid]        f32  folded BN1 bias
    w2_ref : [9, Cmid, Cout]  bf16 per-tap weights, BN2 scale folded in
    b2_ref : [1, Cout]        f32  folded BN2 bias
    o_ref  : [H*(W+2), Cout]  f32  padded-width output slab (cols W, W+1 junk)
    mid_ref: [Rm, Cmid]       bf16 scratch: flat zero-haloed intermediate
    """
    Wp = W + 2
    rows = H * Wp                       # padded-width output rows
    cmid = mid_ref.shape[-1]
    rm = mid_ref.shape[0]
    mid_int = mid_base + Wp + 1         # flat offset of haloed (1,1); 16-aligned

    # Mask for the 2 halo columns folded into every padded-width row: they must
    # stay zero in the mid scratch so conv2's halo reads are correct.
    col = jax.lax.broadcasted_iota(jnp.int32, (rows, cmid), 0) % Wp
    interior = col < W

    # ---- conv1: 9 contiguous row-offset slices -> accumulating MXU matmuls
    acc1 = None
    for ky in range(3):
        for kx in range(3):
            off = ky * Wp + kx
            xs = x_ref[off:off + rows, :].astype(jnp.bfloat16)
            d = jnp.dot(xs, w1_ref[ky * 3 + kx],
                        preferred_element_type=jnp.float32)
            acc1 = d if acc1 is None else acc1 + d
    out1 = jnp.maximum(acc1 + b1_ref[...], 0.0)
    out1 = jnp.where(interior, out1, 0.0)          # keep halo columns zero

    # Stage intermediate in the flat haloed VMEM scratch (never hits HBM).
    # Only the strips outside the fully rewritten interior need zeroing; do it
    # every step (cheap) so it is safe under TensorCore sharding of the grid.
    mid_ref[0:mid_int, :] = jnp.zeros((mid_int, cmid), mid_ref.dtype)
    mid_ref[mid_int + rows:rm, :] = jnp.zeros((rm - mid_int - rows, cmid),
                                              mid_ref.dtype)
    mid_ref[mid_int:mid_int + rows, :] = out1.astype(mid_ref.dtype)

    # ---- conv2 (3x3, pad=1) + bias + residual + ReLU ----
    acc2 = None
    for ky in range(3):
        for kx in range(3):
            off = mid_base + ky * Wp + kx
            d = jnp.dot(mid_ref[off:off + rows, :], w2_ref[ky * 3 + kx],
                        preferred_element_type=jnp.float32)
            acc2 = d if acc2 is None else acc2 + d
    residual = x_ref[Wp + 1:Wp + 1 + rows, :]      # f32, exact skip connection
    out2 = acc2 + b2_ref[...] + residual
    o_ref[...] = jnp.maximum(out2, 0.0)


def _basic_block_pallas(x_flat, w1, b1, w2, b2, *, H, W, mid_base, mid_rows):
    n, rx, cin_p = x_flat.shape
    cmid_p = w1.shape[-1]
    cout_p = w2.shape[-1]
    rows = H * (W + 2)
    kernel = functools.partial(_basic_block_kernel, H=H, W=W, mid_base=mid_base)
    return pl.pallas_call(
        kernel,
        out_shape=jax.ShapeDtypeStruct((n, rows, cout_p), jnp.float32),
        grid=(n,),
        in_specs=[
            pl.BlockSpec((None, rx, cin_p), lambda i: (i, 0, 0)),
            pl.BlockSpec((9, cin_p, cmid_p), lambda i: (0, 0, 0)),   # resident
            pl.BlockSpec((1, cmid_p), lambda i: (0, 0)),             # resident
            pl.BlockSpec((9, cmid_p, cout_p), lambda i: (0, 0, 0)),  # resident
            pl.BlockSpec((1, cout_p), lambda i: (0, 0)),             # resident
        ],
        out_specs=pl.BlockSpec((None, rows, cout_p), lambda i: (i, 0, 0)),
        scratch_shapes=[pltpu.VMEM((mid_rows, cmid_p), jnp.bfloat16)],
        compiler_params=pltpu.CompilerParams(
            dimension_semantics=("parallel",),
            # Footprint here is tiny; explicit limit kept so the same config is
            # valid on v5e (16 MiB default scoped VMEM) and v7x (64 MiB phys).
            vmem_limit_bytes=32 * 1024 * 1024),
    )(x_flat, w1, b1, w2, b2)


# --------------------------- host-side weight prep --------------------------

def apply_nm_sparsity(w_oihw, N=2, M=4):
    """Keep top-N (by |magnitude|) weights per group of M along Cin*Kh*Kw."""
    cout = w_oihw.shape[0]
    flat = w_oihw.reshape(cout, -1)
    g = flat.shape[1] // M
    grouped = flat.reshape(cout, g, M)
    order = jnp.argsort(-jnp.abs(grouped), axis=-1)
    ranks = jnp.argsort(order, axis=-1)
    mask = (ranks < N).astype(w_oihw.dtype)
    return (grouped * mask).reshape(w_oihw.shape)


def _fold_bn(gamma, beta, running_mean, running_var, eps=1e-5):
    scale = gamma / jnp.sqrt(running_var + eps)
    return scale, beta - running_mean * scale


def prepare_block_params(params, pad_to=SUB):
    """One-time prep (outside the hot path): N:M mask, fold BN scale into the
    weights in f32, reorder to per-tap [9, Cin, Cout], pad channels only to the
    sublane multiple (NOT 128), cast MXU operands to bf16."""
    w1 = apply_nm_sparsity(params["w1"])      # [planes, inplanes, 3, 3]
    w2 = apply_nm_sparsity(params["w2"])
    s1, b1 = _fold_bn(*params["bn1"])
    s2, b2 = _fold_bn(*params["bn2"])

    def pack_weight(w_oihw, scale):
        cout, cin = w_oihw.shape[0], w_oihw.shape[1]
        w = jnp.transpose(w_oihw, (2, 3, 1, 0)).reshape(9, cin, cout)
        w = w * scale[None, None, :]                    # fold BN scale (f32)
        cin_p, cout_p = _round_up(cin, pad_to), _round_up(cout, pad_to)
        wp = jnp.zeros((9, cin_p, cout_p), jnp.float32)
        wp = wp.at[:, :cin, :cout].set(w)
        return wp.astype(jnp.bfloat16)

    def pack_bias(b):
        c = b.shape[0]
        bp = jnp.zeros((1, _round_up(c, pad_to)), jnp.float32)
        return bp.at[0, :c].set(b)

    return {"w1": pack_weight(w1, s1), "b1": pack_bias(b1),
            "w2": pack_weight(w2, s2), "b2": pack_bias(b2)}


# ------------------------------- forward pass -------------------------------

def basic_block_forward(x_nchw, w1p, b1p, w2p, b2p, *, planes):
    """BasicBlock forward (stride=1, downsample=None). x: [N, C, H, W] f32."""
    n, c, H, W = x_nchw.shape
    if c != planes:
        # TODO(synk): downsample / stride != 1 residual path not implemented.
        raise NotImplementedError("residual path requires inplanes == planes")
    cin_p = w1p.shape[1]
    Wp = W + 2
    rows = H * Wp
    halo_rows = (H + 2) * Wp
    rx = _round_up(2 * Wp + 2 + rows, SUB)        # tail-pad: all tap slices fit
    mid_int = _round_up(Wp + 1, SUB_BF16)         # sublane-aligned interior
    mid_base = mid_int - (Wp + 1)
    mid_rows = _round_up(mid_base + 2 * Wp + 2 + rows, SUB_BF16)

    # Layout plumbing: NCHW -> flat zero-haloed [(H+2)*(W+2), C] slab, channels
    # padded to the sublane multiple only.
    # TODO(synk): in a full network keep activations in this flat haloed (bf16)
    # layout between blocks so transpose/pad/cast is paid once, not per block.
    x_nhwc = jnp.transpose(x_nchw, (0, 2, 3, 1))
    x_halo = jnp.pad(x_nhwc, ((0, 0), (1, 1), (1, 1), (0, cin_p - c)))
    x_flat = x_halo.reshape(n, halo_rows, cin_p)
    x_flat = jnp.pad(x_flat, ((0, 0), (0, rx - halo_rows), (0, 0)))

    out = _basic_block_pallas(x_flat, w1p, b1p, w2p, b2p, H=H, W=W,
                              mid_base=mid_base, mid_rows=mid_rows)
    out = out.reshape(n, H, Wp, -1)[:, :, :W, :planes]   # drop halo cols + pad
    return jnp.transpose(out, (0, 3, 1, 2))              # back to NCHW


# --------------------------- pure-JAX f32 reference -------------------------

def _reference_forward(x_nchw, params):
    def conv3x3(x, w):
        return jax.lax.conv_general_dilated(
            x, w, window_strides=(1, 1), padding=((1, 1), (1, 1)),
            dimension_numbers=("NCHW", "OIHW", "NCHW"),
            precision=jax.lax.Precision.HIGHEST)

    def bn(x, g, b, m, v, eps=1e-5):
        sc = g / jnp.sqrt(v + eps)
        return x * sc[None, :, None, None] + (b - m * sc)[None, :, None, None]

    w1 = apply_nm_sparsity(params["w1"])
    w2 = apply_nm_sparsity(params["w2"])
    out = jax.nn.relu(bn(conv3x3(x_nchw, w1), *params["bn1"]))
    out = bn(conv3x3(out, w2), *params["bn2"]) + x_nchw
    return jax.nn.relu(out)


# --------------------------------- main -------------------------------------

if __name__ == "__main__":
    inplanes = planes = 4
    batch, H, W = 2, 16, 16

    key = jax.random.PRNGKey(0)
    k = jax.random.split(key, 10)

    params = {
        "w1": jax.random.normal(k[0], (planes, inplanes, 3, 3), jnp.float32) * 0.1,
        "w2": jax.random.normal(k[1], (planes, planes, 3, 3), jnp.float32) * 0.1,
        # BN params: (gamma, beta, running_mean, running_var) — inference mode.
        # TODO(synk): training-mode BatchNorm (batch statistics) is not fused.
        "bn1": (jax.random.uniform(k[2], (planes,), jnp.float32, 0.5, 1.5),
                jax.random.normal(k[3], (planes,), jnp.float32) * 0.1,
                jax.random.normal(k[4], (planes,), jnp.float32) * 0.1,
                jax.random.uniform(k[5], (planes,), jnp.float32, 0.5, 1.5)),
        "bn2": (jax.random.uniform(k[6], (planes,), jnp.float32, 0.5, 1.5),
                jax.random.normal(k[7], (planes,), jnp.float32) * 0.1,
                jax.random.normal(k[8], (planes,), jnp.float32) * 0.1,
                jax.random.uniform(k[9], (planes,), jnp.float32, 0.5, 1.5)),
    }

    x = jax.random.normal(jax.random.PRNGKey(42), (batch, inplanes, H, W),
                          jnp.float32)

    prep = prepare_block_params(params)          # one-time, outside hot path
    fwd = jax.jit(functools.partial(basic_block_forward, planes=planes))
    out = jax.block_until_ready(
        fwd(x, prep["w1"], prep["b1"], prep["w2"], prep["b2"]))
    ref = jax.block_until_ready(_reference_forward(x, params))

    assert out.shape == (batch, planes, H, W)
    # bf16 MXU operands (weights + activation casts) vs a pure-f32 reference;
    # residual, bias and accumulation are exact f32.  Structure (halo conv,
    # residual, BN fold, N:M mask) must match exactly.
    assert jnp.allclose(out, ref, atol=3e-2, rtol=3e-2), "mismatch vs reference"
    print("KERNEL_OK")
</pallas_src>

<mosaic_0001>
module attributes {stable_mosaic.version = 11 : i64} {
  func.func @_basic_block_kernel(%arg0: i32, %arg1: memref<1x328x8xf32, #tpu.memory_space<vmem>>, %arg2: memref<9x8x8xbf16, #tpu.memory_space<vmem>>, %arg3: memref<1x8xf32, #tpu.memory_space<vmem>>, %arg4: memref<9x8x8xbf16, #tpu.memory_space<vmem>>, %arg5: memref<1x8xf32, #tpu.memory_space<vmem>>, %arg6: memref<1x288x8xf32, #tpu.memory_space<vmem>>, %arg7: memref<352x8xbf16, #tpu.memory_space<vmem>>) attributes {dimension_semantics = [#tpu.dimension_semantics<parallel>], iteration_bounds = array<i64: 2>, scalar_prefetch = 0 : i64, scratch_operands = 1 : i64, tpu.core_type = #tpu.core_type<tc>, window_params = [{transform_indices = @transform_0, window_bounds = array<i64: 1, 328, 8>}, {pipeline_mode = #tpu.pipeline_mode<synchronous>, transform_indices = @transform_1, window_bounds = array<i64: 9, 8, 8>}, {pipeline_mode = #tpu.pipeline_mode<synchronous>, transform_indices = @transform_2, window_bounds = array<i64: 1, 8>}, {pipeline_mode = #tpu.pipeline_mode<synchronous>, transform_indices = @transform_3, window_bounds = array<i64: 9, 8, 8>}, {pipeline_mode = #tpu.pipeline_mode<synchronous>, transform_indices = @transform_4, window_bounds = array<i64: 1, 8>}, {transform_indices = @transform_5, window_bounds = array<i64: 1, 288, 8>}]} {
    %0 = tpu.iota {dimensions = array<i32: 0>} : vector<288x8xi32>
    %c18_i32 = arith.constant 18 : i32
    %c0_i32 = arith.constant 0 : i32
    %1 = arith.cmpi eq, %c18_i32, %c0_i32 : i32
    %c1_i32 = arith.constant 1 : i32
    %2 = arith.select %1, %c1_i32, %c18_i32 : i32
    %3 = vector.broadcast %2 : i32 to vector<288x8xi32>
    %4 = arith.remsi %0, %3 : vector<288x8xi32>
    %c0_i32_0 = arith.constant 0 : i32
    %5 = vector.broadcast %c0_i32_0 : i32 to vector<288x8xi32>
    %6 = arith.cmpi ne, %4, %5 : vector<288x8xi32>
    %c0_i32_1 = arith.constant 0 : i32
    %7 = vector.broadcast %c0_i32_1 : i32 to vector<288x8xi32>
    %8 = arith.cmpi slt, %4, %7 : vector<288x8xi32>
    %c0_i32_2 = arith.constant 0 : i32
    %9 = arith.cmpi slt, %2, %c0_i32_2 : i32
    %10 = vector.broadcast %9 : i1 to vector<288x8xi1>
    %11 = vector.broadcast %10 : vector<288x8xi1> to vector<288x8xi1>
    %12 = arith.xori %8, %11 : vector<288x8xi1>
    %13 = arith.andi %12, %6 : vector<288x8xi1>
    %14 = vector.broadcast %2 : i32 to vector<288x8xi32>
    %15 = arith.addi %4, %14 : vector<288x8xi32>
    %16 = arith.select %13, %15, %4 : vector<288x8xi1>, vector<288x8xi32>
    %c16_i32 = arith.constant 16 : i32
    %17 = vector.broadcast %c16_i32 : i32 to vector<288x8xi32>
    %18 = arith.cmpi slt, %16, %17 : vector<288x8xi32>
    %c0 = arith.constant 0 : index
    %c0_3 = arith.constant 0 : index
    %c0_4 = arith.constant 0 : index
    %19 = vector.load %arg1[%c0, %c0_3, %c0_4] : memref<1x328x8xf32, #tpu.memory_space<vmem>>, vector<1x288x8xf32>
    %20 = vector.shape_cast %19 : vector<1x288x8xf32> to vector<288x8xf32>
    %21 = arith.truncf %20 : vector<288x8xf32> to vector<288x8xbf16>
    %c0_5 = arith.constant 0 : index
    %c0_6 = arith.constant 0 : index
    %c0_7 = arith.constant 0 : index
    %22 = vector.load %arg2[%c0_5, %c0_6, %c0_7] : memref<9x8x8xbf16, #tpu.memory_space<vmem>>, vector<1x8x8xbf16>
    %23 = vector.shape_cast %22 : vector<1x8x8xbf16> to vector<8x8xbf16>
    %cst = arith.constant dense<0.000000e+00> : vector<288x8xf32>
    %24 = tpu.matmul %21, %23, %cst {dimension_numbers = #tpu.dot_dimension_numbers<[1], [0], [0], [1], [0, 0, 1, 1], [], []>} : vector<288x8xbf16>, vector<8x8xbf16>, vector<288x8xf32> -> vector<288x8xf32>
    %c0_8 = arith.constant 0 : index
    %c1 = arith.constant 1 : index
    %c0_9 = arith.constant 0 : index
    %25 = vector.load %arg1[%c0_8, %c1, %c0_9] : memref<1x328x8xf32, #tpu.memory_space<vmem>>, vector<1x288x8xf32>
    %26 = vector.shape_cast %25 : vector<1x288x8xf32> to vector<288x8xf32>
    %27 = arith.truncf %26 : vector<288x8xf32> to vector<288x8xbf16>
    %c1_10 = arith.constant 1 : index
    %c0_11 = arith.constant 0 : index
    %c0_12 = arith.constant 0 : index
    %28 = vector.load %arg2[%c1_10, %c0_11, %c0_12] : memref<9x8x8xbf16, #tpu.memory_space<vmem>>, vector<1x8x8xbf16>
    %29 = vector.shape_cast %28 : vector<1x8x8xbf16> to vector<8x8xbf16>
    %cst_13 = arith.constant dense<0.000000e+00> : vector<288x8xf32>
    %30 = tpu.matmul %27, %29, %cst_13 {dimension_numbers = #tpu.dot_dimension_numbers<[1], [0], [0], [1], [0, 0, 1, 1], [], []>} : vector<288x8xbf16>, vector<8x8xbf16>, vector<288x8xf32> -> vector<288x8xf32>
    %31 = arith.addf %24, %30 : vector<288x8xf32>
    %c0_14 = arith.constant 0 : index
    %c2 = arith.constant 2 : index
    %c0_15 = arith.constant 0 : index
    %32 = vector.load %arg1[%c0_14, %c2, %c0_15] : memref<1x328x8xf32, #tpu.memory_space<vmem>>, vector<1x288x8xf32>
    %33 = vector.shape_cast %32 : vector<1x288x8xf32> to vector<288x8xf32>
    %34 = arith.truncf %33 : vector<288x8xf32> to vector<288x8xbf16>
    %c2_16 = arith.constant 2 : index
    %c0_17 = arith.constant 0 : index
    %c0_18 = arith.constant 0 : index
    %35 = vector.load %arg2[%c2_16, %c0_17, %c0_18] : memref<9x8x8xbf16, #tpu.memory_space<vmem>>, vector<1x8x8xbf16>
    %36 = vector.shape_cast %35 : vector<1x8x8xbf16> to vector<8x8xbf16>
    %cst_19 = arith.constant dense<0.000000e+00> : vector<288x8xf32>
    %37 = tpu.matmul %34, %36, %cst_19 {dimension_numbers = #tpu.dot_dimension_numbers<[1], [0], [0], [1], [0, 0, 1, 1], [], []>} : vector<288x8xbf16>, vector<8x8xbf16>, vector<288x8xf32> -> vector<288x8xf32>
    %38 = arith.addf %31, %37 : vector<288x8xf32>
    %c0_20 = arith.constant 0 : index
    %c18 = arith.constant 18 : index
    %c0_21 = arith.constant 0 : index
    %39 = vector.load %arg1[%c0_20, %c18, %c0_21] : memref<1x328x8xf32, #tpu.memory_space<vmem>>, vector<1x288x8xf32>
    %40 = vector.shape_cast %39 : vector<1x288x8xf32> to vector<288x8xf32>
    %41 = arith.truncf %40 : vector<288x8xf32> to vector<288x8xbf16>
    %c3 = arith.constant 3 : index
    %c0_22 = arith.constant 0 : index
    %c0_23 = arith.constant 0 : index
    %42 = vector.load %arg2[%c3, %c0_22, %c0_23] : memref<9x8x8xbf16, #tpu.memory_space<vmem>>, vector<1x8x8xbf16>
    %43 = vector.shape_cast %42 : vector<1x8x8xbf16> to vector<8x8xbf16>
    %cst_24 = arith.constant dense<0.000000e+00> : vector<288x8xf32>
    %44 = tpu.matmul %41, %43, %cst_24 {dimension_numbers = #tpu.dot_dimension_numbers<[1], [0], [0], [1], [0, 0, 1, 1], [], []>} : vector<288x8xbf16>, vector<8x8xbf16>, vector<288x8xf32> -> vector<288x8xf32>
    %45 = arith.addf %38, %44 : vector<288x8xf32>
    %c0_25 = arith.constant 0 : index
    %c19 = arith.constant 19 : index
    %c0_26 = arith.constant 0 : index
    %46 = vector.load %arg1[%c0_25, %c19, %c0_26] : memref<1x328x8xf32, #tpu.memory_space<vmem>>, vector<1x288x8xf32>
    %47 = vector.shape_cast %46 : vector<1x288x8xf32> to vector<288x8xf32>
    %48 = arith.truncf %47 : vector<288x8xf32> to vector<288x8xbf16>
    %c4 = arith.constant 4 : index
    %c0_27 = arith.constant 0 : index
    %c0_28 = arith.constant 0 : index
    %49 = vector.load %arg2[%c4, %c0_27, %c0_28] : memref<9x8x8xbf16, #tpu.memory_space<vmem>>, vector<1x8x8xbf16>
    %50 = vector.shape_cast %49 : vector<1x8x8xbf16> to vector<8x8xbf16>
    %cst_29 = arith.constant dense<0.000000e+00> : vector<288x8xf32>
    %51 = tpu.matmul %48, %50, %cst_29 {dimension_numbers = #tpu.dot_dimension_numbers<[1], [0], [0], [1], [0, 0, 1, 1], [], []>} : vector<288x8xbf16>, vector<8x8xbf16>, vector<288x8xf32> -> vector<288x8xf32>
    %52 = arith.addf %45, %51 : vector<288x8xf32>
    %c0_30 = arith.constant 0 : index
    %c20 = arith.constant 20 : index
    %c0_31 = arith.constant 0 : index
    %53 = vector.load %arg1[%c0_30, %c20, %c0_31] : memref<1x328x8xf32, #tpu.memory_space<vmem>>, vector<1x288x8xf32>
    %54 = vector.shape_cast %53 : vector<1x288x8xf32> to vector<288x8xf32>
    %55 = arith.truncf %54 : vector<288x8xf32> to vector<288x8xbf16>
    %c5 = arith.constant 5 : index
    %c0_32 = arith.constant 0 : index
    %c0_33 = arith.constant 0 : index
    %56 = vector.load %arg2[%c5, %c0_32, %c0_33] : memref<9x8x8xbf16, #tpu.memory_space<vmem>>, vector<1x8x8xbf16>
    %57 = vector.shape_cast %56 : vector<1x8x8xbf16> to vector<8x8xbf16>
    %cst_34 = arith.constant dense<0.000000e+00> : vector<288x8xf32>
    %58 = tpu.matmul %55, %57, %cst_34 {dimension_numbers = #tpu.dot_dimension_numbers<[1], [0], [0], [1], [0, 0, 1, 1], [], []>} : vector<288x8xbf16>, vector<8x8xbf16>, vector<288x8xf32> -> vector<288x8xf32>
    %59 = arith.addf %52, %58 : vector<288x8xf32>
    %c0_35 = arith.constant 0 : index
    %c36 = arith.constant 36 : index
    %c0_36 = arith.constant 0 : index
    %60 = vector.load %arg1[%c0_35, %c36, %c0_36] : memref<1x328x8xf32, #tpu.memory_space<vmem>>, vector<1x288x8xf32>
    %61 = vector.shape_cast %60 : vector<1x288x8xf32> to vector<288x8xf32>
    %62 = arith.truncf %61 : vector<288x8xf32> to vector<288x8xbf16>
    %c6 = arith.constant 6 : index
    %c0_37 = arith.constant 0 : index
    %c0_38 = arith.constant 0 : index
    %63 = vector.load %arg2[%c6, %c0_37, %c0_38] : memref<9x8x8xbf16, #tpu.memory_space<vmem>>, vector<1x8x8xbf16>
    %64 = vector.shape_cast %63 : vector<1x8x8xbf16> to vector<8x8xbf16>
    %cst_39 = arith.constant dense<0.000000e+00> : vector<288x8xf32>
    %65 = tpu.matmul %62, %64, %cst_39 {dimension_numbers = #tpu.dot_dimension_numbers<[1], [0], [0], [1], [0, 0, 1, 1], [], []>} : vector<288x8xbf16>, vector<8x8xbf16>, vector<288x8xf32> -> vector<288x8xf32>
    %66 = arith.addf %59, %65 : vector<288x8xf32>
    %c0_40 = arith.constant 0 : index
    %c37 = arith.constant 37 : index
    %c0_41 = arith.constant 0 : index
    %67 = vector.load %arg1[%c0_40, %c37, %c0_41] : memref<1x328x8xf32, #tpu.memory_space<vmem>>, vector<1x288x8xf32>
    %68 = vector.shape_cast %67 : vector<1x288x8xf32> to vector<288x8xf32>
    %69 = arith.truncf %68 : vector<288x8xf32> to vector<288x8xbf16>
    %c7 = arith.constant 7 : index
    %c0_42 = arith.constant 0 : index
    %c0_43 = arith.constant 0 : index
    %70 = vector.load %arg2[%c7, %c0_42, %c0_43] : memref<9x8x8xbf16, #tpu.memory_space<vmem>>, vector<1x8x8xbf16>
    %71 = vector.shape_cast %70 : vector<1x8x8xbf16> to vector<8x8xbf16>
    %cst_44 = arith.constant dense<0.000000e+00> : vector<288x8xf32>
    %72 = tpu.matmul %69, %71, %cst_44 {dimension_numbers = #tpu.dot_dimension_numbers<[1], [0], [0], [1], [0, 0, 1, 1], [], []>} : vector<288x8xbf16>, vector<8x8xbf16>, vector<288x8xf32> -> vector<288x8xf32>
    %73 = arith.addf %66, %72 : vector<288x8xf32>
    %c0_45 = arith.constant 0 : index
    %c38 = arith.constant 38 : index
    %c0_46 = arith.constant 0 : index
    %74 = vector.load %arg1[%c0_45, %c38, %c0_46] : memref<1x328x8xf32, #tpu.memory_space<vmem>>, vector<1x288x8xf32>
    %75 = vector.shape_cast %74 : vector<1x288x8xf32> to vector<288x8xf32>
    %76 = arith.truncf %75 : vector<288x8xf32> to vector<288x8xbf16>
    %c8 = arith.constant 8 : index
    %c0_47 = arith.constant 0 : index
    %c0_48 = arith.constant 0 : index
    %77 = vector.load %arg2[%c8, %c0_47, %c0_48] : memref<9x8x8xbf16, #tpu.memory_space<vmem>>, vector<1x8x8xbf16>
    %78 = vector.shape_cast %77 : vector<1x8x8xbf16> to vector<8x8xbf16>
    %cst_49 = arith.constant dense<0.000000e+00> : vector<288x8xf32>
    %79 = tpu.matmul %76, %78, %cst_49 {dimension_numbers = #tpu.dot_dimension_numbers<[1], [0], [0], [1], [0, 0, 1, 1], [], []>} : vector<288x8xbf16>, vector<8x8xbf16>, vector<288x8xf32> -> vector<288x8xf32>
    %80 = arith.addf %73, %79 : vector<288x8xf32>
    %c0_50 = arith.constant 0 : index
    %c0_51 = arith.constant 0 : index
    %81 = vector.load %arg3[%c0_50, %c0_51] : memref<1x8xf32, #tpu.memory_space<vmem>>, vector<1x8xf32>
    %82 = vector.broadcast %81 : vector<1x8xf32> to vector<288x8xf32>
    %83 = arith.addf %80, %82 : vector<288x8xf32>
    %cst_52 = arith.constant 0.000000e+00 : f32
    %84 = vector.broadcast %cst_52 : f32 to vector<288x8xf32>
    %85 = arith.maximumf %83, %84 : vector<288x8xf32>
    %cst_53 = arith.constant 0.000000e+00 : f32
    %86 = vector.broadcast %cst_53 : f32 to vector<288x8xf32>
    %87 = arith.select %18, %85, %86 : vector<288x8xi1>, vector<288x8xf32>
    %cst_54 = arith.constant 0.000000e+00 : bf16
    %88 = vector.broadcast %cst_54 : bf16 to vector<32x8xbf16>
    %c0_55 = arith.constant 0 : index
    %c0_56 = arith.constant 0 : index
    %89 = vector.load %arg7[%c0_55, %c0_56] : memref<352x8xbf16, #tpu.memory_space<vmem>>, vector<32x8xbf16>
    tpu.vector_store %arg7[%c0_55, %c0_56], %88 {strides = array<i32>} : memref<352x8xbf16, #tpu.memory_space<vmem>>, vector<32x8xbf16>,
    %cst_57 = arith.constant 0.000000e+00 : bf16
    %90 = vector.broadcast %cst_57 : bf16 to vector<32x8xbf16>
    %c320 = arith.constant 320 : index
    %c0_58 = arith.constant 0 : index
    %91 = vector.load %arg7[%c320, %c0_58] : memref<352x8xbf16, #tpu.memory_space<vmem>>, vector<32x8xbf16>
    tpu.vector_store %arg7[%c320, %c0_58], %90 {strides = array<i32>} : memref<352x8xbf16, #tpu.memory_space<vmem>>, vector<32x8xbf16>,
    %92 = arith.truncf %87 : vector<288x8xf32> to vector<288x8xbf16>
    %c32 = arith.constant 32 : index
    %c0_59 = arith.constant 0 : index
    %93 = vector.load %arg7[%c32, %c0_59] : memref<352x8xbf16, #tpu.memory_space<vmem>>, vector<288x8xbf16>
    tpu.vector_store %arg7[%c32, %c0_59], %92 {strides = array<i32>} : memref<352x8xbf16, #tpu.memory_space<vmem>>, vector<288x8xbf16>,
    %c13 = arith.constant 13 : index
    %c0_60 = arith.constant 0 : index
    %94 = vector.load %arg7[%c13, %c0_60] : memref<352x8xbf16, #tpu.memory_space<vmem>>, vector<288x8xbf16>
    %c0_61 = arith.constant 0 : index
    %c0_62 = arith.constant 0 : index
    %c0_63 = arith.constant 0 : index
    %95 = vector.load %arg4[%c0_61, %c0_62, %c0_63] : memref<9x8x8xbf16, #tpu.memory_space<vmem>>, vector<1x8x8xbf16>
    %96 = vector.shape_cast %95 : vector<1x8x8xbf16> to vector<8x8xbf16>
    %cst_64 = arith.constant dense<0.000000e+00> : vector<288x8xf32>
    %97 = tpu.matmul %94, %96, %cst_64 {dimension_numbers = #tpu.dot_dimension_numbers<[1], [0], [0], [1], [0, 0, 1, 1], [], []>} : vector<288x8xbf16>, vector<8x8xbf16>, vector<288x8xf32> -> vector<288x8xf32>
    %c14 = arith.constant 14 : index
    %c0_65 = arith.constant 0 : index
    %98 = vector.load %arg7[%c14, %c0_65] : memref<352x8xbf16, #tpu.memory_space<vmem>>, vector<288x8xbf16>
    %c1_66 = arith.constant 1 : index
    %c0_67 = arith.constant 0 : index
    %c0_68 = arith.constant 0 : index
    %99 = vector.load %arg4[%c1_66, %c0_67, %c0_68] : memref<9x8x8xbf16, #tpu.memory_space<vmem>>, vector<1x8x8xbf16>
    %100 = vector.shape_cast %99 : vector<1x8x8xbf16> to vector<8x8xbf16>
    %cst_69 = arith.constant dense<0.000000e+00> : vector<288x8xf32>
    %101 = tpu.matmul %98, %100, %cst_69 {dimension_numbers = #tpu.dot_dimension_numbers<[1], [0], [0], [1], [0, 0, 1, 1], [], []>} : vector<288x8xbf16>, vector<8x8xbf16>, vector<288x8xf32> -> vector<288x8xf32>
    %102 = arith.addf %97, %101 : vector<288x8xf32>
    %c15 = arith.constant 15 : index
    %c0_70 = arith.constant 0 : index
    %103 = vector.load %arg7[%c15, %c0_70] : memref<352x8xbf16, #tpu.memory_space<vmem>>, vector<288x8xbf16>
    %c2_71 = arith.constant 2 : index
    %c0_72 = arith.constant 0 : index
    %c0_73 = arith.constant 0 : index
    %104 = vector.load %arg4[%c2_71, %c0_72, %c0_73] : memref<9x8x8xbf16, #tpu.memory_space<vmem>>, vector<1x8x8xbf16>
    %105 = vector.shape_cast %104 : vector<1x8x8xbf16> to vector<8x8xbf16>
    %cst_74 = arith.constant dense<0.000000e+00> : vector<288x8xf32>
    %106 = tpu.matmul %103, %105, %cst_74 {dimension_numbers = #tpu.dot_dimension_numbers<[1], [0], [0], [1], [0, 0, 1, 1], [], []>} : vector<288x8xbf16>, vector<8x8xbf16>, vector<288x8xf32> -> vector<288x8xf32>
    %107 = arith.addf %102, %106 : vector<288x8xf32>
    %c31 = arith.constant 31 : index
    %c0_75 = arith.constant 0 : index
    %108 = vector.load %arg7[%c31, %c0_75] : memref<352x8xbf16, #tpu.memory_space<vmem>>, vector<288x8xbf16>
    %c3_76 = arith.constant 3 : index
    %c0_77 = arith.constant 0 : index
    %c0_78 = arith.constant 0 : index
    %109 = vector.load %arg4[%c3_76, %c0_77, %c0_78] : memref<9x8x8xbf16, #tpu.memory_space<vmem>>, vector<1x8x8xbf16>
    %110 = vector.shape_cast %109 : vector<1x8x8xbf16> to vector<8x8xbf16>
    %cst_79 = arith.constant dense<0.000000e+00> : vector<288x8xf32>
    %111 = tpu.matmul %108, %110, %cst_79 {dimension_numbers = #tpu.dot_dimension_numbers<[1], [0], [0], [1], [0, 0, 1, 1], [], []>} : vector<288x8xbf16>, vector<8x8xbf16>, vector<288x8xf32> -> vector<288x8xf32>
    %112 = arith.addf %107, %111 : vector<288x8xf32>
    %c32_80 = arith.constant 32 : index
    %c0_81 = arith.constant 0 : index
    %113 = vector.load %arg7[%c32_80, %c0_81] : memref<352x8xbf16, #tpu.memory_space<vmem>>, vector<288x8xbf16>
    %c4_82 = arith.constant 4 : index
    %c0_83 = arith.constant 0 : index
    %c0_84 = arith.constant 0 : index
    %114 = vector.load %arg4[%c4_82, %c0_83, %c0_84] : memref<9x8x8xbf16, #tpu.memory_space<vmem>>, vector<1x8x8xbf16>
    %115 = vector.shape_cast %114 : vector<1x8x8xbf16> to vector<8x8xbf16>
    %cst_85 = arith.constant dense<0.000000e+00> : vector<288x8xf32>
    %116 = tpu.matmul %113, %115, %cst_85 {dimension_numbers = #tpu.dot_dimension_numbers<[1], [0], [0], [1], [0, 0, 1, 1], [], []>} : vector<288x8xbf16>, vector<8x8xbf16>, vector<288x8xf32> -> vector<288x8xf32>
    %117 = arith.addf %112, %116 : vector<288x8xf32>
    %c33 = arith.constant 33 : index
    %c0_86 = arith.constant 0 : index
    %118 = vector.load %arg7[%c33, %c0_86] : memref<352x8xbf16, #tpu.memory_space<vmem>>, vector<288x8xbf16>
    %c5_87 = arith.constant 5 : index
    %c0_88 = arith.constant 0 : index
    %c0_89 = arith.constant 0 : index
    %119 = vector.load %arg4[%c5_87, %c0_88, %c0_89] : memref<9x8x8xbf16, #tpu.memory_space<vmem>>, vector<1x8x8xbf16>
    %120 = vector.shape_cast %119 : vector<1x8x8xbf16> to vector<8x8xbf16>
    %cst_90 = arith.constant dense<0.000000e+00> : vector<288x8xf32>
    %121 = tpu.matmul %118, %120, %cst_90 {dimension_numbers = #tpu.dot_dimension_numbers<[1], [0], [0], [1], [0, 0, 1, 1], [], []>} : vector<288x8xbf16>, vector<8x8xbf16>, vector<288x8xf32> -> vector<288x8xf32>
    %122 = arith.addf %117, %121 : vector<288x8xf32>
    %c49 = arith.constant 49 : index
    %c0_91 = arith.constant 0 : index
    %123 = vector.load %arg7[%c49, %c0_91] : memref<352x8xbf16, #tpu.memory_space<vmem>>, vector<288x8xbf16>
    %c6_92 = arith.constant 6 : index
    %c0_93 = arith.constant 0 : index
    %c0_94 = arith.constant 0 : index
    %124 = vector.load %arg4[%c6_92, %c0_93, %c0_94] : memref<9x8x8xbf16, #tpu.memory_space<vmem>>, vector<1x8x8xbf16>
    %125 = vector.shape_cast %124 : vector<1x8x8xbf16> to vector<8x8xbf16>
    %cst_95 = arith.constant dense<0.000000e+00> : vector<288x8xf32>
    %126 = tpu.matmul %123, %125, %cst_95 {dimension_numbers = #tpu.dot_dimension_numbers<[1], [0], [0], [1], [0, 0, 1, 1], [], []>} : vector<288x8xbf16>, vector<8x8xbf16>, vector<288x8xf32> -> vector<288x8xf32>
    %127 = arith.addf %122, %126 : vector<288x8xf32>
    %c50 = arith.constant 50 : index
    %c0_96 = arith.constant 0 : index
    %128 = vector.load %arg7[%c50, %c0_96] : memref<352x8xbf16, #tpu.memory_space<vmem>>, vector<288x8xbf16>
    %c7_97 = arith.constant 7 : index
    %c0_98 = arith.constant 0 : index
    %c0_99 = arith.constant 0 : index
    %129 = vector.load %arg4[%c7_97, %c0_98, %c0_99] : memref<9x8x8xbf16, #tpu.memory_space<vmem>>, vector<1x8x8xbf16>
    %130 = vector.shape_cast %129 : vector<1x8x8xbf16> to vector<8x8xbf16>
    %cst_100 = arith.constant dense<0.000000e+00> : vector<288x8xf32>
    %131 = tpu.matmul %128, %130, %cst_100 {dimension_numbers = #tpu.dot_dimension_numbers<[1], [0], [0], [1], [0, 0, 1, 1], [], []>} : vector<288x8xbf16>, vector<8x8xbf16>, vector<288x8xf32> -> vector<288x8xf32>
    %132 = arith.addf %127, %131 : vector<288x8xf32>
    %c51 = arith.constant 51 : index
    %c0_101 = arith.constant 0 : index
    %133 = vector.load %arg7[%c51, %c0_101] : memref<352x8xbf16, #tpu.memory_space<vmem>>, vector<288x8xbf16>
    %c8_102 = arith.constant 8 : index
    %c0_103 = arith.constant 0 : index
    %c0_104 = arith.constant 0 : index
    %134 = vector.load %arg4[%c8_102, %c0_103, %c0_104] : memref<9x8x8xbf16, #tpu.memory_space<vmem>>, vector<1x8x8xbf16>
    %135 = vector.shape_cast %134 : vector<1x8x8xbf16> to vector<8x8xbf16>
    %cst_105 = arith.constant dense<0.000000e+00> : vector<288x8xf32>
    %136 = tpu.matmul %133, %135, %cst_105 {dimension_numbers = #tpu.dot_dimension_numbers<[1], [0], [0], [1], [0, 0, 1, 1], [], []>} : vector<288x8xbf16>, vector<8x8xbf16>, vector<288x8xf32> -> vector<288x8xf32>
    %137 = arith.addf %132, %136 : vector<288x8xf32>
    %c0_106 = arith.constant 0 : index
    %c19_107 = arith.constant 19 : index
    %c0_108 = arith.constant 0 : index
    %138 = vector.load %arg1[%c0_106, %c19_107, %c0_108] : memref<1x328x8xf32, #tpu.memory_space<vmem>>, vector<1x288x8xf32>
    %139 = vector.shape_cast %138 : vector<1x288x8xf32> to vector<288x8xf32>
    %c0_109 = arith.constant 0 : index
    %c0_110 = arith.constant 0 : index
    %140 = vector.load %arg5[%c0_109, %c0_110] : memref<1x8xf32, #tpu.memory_space<vmem>>, vector<1x8xf32>
    %141 = vector.broadcast %140 : vector<1x8xf32> to vector<288x8xf32>
    %142 = arith.addf %137, %141 : vector<288x8xf32>
    %143 = arith.addf %142, %139 : vector<288x8xf32>
    %cst_111 = arith.constant 0.000000e+00 : f32
    %144 = vector.broadcast %cst_111 : f32 to vector<288x8xf32>
    %145 = arith.maximumf %143, %144 : vector<288x8xf32>
    %c0_112 = arith.constant 0 : index
    %c0_113 = arith.constant 0 : index
    %c0_114 = arith.constant 0 : index
    %146 = vector.load %arg6[%c0_112, %c0_113, %c0_114] : memref<1x288x8xf32, #tpu.memory_space<vmem>>, vector<1x288x8xf32>
    %147 = vector.shape_cast %146 : vector<1x288x8xf32> to vector<288x8xf32>
    %148 = vector.shape_cast %145 : vector<288x8xf32> to vector<1x288x8xf32>
    tpu.vector_store %arg6[%c0_112, %c0_113, %c0_114], %148 {strides = array<i32>} : memref<1x288x8xf32, #tpu.memory_space<vmem>>, vector<1x288x8xf32>,
    return
  }
  func.func @transform_0(%arg0: i32) -> (i32, i32, i32) {
    %c0_i32 = arith.constant 0 : i32
    %c0_i32_0 = arith.constant 0 : i32
    %c0_i32_1 = arith.constant 0 : i32
    return %arg0, %c0_i32, %c0_i32_0 : i32, i32, i32
  }
  func.func @transform_1(%arg0: i32) -> (i32, i32, i32) {
    %c0_i32 = arith.constant 0 : i32
    %c0_i32_0 = arith.constant 0 : i32
    %c0_i32_1 = arith.constant 0 : i32
    %c0_i32_2 = arith.constant 0 : i32
    return %c0_i32, %c0_i32_0, %c0_i32_1 : i32, i32, i32
  }
  func.func @transform_2(%arg0: i32) -> (i32, i32) {
    %c0_i32 = arith.constant 0 : i32
    %c0_i32_0 = arith.constant 0 : i32
    %c0_i32_1 = arith.constant 0 : i32
    return %c0_i32, %c0_i32_0 : i32, i32
  }
  func.func @transform_3(%arg0: i32) -> (i32, i32, i32) {
    %c0_i32 = arith.constant 0 : i32
    %c0_i32_0 = arith.constant 0 : i32
    %c0_i32_1 = arith.constant 0 : i32
    %c0_i32_2 = arith.constant 0 : i32
    return %c0_i32, %c0_i32_0, %c0_i32_1 : i32, i32, i32
  }
  func.func @transform_4(%arg0: i32) -> (i32, i32) {
    %c0_i32 = arith.constant 0 : i32
    %c0_i32_0 = arith.constant 0 : i32
    %c0_i32_1 = arith.constant 0 : i32
    return %c0_i32, %c0_i32_0 : i32, i32
  }
  func.func @transform_5(%arg0: i32) -> (i32, i32, i32) {
    %c0_i32 = arith.constant 0 : i32
    %c0_i32_0 = arith.constant 0 : i32
    %c0_i32_1 = arith.constant 0 : i32
    return %arg0, %c0_i32, %c0_i32_0 : i32, i32, i32
  }
}

</mosaic_0001>

<bundles_post_ra>
// kernel: basic_block_forward.1
= control target key start
LH: loop header
LB: loop body
LE: loop exit
PB: predicated region body
PF: predicated region fallthrough
CT: control target
= control target key end

     0   :  { %s8131_s18 = smov 0   ;;  %s11731_s0 = inlined_call_operand.vmem [shape: f32[2,328,8], index: 0, kind: input, shape index: {}]   ;;  %s11732_s1 = inlined_call_operand.vmem [shape: bf16[9,8,8], index: 1, kind: input, shape index: {}]   ;;  %s11733_s2 = inlined_call_operand.vmem [shape: f32[1,8], index: 2, kind: input, shape index: {}]   ;;  %s11734_s3 = inlined_call_operand.vmem [shape: bf16[9,8,8], index: 3, kind: input, shape index: {}]   ;;  %s11735_s4 = inlined_call_operand.vmem [shape: f32[1,8], index: 4, kind: input, shape index: {}]   ;;  %s11736_s5 = inlined_call_operand.vmem [shape: f32[2,288,8], index: 5, kind: output, shape index: {}]  }
   0x1 LB: > { %s7229_s19 = sadd.s32 4294967295, %s8098_s18   ;;  %p7233_p0 = scmp.ge.s32.totalorder %s8098_s18, 1  ;;  %s8098_s18 = sphi %s8131_s18, %s15_s18  }
   0x2   : > { %p187_p1 = scmp.lt.s32.totalorder %s8098_s18, 3 }
   0x4   : > { %p188_p2 = pnand %p7233_p0, %p187_p1 }
   0x6   : > { %191 = sbr.rel (%p188_p2) target bundleno = 1656 (0x678), region = 40 }
   0xb   : > { %v7236_v0 = vld [vmem:[%s11732_s1 + $0x4] sm:$0xf]  ;;  %vm1689_vm0 = vcmask 1043456   ;;  %v1577_v1 = vld [vmem:[%s11732_s1] sm:$0xf]  ;;  %p215_p3 = scmp.lt.s32.totalorder %s7229_s19, 1 }
   0xc   : > { %v1691_v2 = vsel %vm1689_vm0, %v7236_v0, 0  ;;  %v1847_v3 = vsel %vm1689_vm0, %v1577_v1, 0  ;;  %v7273_v4 = vld [vmem:[%s11732_s1 + $0x8] sm:$0xf]  ;;  %v7292_v6 = vld [vmem:[%s11732_s1 + $0xc] sm:$0xf] }
   0xd   : > { %1700 = vmatpush.bf16.msra.mxu0 %v1691_v2  ;;  %8025 = vmatpush.bf16.msra.mxu2 %v1691_v2  ;;  %s12098_s19 = smov (!%p215_p3, %s7229_s19), 1  ;;  %v2059_v5 = vsel %vm1689_vm0, %v7273_v4, 0  ;;  %v7311_v7 = vld [vmem:[%s11732_s1 + $0x10] sm:$0xf]  ;;  %v2307_v8 = vsel %vm1689_vm0, %v7292_v6, 0  ;;  %vm1634_vm1 = vcmask 64512  }
   0xe   : > { %8026 = vmatpush.bf16.msra.mxu3 %v1847_v3  ;;  %1856 = vmatpush.bf16.msra.mxu1 %v1847_v3  ;;  %v2555_v9 = vsel %vm1689_vm0, %v7311_v7, 0  ;;  %s8062_s30 = smul.u32 328, %s12098_s19  ;;  %vm3796_vm7 = vcmask 60416  }
   0xf   : > { %s8063_s25 = smul.u32 288, %s12098_s19 }
  0x10   : > { %s8165_s8 = scalar_lea.vmem %s11731_s0, %s8062_s30 }
  0x11   : > { %2068 = vmatpush.bf16.msrb.mxu2 %v2059_v5  ;;  %2564 = vmatpush.bf16.msrb.mxu0 %v2555_v9  ;;  %v1578_v10 = vld [vmem:[%s8165_s8 + $0x1] sm:$0xff]  ;;  %v1579_v11 = vld [vmem:[%s8165_s8 + $0x9] sm:$0xff]  ;;  %v1596_v12 = vld [vmem:[%s8165_s8 + $0x91] sm:$0xff]  ;;  %s11459_s28 = scalar_lea.vmem %s11736_s5, %s8063_s25 }
  0x12   : > { %2316 = vmatpush.bf16.msrb.mxu3 %v2307_v8  ;;  %v1614_v13 = vpack.c.bf16 %v1579_v11, %v1578_v10  ;;  %v1597_v14 = vld [vmem:[%s8165_s8 + $0x99] sm:$0xff]  ;;  %v1541_v15 = vld [vmem:[%s8165_s8 + $0x90] sm:$0xff]  ;;  %v1524_v20 = vld [vmem:[%s8165_s8 + $0x8] sm:$0xff] }
  0x13   : > { %v1542_v16 = vld [vmem:[%s8165_s8 + $0x98] sm:$0xff]  ;;  %v1623_v17 = vpack.c.bf16 %v1597_v14, %v1596_v12  ;;  %v1523_v19 = vld [vmem:[%s8165_s8] sm:$0xff]  ;;  %v1599_v25 = vld [vmem:[%s8165_s8 + $0xa9] sm:$0xff] }
  0x14   : > { %v1568_v18 = vpack.c.bf16 %v1542_v16, %v1541_v15  ;;  %7237 = vmatmul.msk.bf16.vlgmr.msra.gmra.mxu0 %vm1634_vm1, %v1614_v13  ;;  %v1559_v21 = vpack.c.bf16 %v1524_v20, %v1523_v19  ;;  %v1580_v22 = vld [vmem:[%s8165_s8 + $0x11] sm:$0xff]  ;;  %v1581_v23 = vld [vmem:[%s8165_s8 + $0x19] sm:$0xff]  ;;  %v1598_v24 = vld [vmem:[%s8165_s8 + $0xa1] sm:$0xff] }
  0x15   : > { %7246 = vmatmul.msk.bf16.vlgmr.msra.gmra.mxu2 %vm1634_vm1, %v1623_v17  ;;  %v1543_v26 = vld [vmem:[%s8165_s8 + $0xa0] sm:$0xff]  ;;  %v1544_v27 = vld [vmem:[%s8165_s8 + $0xa8] sm:$0xff]  ;;  %v1525_v28 = vld [vmem:[%s8165_s8 + $0x10] sm:$0xff]  ;;  %v1615_v30 = vpack.c.bf16 %v1581_v23, %v1580_v22  ;;  %v1624_v31 = vpack.c.bf16 %v1599_v25, %v1598_v24 }
  0x16   : > { %7264 = vmatmul.msk.bf16.vlgmr.msra.gmra.mxu3 %vm1634_vm1, %v1568_v18  ;;  %7255 = vmatmul.msk.bf16.vlgmr.msra.gmra.mxu1 %vm1634_vm1, %v1559_v21  ;;  %v1526_v29 = vld [vmem:[%s8165_s8 + $0x18] sm:$0xff]  ;;  %v1569_v32 = vpack.c.bf16 %v1544_v27, %v1543_v26  ;;  %v1582_v34 = vld [vmem:[%s8165_s8 + $0x21] sm:$0xff]  ;;  %v1583_v35 = vld [vmem:[%s8165_s8 + $0x29] sm:$0xff] }
  0x17   : > { %v1560_v33 = vpack.c.bf16 %v1526_v29, %v1525_v28  ;;  %v1600_v36 = vld [vmem:[%s8165_s8 + $0xb1] sm:$0xff]  ;;  %v1601_v37 = vld [vmem:[%s8165_s8 + $0xb9] sm:$0xff]  ;;  %v1528_v41 = vld [vmem:[%s8165_s8 + $0x28] sm:$0xff]  ;;  %v1616_v42 = vpack.c.bf16 %v1583_v35, %v1582_v34 }
  0x18   : > { %v1545_v38 = vld [vmem:[%s8165_s8 + $0xb0] sm:$0xff]  ;;  %v1546_v39 = vld [vmem:[%s8165_s8 + $0xb8] sm:$0xff]  ;;  %v1527_v40 = vld [vmem:[%s8165_s8 + $0x20] sm:$0xff]  ;;  %v1625_v43 = vpack.c.bf16 %v1601_v37, %v1600_v36 }
  0x19   : > { %v1570_v44 = vpack.c.bf16 %v1546_v39, %v1545_v38  ;;  %v1561_v45 = vpack.c.bf16 %v1528_v41, %v1527_v40  ;;  %v1584_v46 = vld [vmem:[%s8165_s8 + $0x31] sm:$0xff]  ;;  %v1585_v47 = vld [vmem:[%s8165_s8 + $0x39] sm:$0xff]  ;;  %v1602_v48 = vld [vmem:[%s8165_s8 + $0xc1] sm:$0xff] }
  0x1a   : > { %v1603_v49 = vld [vmem:[%s8165_s8 + $0xc9] sm:$0xff]  ;;  %v1547_v50 = vld [vmem:[%s8165_s8 + $0xc0] sm:$0xff]  ;;  %v1530_v53 = vld [vmem:[%s8165_s8 + $0x38] sm:$0xff]  ;;  %v1617_v54 = vpack.c.bf16 %v1585_v47, %v1584_v46 }
  0x1b   : > { %v1548_v51 = vld [vmem:[%s8165_s8 + $0xc8] sm:$0xff]  ;;  %v1529_v52 = vld [vmem:[%s8165_s8 + $0x30] sm:$0xff]  ;;  %v1626_v55 = vpack.c.bf16 %v1603_v49, %v1602_v48  ;;  %v1605_v61 = vld [vmem:[%s8165_s8 + $0xd9] sm:$0xff] }
  0x1c   : > { %v1571_v56 = vpack.c.bf16 %v1548_v51, %v1547_v50  ;;  %v1562_v57 = vpack.c.bf16 %v1530_v53, %v1529_v52  ;;  %v1586_v58 = vld [vmem:[%s8165_s8 + $0x41] sm:$0xff]  ;;  %v1587_v59 = vld [vmem:[%s8165_s8 + $0x49] sm:$0xff]  ;;  %v1604_v60 = vld [vmem:[%s8165_s8 + $0xd1] sm:$0xff] }
  0x1d   : > { %v1549_v62 = vld [vmem:[%s8165_s8 + $0xd0] sm:$0xff]  ;;  %v1550_v63 = vld [vmem:[%s8165_s8 + $0xd8] sm:$0xff]  ;;  %v1531_v0 = vld [vmem:[%s8165_s8 + $0x40] sm:$0xff]  ;;  %v1618_v2 = vpack.c.bf16 %v1587_v59, %v1586_v58  ;;  %v1627_v3 = vpack.c.bf16 %v1605_v61, %v1604_v60 }
  0x1e   : > { %v1532_v1 = vld [vmem:[%s8165_s8 + $0x48] sm:$0xff]  ;;  %v1572_v4 = vpack.c.bf16 %v1550_v63, %v1549_v62  ;;  %v1588_v6 = vld [vmem:[%s8165_s8 + $0x51] sm:$0xff]  ;;  %v1589_v7 = vld [vmem:[%s8165_s8 + $0x59] sm:$0xff] }
  0x1f   : > { %v1563_v5 = vpack.c.bf16 %v1532_v1, %v1531_v0  ;;  %v1606_v8 = vld [vmem:[%s8165_s8 + $0xe1] sm:$0xff]  ;;  %v1607_v9 = vld [vmem:[%s8165_s8 + $0xe9] sm:$0xff]  ;;  %v1534_v13 = vld [vmem:[%s8165_s8 + $0x58] sm:$0xff]  ;;  %v1619_v14 = vpack.c.bf16 %v1589_v7, %v1588_v6 }
  0x20   : > { %v1551_v10 = vld [vmem:[%s8165_s8 + $0xe0] sm:$0xff]  ;;  %v1552_v11 = vld [vmem:[%s8165_s8 + $0xe8] sm:$0xff]  ;;  %v1533_v12 = vld [vmem:[%s8165_s8 + $0x50] sm:$0xff]  ;;  %v1628_v15 = vpack.c.bf16 %v1607_v9, %v1606_v8 }
  0x21   : > { %v1573_v16 = vpack.c.bf16 %v1552_v11, %v1551_v10  ;;  %v1564_v17 = vpack.c.bf16 %v1534_v13, %v1533_v12  ;;  %v1590_v18 = vld [vmem:[%s8165_s8 + $0x61] sm:$0xff]  ;;  %v1591_v19 = vld [vmem:[%s8165_s8 + $0x69] sm:$0xff]  ;;  %v1608_v20 = vld [vmem:[%s8165_s8 + $0xf1] sm:$0xff] }
  0x22   : > { %v1609_v21 = vld [vmem:[%s8165_s8 + $0xf9] sm:$0xff]  ;;  %v1553_v22 = vld [vmem:[%s8165_s8 + $0xf0] sm:$0xff]  ;;  %v1536_v25 = vld [vmem:[%s8165_s8 + $0x68] sm:$0xff]  ;;  %v1620_v26 = vpack.c.bf16 %v1591_v19, %v1590_v18 }
  0x23   : > { %v1554_v23 = vld [vmem:[%s8165_s8 + $0xf8] sm:$0xff]  ;;  %v1535_v24 = vld [vmem:[%s8165_s8 + $0x60] sm:$0xff]  ;;  %v1629_v27 = vpack.c.bf16 %v1609_v21, %v1608_v20  ;;  %v1556_v35 = vld [vmem:[%s8165_s8 + $0x108] sm:$0xff] }
  0x24   : > { %7238 = vmatmul.msk.bf16.gmra.mxu0 %vm1634_vm1, %v1615_v30  ;;  %v1574_v28 = vpack.c.bf16 %v1554_v23, %v1553_v22  ;;  %v1565_v29 = vpack.c.bf16 %v1536_v25, %v1535_v24  ;;  %v1592_v30 = vld [vmem:[%s8165_s8 + $0x71] sm:$0xff]  ;;  %v1555_v34 = vld [vmem:[%s8165_s8 + $0x100] sm:$0xff]  ;;  %v1595_v49 = vld [vmem:[%s8165_s8 + $0x89] sm:$0xff] }
  0x25   : > { %7247 = vmatmul.msk.bf16.gmra.mxu2 %vm1634_vm1, %v1624_v31  ;;  %v1593_v31 = vld [vmem:[%s8165_s8 + $0x79] sm:$0xff]  ;;  %v1537_v36 = vld [vmem:[%s8165_s8 + $0x70] sm:$0xff]  ;;  %v1575_v40 = vpack.c.bf16 %v1556_v35, %v1555_v34  ;;  %v1594_v48 = vld [vmem:[%s8165_s8 + $0x81] sm:$0xff] }
  0x26   : > { %7265 = vmatmul.msk.bf16.gmra.mxu3 %vm1634_vm1, %v1569_v32  ;;  %7256 = vmatmul.msk.bf16.gmra.mxu1 %vm1634_vm1, %v1560_v33  ;;  %v1610_v32 = vld [vmem:[%s8165_s8 + $0x101] sm:$0xff]  ;;  %v1611_v33 = vld [vmem:[%s8165_s8 + $0x109] sm:$0xff]  ;;  %v1538_v37 = vld [vmem:[%s8165_s8 + $0x78] sm:$0xff]  ;;  %v1621_v38 = vpack.c.bf16 %v1593_v31, %v1592_v30  ;;  %v1622_v58 = vpack.c.bf16 %v1595_v49, %v1594_v48 }
  0x27   : > { %v1630_v39 = vpack.c.bf16 %v1611_v33, %v1610_v32  ;;  %v1566_v41 = vpack.c.bf16 %v1538_v37, %v1537_v36  ;;  %v7330_v46 = vld [vmem:[%s11732_s1 + $0x14] sm:$0xf]  ;;  %v7387_v47 = vld [vmem:[%s11732_s1 + $0x20] sm:$0xf]  ;;  %v1949_v10 = vld [vmem:[%s8165_s8 + $0xa] sm:$0xff] }
  0x28   : > { %v1612_v50 = vld [vmem:[%s8165_s8 + $0x111] sm:$0xff]  ;;  %v2803_v51 = vsel %vm1689_vm0, %v7330_v46, 0  ;;  %v3547_v52 = vsel %vm1689_vm0, %v7387_v47, 0  ;;  %v1613_v53 = vld [vmem:[%s8165_s8 + $0x119] sm:$0xff]  ;;  %v1948_v7 = vld [vmem:[%s8165_s8 + $0x2] sm:$0xff] }
  0x29   : > { %2812 = vmatpush.bf16.msrb.mxu1 %v2803_v51  ;;  %3556 = vmatpush.bf16.msra.mxu0 %v3547_v52  ;;  %v1631_v60 = vpack.c.bf16 %v1613_v53, %v1612_v50  ;;  %v2444_v8 = vld [vmem:[%s8165_s8 + $0x13] sm:$0xff]  ;;  %v2445_v9 = vld [vmem:[%s8165_s8 + $0x1b] sm:$0xff]  ;;  %v1984_v20 = vpack.c.bf16 %v1949_v10, %v1948_v7  ;;  %v2446_v31 = vld [vmem:[%s8165_s8 + $0x23] sm:$0xff] }
  0x2a   : > { %v2196_v11 = vld [vmem:[%s8165_s8 + $0x12] sm:$0xff]  ;;  %v2197_v12 = vld [vmem:[%s8165_s8 + $0x1a] sm:$0xff]  ;;  %v2198_v33 = vld [vmem:[%s8165_s8 + $0x22] sm:$0xff] }
  0x2b   : > { %v2692_v13 = vld [vmem:[%s8165_s8 + $0x14] sm:$0xff]  ;;  %v2232_v21 = vpack.c.bf16 %v2197_v12, %v2196_v11  ;;  %v2447_v32 = vld [vmem:[%s8165_s8 + $0x2b] sm:$0xff]  ;;  %v2450_v12 = vld [vmem:[%s8165_s8 + $0x43] sm:$0xff] }
  0x2c   : > { %v2199_v34 = vld [vmem:[%s8165_s8 + $0x2a] sm:$0xff]  ;;  %v2448_v52 = vld [vmem:[%s8165_s8 + $0x33] sm:$0xff]  ;;  %v2449_v53 = vld [vmem:[%s8165_s8 + $0x3b] sm:$0xff] }
  0x2d   : > { %v2694_v35 = vld [vmem:[%s8165_s8 + $0x24] sm:$0xff]  ;;  %v2695_v36 = vld [vmem:[%s8165_s8 + $0x2c] sm:$0xff] }
  0x34   : > { %7239 = vmatmul.msk.bf16.gmra.mxu0 %vm1634_vm1, %v1616_v42  ;;  %v7349_v42 = vld [vmem:[%s11732_s1 + $0x18] sm:$0xf] }
  0x35   : > { %7248 = vmatmul.msk.bf16.gmra.mxu2 %vm1634_vm1, %v1625_v43  ;;  %v7368_v43 = vld [vmem:[%s11732_s1 + $0x1c] sm:$0xf] }
  0x36   : > { %7266 = vmatmul.msk.bf16.gmra.mxu3 %vm1634_vm1, %v1570_v44  ;;  %7257 = vmatmul.msk.bf16.gmra.mxu1 %vm1634_vm1, %v1561_v45  ;;  %v3051_v44 = vsel %vm1689_vm0, %v7349_v42, 0  ;;  %v3299_v45 = vsel %vm1689_vm0, %v7368_v43, 0  ;;  %v2233_v42 = vpack.c.bf16 %v2199_v34, %v2198_v33  ;;  %v8325_v43 = vpack.c.bf16 %v2695_v36, %v2694_v35 }
  0x37   : > { %3060 = vmatpush.bf16.msra.mxu2 %v3051_v44  ;;  %3308 = vmatpush.bf16.msra.mxu3 %v3299_v45 }
  0x44   : > { %7240 = vmatmul.msk.bf16.gmra.mxu0 %vm1634_vm1, %v1617_v54  ;;  %v1557_v54 = vld [vmem:[%s8165_s8 + $0x110] sm:$0xff] }
  0x45   : > { %7249 = vmatmul.msk.bf16.gmra.mxu2 %vm1634_vm1, %v1626_v55  ;;  %v1558_v55 = vld [vmem:[%s8165_s8 + $0x118] sm:$0xff] }
  0x46   : > { %7267 = vmatmul.msk.bf16.gmra.mxu3 %vm1634_vm1, %v1571_v56  ;;  %7258 = vmatmul.msk.bf16.gmra.mxu1 %vm1634_vm1, %v1562_v57  ;;  %v1539_v56 = vld [vmem:[%s8165_s8 + $0x80] sm:$0xff]  ;;  %v1540_v57 = vld [vmem:[%s8165_s8 + $0x88] sm:$0xff]  ;;  %v1576_v61 = vpack.c.bf16 %v1558_v55, %v1557_v54  ;;  %v2200_v54 = vld [vmem:[%s8165_s8 + $0x32] sm:$0xff] }
  0x47   : > { %v1567_v62 = vpack.c.bf16 %v1540_v57, %v1539_v56  ;;  %v2201_v55 = vld [vmem:[%s8165_s8 + $0x3a] sm:$0xff] }
  0x48   : > { %v2696_v56 = vld [vmem:[%s8165_s8 + $0x34] sm:$0xff]  ;;  %v2697_v57 = vld [vmem:[%s8165_s8 + $0x3c] sm:$0xff] }
  0x54   : > { %7241 = vmatmul.msk.bf16.gmra.mxu0 %vm1634_vm1, %v1618_v2 }
  0x55   : > { %7250 = vmatmul.msk.bf16.gmra.mxu2 %vm1634_vm1, %v1627_v3 }
  0x56   : > { %7268 = vmatmul.msk.bf16.gmra.mxu3 %vm1634_vm1, %v1572_v4  ;;  %7259 = vmatmul.msk.bf16.gmra.mxu1 %vm1634_vm1, %v1563_v5 }
  0x64   : > { %7242 = vmatmul.msk.bf16.gmra.mxu0 %vm1634_vm1, %v1619_v14  ;;  %v2693_v14 = vld [vmem:[%s8165_s8 + $0x1c] sm:$0xff] }
  0x65   : > { %7251 = vmatmul.msk.bf16.gmra.mxu2 %vm1634_vm1, %v1628_v15  ;;  %v2728_v22 = vpack.c.bf16 %v2693_v14, %v2692_v13  ;;  %v2451_v13 = vld [vmem:[%s8165_s8 + $0x4b] sm:$0xff]  ;;  %v2202_v14 = vld [vmem:[%s8165_s8 + $0x42] sm:$0xff] }
  0x66   : > { %7269 = vmatmul.msk.bf16.gmra.mxu3 %vm1634_vm1, %v1573_v16  ;;  %7260 = vmatmul.msk.bf16.gmra.mxu1 %vm1634_vm1, %v1564_v17  ;;  %v2480_v17 = vpack.c.bf16 %v2445_v9, %v2444_v8 }
  0x74   : > { %7243 = vmatmul.msk.bf16.gmra.mxu0 %vm1634_vm1, %v1620_v26 }
  0x75   : > { %7252 = vmatmul.msk.bf16.gmra.mxu2 %vm1634_vm1, %v1629_v27 }
  0x76   : > { %7270 = vmatmul.msk.bf16.gmra.mxu3 %vm1634_vm1, %v1574_v28  ;;  %7261 = vmatmul.msk.bf16.gmra.mxu1 %vm1634_vm1, %v1565_v29 }
  0x84   : > { %7244 = vmatmul.msk.bf16.gmra.mxu0 %vm1634_vm1, %v1621_v38 }
  0x85   : > { %7253 = vmatmul.msk.bf16.gmra.mxu2 %vm1634_vm1, %v1630_v39  ;;  %v2481_v39 = vpack.c.bf16 %v2447_v32, %v2446_v31 }
  0x86   : > { %7271 = vmatmul.msk.bf16.gmra.mxu3 %vm1634_vm1, %v1575_v40  ;;  %7262 = vmatmul.msk.bf16.gmra.mxu1 %vm1634_vm1, %v1566_v41 }
  0x91   : > { %v1702_v59 = vpop.f32.mrf.mxu0 }
  0x93   : > { %v1858_v63 = vpop.f32.mrf.mxu1 }
  0x94   : > { %v8287_v0 = vadd.f32 %v1858_v63, %v1702_v59  ;;  %7245 = vmatmul.msk.bf16.gmra.mxu0 %vm1634_vm1, %v1622_v58  ;;  %v2234_v63 = vpack.c.bf16 %v2201_v55, %v2200_v54 }
  0x95   : > { %7254 = vmatmul.msk.bf16.gmra.mxu2 %vm1634_vm1, %v1631_v60  ;;  %v2482_v60 = vpack.c.bf16 %v2449_v53, %v2448_v52 }
  0x96   : > { %7272 = vmatmul.msk.bf16.gmra.mxu3 %vm1634_vm1, %v1576_v61  ;;  %7263 = vmatmul.msk.bf16.gmra.mxu1 %vm1634_vm1, %v1567_v62 }
  0x98   : > { %v1747_v1 = vpop.f32.mrf.mxu2 }
  0x99   : > { %v1903_v2 = vpop.f32.mrf.mxu3  ;;  %v1704_v4 = vpop.f32.mrf.mxu0 }
  0x9a   : > { %v8293_v3 = vadd.f32 %v1903_v2, %v1747_v1  ;;  %v8346_v1 = vpack.c.bf16 %v2697_v57, %v2696_v56 }
  0x9b   : > { %v1860_v5 = vpop.f32.mrf.mxu1 }
  0x9c   : > { %v8295_v6 = vadd.f32 %v1860_v5, %v1704_v4 }
  0xa0   : > { %v1749_v15 = vpop.f32.mrf.mxu2 }
  0xa1   : > { %v1905_v16 = vpop.f32.mrf.mxu3  ;;  %v1707_v19 = vpop.f32.mrf.mxu0 }
  0xa2   : > { %v8305_v18 = vadd.f32 %v1905_v16, %v1749_v15  ;;  %v2203_v15 = vld [vmem:[%s8165_s8 + $0x4a] sm:$0xff] }
  0xa3   : > { %v1863_v23 = vpop.f32.mrf.mxu1  ;;  %v2698_v16 = vld [vmem:[%s8165_s8 + $0x44] sm:$0xff] }
  0xa4   : > { %v8307_v24 = vadd.f32 %v1863_v23, %v1707_v19  ;;  %7312 = vmatmul.msk.bf16.vlgmr.msrb.gmra.mxu0 %vm1634_vm1, %v2480_v17  ;;  %v2699_v17 = vld [vmem:[%s8165_s8 + $0x4c] sm:$0xff] }
  0xa5   : > { %7274 = vmatmul.msk.bf16.vlgmr.msrb.gmra.mxu2 %vm1634_vm1, %v1984_v20 }
  0xa6   : > { %7293 = vmatmul.msk.bf16.vlgmr.msrb.gmra.mxu3 %vm1634_vm1, %v2232_v21  ;;  %7331 = vmatmul.msk.bf16.vlgmr.msrb.gmra.mxu1 %vm1634_vm1, %v2728_v22 }
  0xa8   : > { %v1752_v25 = vpop.f32.mrf.mxu2 }
  0xa9   : > { %v1908_v26 = vpop.f32.mrf.mxu3  ;;  %v1709_v28 = vpop.f32.mrf.mxu0 }
  0xaa   : > { %v8313_v27 = vadd.f32 %v1908_v26, %v1752_v25  ;;  %v2235_v25 = vpack.c.bf16 %v2203_v15, %v2202_v14  ;;  %v8367_v26 = vpack.c.bf16 %v2699_v17, %v2698_v16 }
  0xab   : > { %v1865_v29 = vpop.f32.mrf.mxu1 }
  0xac   : > { %v8315_v30 = vadd.f32 %v1865_v29, %v1709_v28 }
  0xb0   : > { %v1754_v37 = vpop.f32.mrf.mxu2 }
  0xb1   : > { %v1910_v38 = vpop.f32.mrf.mxu3  ;;  %v1712_v41 = vpop.f32.mrf.mxu0 }
  0xb2   : > { %v8323_v40 = vadd.f32 %v1910_v38, %v1754_v37  ;;  %v2452_v37 = vld [vmem:[%s8165_s8 + $0x53] sm:$0xff]  ;;  %v2453_v38 = vld [vmem:[%s8165_s8 + $0x5b] sm:$0xff] }
  0xb3   : > { %v1868_v44 = vpop.f32.mrf.mxu1 }
  0xb4   : > { %v8327_v45 = vadd.f32 %v1868_v44, %v1712_v41  ;;  %7313 = vmatmul.msk.bf16.gmra.mxu0 %vm1634_vm1, %v2481_v39  ;;  %v2204_v39 = vld [vmem:[%s8165_s8 + $0x52] sm:$0xff]  ;;  %v2205_v41 = vld [vmem:[%s8165_s8 + $0x5a] sm:$0xff] }
  0xb5   : > { %7275 = vmatmul.msk.bf16.gmra.mxu2 %vm1634_vm1, %v2232_v21  ;;  %v2483_v21 = vpack.c.bf16 %v2451_v13, %v2450_v12  ;;  %v2701_v44 = vld [vmem:[%s8165_s8 + $0x5c] sm:$0xff]  ;;  %v2236_v53 = vpack.c.bf16 %v2205_v41, %v2204_v39  ;;  %v2703_v12 = vld [vmem:[%s8165_s8 + $0x6c] sm:$0xff] }
  0xb6   : > { %7294 = vmatmul.msk.bf16.gmra.mxu3 %vm1634_vm1, %v2233_v42  ;;  %7332 = vmatmul.msk.bf16.gmra.mxu1 %vm1634_vm1, %v8325_v43  ;;  %v2208_v39 = vld [vmem:[%s8165_s8 + $0x72] sm:$0xff]  ;;  %v2209_v41 = vld [vmem:[%s8165_s8 + $0x7a] sm:$0xff] }
  0xb8   : > { %v1757_v46 = vpop.f32.mrf.mxu2 }
  0xb9   : > { %v1913_v47 = vpop.f32.mrf.mxu3  ;;  %v1714_v49 = vpop.f32.mrf.mxu0 }
  0xba   : > { %v8334_v48 = vadd.f32 %v1913_v47, %v1757_v46 }
  0xbb   : > { %v1870_v50 = vpop.f32.mrf.mxu1 }
  0xbc   : > { %v8336_v51 = vadd.f32 %v1870_v50, %v1714_v49  ;;  %v2484_v49 = vpack.c.bf16 %v2453_v38, %v2452_v37  ;;  %v2456_v37 = vld [vmem:[%s8165_s8 + $0x73] sm:$0xff]  ;;  %v2457_v38 = vld [vmem:[%s8165_s8 + $0x7b] sm:$0xff] }
  0xc0   : > { %v1759_v58 = vpop.f32.mrf.mxu2 }
  0xc1   : > { %v1915_v59 = vpop.f32.mrf.mxu3  ;;  %v1717_v62 = vpop.f32.mrf.mxu0 }
  0xc2   : > { %v8344_v61 = vadd.f32 %v1915_v59, %v1759_v58 }
  0xc3   : > { %v1873_v2 = vpop.f32.mrf.mxu1 }
  0xc4   : > { %v8348_v4 = vadd.f32 %v1873_v2, %v1717_v62  ;;  %7314 = vmatmul.msk.bf16.gmra.mxu0 %vm1634_vm1, %v2482_v60  ;;  %v2454_v2 = vld [vmem:[%s8165_s8 + $0x63] sm:$0xff] }
  0xc5   : > { %7276 = vmatmul.msk.bf16.gmra.mxu2 %vm1634_vm1, %v2233_v42  ;;  %v2700_v42 = vld [vmem:[%s8165_s8 + $0x54] sm:$0xff] }
  0xc6   : > { %7295 = vmatmul.msk.bf16.gmra.mxu3 %vm1634_vm1, %v2234_v63  ;;  %7333 = vmatmul.msk.bf16.gmra.mxu1 %vm1634_vm1, %v8346_v1  ;;  %v8388_v54 = vpack.c.bf16 %v2701_v44, %v2700_v42  ;;  %v2704_v42 = vld [vmem:[%s8165_s8 + $0x74] sm:$0xff]  ;;  %v2705_v44 = vld [vmem:[%s8165_s8 + $0x7c] sm:$0xff] }
  0xc8   : > { %v1762_v5 = vpop.f32.mrf.mxu2 }
  0xc9   : > { %v1918_v7 = vpop.f32.mrf.mxu3  ;;  %v1719_v9 = vpop.f32.mrf.mxu0 }
  0xca   : > { %v8355_v8 = vadd.f32 %v1918_v7, %v1762_v5  ;;  %v2455_v5 = vld [vmem:[%s8165_s8 + $0x6b] sm:$0xff]  ;;  %v2206_v7 = vld [vmem:[%s8165_s8 + $0x62] sm:$0xff] }
  0xcb   : > { %v1875_v10 = vpop.f32.mrf.mxu1  ;;  %v2485_v15 = vpack.c.bf16 %v2455_v5, %v2454_v2 }
  0xcc   : > { %v8357_v11 = vadd.f32 %v1875_v10, %v1719_v9  ;;  %v2207_v9 = vld [vmem:[%s8165_s8 + $0x6a] sm:$0xff] }
  0xcd   : > { %v2702_v10 = vld [vmem:[%s8165_s8 + $0x64] sm:$0xff] }
  0xd0   : > { %v1764_v19 = vpop.f32.mrf.mxu2 }
  0xd1   : > { %v1920_v20 = vpop.f32.mrf.mxu3  ;;  %v1722_v23 = vpop.f32.mrf.mxu0 }
  0xd2   : > { %v8365_v22 = vadd.f32 %v1920_v20, %v1764_v19  ;;  %v2237_v19 = vpack.c.bf16 %v2207_v9, %v2206_v7  ;;  %v8409_v20 = vpack.c.bf16 %v2703_v12, %v2702_v10  ;;  %v2458_v12 = vld [vmem:[%s8165_s8 + $0x83] sm:$0xff] }
  0xd3   : > { %v1878_v28 = vpop.f32.mrf.mxu1 }
  0xd4   : > { %v8369_v29 = vadd.f32 %v1878_v28, %v1722_v23  ;;  %7315 = vmatmul.msk.bf16.gmra.mxu0 %vm1634_vm1, %v2483_v21 }
  0xd5   : > { %7277 = vmatmul.msk.bf16.gmra.mxu2 %vm1634_vm1, %v2234_v63 }
  0xd6   : > { %7296 = vmatmul.msk.bf16.gmra.mxu3 %vm1634_vm1, %v2235_v25  ;;  %7334 = vmatmul.msk.bf16.gmra.mxu1 %vm1634_vm1, %v8367_v26 }
  0xd8   : > { %v1767_v31 = vpop.f32.mrf.mxu2 }
  0xd9   : > { %v1923_v32 = vpop.f32.mrf.mxu3  ;;  %v1724_v34 = vpop.f32.mrf.mxu0 }
  0xda   : > { %v8376_v33 = vadd.f32 %v1923_v32, %v1767_v31 }
  0xdb   : > { %v1880_v35 = vpop.f32.mrf.mxu1 }
  0xdc   : > { %v8378_v36 = vadd.f32 %v1880_v35, %v1724_v34 }
  0xe0   : > { %v1769_v46 = vpop.f32.mrf.mxu2 }
  0xe1   : > { %v1925_v47 = vpop.f32.mrf.mxu3  ;;  %v1727_v52 = vpop.f32.mrf.mxu0 }
  0xe2   : > { %v8386_v50 = vadd.f32 %v1925_v47, %v1769_v46 }
  0xe3   : > { %v1883_v55 = vpop.f32.mrf.mxu1 }
  0xe4   : > { %v8390_v56 = vadd.f32 %v1883_v55, %v1727_v52  ;;  %7316 = vmatmul.msk.bf16.gmra.mxu0 %vm1634_vm1, %v2484_v49  ;;  %v2486_v49 = vpack.c.bf16 %v2457_v38, %v2456_v37  ;;  %v2238_v55 = vpack.c.bf16 %v2209_v41, %v2208_v39 }
  0xe5   : > { %7278 = vmatmul.msk.bf16.gmra.mxu2 %vm1634_vm1, %v2235_v25 }
  0xe6   : > { %7297 = vmatmul.msk.bf16.gmra.mxu3 %vm1634_vm1, %v2236_v53  ;;  %7335 = vmatmul.msk.bf16.gmra.mxu1 %vm1634_vm1, %v8388_v54 }
  0xe8   : > { %v1772_v57 = vpop.f32.mrf.mxu2 }
  0xe9   : > { %v1928_v58 = vpop.f32.mrf.mxu3  ;;  %v1729_v60 = vpop.f32.mrf.mxu0 }
  0xea   : > { %v8397_v59 = vadd.f32 %v1928_v58, %v1772_v57  ;;  %v8430_v57 = vpack.c.bf16 %v2705_v44, %v2704_v42 }
  0xeb   : > { %v1885_v62 = vpop.f32.mrf.mxu1 }
  0xec   : > { %v8399_v63 = vadd.f32 %v1885_v62, %v1729_v60 }
  0xf0   : > { %v1774_v13 = vpop.f32.mrf.mxu2 }
  0xf1   : > { %v1930_v14 = vpop.f32.mrf.mxu3  ;;  %v1732_v17 = vpop.f32.mrf.mxu0 }
  0xf2   : > { %v8407_v16 = vadd.f32 %v1930_v14, %v1774_v13  ;;  %v2459_v13 = vld [vmem:[%s8165_s8 + $0x8b] sm:$0xff]  ;;  %v2210_v14 = vld [vmem:[%s8165_s8 + $0x82] sm:$0xff] }
  0xf3   : > { %v1888_v21 = vpop.f32.mrf.mxu1 }
  0xf4   : > { %v8411_v23 = vadd.f32 %v1888_v21, %v1732_v17  ;;  %7317 = vmatmul.msk.bf16.gmra.mxu0 %vm1634_vm1, %v2485_v15  ;;  %v2211_v15 = vld [vmem:[%s8165_s8 + $0x8a] sm:$0xff] }
  0xf5   : > { %7279 = vmatmul.msk.bf16.gmra.mxu2 %vm1634_vm1, %v2236_v53  ;;  %v2706_v17 = vld [vmem:[%s8165_s8 + $0x84] sm:$0xff]  ;;  %v2707_v21 = vld [vmem:[%s8165_s8 + $0x8c] sm:$0xff]  ;;  %v2239_v37 = vpack.c.bf16 %v2211_v15, %v2210_v14 }
  0xf6   : > { %7298 = vmatmul.msk.bf16.gmra.mxu3 %vm1634_vm1, %v2237_v19  ;;  %7336 = vmatmul.msk.bf16.gmra.mxu1 %vm1634_vm1, %v8409_v20  ;;  %v8451_v38 = vpack.c.bf16 %v2707_v21, %v2706_v17 }
  0xf8   : > { %v1777_v25 = vpop.f32.mrf.mxu2 }
  0xf9   : > { %v1933_v28 = vpop.f32.mrf.mxu3  ;;  %v1734_v32 = vpop.f32.mrf.mxu0 }
  0xfa   : > { %v8418_v31 = vadd.f32 %v1933_v28, %v1777_v25  ;;  %v2487_v28 = vpack.c.bf16 %v2459_v13, %v2458_v12  ;;  %v2709_v12 = vld [vmem:[%s8165_s8 + $0x9c] sm:$0xff] }
  0xfb   : > { %v1890_v34 = vpop.f32.mrf.mxu1 }
  0xfc   : > { %v8420_v35 = vadd.f32 %v1890_v34, %v1734_v32 }
 0x100   : > { %v1779_v46 = vpop.f32.mrf.mxu2 }
 0x101   : > { %v1935_v47 = vpop.f32.mrf.mxu3  ;;  %v1737_v53 = vpop.f32.mrf.mxu0 }
 0x102   : > { %v8428_v52 = vadd.f32 %v1935_v47, %v1779_v46 }
 0x103   : > { %v1893_v58 = vpop.f32.mrf.mxu1 }
 0x104   : > { %v8432_v60 = vadd.f32 %v1893_v58, %v1737_v53  ;;  %7318 = vmatmul.msk.bf16.gmra.mxu0 %vm1634_vm1, %v2486_v49  ;;  %v2460_v58 = vld [vmem:[%s8165_s8 + $0x93] sm:$0xff] }
 0x105   : > { %7280 = vmatmul.msk.bf16.gmra.mxu2 %vm1634_vm1, %v2237_v19 }
 0x106   : > { %7299 = vmatmul.msk.bf16.gmra.mxu3 %vm1634_vm1, %v2238_v55  ;;  %7337 = vmatmul.msk.bf16.gmra.mxu1 %vm1634_vm1, %v8430_v57 }
 0x108   : > { %v1782_v62 = vpop.f32.mrf.mxu2 }
 0x109   : > { %v1938_v2 = vpop.f32.mrf.mxu3  ;;  %v1739_v7 = vpop.f32.mrf.mxu0 }
 0x10a   : > { %v8439_v5 = vadd.f32 %v1938_v2, %v1782_v62  ;;  %v2461_v62 = vld [vmem:[%s8165_s8 + $0x9b] sm:$0xff]  ;;  %v2212_v2 = vld [vmem:[%s8165_s8 + $0x92] sm:$0xff] }
 0x10b   : > { %v1895_v9 = vpop.f32.mrf.mxu1  ;;  %v2488_v14 = vpack.c.bf16 %v2461_v62, %v2460_v58 }
 0x10c   : > { %v8441_v10 = vadd.f32 %v1895_v9, %v1739_v7  ;;  %v2213_v7 = vld [vmem:[%s8165_s8 + $0x9a] sm:$0xff] }
 0x10d   : > { %v2708_v9 = vld [vmem:[%s8165_s8 + $0x94] sm:$0xff]  ;;  %v2240_v21 = vpack.c.bf16 %v2213_v7, %v2212_v2  ;;  %v2462_v2 = vld [vmem:[%s8165_s8 + $0xa3] sm:$0xff]  ;;  %v2463_v7 = vld [vmem:[%s8165_s8 + $0xab] sm:$0xff] }
 0x110   : > { %v1784_v19 = vpop.f32.mrf.mxu2 }
 0x111   : > { %v1940_v25 = vpop.f32.mrf.mxu3  ;;  %v1742_v34 = vpop.f32.mrf.mxu0 }
 0x112   : > { %v8449_v32 = vadd.f32 %v1940_v25, %v1784_v19  ;;  %v8472_v19 = vpack.c.bf16 %v2709_v12, %v2708_v9  ;;  %v2214_v9 = vld [vmem:[%s8165_s8 + $0xa2] sm:$0xff] }
 0x113   : > { %v1898_v39 = vpop.f32.mrf.mxu1 }
 0x114   : > { %v8453_v41 = vadd.f32 %v1898_v39, %v1742_v34  ;;  %7319 = vmatmul.msk.bf16.gmra.mxu0 %vm1634_vm1, %v2487_v28  ;;  %11789 = vst [vmem:[#allocation5_spill] sm:$0xff] %v8472_v19  ;;  %v7406_v28 = vld [vmem:[%s11734_s3 + $0x4] sm:$0xf] }
 0x115   : > { %7281 = vmatmul.msk.bf16.gmra.mxu2 %vm1634_vm1, %v2238_v55  ;;  %v4104_v34 = vsel %vm1689_vm0, %v7406_v28, 0 }
 0x116   : > { %7300 = vmatmul.msk.bf16.gmra.mxu3 %vm1634_vm1, %v2239_v37  ;;  %7338 = vmatmul.msk.bf16.gmra.mxu1 %vm1634_vm1, %v8451_v38 }
 0x117   : > { %4113 = vmatpush.bf16.msra.mxu1 %v4104_v34 }
 0x118   : > { %v1787_v42 = vpop.f32.mrf.mxu2 }
 0x119   : > { %v1943_v44 = vpop.f32.mrf.mxu3  ;;  %v1744_v47 = vpop.f32.mrf.mxu0 }
 0x11a   : > { %v8460_v46 = vadd.f32 %v1943_v44, %v1787_v42 }
 0x11b   : > { %v1900_v49 = vpop.f32.mrf.mxu1 }
 0x11c   : > { %11787 = vst [vmem:[#allocation3_spill] sm:$0xff] %v8460_v46  ;;  %v8462_v53 = vadd.f32 %v1900_v49, %v1744_v47 }
 0x120   : > { %v1789_v55 = vpop.f32.mrf.mxu2 }
 0x121   : > { %v1945_v13 = vpop.f32.mrf.mxu3  ;;  %v2566_v17 = vpop.f32.mrf.mxu0 }
 0x122   : > { %v8470_v15 = vadd.f32 %v1945_v13, %v1789_v55  ;;  %v2710_v55 = vld [vmem:[%s8165_s8 + $0xa4] sm:$0xff]  ;;  %v2711_v13 = vld [vmem:[%s8165_s8 + $0xac] sm:$0xff] }
 0x123   : > { %v2814_v25 = vpop.f32.mrf.mxu1 }
 0x124   : > { %11788 = vst [vmem:[#allocation4_spill] sm:$0xff] %v8470_v15  ;;  %7320 = vmatmul.msk.bf16.gmra.mxu0 %vm1634_vm1, %v2488_v14  ;;  %v2489_v15 = vpack.c.bf16 %v2463_v7, %v2462_v2 }
 0x125   : > { %7282 = vmatmul.msk.bf16.gmra.mxu2 %vm1634_vm1, %v2239_v37  ;;  %v2215_v37 = vld [vmem:[%s8165_s8 + $0xaa] sm:$0xff] }
 0x126   : > { %7301 = vmatmul.msk.bf16.gmra.mxu3 %vm1634_vm1, %v2240_v21  ;;  %7339 = vmatmul.msk.bf16.gmra.mxu1 %vm1634_vm1, %v8472_v19  ;;  %v2241_v19 = vpack.c.bf16 %v2215_v37, %v2214_v9  ;;  %v2464_v9 = vld [vmem:[%s8165_s8 + $0xb3] sm:$0xff] }
 0x127   : > { %v2216_v37 = vld [vmem:[%s8165_s8 + $0xb2] sm:$0xff] }
 0x128   : > { %v2070_v39 = vpop.f32.mrf.mxu2 }
 0x129   : > { %v2318_v42 = vpop.f32.mrf.mxu3  ;;  %v2160_v44 = vadd.f32 %v2070_v39, %v8287_v0  ;;  %v2568_v47 = vpop.f32.mrf.mxu0  ;;  %v8493_v0 = vpack.c.bf16 %v2711_v13, %v2710_v55  ;;  %v2217_v55 = vld [vmem:[%s8165_s8 + $0xba] sm:$0xff] }
 0x12b   : > { %v2408_v49 = vadd.f32 %v2318_v42, %v2160_v44  ;;  %v2816_v58 = vpop.f32.mrf.mxu1 }
 0x12d   : > { %v2656_v62 = vadd.f32 %v2566_v17, %v2408_v49 }
 0x12f   : > { %v8488_v12 = vadd.f32 %v2814_v25, %v2656_v62 }
 0x130   : > { %v2072_v14 = vpop.f32.mrf.mxu2 }
 0x131   : > { %v2320_v28 = vpop.f32.mrf.mxu3  ;;  %v2161_v34 = vadd.f32 %v2072_v14, %v8295_v6  ;;  %v2571_v46 = vpop.f32.mrf.mxu0  ;;  %v2713_v14 = vld [vmem:[%s8165_s8 + $0xbc] sm:$0xff] }
 0x133   : > { %v2409_v39 = vadd.f32 %v2320_v28, %v2161_v34  ;;  %v2819_v17 = vpop.f32.mrf.mxu1 }
 0x134   : > { %7321 = vmatmul.msk.bf16.gmra.mxu0 %vm1634_vm1, %v2489_v15 }
 0x135   : > { %7283 = vmatmul.msk.bf16.gmra.mxu2 %vm1634_vm1, %v2240_v21  ;;  %v2657_v25 = vadd.f32 %v2568_v47, %v2409_v39  ;;  %v2465_v21 = vld [vmem:[%s8165_s8 + $0xbb] sm:$0xff] }
 0x136   : > { %7302 = vmatmul.msk.bf16.gmra.mxu3 %vm1634_vm1, %v2241_v19  ;;  %7340 = vmatmul.msk.bf16.gmra.mxu1 %vm1634_vm1, %v8493_v0  ;;  %v2712_v47 = vld [vmem:[%s8165_s8 + $0xb4] sm:$0xff] }
 0x137   : > { %v8500_v6 = vadd.f32 %v2816_v58, %v2657_v25  ;;  %v2490_v58 = vpack.c.bf16 %v2465_v21, %v2464_v9 }
 0x138   : > { %v2075_v42 = vpop.f32.mrf.mxu2 }
 0x139   : > { %11790 = vst [vmem:[#allocation6_spill] sm:$0xff] %v8500_v6  ;;  %v2323_v44 = vpop.f32.mrf.mxu3  ;;  %v2162_v49 = vadd.f32 %v2075_v42, %v8307_v24  ;;  %v2573_v62 = vpop.f32.mrf.mxu0  ;;  %v2242_v6 = vpack.c.bf16 %v2217_v55, %v2216_v37  ;;  %v2738_v24 = vpack.c.bf16 %v2713_v14, %v2712_v47  ;;  %v2466_v55 = vld [vmem:[%s8165_s8 + $0xc3] sm:$0xff]  ;;  %v2467_v47 = vld [vmem:[%s8165_s8 + $0xcb] sm:$0xff] }
 0x13a   : > { %v2219_v14 = vld [vmem:[%s8165_s8 + $0xca] sm:$0xff] }
 0x13b   : > { %v2410_v2 = vadd.f32 %v2323_v44, %v2162_v49  ;;  %v2821_v15 = vpop.f32.mrf.mxu1 }
 0x13d   : > { %v2658_v7 = vadd.f32 %v2571_v46, %v2410_v2 }
 0x13f   : > { %v8507_v13 = vadd.f32 %v2819_v17, %v2658_v7 }
 0x140   : > { %v2077_v28 = vpop.f32.mrf.mxu2 }
 0x141   : > { %v2325_v34 = vpop.f32.mrf.mxu3  ;;  %v2163_v39 = vadd.f32 %v2077_v28, %v8315_v30  ;;  %v2576_v25 = vpop.f32.mrf.mxu0 }
 0x143   : > { %v2411_v42 = vadd.f32 %v2325_v34, %v2163_v39  ;;  %v2824_v46 = vpop.f32.mrf.mxu1  ;;  %v2715_v34 = vld [vmem:[%s8165_s8 + $0xcc] sm:$0xff] }
 0x144   : > { %7322 = vmatmul.msk.bf16.gmra.mxu0 %vm1634_vm1, %v2490_v58 }
 0x145   : > { %7284 = vmatmul.msk.bf16.gmra.mxu2 %vm1634_vm1, %v2241_v19  ;;  %v2659_v17 = vadd.f32 %v2573_v62, %v2411_v42  ;;  %v2218_v19 = vld [vmem:[%s8165_s8 + $0xc2] sm:$0xff] }
 0x146   : > { %7303 = vmatmul.msk.bf16.gmra.mxu3 %vm1634_vm1, %v2242_v6  ;;  %7341 = vmatmul.msk.bf16.gmra.mxu1 %vm1634_vm1, %v2738_v24  ;;  %v2714_v62 = vld [vmem:[%s8165_s8 + $0xc4] sm:$0xff] }
 0x147   : > { %v8516_v30 = vadd.f32 %v2821_v15, %v2659_v17  ;;  %v2491_v15 = vpack.c.bf16 %v2467_v47, %v2466_v55  ;;  %v2243_v17 = vpack.c.bf16 %v2219_v14, %v2218_v19  ;;  %v2468_v14 = vld [vmem:[%s8165_s8 + $0xd3] sm:$0xff] }
 0x148   : > { %v2080_v44 = vpop.f32.mrf.mxu2 }
 0x149   : > { %v2328_v49 = vpop.f32.mrf.mxu3  ;;  %v2164_v2 = vadd.f32 %v2080_v44, %v8327_v45  ;;  %v2578_v7 = vpop.f32.mrf.mxu0  ;;  %v2739_v45 = vpack.c.bf16 %v2715_v34, %v2714_v62  ;;  %v2469_v62 = vld [vmem:[%s8165_s8 + $0xdb] sm:$0xff] }
 0x14a   : > { %v2221_v34 = vld [vmem:[%s8165_s8 + $0xda] sm:$0xff] }
 0x14b   : > { %v2412_v9 = vadd.f32 %v2328_v49, %v2164_v2  ;;  %v2826_v21 = vpop.f32.mrf.mxu1 }
 0x14d   : > { %v2660_v37 = vadd.f32 %v2576_v25, %v2412_v9 }
 0x14f   : > { %v8523_v28 = vadd.f32 %v2824_v46, %v2660_v37 }
 0x150   : > { %v2082_v58 = vpop.f32.mrf.mxu2 }
 0x151   : > { %v2330_v39 = vpop.f32.mrf.mxu3  ;;  %v2165_v24 = vadd.f32 %v2082_v58, %v8336_v51  ;;  %v2581_v42 = vpop.f32.mrf.mxu0 }
 0x153   : > { %v2413_v44 = vadd.f32 %v2330_v39, %v2165_v24  ;;  %v2829_v25 = vpop.f32.mrf.mxu1  ;;  %v2717_v39 = vld [vmem:[%s8165_s8 + $0xdc] sm:$0xff] }
 0x154   : > { %7323 = vmatmul.msk.bf16.gmra.mxu0 %vm1634_vm1, %v2491_v15 }
 0x155   : > { %7285 = vmatmul.msk.bf16.gmra.mxu2 %vm1634_vm1, %v2242_v6  ;;  %v2661_v46 = vadd.f32 %v2578_v7, %v2413_v44  ;;  %v2220_v6 = vld [vmem:[%s8165_s8 + $0xd2] sm:$0xff] }
 0x156   : > { %7304 = vmatmul.msk.bf16.gmra.mxu3 %vm1634_vm1, %v2243_v17  ;;  %7342 = vmatmul.msk.bf16.gmra.mxu1 %vm1634_vm1, %v2739_v45  ;;  %v2716_v7 = vld [vmem:[%s8165_s8 + $0xd4] sm:$0xff] }
 0x157   : > { %v8532_v51 = vadd.f32 %v2826_v21, %v2661_v46  ;;  %v2492_v21 = vpack.c.bf16 %v2469_v62, %v2468_v14  ;;  %v2244_v46 = vpack.c.bf16 %v2221_v34, %v2220_v6  ;;  %v2470_v34 = vld [vmem:[%s8165_s8 + $0xe3] sm:$0xff] }
 0x158   : > { %v2085_v49 = vpop.f32.mrf.mxu2 }
 0x159   : > { %v2333_v2 = vpop.f32.mrf.mxu3  ;;  %v2166_v9 = vadd.f32 %v2085_v49, %v8348_v4  ;;  %v2583_v37 = vpop.f32.mrf.mxu0  ;;  %v2740_v4 = vpack.c.bf16 %v2717_v39, %v2716_v7  ;;  %v2471_v7 = vld [vmem:[%s8165_s8 + $0xeb] sm:$0xff] }
 0x15a   : > { %v2223_v39 = vld [vmem:[%s8165_s8 + $0xea] sm:$0xff] }
 0x15b   : > { %v2414_v55 = vadd.f32 %v2333_v2, %v2166_v9  ;;  %v2831_v47 = vpop.f32.mrf.mxu1 }
 0x15d   : > { %v2662_v19 = vadd.f32 %v2581_v42, %v2414_v55 }
 0x15f   : > { %v8539_v58 = vadd.f32 %v2829_v25, %v2662_v19 }
 0x160   : > { %v2087_v15 = vpop.f32.mrf.mxu2 }
 0x161   : > { %v2335_v24 = vpop.f32.mrf.mxu3  ;;  %v2167_v45 = vadd.f32 %v2087_v15, %v8357_v11  ;;  %v2586_v44 = vpop.f32.mrf.mxu0 }
 0x163   : > { %v2415_v49 = vadd.f32 %v2335_v24, %v2167_v45  ;;  %v2834_v42 = vpop.f32.mrf.mxu1  ;;  %v2719_v24 = vld [vmem:[%s8165_s8 + $0xec] sm:$0xff] }
 0x164   : > { %7324 = vmatmul.msk.bf16.gmra.mxu0 %vm1634_vm1, %v2492_v21 }
 0x165   : > { %7286 = vmatmul.msk.bf16.gmra.mxu2 %vm1634_vm1, %v2243_v17  ;;  %v2663_v25 = vadd.f32 %v2583_v37, %v2415_v49  ;;  %v2222_v17 = vld [vmem:[%s8165_s8 + $0xe2] sm:$0xff] }
 0x166   : > { %7305 = vmatmul.msk.bf16.gmra.mxu3 %vm1634_vm1, %v2244_v46  ;;  %7343 = vmatmul.msk.bf16.gmra.mxu1 %vm1634_vm1, %v2740_v4  ;;  %v2718_v37 = vld [vmem:[%s8165_s8 + $0xe4] sm:$0xff] }
 0x167   : > { %v8548_v11 = vadd.f32 %v2831_v47, %v2663_v25  ;;  %v2493_v47 = vpack.c.bf16 %v2471_v7, %v2470_v34  ;;  %v2245_v25 = vpack.c.bf16 %v2223_v39, %v2222_v17  ;;  %v2472_v39 = vld [vmem:[%s8165_s8 + $0xf3] sm:$0xff] }
 0x168   : > { %v2090_v2 = vpop.f32.mrf.mxu2 }
 0x169   : > { %v2338_v9 = vpop.f32.mrf.mxu3  ;;  %v2168_v55 = vadd.f32 %v2090_v2, %v8369_v29  ;;  %v2588_v19 = vpop.f32.mrf.mxu0  ;;  %v2741_v29 = vpack.c.bf16 %v2719_v24, %v2718_v37  ;;  %v2473_v37 = vld [vmem:[%s8165_s8 + $0xfb] sm:$0xff] }
 0x16a   : > { %v2225_v24 = vld [vmem:[%s8165_s8 + $0xfa] sm:$0xff] }
 0x16b   : > { %v2416_v14 = vadd.f32 %v2338_v9, %v2168_v55  ;;  %v2836_v62 = vpop.f32.mrf.mxu1 }
 0x16d   : > { %v2664_v6 = vadd.f32 %v2586_v44, %v2416_v14 }
 0x16f   : > { %v8555_v15 = vadd.f32 %v2834_v42, %v2664_v6 }
 0x170   : > { %v2092_v21 = vpop.f32.mrf.mxu2 }
 0x171   : > { %v2340_v45 = vpop.f32.mrf.mxu3  ;;  %v2169_v4 = vadd.f32 %v2092_v21, %v8378_v36  ;;  %v2591_v49 = vpop.f32.mrf.mxu0 }
 0x173   : > { %v2417_v2 = vadd.f32 %v2340_v45, %v2169_v4  ;;  %v2839_v44 = vpop.f32.mrf.mxu1  ;;  %v2721_v45 = vld [vmem:[%s8165_s8 + $0xfc] sm:$0xff] }
 0x174   : > { %7325 = vmatmul.msk.bf16.gmra.mxu0 %vm1634_vm1, %v2493_v47 }
 0x175   : > { %7287 = vmatmul.msk.bf16.gmra.mxu2 %vm1634_vm1, %v2244_v46  ;;  %v2665_v42 = vadd.f32 %v2588_v19, %v2417_v2  ;;  %v2224_v46 = vld [vmem:[%s8165_s8 + $0xf2] sm:$0xff] }
 0x176   : > { %7306 = vmatmul.msk.bf16.gmra.mxu3 %vm1634_vm1, %v2245_v25  ;;  %7344 = vmatmul.msk.bf16.gmra.mxu1 %vm1634_vm1, %v2741_v29  ;;  %v2720_v19 = vld [vmem:[%s8165_s8 + $0xf4] sm:$0xff] }
 0x177   : > { %v8564_v36 = vadd.f32 %v2836_v62, %v2665_v42  ;;  %v2494_v62 = vpack.c.bf16 %v2473_v37, %v2472_v39  ;;  %v2246_v42 = vpack.c.bf16 %v2225_v24, %v2224_v46  ;;  %v2474_v24 = vld [vmem:[%s8165_s8 + $0x103] sm:$0xff] }
 0x178   : > { %v2095_v9 = vpop.f32.mrf.mxu2 }
 0x179   : > { %v2343_v55 = vpop.f32.mrf.mxu3  ;;  %v2170_v14 = vadd.f32 %v2095_v9, %v8390_v56  ;;  %v2593_v6 = vpop.f32.mrf.mxu0  ;;  %v2742_v56 = vpack.c.bf16 %v2721_v45, %v2720_v19  ;;  %v2226_v19 = vld [vmem:[%s8165_s8 + $0x102] sm:$0xff]  ;;  %v2227_v45 = vld [vmem:[%s8165_s8 + $0x10a] sm:$0xff] }
 0x17b   : > { %v2418_v34 = vadd.f32 %v2343_v55, %v2170_v14  ;;  %v2841_v7 = vpop.f32.mrf.mxu1 }
 0x17d   : > { %v2666_v17 = vadd.f32 %v2591_v49, %v2418_v34 }
 0x17f   : > { %v8571_v21 = vadd.f32 %v2839_v44, %v2666_v17 }
 0x180   : > { %v2097_v47 = vpop.f32.mrf.mxu2 }
 0x181   : > { %11791 = vst [vmem:[#allocation7_spill] sm:$0xff] %v8571_v21  ;;  %v2345_v4 = vpop.f32.mrf.mxu3  ;;  %v2171_v29 = vadd.f32 %v2097_v47, %v8399_v63  ;;  %v2596_v2 = vpop.f32.mrf.mxu0 }
 0x183   : > { %v2419_v9 = vadd.f32 %v2345_v4, %v2171_v29  ;;  %v2844_v49 = vpop.f32.mrf.mxu1  ;;  %v2723_v4 = vld [vmem:[%s8165_s8 + $0x10c] sm:$0xff] }
 0x184   : > { %7326 = vmatmul.msk.bf16.gmra.mxu0 %vm1634_vm1, %v2494_v62 }
 0x185   : > { %7288 = vmatmul.msk.bf16.gmra.mxu2 %vm1634_vm1, %v2245_v25  ;;  %v2667_v44 = vadd.f32 %v2593_v6, %v2419_v9  ;;  %v2475_v25 = vld [vmem:[%s8165_s8 + $0x10b] sm:$0xff] }
 0x186   : > { %7307 = vmatmul.msk.bf16.gmra.mxu3 %vm1634_vm1, %v2246_v42  ;;  %7345 = vmatmul.msk.bf16.gmra.mxu1 %vm1634_vm1, %v2742_v56  ;;  %v2722_v6 = vld [vmem:[%s8165_s8 + $0x104] sm:$0xff]  ;;  %v2495_v29 = vpack.c.bf16 %v2475_v25, %v2474_v24 }
 0x187   : > { %v8580_v63 = vadd.f32 %v2841_v7, %v2667_v44  ;;  %v2743_v44 = vpack.c.bf16 %v2723_v4, %v2722_v6  ;;  %v2229_v6 = vld [vmem:[%s8165_s8 + $0x11a] sm:$0xff] }
 0x188   : > { %v2100_v55 = vpop.f32.mrf.mxu2 }
 0x189   : > { %11792 = vst [vmem:[#allocation8_spill] sm:$0xff] %v8580_v63  ;;  %v2348_v14 = vpop.f32.mrf.mxu3  ;;  %v2172_v34 = vadd.f32 %v2100_v55, %v8411_v23  ;;  %v2598_v17 = vpop.f32.mrf.mxu0  ;;  %v2247_v23 = vpack.c.bf16 %v2227_v45, %v2226_v19  ;;  %v2476_v19 = vld [vmem:[%s8165_s8 + $0x113] sm:$0xff]  ;;  %v2477_v45 = vld [vmem:[%s8165_s8 + $0x11b] sm:$0xff] }
 0x18b   : > { %v2420_v39 = vadd.f32 %v2348_v14, %v2172_v34  ;;  %v8583_v37 = vpop.f32.mrf.mxu1 }
 0x18d   : > { %v2668_v46 = vadd.f32 %v2596_v2, %v2420_v39 }
 0x18f   : > { %v8589_v47 = vadd.f32 %v2844_v49, %v2668_v46 }
 0x190   : > { %v2102_v62 = vpop.f32.mrf.mxu2 }
 0x191   : > { %11793 = vst [vmem:[#allocation9_spill] sm:$0xff] %v8589_v47  ;;  %v2350_v7 = vpop.f32.mrf.mxu3  ;;  %v2173_v56 = vadd.f32 %v2102_v62, %v8420_v35  ;;  %v2601_v9 = vpop.f32.mrf.mxu0  ;;  %v2724_v62 = vld [vmem:[%s8165_s8 + $0x114] sm:$0xff] }
 0x193   : > { %v2421_v55 = vadd.f32 %v2350_v7, %v2173_v56  ;;  %v2849_v2 = vpop.f32.mrf.mxu1  ;;  %v2496_v56 = vpack.c.bf16 %v2477_v45, %v2476_v19 }
 0x194   : > { %7327 = vmatmul.msk.bf16.gmra.mxu0 %vm1634_vm1, %v2495_v29 }
 0x195   : > { %7289 = vmatmul.msk.bf16.gmra.mxu2 %vm1634_vm1, %v2246_v42  ;;  %v8597_v49 = vadd.f32 %v2598_v17, %v2421_v55  ;;  %v2228_v42 = vld [vmem:[%s8165_s8 + $0x112] sm:$0xff]  ;;  %v2725_v17 = vld [vmem:[%s8165_s8 + $0x11c] sm:$0xff] }
 0x196   : > { %7308 = vmatmul.msk.bf16.gmra.mxu3 %vm1634_vm1, %v2247_v23  ;;  %7346 = vmatmul.msk.bf16.gmra.mxu1 %vm1634_vm1, %v2743_v44 }
 0x198   : > { %v2105_v35 = vpop.f32.mrf.mxu2 }
 0x199   : > { %v2353_v14 = vpop.f32.mrf.mxu3  ;;  %v2174_v34 = vadd.f32 %v2105_v35, %v8432_v60  ;;  %v2603_v39 = vpop.f32.mrf.mxu0  ;;  %v2248_v60 = vpack.c.bf16 %v2229_v6, %v2228_v42  ;;  %v2744_v35 = vpack.c.bf16 %v2725_v17, %v2724_v62  ;;  %v2478_v6 = vld [vmem:[%s8165_s8 + $0x123] sm:$0xff]  ;;  %v2479_v62 = vld [vmem:[%s8165_s8 + $0x12b] sm:$0xff] }
 0x19a   : > { %v2231_v17 = vld [vmem:[%s8165_s8 + $0x12a] sm:$0xff] }
 0x19b   : > { %v2422_v46 = vadd.f32 %v2353_v14, %v2174_v34  ;;  %v8601_v24 = vpop.f32.mrf.mxu1 }
 0x19d   : > { %v2670_v25 = vadd.f32 %v2601_v9, %v2422_v46 }
 0x19f   : > { %v8607_v4 = vadd.f32 %v2849_v2, %v2670_v25 }
 0x1a0   : > { %v2107_v7 = vpop.f32.mrf.mxu2 }
 0x1a1   : > { %11794 = vst [vmem:[#allocation10_spill] sm:$0xff] %v8607_v4  ;;  %v2355_v29 = vpop.f32.mrf.mxu3  ;;  %v2175_v44 = vadd.f32 %v2107_v7, %v8441_v10  ;;  %v2606_v55 = vpop.f32.mrf.mxu0 }
 0x1a3   : > { %v2423_v14 = vadd.f32 %v2355_v29, %v2175_v44  ;;  %v2854_v9 = vpop.f32.mrf.mxu1  ;;  %v2726_v29 = vld [vmem:[%s8165_s8 + $0x124] sm:$0xff] }
 0x1a4   : > { %7328 = vmatmul.msk.bf16.gmra.mxu0 %vm1634_vm1, %v2496_v56 }
 0x1a5   : > { %7290 = vmatmul.msk.bf16.gmra.mxu2 %vm1634_vm1, %v2247_v23  ;;  %v8615_v2 = vadd.f32 %v2603_v39, %v2423_v14  ;;  %v2230_v23 = vld [vmem:[%s8165_s8 + $0x122] sm:$0xff]  ;;  %v2727_v39 = vld [vmem:[%s8165_s8 + $0x12c] sm:$0xff] }
 0x1a6   : > { %7309 = vmatmul.msk.bf16.gmra.mxu3 %vm1634_vm1, %v2248_v60  ;;  %7347 = vmatmul.msk.bf16.gmra.mxu1 %vm1634_vm1, %v2744_v35  ;;  %v2497_v35 = vpack.c.bf16 %v2479_v62, %v2478_v6 }
 0x1a8   : > { %v2110_v10 = vpop.f32.mrf.mxu2 }
 0x1a9   : > { %v2358_v34 = vpop.f32.mrf.mxu3  ;;  %v2176_v46 = vadd.f32 %v2110_v10, %v8453_v41  ;;  %v2608_v25 = vpop.f32.mrf.mxu0  ;;  %v2249_v41 = vpack.c.bf16 %v2231_v17, %v2230_v23  ;;  %v2745_v10 = vpack.c.bf16 %v2727_v39, %v2726_v29  ;;  %v3436_v17 = vld [vmem:[%s8165_s8 + $0x26] sm:$0xff]  ;;  %v3437_v29 = vld [vmem:[%s8165_s8 + $0x2e] sm:$0xff] }
 0x1aa   : > { %v3188_v39 = vld [vmem:[%s8165_s8 + $0x25] sm:$0xff] }
 0x1ab   : > { %v2424_v19 = vadd.f32 %v2358_v34, %v2176_v46  ;;  %v8619_v45 = vpop.f32.mrf.mxu1 }
 0x1ad   : > { %v2672_v42 = vadd.f32 %v2606_v55, %v2424_v19 }
 0x1af   : > { %v8625_v7 = vadd.f32 %v2854_v9, %v2672_v42 }
 0x1b0   : > { %v2112_v56 = vpop.f32.mrf.mxu2 }
 0x1b1   : > { %11795 = vst [vmem:[#allocation11_spill] sm:$0xff] %v8625_v7  ;;  %v2360_v44 = vpop.f32.mrf.mxu3  ;;  %v2177_v14 = vadd.f32 %v2112_v56, %v8462_v53  ;;  %v2611_v4 = vpop.f32.mrf.mxu0  ;;  %v3189_v56 = vld [vmem:[%s8165_s8 + $0x2d] sm:$0xff]  ;;  %v3451_v7 = vld [vmem:[%s8165_s8 + $0x9e] sm:$0xff] }
 0x1b3   : > { %v2425_v34 = vadd.f32 %v2360_v44, %v2177_v14  ;;  %v2859_v55 = vpop.f32.mrf.mxu1 }
 0x1b4   : > { %7329 = vmatmul.msk.bf16.gmra.mxu0 %vm1634_vm1, %v2497_v35  ;;  %v3472_v35 = vpack.c.bf16 %v3437_v29, %v3436_v17  ;;  %v3438_v17 = vld [vmem:[%s8165_s8 + $0x36] sm:$0xff]  ;;  %v3439_v29 = vld [vmem:[%s8165_s8 + $0x3e] sm:$0xff] }
 0x1b5   : > { %7291 = vmatmul.msk.bf16.gmra.mxu2 %vm1634_vm1, %v2248_v60  ;;  %v8633_v9 = vadd.f32 %v2608_v25, %v2425_v34 }
 0x1b6   : > { %7310 = vmatmul.msk.bf16.gmra.mxu3 %vm1634_vm1, %v2249_v41  ;;  %7348 = vmatmul.msk.bf16.gmra.mxu1 %vm1634_vm1, %v2745_v10 }
 0x1b8   : > { %v2115_v53 = vpop.f32.mrf.mxu2 }
 0x1b9   : > { %v2363_v46 = vpop.f32.mrf.mxu3  ;;  %v2178_v19 = vadd.f32 %v2115_v53, %v8293_v3  ;;  %v2613_v42 = vpop.f32.mrf.mxu0  ;;  %v3224_v3 = vpack.c.bf16 %v3189_v56, %v3188_v39  ;;  %v3190_v39 = vld [vmem:[%s8165_s8 + $0x35] sm:$0xff]  ;;  %v3191_v56 = vld [vmem:[%s8165_s8 + $0x3d] sm:$0xff] }
 0x1bb   : > { %v2426_v6 = vadd.f32 %v2363_v46, %v2178_v19  ;;  %v8637_v62 = vpop.f32.mrf.mxu1 }
 0x1bd   : > { %v2674_v23 = vadd.f32 %v2611_v4, %v2426_v6 }
 0x1bf   : > { %v8643_v60 = vadd.f32 %v2859_v55, %v2674_v23 }
 0x1c0   : > { %v2117_v44 = vpop.f32.mrf.mxu2 }
 0x1c1   : > { %11796 = vst [vmem:[#allocation12_spill] sm:$0xff] %v8643_v60  ;;  %v2365_v25 = vpop.f32.mrf.mxu3  ;;  %v2179_v14 = vadd.f32 %v2117_v44, %v8305_v18  ;;  %v2616_v41 = vpop.f32.mrf.mxu0 }
 0x1c3   : > { %v2427_v10 = vadd.f32 %v2365_v25, %v2179_v14  ;;  %v2864_v34 = vpop.f32.mrf.mxu1 }
 0x1c4   : > { %7388 = vmatmul.msk.bf16.vlgmr.msra.gmra.mxu0 %vm1634_vm1, %v3472_v35  ;;  %v3473_v35 = vpack.c.bf16 %v3439_v29, %v3438_v17  ;;  %v3440_v17 = vld [vmem:[%s8165_s8 + $0x46] sm:$0xff]  ;;  %v3441_v29 = vld [vmem:[%s8165_s8 + $0x4e] sm:$0xff] }
 0x1c5   : > { %7350 = vmatmul.msk.bf16.vlgmr.msra.gmra.mxu2 %vm1634_vm1, %v8325_v43  ;;  %v8650_v4 = vadd.f32 %v2613_v42, %v2427_v10 }
 0x1c6   : > { %7369 = vmatmul.msk.bf16.vlgmr.msra.gmra.mxu3 %vm1634_vm1, %v3224_v3 }
 0x1c8   : > { %v2120_v55 = vpop.f32.mrf.mxu2 }
 0x1c9   : > { %v2368_v53 = vpop.f32.mrf.mxu3  ;;  %v2180_v18 = vadd.f32 %v2120_v55, %v8313_v27  ;;  %v2618_v46 = vpop.f32.mrf.mxu0  ;;  %v3225_v27 = vpack.c.bf16 %v3191_v56, %v3190_v39  ;;  %v3192_v39 = vld [vmem:[%s8165_s8 + $0x45] sm:$0xff]  ;;  %v3193_v56 = vld [vmem:[%s8165_s8 + $0x4d] sm:$0xff] }
 0x1cb   : > { %v2428_v19 = vadd.f32 %v2368_v53, %v2180_v18  ;;  %v8653_v6 = vpop.f32.mrf.mxu1 }
 0x1cd   : > { %v2676_v23 = vadd.f32 %v2616_v41, %v2428_v19 }
 0x1cf   : > { %v8659_v44 = vadd.f32 %v2864_v34, %v2676_v23 }
 0x1d0   : > { %v2122_v43 = vpop.f32.mrf.mxu2 }
 0x1d1   : > { %11797 = vst [vmem:[#allocation13_spill] sm:$0xff] %v8659_v44  ;;  %v2370_v25 = vpop.f32.mrf.mxu3  ;;  %v2181_v42 = vadd.f32 %v2122_v43, %v8323_v40  ;;  %v2621_v14 = vpop.f32.mrf.mxu0 }
 0x1d3   : > { %v2429_v3 = vadd.f32 %v2370_v25, %v2181_v42  ;;  %v2869_v10 = vpop.f32.mrf.mxu1 }
 0x1d4   : > { %7389 = vmatmul.msk.bf16.gmra.mxu0 %vm1634_vm1, %v3473_v35  ;;  %v3474_v35 = vpack.c.bf16 %v3441_v29, %v3440_v17  ;;  %v3442_v17 = vld [vmem:[%s8165_s8 + $0x56] sm:$0xff]  ;;  %v3443_v29 = vld [vmem:[%s8165_s8 + $0x5e] sm:$0xff] }
 0x1d5   : > { %7351 = vmatmul.msk.bf16.gmra.mxu2 %vm1634_vm1, %v8346_v1  ;;  %v8666_v41 = vadd.f32 %v2618_v46, %v2429_v3 }
 0x1d6   : > { %7370 = vmatmul.msk.bf16.gmra.mxu3 %vm1634_vm1, %v3225_v27 }
 0x1d8   : > { %v2125_v34 = vpop.f32.mrf.mxu2 }
 0x1d9   : > { %v2373_v55 = vpop.f32.mrf.mxu3  ;;  %v2182_v40 = vadd.f32 %v2125_v34, %v8334_v48  ;;  %v2623_v53 = vpop.f32.mrf.mxu0  ;;  %v3226_v48 = vpack.c.bf16 %v3193_v56, %v3192_v39  ;;  %v3194_v39 = vld [vmem:[%s8165_s8 + $0x55] sm:$0xff]  ;;  %v3195_v56 = vld [vmem:[%s8165_s8 + $0x5d] sm:$0xff] }
 0x1db   : > { %v2430_v18 = vadd.f32 %v2373_v55, %v2182_v40  ;;  %v8669_v19 = vpop.f32.mrf.mxu1 }
 0x1dd   : > { %v2678_v23 = vadd.f32 %v2621_v14, %v2430_v18 }
 0x1df   : > { %v8675_v43 = vadd.f32 %v2869_v10, %v2678_v23 }
 0x1e0   : > { %v2127_v1 = vpop.f32.mrf.mxu2 }
 0x1e1   : > { %11798 = vst [vmem:[#allocation14_spill] sm:$0xff] %v8675_v43  ;;  %v2375_v25 = vpop.f32.mrf.mxu3  ;;  %v2183_v46 = vadd.f32 %v2127_v1, %v8344_v61  ;;  %v2626_v42 = vpop.f32.mrf.mxu0  ;;  %v11738_v43 = vmov 0  }
 0x1e2   : > { %3798 = vst.msk [vmem:[#allocation2 + $0x4] sm:$0xf] %vm3796_vm7, %v11738_v43 }
 0x1e3   : > { %v2431_v27 = vadd.f32 %v2375_v25, %v2183_v46  ;;  %v2874_v3 = vpop.f32.mrf.mxu1  ;;  %3799 = vst.msk [vmem:[#allocation2 + $0x8] sm:$0xf] %vm3796_vm7, %v11738_v43 }
 0x1e4   : > { %7390 = vmatmul.msk.bf16.gmra.mxu0 %vm1634_vm1, %v3474_v35  ;;  %v3475_v35 = vpack.c.bf16 %v3443_v29, %v3442_v17  ;;  %v3444_v17 = vld [vmem:[%s8165_s8 + $0x66] sm:$0xff]  ;;  %v3445_v29 = vld [vmem:[%s8165_s8 + $0x6e] sm:$0xff]  ;;  %3800 = vst.msk [vmem:[#allocation2 + $0xc] sm:$0xf] %vm3796_vm7, %v11738_v43 }
 0x1e5   : > { %7352 = vmatmul.msk.bf16.gmra.mxu2 %vm1634_vm1, %v8367_v26  ;;  %v8682_v14 = vadd.f32 %v2623_v53, %v2431_v27  ;;  %3801 = vst.msk [vmem:[#allocation2 + $0xa0] sm:$0xf] %vm3796_vm7, %v11738_v43 }
 0x1e6   : > { %7371 = vmatmul.msk.bf16.gmra.mxu3 %vm1634_vm1, %v3226_v48  ;;  %3802 = vst.msk [vmem:[#allocation2 + $0xa4] sm:$0xf] %vm3796_vm7, %v11738_v43 }
 0x1e7   : > { %3803 = vst.msk [vmem:[#allocation2 + $0xa8] sm:$0xf] %vm3796_vm7, %v11738_v43 }
 0x1e8   : > { %v2130_v10 = vpop.f32.mrf.mxu2 }
 0x1e9   : > { %v2378_v34 = vpop.f32.mrf.mxu3  ;;  %v2184_v61 = vadd.f32 %v2130_v10, %v8355_v8  ;;  %v2628_v55 = vpop.f32.mrf.mxu0  ;;  %v3227_v8 = vpack.c.bf16 %v3195_v56, %v3194_v39  ;;  %v3196_v39 = vld [vmem:[%s8165_s8 + $0x65] sm:$0xff]  ;;  %v3197_v56 = vld [vmem:[%s8165_s8 + $0x6d] sm:$0xff] }
 0x1eb   : > { %v2432_v40 = vadd.f32 %v2378_v34, %v2184_v61  ;;  %v8685_v18 = vpop.f32.mrf.mxu1 }
 0x1ed   : > { %v2680_v23 = vadd.f32 %v2626_v42, %v2432_v40 }
 0x1ef   : > { %v8691_v1 = vadd.f32 %v2874_v3, %v2680_v23 }
 0x1f0   : > { %v2132_v26 = vpop.f32.mrf.mxu2 }
 0x1f1   : > { %11799 = vst [vmem:[#allocation15_spill] sm:$0xff] %v8691_v1  ;;  %v2380_v25 = vpop.f32.mrf.mxu3  ;;  %v2185_v53 = vadd.f32 %v2132_v26, %v8365_v22  ;;  %v2631_v46 = vpop.f32.mrf.mxu0 }
 0x1f3   : > { %v2433_v48 = vadd.f32 %v2380_v25, %v2185_v53  ;;  %v2879_v27 = vpop.f32.mrf.mxu1 }
 0x1f4   : > { %7391 = vmatmul.msk.bf16.gmra.mxu0 %vm1634_vm1, %v3475_v35  ;;  %v3476_v35 = vpack.c.bf16 %v3445_v29, %v3444_v17  ;;  %v3446_v17 = vld [vmem:[%s8165_s8 + $0x76] sm:$0xff]  ;;  %v3447_v29 = vld [vmem:[%s8165_s8 + $0x7e] sm:$0xff] }
 0x1f5   : > { %7353 = vmatmul.msk.bf16.gmra.mxu2 %vm1634_vm1, %v8388_v54  ;;  %v8698_v42 = vadd.f32 %v2628_v55, %v2433_v48 }
 0x1f6   : > { %7372 = vmatmul.msk.bf16.gmra.mxu3 %vm1634_vm1, %v3227_v8 }
 0x1f8   : > { %v2135_v3 = vpop.f32.mrf.mxu2 }
 0x1f9   : > { %v2383_v10 = vpop.f32.mrf.mxu3  ;;  %v2186_v22 = vadd.f32 %v2135_v3, %v8376_v33  ;;  %v2633_v34 = vpop.f32.mrf.mxu0  ;;  %v3228_v33 = vpack.c.bf16 %v3197_v56, %v3196_v39  ;;  %v3198_v39 = vld [vmem:[%s8165_s8 + $0x75] sm:$0xff]  ;;  %v3199_v56 = vld [vmem:[%s8165_s8 + $0x7d] sm:$0xff] }
 0x1fb   : > { %v2434_v61 = vadd.f32 %v2383_v10, %v2186_v22  ;;  %v8701_v40 = vpop.f32.mrf.mxu1 }
 0x1fd   : > { %v2682_v23 = vadd.f32 %v2631_v46, %v2434_v61 }
 0x1ff   : > { %v8707_v26 = vadd.f32 %v2879_v27, %v2682_v23 }
 0x200   : > { %v2137_v54 = vpop.f32.mrf.mxu2 }
 0x201   : > { %11800 = vst [vmem:[#allocation16_spill] sm:$0xff] %v8707_v26  ;;  %v2385_v25 = vpop.f32.mrf.mxu3  ;;  %v2187_v55 = vadd.f32 %v2137_v54, %v8386_v50  ;;  %v2636_v53 = vpop.f32.mrf.mxu0 }
 0x203   : > { %v2435_v8 = vadd.f32 %v2385_v25, %v2187_v55  ;;  %v2884_v48 = vpop.f32.mrf.mxu1 }
 0x204   : > { %7392 = vmatmul.msk.bf16.gmra.mxu0 %vm1634_vm1, %v3476_v35  ;;  %v3477_v35 = vpack.c.bf16 %v3447_v29, %v3446_v17 }
 0x205   : > { %7354 = vmatmul.msk.bf16.gmra.mxu2 %vm1634_vm1, %v8409_v20  ;;  %v8714_v46 = vadd.f32 %v2633_v34, %v2435_v8 }
 0x206   : > { %7373 = vmatmul.msk.bf16.gmra.mxu3 %vm1634_vm1, %v3228_v33  ;;  %v3229_v33 = vpack.c.bf16 %v3199_v56, %v3198_v39  ;;  %v3448_v56 = vld [vmem:[%s8165_s8 + $0x86] sm:$0xff] }
 0x208   : > { %v2140_v27 = vpop.f32.mrf.mxu2 }
 0x209   : > { %v2388_v3 = vpop.f32.mrf.mxu3  ;;  %v2188_v50 = vadd.f32 %v2140_v27, %v8397_v59  ;;  %v2638_v10 = vpop.f32.mrf.mxu0 }
 0x20b   : > { %v2436_v22 = vadd.f32 %v2388_v3, %v2188_v50  ;;  %v8717_v61 = vpop.f32.mrf.mxu1 }
 0x20d   : > { %v2684_v23 = vadd.f32 %v2636_v53, %v2436_v22 }
 0x20f   : > { %v8723_v54 = vadd.f32 %v2884_v48, %v2684_v23  ;;  %v226_v48 = vlaneseq }
 0x210   : > { %v2142_v20 = vpop.f32.mrf.mxu2 }
 0x211   : > { %11801 = vst [vmem:[#allocation17_spill] sm:$0xff] %v8723_v54  ;;  %v2390_v25 = vpop.f32.mrf.mxu3  ;;  %v2189_v34 = vadd.f32 %v2142_v20, %v8407_v16  ;;  %v2641_v55 = vpop.f32.mrf.mxu0  ;;  %v8732_v27 = vshrl.u32 %v226_v48, 7 }
 0x213   : > { %v2437_v8 = vadd.f32 %v2390_v25, %v2189_v34  ;;  %v2889_v59 = vpop.f32.mrf.mxu1  ;;  %v266_v23 = vand.u32 65535, %v8732_v27  ;;  %v267_v29 = vshrl.u32 %v8732_v27, 16 }
 0x214   : > { %7393 = vmatmul.msk.bf16.gmra.mxu0 %vm1634_vm1, %v3477_v35 }
 0x215   : > { %7355 = vmatmul.msk.bf16.gmra.mxu2 %vm1634_vm1, %v8430_v57  ;;  %v8730_v53 = vadd.f32 %v2638_v10, %v2437_v8  ;;  %v270_v57 = vmul.u32 58254, %v266_v23  ;;  %v3449_v10 = vld [vmem:[%s8165_s8 + $0x8e] sm:$0xff]  ;;  %v269_v25 = vmul.u32 14564, %v266_v23  ;;  %v271_v35 = vmul.u32 14564, %v267_v29 }
 0x216   : > { %7374 = vmatmul.msk.bf16.gmra.mxu3 %vm1634_vm1, %v3229_v33  ;;  %v3200_v33 = vld [vmem:[%s8165_s8 + $0x85] sm:$0xff]  ;;  %v3201_v8 = vld [vmem:[%s8165_s8 + $0x8d] sm:$0xff] }
 0x217   : > { %v273_v34 = vshll.u32 %v270_v57, 16  ;;  %v3230_v23 = vpack.c.bf16 %v3201_v8, %v3200_v33 }
 0x218   : > { %v2145_v16 = vpop.f32.mrf.mxu2 }
 0x219   : > { %v2393_v3 = vpop.f32.mrf.mxu3  ;;  %v2190_v50 = vadd.f32 %v2145_v16, %v8418_v31  ;;  %v2643_v22 = vpop.f32.mrf.mxu0  ;;  %v272_v31 = vmul.u32 58254, %v267_v29  ;;  %v275_v16 = vshll.u32 %v271_v35, 16  ;;  %vm277_vm2 = vc.u32 %v269_v25, %v273_v34 }
 0x21a   : > { %v279_v26 = vadd.s32 %v273_v34, %v269_v25  ;;  %v278_v44 = vsel %vm277_vm2, 1, %v11738_v43 }
 0x21b   : > { %v2438_v17 = vadd.f32 %v2393_v3, %v2190_v50  ;;  %v8739_v20 = vpop.f32.mrf.mxu1  ;;  %v3478_v50 = vpack.c.bf16 %v3449_v10, %v3448_v56  ;;  %v280_v60 = vadd.s32 %v278_v44, %v272_v31  ;;  %v276_v44 = vshrl.u32 %v271_v35, 16 }
 0x21c   : > { %vm281_vm3 = vc.u32 %v279_v26, %v275_v16  ;;  %v8760_v31 = vadd.s32 16, %v8732_v27 }
 0x21d   : > { %v2686_v39 = vadd.f32 %v2641_v55, %v2438_v17  ;;  %v8746_v55 = vadd.s32 8, %v8732_v27 }
 0x21f   : > { %v8743_v48 = vadd.f32 %v2889_v59, %v2686_v39  ;;  %v295_v59 = vand.u32 65535, %v8746_v55  ;;  %v274_v39 = vshrl.u32 %v270_v57, 16  ;;  %v296_v10 = vshrl.u32 %v8746_v55, 16 }
 0x220   : > { %v2147_v54 = vpop.f32.mrf.mxu2 }
 0x221   : > { %11802 = vst [vmem:[#allocation18_spill] sm:$0xff] %v8743_v48  ;;  %v2395_v3 = vpop.f32.mrf.mxu3  ;;  %v2191_v17 = vadd.f32 %v2147_v54, %v8428_v52  ;;  %v2646_v1 = vpop.f32.mrf.mxu0  ;;  %v282_v48 = vsel %vm281_vm3, 1, %v11738_v43  ;;  %v299_v25 = vmul.u32 58254, %v295_v59  ;;  %v298_v26 = vmul.u32 14564, %v295_v59 }
 0x222   : > { %v284_v56 = vadd.s32 %v282_v48, %v280_v60  ;;  %v300_v34 = vmul.u32 14564, %v296_v10  ;;  %v301_v8 = vmul.u32 58254, %v296_v10  ;;  %v3202_v10 = vld [vmem:[%s8165_s8 + $0x95] sm:$0xff] }
 0x223   : > { %v2439_v29 = vadd.f32 %v2395_v3, %v2191_v17  ;;  %v302_v57 = vshll.u32 %v299_v25, 16  ;;  %v2894_v33 = vpop.f32.mrf.mxu1  ;;  %v324_v17 = vand.u32 65535, %v8760_v31 }
 0x224   : > { %7394 = vmatmul.msk.bf16.gmra.mxu0 %vm1634_vm1, %v3478_v50  ;;  %v285_v54 = vadd.s32 %v284_v56, %v274_v39  ;;  %v304_v3 = vshll.u32 %v300_v34, 16  ;;  %v325_v56 = vshrl.u32 %v8760_v31, 16  ;;  %v305_v47 = vshrl.u32 %v300_v34, 16 }
 0x225   : > { %7356 = vmatmul.msk.bf16.gmra.mxu2 %vm1634_vm1, %v8451_v38  ;;  %v8757_v52 = vadd.f32 %v2643_v22, %v2439_v29  ;;  %vm306_vm4 = vc.u32 %v298_v26, %v302_v57  ;;  %v308_v38 = vadd.s32 %v302_v57, %v298_v26  ;;  %v303_v29 = vshrl.u32 %v299_v25, 16  ;;  %v3203_v57 = vld [vmem:[%s8165_s8 + $0x9d] sm:$0xff] }
 0x226   : > { %7375 = vmatmul.msk.bf16.gmra.mxu3 %vm1634_vm1, %v3230_v23  ;;  %v286_v16 = vadd.s32 %v285_v54, %v276_v44  ;;  %v307_v50 = vsel %vm306_vm4, 1, %v11738_v43  ;;  %v8768_v54 = vmul.u32 58254, %v324_v17  ;;  %v327_v63 = vmul.u32 14564, %v324_v17 }
 0x227   : > { %v309_v23 = vadd.s32 %v307_v50, %v301_v8  ;;  %vm310_vm5 = vc.u32 %v308_v38, %v304_v3  ;;  %v8773_v21 = vmul.u32 14564, %v325_v56  ;;  %v8777_v25 = vadd.f32 %v8583_v37, %v8597_v49 }
 0x228   : > { %v2150_v60 = vpop.f32.mrf.mxu2  ;;  %v311_v39 = vsel %vm310_vm5, 1, %v11738_v43  ;;  %v287_v44 = vshrl.u32 %v286_v16, 4  ;;  %v8781_v8 = vadd.f32 %v8601_v24, %v8615_v2  ;;  %v331_v16 = vshll.u32 %v8768_v54, 16 }
 0x229   : > { %v2398_v48 = vpop.f32.mrf.mxu3  ;;  %v2192_v22 = vadd.f32 %v2150_v60, %v8439_v5  ;;  %v2648_v35 = vpop.f32.mrf.mxu0  ;;  %v313_v26 = vadd.s32 %v311_v39, %v309_v23  ;;  %v3450_v60 = vld [vmem:[%s8165_s8 + $0x96] sm:$0xff]  ;;  %v330_v34 = vmul.u32 58254, %v325_v56  ;;  %v8791_v38 = vadd.s32 24, %v8732_v27 }
 0x22a   : > { %v3231_v49 = vpack.c.bf16 %v3203_v57, %v3202_v10  ;;  %v3479_v50 = vpack.c.bf16 %v3451_v7, %v3450_v60  ;;  %v288_v17 = vmul.u32 18, %v287_v44  ;;  %vm335_vm6 = vc.u32 %v327_v63, %v331_v16  ;;  %v8819_v44 = vld [vmem:[%s8165_s8 + $0xa5] sm:$0xff] }
 0x22b   : > { %v2440_v59 = vadd.f32 %v2398_v48, %v2192_v22  ;;  %v314_v48 = vadd.s32 %v313_v26, %v303_v29  ;;  %v336_v29 = vsel %vm335_vm6, 1, %v11738_v43  ;;  %v353_v7 = vand.u32 65535, %v8791_v38 }
 0x22c   : > { %v8811_v56 = vadd.f32 %v8669_v19, %v8682_v14  ;;  %v8815_v10 = vadd.f32 %v8685_v18, %v8698_v42  ;;  %v8835_v19 = vld [vmem:[%s8165_s8 + $0xa6] sm:$0xff]  ;;  %v8838_v14 = vld [vmem:[%s8165_s8 + $0xae] sm:$0xff]  ;;  %v332_v18 = vshrl.u32 %v8768_v54, 16  ;;  %v354_v42 = vshrl.u32 %v8791_v38, 16 }
 0x22d   : > { %v2688_v5 = vadd.f32 %v2646_v1, %v2440_v59  ;;  %v8786_v1 = vadd.f32 %v8619_v45, %v8633_v9  ;;  %v315_v24 = vadd.s32 %v314_v48, %v305_v47  ;;  %v333_v45 = vshll.u32 %v8773_v21, 16 }
 0x22e   : > { %v337_v9 = vadd.s32 %v331_v16, %v327_v63  ;;  %v8807_v47 = vadd.f32 %v8653_v6, %v8666_v41  ;;  %v338_v63 = vadd.s32 %v336_v29, %v330_v34  ;;  %11804 = vst [vmem:[#allocation20_spill] sm:$0xff] %v8815_v10  ;;  %v11805_v6 = vld [vmem:[#allocation5_spill] sm:$0xff]  ;;  %v8847_v57 = vmul.u32 58254, %v353_v7 }
 0x22f   : > { %v8788_v3 = vadd.f32 %v2894_v33, %v2688_v5  ;;  %v8797_v33 = vpop.f32.mrf.mxu1  ;;  %v316_v59 = vshrl.u32 %v315_v24, 4  ;;  %v8851_v60 = vadd.f32 %v8701_v40, %v8714_v46  ;;  %v334_v54 = vshrl.u32 %v8773_v21, 16  ;;  %v9116_v10 = vld [vmem:[%s8165_s8 + $0xdc] sm:$0xff] }
 0x230   : > { %v2152_v22 = vpop.f32.mrf.mxu2  ;;  %vm339_vm8 = vc.u32 %v337_v9, %v333_v45  ;;  %v8856_v16 = vmul.u32 14564, %v354_v42  ;;  %v359_v40 = vmul.u32 58254, %v354_v42  ;;  %v360_v46 = vshll.u32 %v8847_v57, 16 }
 0x231   : > { %11803 = vst [vmem:[#allocation19_spill] sm:$0xff] %v8788_v3  ;;  %v2400_v37 = vpop.f32.mrf.mxu3  ;;  %v2193_v2 = vadd.f32 %v2152_v22, %v8449_v32  ;;  %v8794_v23 = vpop.f32.mrf.mxu0  ;;  %v8803_v32 = vadd.f32 %v8637_v62, %v8650_v4  ;;  %v8822_v62 = vld [vmem:[%s8165_s8 + $0xad] sm:$0xff]  ;;  %v8825_v4 = vsub.s32 %v8732_v27, %v288_v17  ;;  %v317_v26 = vmul.u32 18, %v316_v59 }
 0x232   : > { %v340_v5 = vsel %vm339_vm8, 1, %v11738_v43  ;;  %11806 = vst [vmem:[#allocation5_spill] sm:$0xff] %v8851_v60  ;;  %v8872_v45 = vadd.s32 32, %v8732_v27 }
 0x233   : > { %v2441_v39 = vadd.f32 %v2400_v37, %v2193_v2  ;;  %v342_v48 = vadd.s32 %v340_v5, %v338_v63  ;;  %v362_v2 = vshll.u32 %v8856_v16, 16  ;;  %vm1307_vm9 = vcmp.ne.s32.totalorder %v8825_v4, 0  ;;  %v3915_v63 = vld [vmem:[#allocation2 + $0x4] sm:$0x8]  ;;  %v8931_v37 = vld [vmem:[%s8165_s8 + $0xb6] sm:$0xff] }
 0x234   : > { %7395 = vmatmul.msk.bf16.gmra.mxu0 %vm1634_vm1, %v3479_v50  ;;  %v11807_v50 = vld [vmem:[#allocation3_spill] sm:$0xff]  ;;  %v8876_v9 = vsub.s32 %v8746_v55, %v317_v26  ;;  %vm1343_vm11 = vcmp.lt.s32.totalorder %v8825_v4, 0  ;;  %v8884_v55 = vld [vmem:[#allocation2 + $0x8] sm:$0xf]  ;;  %v382_v26 = vand.u32 65535, %v8872_v45 }
 0x235   : > { %7357 = vmatmul.msk.bf16.gmra.mxu2 %vm1634_vm1, %v11805_v6  ;;  %v8832_v41 = vadd.f32 %v2648_v35, %v2441_v39  ;;  %v356_v35 = vmul.u32 14564, %v353_v7  ;;  %v343_v24 = vadd.s32 %v342_v48, %v332_v18  ;;  %v8880_v7 = vadd.s32 18, %v8825_v4  ;;  %vm8909_vm15 = vmand %vm1343_vm11, %vm1307_vm9 }
 0x236   : > { %7376 = vmatmul.msk.bf16.gmra.mxu3 %vm1634_vm1, %v3231_v49  ;;  %v361_v18 = vshrl.u32 %v8847_v57, 16  ;;  %vm1308_vm13 = vcmp.ne.s32.totalorder %v8876_v9, 0  ;;  %v3914_v57 = vld [vmem:[%s11734_s3] sm:$0xf]  ;;  %vm1344_vm14 = vcmp.lt.s32.totalorder %v8876_v9, 0  ;;  %v11812_v3 = vunpack.c.l.b16 %v8884_v55 }
 0x237   : > { %vm364_vm10 = vc.u32 %v356_v35, %v360_v46  ;;  %v366_v59 = vadd.s32 %v360_v46, %v356_v35  ;;  %v344_v39 = vadd.s32 %v343_v24, %v334_v54  ;;  %v2899_v6 = vpop.f32.mrf.mxu1  ;;  %v383_v46 = vshrl.u32 %v8872_v45, 16  ;;  %v8934_v49 = vld [vmem:[%s8165_s8 + $0xbe] sm:$0xff]  ;;  %vm8952_vm2 = vmand %vm1344_vm14, %vm1308_vm13 }
 0x238   : > { %v2155_v34 = vpop.f32.mrf.mxu2  ;;  %v365_v42 = vsel %vm364_vm10, 1, %v11738_v43 }
 0x239   : > { %v2403_v22 = vpop.f32.mrf.mxu3  ;;  %v2194_v17 = vadd.f32 %v2155_v34, %v11807_v50  ;;  %v8866_v21 = vpop.f32.mrf.mxu0  ;;  %vm368_vm12 = vc.u32 %v366_v59, %v362_v2  ;;  %v345_v35 = vshrl.u32 %v344_v39, 4  ;;  %v367_v48 = vadd.s32 %v365_v42, %v359_v40  ;;  %v8902_v40 = vld [vmem:[%s8165_s8 + $0xbc] sm:$0xff] }
 0x23a   : > { %v3955_v34 = vunpack.c.l.b16 %v3915_v63  ;;  %v369_v54 = vsel %vm368_vm12, 1, %v11738_v43  ;;  %v8914_v39 = vadd.s32 18, %v8876_v9  ;;  %v8917_v63 = vld [vmem:[%s8165_s8 + $0xb5] sm:$0xff]  ;;  %v363_v42 = vshrl.u32 %v8856_v16, 16 }
 0x23b   : > { %v2442_v29 = vadd.f32 %v2403_v22, %v2194_v17  ;;  %v4434_v17 = vsel %vm1689_vm0, %v3914_v57, 0  ;;  %v371_v24 = vadd.s32 %v369_v54, %v367_v48  ;;  %v8925_v48 = vmul.u32 14564, %v383_v46  ;;  %v11811_v57 = vld [vmem:[#allocation4_spill] sm:$0xff] }
 0x23c   : > { %4443 = vmatpush.bf16.msrb.mxu2 %v4434_v17  ;;  %v346_v22 = vmul.u32 18, %v345_v35  ;;  %v8938_v60 = vpack.c.b16 %v11812_v3, %v3955_v34  ;;  %v8942_v16 = vadd.f32 %v8717_v61, %v8730_v53  ;;  %v8946_v17 = vadd.f32 %v8739_v20, %v8757_v52  ;;  %v8965_v52 = vld [vmem:[#allocation2 + $0x4] sm:$0xc]  ;;  %v7549_v20 = vld [vmem:[%s11734_s3 + $0x10] sm:$0xf] }
 0x23d   : > { %v2690_v5 = vadd.f32 %v8794_v23, %v2442_v29  ;;  %v8899_v23 = vld [vmem:[%s8165_s8 + $0xb4] sm:$0xff]  ;;  %v1451_v61 = vsel %vm8909_vm15, %v8880_v7, %v8825_v4  ;;  %v11817_v34 = vpack.c.bf16 %v8838_v14, %v8835_v19  ;;  %v391_v4 = vshll.u32 %v8925_v48, 16 }
 0x23e   : > { %11813 = vst [vmem:[#allocation4_spill] sm:$0xff] %v8942_v16  ;;  %v11818_v7 = vpack.c.bf16 %v8822_v62, %v8819_v44  ;;  %v1452_v19 = vsel %vm8952_vm2, %v8914_v39, %v8876_v9  ;;  %v8988_v14 = vsub.s32 %v8760_v31, %v346_v22  ;;  %v11820_v39 = vmov 0  }
 0x23f   : > { %v8895_v50 = vadd.f32 %v2899_v6, %v2690_v5  ;;  %v8920_v6 = vld [vmem:[%s8165_s8 + $0xbd] sm:$0xff]  ;;  %v8923_v5 = vmul.u32 58254, %v382_v26  ;;  %11814 = vst [vmem:[#allocation21_spill] sm:$0xff] %v8946_v17  ;;  %v8999_v22 = vadd.s32 40, %v8732_v27  ;;  %vm9001_vm4 = vcmp.lt.s32.totalorder %v1451_v61, 16  ;;  %v9015_v61 = vld [vmem:[%s8165_s8 + $0xcc] sm:$0xff] }
 0x240   : > { %v2157_v2 = vpop.f32.mrf.mxu2  ;;  %vm1309_vm6 = vcmp.ne.s32.totalorder %v8988_v14, 0  ;;  %vm1345_vm8 = vcmp.lt.s32.totalorder %v8988_v14, 0  ;;  %v5388_v53 = vsel %vm1689_vm0, %v7549_v20, 0  ;;  %vm9063_vm11 = vcmp.lt.s32.totalorder %v1452_v19, 16 }
 0x241   : > { %11808 = vst [vmem:[#allocation3_spill] sm:$0xff] %v8895_v50  ;;  %v2405_v59 = vpop.f32.mrf.mxu3  ;;  %v2195_v54 = vadd.f32 %v2157_v2, %v11811_v57  ;;  %v8928_v43 = vpop.f32.mrf.mxu0  ;;  %v372_v50 = vadd.s32 %v371_v24, %v361_v18  ;;  %v385_v18 = vmul.u32 14564, %v382_v26  ;;  %v389_v3 = vshll.u32 %v8923_v5, 16  ;;  %5397 = vmatpush.bf16.msrb.mxu1 %v5388_v53  ;;  %vm9077_vm13 = vmand %vm1345_vm8, %vm1309_vm6 }
 0x242   : > { %v390_v9 = vshrl.u32 %v8923_v5, 16  ;;  %vm4011_vm2 = vcmask 1044480  }
 0x243   : > { %v2443_v35 = vadd.f32 %v2405_v59, %v2195_v54  ;;  %v373_v24 = vadd.s32 %v372_v50, %v363_v42  ;;  %v388_v59 = vmul.u32 58254, %v383_v46  ;;  %vm393_vm3 = vc.u32 %v385_v18, %v389_v3 }
 0x244   : > { %7396 = vmatmul.msk.bf16.gmra.mxu0 %vm1634_vm1, %v11817_v34  ;;  %v395_v62 = vadd.s32 %v389_v3, %v385_v18  ;;  %v394_v31 = vsel %vm393_vm3, 1, %v11820_v39  ;;  %v9006_v3 = vadd.s32 48, %v8732_v27  ;;  %v9012_v34 = vld [vmem:[%s8165_s8 + $0xc4] sm:$0xff] }
 0x245   : > { %7358 = vmatmul.msk.bf16.gmra.mxu2 %vm1634_vm1, %v8493_v0  ;;  %v8981_v29 = vadd.f32 %v8866_v21, %v2443_v35  ;;  %v7511_v0 = vld [vmem:[%s11734_s3 + $0x8] sm:$0xf]  ;;  %v374_v44 = vshrl.u32 %v373_v24, 4  ;;  %v396_v18 = vadd.s32 %v394_v31, %v388_v59  ;;  %v412_v59 = vshrl.u32 %v8999_v22, 16  ;;  %v9035_v31 = vld [vmem:[%s8165_s8 + $0xcd] sm:$0xff] }
 0x246   : > { %7377 = vmatmul.msk.bf16.gmra.mxu3 %vm1634_vm1, %v11818_v7  ;;  %v4682_v50 = vsel %vm1689_vm0, %v7511_v0, 0  ;;  %vm397_vm5 = vc.u32 %v395_v62, %v391_v4  ;;  %v411_v7 = vand.u32 65535, %v8999_v22  ;;  %v9023_v4 = vld [vmem:[%s11733_s2] ss:$0 sm:$0xff]  ;;  %v392_v0 = vshrl.u32 %v8925_v48, 16 }
 0x247   : > { %11819 = vst [vmem:[#allocation22_spill] sm:$0xff] %v8981_v29  ;;  %4691 = vmatpush.bf16.msrb.mxu3 %v4682_v50  ;;  %v375_v2 = vmul.u32 18, %v374_v44  ;;  %v398_v24 = vsel %vm397_vm5, 1, %v11820_v39  ;;  %v9032_v50 = vld [vmem:[%s8165_s8 + $0xc5] sm:$0xff]  ;;  %v9039_v46 = vmul.u32 14564, %v412_v59  ;;  %v9042_v21 = vadd.s32 18, %v8988_v14 }
 0x248   : > { %v3062_v42 = vpop.f32.mrf.mxu2  ;;  %v400_v44 = vadd.s32 %v398_v24, %v396_v18  ;;  %v414_v48 = vmul.u32 14564, %v411_v7  ;;  %v7530_v24 = vld [vmem:[%s11734_s3 + $0xc] sm:$0xf] }
 0x249   : > { %v3310_v54 = vpop.f32.mrf.mxu3  ;;  %v3152_v5 = vadd.f32 %v3062_v42, %v8488_v12  ;;  %v9009_v35 = vpop.f32.mrf.mxu0  ;;  %v9027_v12 = vsub.s32 %v8791_v38, %v375_v2  ;;  %v9037_v42 = vmul.u32 58254, %v411_v7  ;;  %v5176_v38 = vsel %vm1689_vm0, %v7530_v24, 0 }
 0x24a   : > { %v401_v2 = vadd.s32 %v400_v44, %v390_v9  ;;  %v417_v44 = vmul.u32 58254, %v412_v59  ;;  %5185 = vmatpush.bf16.msrb.mxu0 %v5176_v38  ;;  %v441_v38 = vshrl.u32 %v9006_v3, 16 }
 0x24b   : > { %v3400_v62 = vadd.f32 %v3310_v54, %v3152_v5  ;;  %vm1310_vm9 = vcmp.ne.s32.totalorder %v9027_v12, 0  ;;  %v418_v18 = vshll.u32 %v9037_v42, 16  ;;  %v440_v5 = vand.u32 65535, %v9006_v3 }
 0x24c   : > { %v402_v7 = vadd.s32 %v401_v2, %v392_v0  ;;  %vm1346_vm10 = vcmp.lt.s32.totalorder %v9027_v12, 0  ;;  %v9068_v9 = vadd.s32 18, %v9027_v12  ;;  %v9136_v19 = vmul.u32 14564, %v441_v38 }
 0x24d   : > { %v3648_v54 = vadd.f32 %v8928_v43, %v3400_v62  ;;  %v420_v43 = vshll.u32 %v9039_v46, 16  ;;  %vm422_vm12 = vc.u32 %v414_v48, %v418_v18  ;;  %v424_v0 = vadd.s32 %v418_v18, %v414_v48  ;;  %vm9090_vm15 = vmand %vm1346_vm10, %vm1310_vm9 }
 0x24e   : > { %v403_v59 = vshrl.u32 %v402_v7, 4  ;;  %v423_v53 = vsel %vm422_vm12, 1, %v11820_v39  ;;  %v419_v48 = vshrl.u32 %v9037_v42, 16  ;;  %v9098_v42 = vld [vmem:[%s8165_s8 + $0xce] sm:$0xff]  ;;  %v450_v17 = vshrl.u32 %v9136_v19, 16 }
 0x24f   : > { %v3688_v62 = vadd.f32 %v9023_v4, %v3648_v54  ;;  %v11825_v54 = vld [vmem:[#allocation6_spill] sm:$0xff]  ;;  %vm426_vm14 = vc.u32 %v424_v0, %v420_v43  ;;  %v9101_v43 = vmul.u32 58254, %v440_v5  ;;  %v1453_v0 = vsel %vm9077_vm13, %v9042_v21, %v8988_v14  ;;  %v9131_v14 = vld [vmem:[%s8165_s8 + $0xd5] sm:$0xff] }
 0x250   : > { %v3064_v26 = vpop.f32.mrf.mxu2  ;;  %v404_v7 = vmul.u32 18, %v403_v59  ;;  %v9095_v59 = vld [vmem:[%s8165_s8 + $0xc6] sm:$0xff]  ;;  %v443_v21 = vmul.u32 14564, %v440_v5  ;;  %vm9155_vm3 = vcmp.lt.s32.totalorder %v1453_v0, 16 }
 0x251   : > { %v3312_v16 = vpop.f32.mrf.mxu3  ;;  %v3724_v2 = vmax.f32 %v3688_v62, 0.0  ;;  %v3153_v24 = vadd.f32 %v3064_v26, %v11825_v54  ;;  %v9071_v20 = vpop.f32.mrf.mxu0  ;;  %v425_v26 = vadd.s32 %v423_v53, %v417_v44  ;;  %v427_v44 = vsel %vm426_vm14, 1, %v11820_v39  ;;  %v9113_v53 = vld [vmem:[%s8165_s8 + $0xd4] sm:$0xff] }
 0x253   : > { %v3760_v18 = vsel %vm9001_vm4, %v3724_v2, 0.0  ;;  %v3401_v62 = vadd.f32 %v3312_v16, %v3153_v24  ;;  %v11830_v16 = vpack.c.bf16 %v8934_v49, %v8931_v37  ;;  %v421_v2 = vshrl.u32 %v9039_v46, 16  ;;  %v9134_v46 = vld [vmem:[%s8165_s8 + $0xdd] sm:$0xff] }
 0x254   : > { %v3805_v57 = vpack.c.bf16 %v3760_v18, %v3760_v18  ;;  %v429_v24 = vadd.s32 %v427_v44, %v425_v26  ;;  %v11831_v18 = vpack.c.bf16 %v8902_v40, %v8899_v23  ;;  %v11832_v37 = vpack.c.bf16 %v8920_v6, %v8917_v63 }
 0x255   : > { %7397 = vmatmul.msk.bf16.gmra.mxu0 %vm1634_vm1, %v11830_v16  ;;  %v3649_v29 = vadd.f32 %v9009_v35, %v3401_v62  ;;  %v9128_v49 = vsub.s32 %v8872_v45, %v404_v7  ;;  %v1454_v23 = vsel %vm9090_vm15, %v9068_v9, %v9027_v12  ;;  %v3482_v40 = vpack.c.bf16 %v9098_v42, %v9095_v59 }
 0x256   : > { %7359 = vmatmul.msk.bf16.gmra.mxu2 %vm1634_vm1, %v11831_v18  ;;  %7378 = vmatmul.msk.bf16.gmra.mxu3 %vm1634_vm1, %v11832_v37  ;;  %3841 = vst.msk [vmem:[#allocation2 + $0x10] sm:$0xf] %vm3796_vm7, %v3805_v57  ;;  %v430_v45 = vadd.s32 %v429_v24, %v419_v48  ;;  %v11833_v63 = vunpack.c.l.b16 %v8965_v52  ;;  %v11834_v6 = vunpack.c.l.b16 %v8884_v55  ;;  %v446_v26 = vmul.u32 58254, %v441_v38  ;;  %v9177_v55 = vld [vmem:[%s8165_s8 + $0xd6] sm:$0xff] }
 0x257   : > { %v3689_v5 = vadd.f32 %v9023_v4, %v3649_v29  ;;  %v447_v62 = vshll.u32 %v9101_v43, 16  ;;  %v449_v52 = vshll.u32 %v9136_v19, 16  ;;  %v9163_v29 = vadd.s32 56, %v8732_v27 }
 0x258   : > { %v9149_v35 = vpack.c.b16 %v11834_v6, %v11833_v63  ;;  %v3067_v12 = vpop.f32.mrf.mxu2  ;;  %v431_v54 = vadd.s32 %v430_v45, %v421_v2  ;;  %vm1311_vm4 = vcmp.ne.s32.totalorder %v9128_v49, 0  ;;  %vm1347_vm8 = vcmp.lt.s32.totalorder %v9128_v49, 0 }
 0x259   : > { %v3315_v48 = vpop.f32.mrf.mxu3  ;;  %v3725_v44 = vmax.f32 %v3689_v5, 0.0  ;;  %v3154_v38 = vadd.f32 %v3067_v12, %v8507_v13  ;;  %v3565_v57 = vpop.f32.mrf.mxu0  ;;  %vm451_vm5 = vc.u32 %v443_v21, %v447_v62  ;;  %v453_v2 = vadd.s32 %v447_v62, %v443_v21  ;;  %v9180_v21 = vld [vmem:[%s8165_s8 + $0xde] sm:$0xff]  ;;  %vm9217_vm10 = vmand %vm1347_vm8, %vm1311_vm4 }
 0x25a   : > { %v432_v16 = vshrl.u32 %v431_v54, 4  ;;  %v452_v0 = vsel %vm451_vm5, 1, %v11820_v39  ;;  %v469_v24 = vand.u32 65535, %v9163_v29  ;;  %v470_v63 = vshrl.u32 %v9163_v29, 16 }
 0x25b   : > { %v3761_v18 = vsel %vm9063_vm11, %v3725_v44, 0.0  ;;  %v3402_v37 = vadd.f32 %v3315_v48, %v3154_v38  ;;  %v454_v45 = vadd.s32 %v452_v0, %v446_v26  ;;  %v448_v5 = vshrl.u32 %v9101_v43, 16 }
 0x25c   : > { %v3806_v13 = vpack.c.bf16 %v3761_v18, %v3761_v18  ;;  %v433_v6 = vmul.u32 18, %v432_v16  ;;  %vm455_vm6 = vc.u32 %v453_v2, %v449_v52  ;;  %v9184_v26 = vmul.u32 58254, %v469_v24 }
 0x25d   : > { %v3650_v12 = vadd.f32 %v9071_v20, %v3402_v37  ;;  %v9174_v54 = vld [vmem:[#allocation2 + $0xc] sm:$0xff]  ;;  %v456_v62 = vsel %vm455_vm6, 1, %v11820_v39  ;;  %v472_v52 = vmul.u32 14564, %v469_v24  ;;  %v9190_v20 = vmul.u32 14564, %v470_v63 }
 0x25e   : > { %3842 = vst.msk [vmem:[#allocation2 + $0x14] sm:$0xf] %vm3796_vm7, %v3806_v13  ;;  %v9188_v48 = vsub.s32 %v8999_v22, %v433_v6  ;;  %v458_v43 = vadd.s32 %v456_v62, %v454_v45  ;;  %v4013_v38 = vrot.slane %v9174_v54, 3  ;;  %v476_v19 = vshll.u32 %v9184_v26, 16 }
 0x25f   : > { %v3690_v44 = vadd.f32 %v9023_v4, %v3650_v12  ;;  %vm9196_vm9 = vcmp.lt.s32.totalorder %v1454_v23, 16  ;;  %v1419_v22 = vadd.s32 18, %v9128_v49  ;;  %v3483_v24 = vpack.c.bf16 %v9180_v21, %v9177_v55 }
 0x260   : > { %v3069_v16 = vpop.f32.mrf.mxu2  ;;  %v459_v18 = vadd.s32 %v458_v43, %v448_v5  ;;  %v475_v37 = vmul.u32 58254, %v470_v63  ;;  %v11839_v12 = vrot.slane %v8938_v60, 3  ;;  %v9210_v62 = vadd.s32 64, %v8732_v27 }
 0x261   : > { %v3317_v2 = vpop.f32.mrf.mxu3  ;;  %v3726_v45 = vmax.f32 %v3690_v44, 0.0  ;;  %v3155_v13 = vadd.f32 %v3069_v16, %v8516_v30  ;;  %v3568_v6 = vpop.f32.mrf.mxu0  ;;  %vm1312_vm11 = vcmp.ne.s32.totalorder %v9188_v48, 0  ;;  %v478_v5 = vshll.u32 %v9190_v20, 16 }
 0x262   : > { %v4014_v23 = vsel %vm4011_vm2, %v11839_v12, %v4013_v38  ;;  %v460_v30 = vadd.s32 %v459_v18, %v450_v17  ;;  %vm480_vm12 = vc.u32 %v472_v52, %v476_v19  ;;  %vm1348_vm13 = vcmp.lt.s32.totalorder %v9188_v48, 0 }
 0x263   : > { %7475 = vmatmul.msk.bf16.vlgmr.msra.gmra.mxu1 %vm1634_vm1, %v4014_v23  ;;  %v3762_v43 = vsel %vm9155_vm3, %v3726_v45, 0.0  ;;  %v3403_v44 = vadd.f32 %v3317_v2, %v3155_v13  ;;  %v481_v16 = vsel %vm480_vm12, 1, %v11820_v39  ;;  %v482_v7 = vadd.s32 %v476_v19, %v472_v52  ;;  %vm9252_vm15 = vmand %vm1348_vm13, %vm1312_vm11  ;;  %v9259_v52 = vld [vmem:[%s8165_s8 + $0xe4] sm:$0xff]  ;;  %v9262_v19 = vld [vmem:[%s8165_s8 + $0xec] sm:$0xff] }
 0x264   : > { %v3807_v12 = vpack.c.bf16 %v3762_v43, %v3762_v43  ;;  %v461_v23 = vshrl.u32 %v460_v30, 4  ;;  %v483_v17 = vadd.s32 %v481_v16, %v475_v37  ;;  %v11842_v9 = vpack.c.bf16 %v9015_v61, %v9012_v34 }
 0x265   : > { %7398 = vmatmul.msk.bf16.gmra.mxu0 %vm1634_vm1, %v3482_v40  ;;  %v3651_v18 = vadd.f32 %v3565_v57, %v3403_v44  ;;  %v11843_v2 = vpack.c.bf16 %v9035_v31, %v9032_v50  ;;  %v1455_v59 = vsel %vm9217_vm10, %v1419_v22, %v9128_v49  ;;  %v477_v42 = vshrl.u32 %v9184_v26, 16 }
 0x266   : > { %7360 = vmatmul.msk.bf16.gmra.mxu2 %vm1634_vm1, %v11842_v9  ;;  %v498_v40 = vand.u32 65535, %v9210_v62  ;;  %3843 = vst.msk [vmem:[#allocation2 + $0x18] sm:$0xf] %vm3796_vm7, %v3807_v12  ;;  %v1420_v34 = vadd.s32 18, %v9188_v48  ;;  %v462_v61 = vmul.u32 18, %v461_v23  ;;  %vm484_vm14 = vc.u32 %v482_v7, %v478_v5 }
 0x267   : > { %7379 = vmatmul.msk.bf16.gmra.mxu3 %vm1634_vm1, %v11843_v2  ;;  %v499_v57 = vshrl.u32 %v9210_v62, 16  ;;  %v3691_v50 = vadd.f32 %v9023_v4, %v3651_v18  ;;  %v479_v49 = vshrl.u32 %v9190_v20, 16  ;;  %v485_v26 = vsel %vm484_vm14, 1, %v11820_v39 }
 0x268   : > { %v9264_v7 = vmul.u32 58254, %v498_v40  ;;  %v3072_v22 = vpop.f32.mrf.mxu2  ;;  %v9267_v45 = vsub.s32 %v9006_v3, %v462_v61  ;;  %v487_v13 = vadd.s32 %v485_v26, %v483_v17  ;;  %v501_v63 = vmul.u32 14564, %v498_v40 }
 0x269   : > { %v3320_v37 = vpop.f32.mrf.mxu3  ;;  %v9269_v30 = vmul.u32 14564, %v499_v57  ;;  %v3727_v5 = vmax.f32 %v3691_v50, 0.0  ;;  %v3156_v20 = vadd.f32 %v3072_v22, %v8523_v28  ;;  %vm9272_vm3 = vcmp.lt.s32.totalorder %v1455_v59, 16  ;;  %v3570_v44 = vpop.f32.mrf.mxu0 }
 0x26a   : > { %v505_v16 = vshll.u32 %v9264_v7, 16  ;;  %v1456_v12 = vsel %vm9252_vm15, %v1420_v34, %v9188_v48  ;;  %v488_v3 = vadd.s32 %v487_v13, %v477_v42  ;;  %v2988_v23 = vpack.c.bf16 %v9262_v19, %v9259_v52 }
 0x26b   : > { %v504_v17 = vmul.u32 58254, %v499_v57  ;;  %v3763_v18 = vsel %vm9196_vm9, %v3727_v5, 0.0  ;;  %v3404_v28 = vadd.f32 %v3320_v37, %v3156_v20  ;;  %vm1313_vm4 = vcmp.ne.s32.totalorder %v9267_v45, 0 }
 0x26c   : > { %v507_v9 = vshll.u32 %v9269_v30, 16  ;;  %v3808_v2 = vpack.c.bf16 %v3763_v18, %v3763_v18  ;;  %vm1349_vm5 = vcmp.lt.s32.totalorder %v9267_v45, 0  ;;  %v489_v59 = vadd.s32 %v488_v3, %v479_v49 }
 0x26d   : > { %vm509_vm6 = vc.u32 %v501_v63, %v505_v16  ;;  %v3652_v40 = vadd.f32 %v3568_v6, %v3404_v28  ;;  %v9287_v48 = vld [vmem:[#allocation2 + $0x14] sm:$0xff]  ;;  %v506_v42 = vshrl.u32 %v9264_v7, 16  ;;  %v511_v61 = vadd.s32 %v505_v16, %v501_v63  ;;  %vm9302_vm8 = vmand %vm1349_vm5, %vm1313_vm4 }
 0x26e   : > { %v510_v34 = vsel %vm509_vm6, 1, %v11820_v39  ;;  %3844 = vst.msk [vmem:[#allocation2 + $0x1c] sm:$0xf] %vm3796_vm7, %v3808_v2  ;;  %v1421_v0 = vadd.s32 18, %v9267_v45  ;;  %v490_v57 = vshrl.u32 %v489_v59, 4  ;;  %v9294_v31 = vadd.s32 72, %v8732_v27 }
 0x26f   : > { %v512_v50 = vadd.s32 %v510_v34, %v504_v17  ;;  %v3692_v49 = vadd.f32 %v9023_v4, %v3652_v40  ;;  %v4015_v6 = vrot.slane %v9287_v48, 3  ;;  %v508_v7 = vshrl.u32 %v9269_v30, 16  ;;  %v9330_v2 = vld [vmem:[%s8165_s8 + $0xe5] sm:$0xff]  ;;  %v9339_v40 = vld [vmem:[%s8165_s8 + $0xed] sm:$0xff] }
 0x270   : > { %vm513_vm9 = vc.u32 %v511_v61, %v507_v9  ;;  %v3074_v22 = vpop.f32.mrf.mxu2  ;;  %vm9307_vm10 = vcmp.lt.s32.totalorder %v1456_v12, 16  ;;  %v491_v63 = vmul.u32 18, %v490_v57  ;;  %v527_v20 = vand.u32 65535, %v9294_v31  ;;  %v9342_v34 = vld [vmem:[%s8165_s8 + $0xe6] sm:$0xff]  ;;  %v9345_v61 = vld [vmem:[%s8165_s8 + $0xee] sm:$0xff] }
 0x271   : > { %v3322_v13 = vpop.f32.mrf.mxu3  ;;  %v514_v5 = vsel %vm513_vm9, 1, %v11820_v39  ;;  %v528_v16 = vshrl.u32 %v9294_v31, 16  ;;  %v3728_v3 = vmax.f32 %v3692_v49, 0.0  ;;  %v3157_v30 = vadd.f32 %v3074_v22, %v8532_v51  ;;  %v9315_v17 = vpop.f32.mrf.mxu0 }
 0x272   : > { %v4016_v12 = vsel %vm4011_vm2, %v4013_v38, %v4015_v6  ;;  %v516_v18 = vadd.s32 %v514_v5, %v512_v50  ;;  %v1457_v28 = vsel %vm9302_vm8, %v1421_v0, %v9267_v45  ;;  %v9327_v9 = vsub.s32 %v9163_v29, %v491_v63 }
 0x273   : > { %7476 = vmatmul.msk.bf16.gmra.mxu1 %vm1634_vm1, %v4016_v12  ;;  %v9332_v51 = vmul.u32 58254, %v527_v20  ;;  %v9334_v59 = vmul.u32 14564, %v528_v16  ;;  %v3764_v54 = vsel %vm9272_vm3, %v3728_v3, 0.0  ;;  %v3405_v38 = vadd.f32 %v3322_v13, %v3157_v30 }
 0x274   : > { %v517_v45 = vadd.s32 %v516_v18, %v506_v42  ;;  %v530_v0 = vmul.u32 14564, %v527_v20  ;;  %v3809_v29 = vpack.c.bf16 %v3764_v54, %v3764_v54  ;;  %vm1314_vm11 = vcmp.ne.s32.totalorder %v9327_v9, 0 }
 0x275   : > { %7399 = vmatmul.msk.bf16.gmra.mxu0 %vm1634_vm1, %v3483_v24  ;;  %vm1350_vm12 = vcmp.lt.s32.totalorder %v9327_v9, 0  ;;  %v1422_v43 = vadd.s32 18, %v9327_v9  ;;  %v3653_v57 = vadd.f32 %v3570_v44, %v3405_v38  ;;  %v11852_v50 = vpack.c.bf16 %v9116_v10, %v9113_v53  ;;  %v9391_v38 = vld [vmem:[%s8165_s8 + $0xf4] sm:$0xff] }
 0x276   : > { %v11853_v42 = vpack.c.bf16 %v9134_v46, %v9131_v14  ;;  %vm9362_vm13 = vmand %vm1350_vm12, %vm1314_vm11  ;;  %v518_v21 = vadd.s32 %v517_v45, %v508_v7  ;;  %v533_v24 = vmul.u32 58254, %v528_v16  ;;  %v534_v49 = vshll.u32 %v9332_v51, 16  ;;  %3845 = vst.msk [vmem:[#allocation2 + $0x20] sm:$0xf] %vm3796_vm7, %v3809_v29  ;;  %v9394_v45 = vld [vmem:[%s8165_s8 + $0xfc] sm:$0xff] }
 0x277   : > { %7361 = vmatmul.msk.bf16.gmra.mxu2 %vm1634_vm1, %v11852_v50  ;;  %v3236_v10 = vpack.c.bf16 %v9339_v40, %v9330_v2  ;;  %v3484_v53 = vpack.c.bf16 %v9345_v61, %v9342_v34  ;;  %v536_v14 = vshll.u32 %v9334_v59, 16  ;;  %v9374_v46 = vadd.s32 80, %v8732_v27  ;;  %v9397_v29 = vld [vmem:[%s8165_s8 + $0xf5] sm:$0xff] }
 0x278   : > { %7380 = vmatmul.msk.bf16.gmra.mxu3 %vm1634_vm1, %v11853_v42  ;;  %v3693_v44 = vadd.f32 %v9023_v4, %v3653_v57  ;;  %v519_v26 = vshrl.u32 %v518_v21, 4  ;;  %vm538_vm14 = vc.u32 %v530_v0, %v534_v49  ;;  %v9378_v7 = vadd.s32 88, %v8732_v27  ;;  %v3077_v22 = vpop.f32.mrf.mxu2 }
 0x279   : > { %vm9380_vm15 = vcmp.lt.s32.totalorder %v1457_v28, 16  ;;  %v3325_v63 = vpop.f32.mrf.mxu3  ;;  %v1458_v5 = vsel %vm9362_vm13, %v1422_v43, %v9327_v9  ;;  %v535_v20 = vshrl.u32 %v9332_v51, 16  ;;  %v539_v16 = vsel %vm538_vm14, 1, %v11820_v39  ;;  %v3575_v18 = vpop.f32.mrf.mxu0  ;;  %v9401_v43 = vld [vmem:[%s8165_s8 + $0xfd] sm:$0xff] }
 0x27a   : > { %v540_v3 = vadd.s32 %v534_v49, %v530_v0  ;;  %v3729_v30 = vmax.f32 %v3693_v44, 0.0  ;;  %v3158_v12 = vadd.f32 %v3077_v22, %v8539_v58  ;;  %v520_v28 = vmul.u32 18, %v519_v26  ;;  %v9404_v51 = vld [vmem:[%s8165_s8 + $0xf6] sm:$0xff]  ;;  %v9407_v0 = vld [vmem:[%s8165_s8 + $0xfe] sm:$0xff] }
 0x27b   : > { %v541_v54 = vadd.s32 %v539_v16, %v533_v24  ;;  %v537_v9 = vshrl.u32 %v9334_v59, 16  ;;  %v556_v58 = vand.u32 65535, %v9374_v46  ;;  %v557_v57 = vshrl.u32 %v9374_v46, 16 }
 0x27c   : > { %vm542_vm3 = vc.u32 %v540_v3, %v536_v14  ;;  %v3765_v50 = vsel %vm9307_vm10, %v3729_v30, 0.0  ;;  %v3406_v42 = vadd.f32 %v3325_v63, %v3158_v12  ;;  %v9414_v55 = vsub.s32 %v9210_v62, %v520_v28 }
 0x27d   : > { %v543_v59 = vsel %vm542_vm3, 1, %v11820_v39  ;;  %v3810_v21 = vpack.c.bf16 %v3765_v50, %v3765_v50  ;;  %v9419_v14 = vmul.u32 58254, %v556_v58  ;;  %v9422_v26 = vld [vmem:[#allocation2 + $0x1c] sm:$0xff]  ;;  %v559_v22 = vmul.u32 14564, %v556_v58 }
 0x27e   : > { %v545_v24 = vadd.s32 %v543_v59, %v541_v54  ;;  %v3654_v44 = vadd.f32 %v9315_v17, %v3406_v42  ;;  %v9429_v16 = vmul.u32 14564, %v557_v57  ;;  %v585_v30 = vand.u32 65535, %v9378_v7 }
 0x27f   : > { %3846 = vst.msk [vmem:[#allocation2 + $0x24] sm:$0xf] %vm3796_vm7, %v3810_v21  ;;  %v563_v3 = vshll.u32 %v9419_v14, 16  ;;  %v4017_v12 = vrot.slane %v9422_v26, 3  ;;  %vm1315_vm4 = vcmp.ne.s32.totalorder %v9414_v55, 0  ;;  %v562_v28 = vmul.u32 58254, %v557_v57 }
 0x280   : > { %v546_v63 = vadd.s32 %v545_v24, %v535_v20  ;;  %v3694_v17 = vadd.f32 %v9023_v4, %v3654_v44  ;;  %v3079_v54 = vpop.f32.mrf.mxu2  ;;  %vm9436_vm5 = vcmp.lt.s32.totalorder %v1458_v5, 16  ;;  %vm1351_vm6 = vcmp.lt.s32.totalorder %v9414_v55, 0 }
 0x281   : > { %v3327_v58 = vpop.f32.mrf.mxu3  ;;  %v1423_v20 = vadd.s32 18, %v9414_v55  ;;  %v565_v59 = vshll.u32 %v9429_v16, 16  ;;  %v3159_v24 = vadd.f32 %v3079_v54, %v8548_v11  ;;  %v3578_v44 = vpop.f32.mrf.mxu0  ;;  %v4018_v5 = vsel %vm4011_vm2, %v4015_v6, %v4017_v12  ;;  %vm9463_vm9 = vmand %vm1351_vm6, %vm1315_vm4 }
 0x282   : > { %v547_v42 = vadd.s32 %v546_v63, %v537_v9  ;;  %v3730_v21 = vmax.f32 %v3694_v17, 0.0  ;;  %vm567_vm8 = vc.u32 %v559_v22, %v563_v3  ;;  %v569_v49 = vadd.s32 %v563_v3, %v559_v22 }
 0x283   : > { %7477 = vmatmul.msk.bf16.gmra.mxu1 %vm1634_vm1, %v4018_v5  ;;  %v568_v37 = vsel %vm567_vm8, 1, %v11820_v39  ;;  %v586_v9 = vshrl.u32 %v9378_v7, 16  ;;  %v3407_v11 = vadd.f32 %v3327_v58, %v3159_v24  ;;  %v564_v17 = vshrl.u32 %v9419_v14, 16 }
 0x284   : > { %v548_v57 = vshrl.u32 %v547_v42, 4  ;;  %v3766_v63 = vsel %vm9380_vm15, %v3730_v21, 0.0  ;;  %v570_v54 = vadd.s32 %v568_v37, %v562_v28  ;;  %vm571_vm10 = vc.u32 %v569_v49, %v565_v59 }
 0x285   : > { %v3811_v62 = vpack.c.bf16 %v3766_v63, %v3766_v63  ;;  %7400 = vmatmul.msk.bf16.gmra.mxu0 %vm1634_vm1, %v3484_v53  ;;  %v9467_v13 = vmul.u32 58254, %v585_v30  ;;  %v3655_v14 = vadd.f32 %v3575_v18, %v3407_v11  ;;  %v572_v34 = vsel %vm571_vm10, 1, %v11820_v39  ;;  %v9512_v63 = vld [vmem:[%s8165_s8 + $0x105] sm:$0xff]  ;;  %v9515_v11 = vld [vmem:[%s8165_s8 + $0x10d] sm:$0xff] }
 0x286   : > { %v549_v6 = vmul.u32 18, %v548_v57  ;;  %v588_v61 = vmul.u32 14564, %v585_v30  ;;  %v9478_v53 = vmul.u32 14564, %v586_v9  ;;  %v566_v18 = vshrl.u32 %v9429_v16, 16 }
 0x287   : > { %7362 = vmatmul.msk.bf16.gmra.mxu2 %vm1634_vm1, %v2988_v23  ;;  %3847 = vst.msk [vmem:[#allocation2 + $0x28] sm:$0xf] %vm3796_vm7, %v3811_v62  ;;  %v574_v37 = vadd.s32 %v572_v34, %v570_v54  ;;  %v592_v52 = vshll.u32 %v9467_v13, 16  ;;  %v3695_v19 = vadd.f32 %v9023_v4, %v3655_v14  ;;  %v1459_v23 = vsel %vm9463_vm9, %v1423_v20, %v9414_v55  ;;  %v9523_v14 = vld [vmem:[%s8165_s8 + $0x106] sm:$0xff]  ;;  %v9526_v34 = vld [vmem:[%s8165_s8 + $0x10e] sm:$0xff] }
 0x288   : > { %7381 = vmatmul.msk.bf16.gmra.mxu3 %vm1634_vm1, %v3236_v10  ;;  %v550_v49 = vsub.s32 %v9294_v31, %v549_v6  ;;  %v591_v2 = vmul.u32 58254, %v586_v9  ;;  %v594_v40 = vshll.u32 %v9478_v53, 16  ;;  %v3082_v10 = vpop.f32.mrf.mxu2  ;;  %vm9496_vm15 = vcmp.lt.s32.totalorder %v1459_v23, 16  ;;  %v9509_v9 = vld [vmem:[%s8165_s8 + $0x10c] sm:$0xff] }
 0x289   : > { %v3330_v22 = vpop.f32.mrf.mxu3  ;;  %v575_v62 = vadd.s32 %v574_v37, %v564_v17  ;;  %v3731_v16 = vmax.f32 %v3695_v19, 0.0  ;;  %v3160_v3 = vadd.f32 %v3082_v10, %v8555_v15  ;;  %v9490_v30 = vpop.f32.mrf.mxu0  ;;  %vm596_vm14 = vc.u32 %v588_v61, %v592_v52  ;;  %v9503_v15 = vld [vmem:[%s8165_s8 + $0x104] sm:$0xff] }
 0x28a   : > { %vm1316_vm11 = vcmp.ne.s32.totalorder %v550_v49, 0  ;;  %vm1352_vm12 = vcmp.lt.s32.totalorder %v550_v49, 0  ;;  %v1424_v31 = vadd.s32 18, %v550_v49  ;;  %v598_v28 = vadd.s32 %v592_v52, %v588_v61 }
 0x28b   : > { %vm9492_vm13 = vmand %vm1352_vm12, %vm1316_vm11  ;;  %v576_v20 = vadd.s32 %v575_v62, %v566_v18  ;;  %v593_v42 = vshrl.u32 %v9467_v13, 16  ;;  %v597_v59 = vsel %vm596_vm14, 1, %v11820_v39  ;;  %v3767_v21 = vsel %vm9436_vm5, %v3731_v16, 0.0 }
 0x28c   : > { %v3408_v24 = vadd.f32 %v3330_v22, %v3160_v3  ;;  %v595_v5 = vshrl.u32 %v9478_v53, 16  ;;  %v599_v57 = vadd.s32 %v597_v59, %v591_v2  ;;  %v3812_v17 = vpack.c.bf16 %v3767_v21, %v3767_v21 }
 0x28d   : > { %v1460_v54 = vsel %vm9492_vm13, %v1424_v31, %v550_v49  ;;  %v577_v48 = vshrl.u32 %v576_v20, 4  ;;  %vm600_vm3 = vc.u32 %v598_v28, %v594_v40  ;;  %v9529_v61 = vadd.s32 96, %v8732_v27 }
 0x28e   : > { %v3656_v6 = vadd.f32 %v3578_v44, %v3408_v24  ;;  %v9519_v50 = vld [vmem:[#allocation2 + $0x24] sm:$0xff]  ;;  %v601_v13 = vsel %vm600_vm3, 1, %v11820_v39  ;;  %v9532_v53 = vadd.s32 104, %v8732_v27  ;;  %3848 = vst.msk [vmem:[#allocation2 + $0x2c] sm:$0xf] %vm3796_vm7, %v3812_v17  ;;  %v2990_v44 = vpack.c.bf16 %v9509_v9, %v9503_v15 }
 0x28f   : > { %v578_v49 = vmul.u32 18, %v577_v48  ;;  %v603_v18 = vadd.s32 %v601_v13, %v599_v57  ;;  %v3238_v37 = vpack.c.bf16 %v9515_v11, %v9512_v63  ;;  %v4019_v19 = vrot.slane %v9519_v50, 3 }
 0x290   : > { %v3696_v52 = vadd.f32 %v9023_v4, %v3656_v6  ;;  %v614_v23 = vand.u32 65535, %v9529_v61  ;;  %v615_v2 = vshrl.u32 %v9529_v61, 16  ;;  %v3084_v40 = vpop.f32.mrf.mxu2  ;;  %vm9543_vm4 = vcmp.lt.s32.totalorder %v1460_v54, 16 }
 0x291   : > { %v3332_v22 = vpop.f32.mrf.mxu3  ;;  %v579_v31 = vsub.s32 %v9374_v46, %v578_v49  ;;  %v604_v62 = vadd.s32 %v603_v18, %v593_v42  ;;  %v3486_v16 = vpack.c.bf16 %v9526_v34, %v9523_v14  ;;  %v643_v3 = vand.u32 65535, %v9532_v53  ;;  %v3583_v20 = vpop.f32.mrf.mxu0 }
 0x292   : > { %v3732_v55 = vmax.f32 %v3696_v52, 0.0  ;;  %v3161_v28 = vadd.f32 %v3084_v40, %v8564_v36  ;;  %v4020_v59 = vsel %vm4011_vm2, %v4017_v12, %v4019_v19  ;;  %v617_v21 = vmul.u32 14564, %v614_v23 }
 0x293   : > { %7478 = vmatmul.msk.bf16.gmra.mxu1 %vm1634_vm1, %v4020_v59  ;;  %vm1317_vm5 = vcmp.ne.s32.totalorder %v579_v31, 0  ;;  %vm1353_vm6 = vcmp.lt.s32.totalorder %v579_v31, 0  ;;  %v1425_v46 = vadd.s32 18, %v579_v31  ;;  %v605_v42 = vadd.s32 %v604_v62, %v595_v5 }
 0x294   : > { %v3768_v24 = vsel %vm9496_vm15, %v3732_v55, 0.0  ;;  %v3409_v57 = vadd.f32 %v3332_v22, %v3161_v28  ;;  %vm9560_vm8 = vmand %vm1353_vm6, %vm1317_vm5  ;;  %v618_v17 = vmul.u32 58254, %v614_v23  ;;  %v9564_v54 = vmul.u32 14564, %v615_v2 }
 0x295   : > { %v3813_v26 = vpack.c.bf16 %v3768_v24, %v3768_v24  ;;  %v11870_v12 = vpack.c.bf16 %v9407_v0, %v9404_v51  ;;  %v606_v48 = vshrl.u32 %v605_v42, 4  ;;  %v644_v5 = vshrl.u32 %v9532_v53, 16 }
 0x296   : > { %v9572_v58 = vadd.s32 112, %v8732_v27  ;;  %v3657_v6 = vadd.f32 %v9490_v30, %v3409_v57  ;;  %v11871_v13 = vpack.c.bf16 %v9394_v45, %v9391_v38  ;;  %v11872_v49 = vpack.c.bf16 %v9401_v43, %v9397_v29 }
 0x297   : > { %7401 = vmatmul.msk.bf16.gmra.mxu0 %vm1634_vm1, %v11870_v12  ;;  %v1461_v51 = vsel %vm9560_vm8, %v1425_v46, %v579_v31  ;;  %v620_v0 = vmul.u32 58254, %v615_v2  ;;  %v621_v18 = vshll.u32 %v618_v17, 16  ;;  %3849 = vst.msk [vmem:[#allocation2 + $0x30] sm:$0xf] %vm3796_vm7, %v3813_v26  ;;  %v607_v52 = vmul.u32 18, %v606_v48  ;;  %v11875_v46 = vld [vmem:[#allocation7_spill] sm:$0xff] }
 0x298   : > { %7363 = vmatmul.msk.bf16.gmra.mxu2 %vm1634_vm1, %v11871_v13  ;;  %7382 = vmatmul.msk.bf16.gmra.mxu3 %vm1634_vm1, %v11872_v49  ;;  %v622_v23 = vshrl.u32 %v618_v17, 16  ;;  %v623_v30 = vshll.u32 %v9564_v54, 16  ;;  %v624_v38 = vshrl.u32 %v9564_v54, 16  ;;  %v3697_v45 = vadd.f32 %v9023_v4, %v3657_v6  ;;  %v3087_v43 = vpop.f32.mrf.mxu2  ;;  %v9602_v17 = vld [vmem:[%s8165_s8 + $0x114] sm:$0xff]  ;;  %v9618_v13 = vld [vmem:[%s8165_s8 + $0x11d] sm:$0xff] }
 0x299   : > { %vm625_vm9 = vc.u32 %v617_v21, %v621_v18  ;;  %v627_v40 = vadd.s32 %v621_v18, %v617_v21  ;;  %v9589_v29 = vmul.u32 58254, %v643_v3  ;;  %vm9591_vm10 = vcmp.lt.s32.totalorder %v1461_v51, 16  ;;  %v3335_v2 = vpop.f32.mrf.mxu3  ;;  %v3585_v42 = vpop.f32.mrf.mxu0  ;;  %v9615_v6 = vld [vmem:[%s8165_s8 + $0x115] sm:$0xff] }
 0x29a   : > { %v608_v31 = vsub.s32 %v9378_v7, %v607_v52  ;;  %v626_v62 = vsel %vm625_vm9, 1, %v11820_v39  ;;  %v646_v55 = vmul.u32 14564, %v643_v3  ;;  %v9597_v28 = vmul.u32 14564, %v644_v5  ;;  %v9605_v7 = vld [vmem:[%s8165_s8 + $0x11c] sm:$0xff] }
 0x29b   : > { %v3733_v59 = vmax.f32 %v3697_v45, 0.0  ;;  %v3162_v21 = vadd.f32 %v3087_v43, %v11875_v46  ;;  %v628_v24 = vadd.s32 %v626_v62, %v620_v0  ;;  %vm629_vm11 = vc.u32 %v627_v40, %v623_v30  ;;  %v9628_v43 = vld [vmem:[%s8165_s8 + $0x116] sm:$0xff] }
 0x29c   : > { %vm1318_vm12 = vcmp.ne.s32.totalorder %v608_v31, 0  ;;  %vm1354_vm13 = vcmp.lt.s32.totalorder %v608_v31, 0  ;;  %v1426_v57 = vadd.s32 18, %v608_v31  ;;  %v630_v36 = vsel %vm629_vm11, 1, %v11820_v39 }
 0x29d   : > { %v3769_v3 = vsel %vm9543_vm4, %v3733_v59, 0.0  ;;  %v3410_v54 = vadd.f32 %v3335_v2, %v3162_v21  ;;  %vm9609_vm14 = vmand %vm1354_vm13, %vm1318_vm12  ;;  %v632_v12 = vadd.s32 %v630_v36, %v628_v24  ;;  %v650_v48 = vshll.u32 %v9589_v29, 16  ;;  %v9631_v2 = vld [vmem:[%s8165_s8 + $0x11e] sm:$0xff] }
 0x29e   : > { %v3814_v49 = vpack.c.bf16 %v3769_v3, %v3769_v3  ;;  %v1462_v51 = vsel %vm9609_vm14, %v1426_v57, %v608_v31  ;;  %v649_v10 = vmul.u32 58254, %v644_v5  ;;  %v652_v0 = vshll.u32 %v9597_v28, 16  ;;  %v9623_v52 = vld [vmem:[#allocation2 + $0x2c] sm:$0xff]  ;;  %v11880_v3 = vld [vmem:[#allocation8_spill] sm:$0xff] }
 0x29f   : > { %v3658_v18 = vadd.f32 %v3583_v20, %v3410_v54  ;;  %v633_v30 = vadd.s32 %v632_v12, %v622_v23  ;;  %v651_v45 = vshrl.u32 %v9589_v29, 16  ;;  %v653_v40 = vshrl.u32 %v9597_v28, 16 }
 0x2a0   : > { %3850 = vst.msk [vmem:[#allocation2 + $0x34] sm:$0xf] %vm3796_vm7, %v3814_v49  ;;  %vm654_vm15 = vc.u32 %v646_v55, %v650_v48  ;;  %v656_v62 = vadd.s32 %v650_v48, %v646_v55  ;;  %v2991_v5 = vpack.c.bf16 %v9605_v7, %v9602_v17  ;;  %v3239_v20 = vpack.c.bf16 %v9618_v13, %v9615_v6  ;;  %v3089_v59 = vpop.f32.mrf.mxu2 }
 0x2a1   : > { %v3698_v23 = vadd.f32 %v9023_v4, %v3658_v18  ;;  %v4021_v29 = vrot.slane %v9623_v52, 3  ;;  %v634_v31 = vadd.s32 %v633_v30, %v624_v38  ;;  %v655_v28 = vsel %vm654_vm15, 1, %v11820_v39  ;;  %v3337_v21 = vpop.f32.mrf.mxu3  ;;  %v3588_v26 = vpop.f32.mrf.mxu0 }
 0x2a2   : > { %vm9641_vm3 = vcmp.lt.s32.totalorder %v1462_v51, 16  ;;  %v657_v55 = vadd.s32 %v655_v28, %v649_v10  ;;  %vm658_vm4 = vc.u32 %v656_v62, %v652_v0  ;;  %v3487_v24 = vpack.c.bf16 %v9631_v2, %v9628_v43 }
 0x2a3   : > { %v672_v57 = vand.u32 65535, %v9572_v58  ;;  %v3734_v36 = vmax.f32 %v3698_v23, 0.0  ;;  %v3163_v54 = vadd.f32 %v3089_v59, %v11880_v3  ;;  %v4022_v38 = vsel %vm4011_vm2, %v4019_v19, %v4021_v29 }
 0x2a4   : > { %v635_v12 = vshrl.u32 %v634_v31, 4  ;;  %7479 = vmatmul.msk.bf16.gmra.mxu1 %vm1634_vm1, %v4022_v38  ;;  %v659_v48 = vsel %vm658_vm4, 1, %v11820_v39  ;;  %v673_v49 = vshrl.u32 %v9572_v58, 16 }
 0x2a5   : > { %v675_v51 = vmul.u32 14564, %v672_v57  ;;  %v676_v10 = vmul.u32 58254, %v672_v57  ;;  %v3770_v0 = vsel %vm9591_vm10, %v3734_v36, 0.0  ;;  %v3411_v18 = vadd.f32 %v3337_v21, %v3163_v54 }
 0x2a6   : > { %v636_v30 = vmul.u32 18, %v635_v12  ;;  %v661_v62 = vadd.s32 %v659_v48, %v657_v55  ;;  %v3815_v23 = vpack.c.bf16 %v3770_v0, %v3770_v0  ;;  %v677_v50 = vmul.u32 14564, %v673_v49  ;;  %v9694_v0 = vld [vmem:[%s8165_s8 + $0x12c] sm:$0xff] }
 0x2a7   : > { %7402 = vmatmul.msk.bf16.gmra.mxu0 %vm1634_vm1, %v3486_v16  ;;  %v678_v19 = vmul.u32 58254, %v673_v49  ;;  %v679_v31 = vshll.u32 %v676_v10, 16  ;;  %v3659_v28 = vadd.f32 %v3585_v42, %v3411_v18  ;;  %v680_v14 = vshrl.u32 %v676_v10, 16  ;;  %v9691_v10 = vld [vmem:[%s8165_s8 + $0x124] sm:$0xff] }
 0x2a8   : > { %7364 = vmatmul.msk.bf16.gmra.mxu2 %vm1634_vm1, %v2990_v44  ;;  %7383 = vmatmul.msk.bf16.gmra.mxu3 %vm1634_vm1, %v3238_v37  ;;  %v637_v22 = vsub.s32 %v9529_v61, %v636_v30  ;;  %v662_v59 = vadd.s32 %v661_v62, %v651_v45  ;;  %3851 = vst.msk [vmem:[#allocation2 + $0x38] sm:$0xf] %vm3796_vm7, %v3815_v23  ;;  %v681_v34 = vshll.u32 %v677_v50, 16  ;;  %v682_v16 = vshrl.u32 %v677_v50, 16  ;;  %v3092_v9 = vpop.f32.mrf.mxu2  ;;  %v11881_v45 = vld [vmem:[#allocation9_spill] sm:$0xff] }
 0x2a9   : > { %vm683_vm5 = vc.u32 %v675_v51, %v679_v31  ;;  %v685_v42 = vadd.s32 %v679_v31, %v675_v51  ;;  %v3699_v21 = vadd.f32 %v9023_v4, %v3659_v28  ;;  %v3340_v63 = vpop.f32.mrf.mxu3  ;;  %v9676_v61 = vadd.s32 120, %v8732_v27  ;;  %v9679_v4 = vpop.f32.mrf.mxu0 }
 0x2aa   : > { %vm1319_vm6 = vcmp.ne.s32.totalorder %v637_v22, 0  ;;  %vm1355_vm8 = vcmp.lt.s32.totalorder %v637_v22, 0  ;;  %v1427_v15 = vadd.s32 18, %v637_v22  ;;  %v663_v11 = vadd.s32 %v662_v59, %v653_v40 }
 0x2ab   : > { %vm1391_vm9 = vmand %vm1355_vm8, %vm1319_vm6  ;;  %v684_v44 = vsel %vm683_vm5, 1, %v11820_v39  ;;  %vm687_vm10 = vc.u32 %v685_v42, %v681_v34  ;;  %v3735_v37 = vmax.f32 %v3699_v21, 0.0  ;;  %v3164_v55 = vadd.f32 %v3092_v9, %v11881_v45  ;;  %v9717_v9 = vld [vmem:[%s8165_s8 + $0x125] sm:$0xff] }
 0x2ac   : > { %v1463_v57 = vsel %vm1391_vm9, %v1427_v15, %v637_v22  ;;  %v686_v36 = vadd.s32 %v684_v44, %v678_v19  ;;  %v664_v40 = vshrl.u32 %v663_v11, 4  ;;  %v688_v54 = vsel %vm687_vm10, 1, %v11820_v39 }
 0x2ad   : > { %vm9681_vm11 = vcmp.lt.s32.totalorder %v1463_v57, 16  ;;  %v701_v38 = vand.u32 65535, %v9676_v61  ;;  %v3771_v12 = vsel %vm9641_vm3, %v3735_v37, 0.0  ;;  %v3412_v48 = vadd.f32 %v3340_v63, %v3164_v55  ;;  %v9720_v63 = vld [vmem:[%s8165_s8 + $0x12d] sm:$0xff] }
 0x2ae   : > { %v690_v49 = vadd.s32 %v688_v54, %v686_v36  ;;  %v702_v51 = vshrl.u32 %v9676_v61, 16  ;;  %v3816_v18 = vpack.c.bf16 %v3771_v12, %v3771_v12  ;;  %v665_v30 = vmul.u32 18, %v664_v40  ;;  %v9730_v54 = vld [vmem:[%s8165_s8 + $0x126] sm:$0xff] }
 0x2af   : > { %v704_v62 = vmul.u32 14564, %v701_v38  ;;  %v9696_v23 = vmul.u32 58254, %v701_v38  ;;  %v3660_v50 = vadd.f32 %v3588_v26, %v3412_v48  ;;  %v9698_v19 = vld [vmem:[#allocation2 + $0x34] sm:$0xff]  ;;  %v2992_v42 = vpack.c.bf16 %v9694_v0, %v9691_v10  ;;  %v9711_v26 = vld [vmem:[%s11733_s2] ss:$0 sm:$0xff] }
 0x2b0   : > { %v691_v46 = vadd.s32 %v690_v49, %v680_v14  ;;  %v9700_v31 = vmul.u32 14564, %v702_v51  ;;  %v707_v28 = vmul.u32 58254, %v702_v51  ;;  %3852 = vst.msk [vmem:[#allocation2 + $0x3c] sm:$0xf] %vm3796_vm7, %v3816_v18  ;;  %v666_v22 = vsub.s32 %v9532_v53, %v665_v30  ;;  %v3094_v11 = vpop.f32.mrf.mxu2  ;;  %v9733_v38 = vld [vmem:[%s8165_s8 + $0x12e] sm:$0xff]  ;;  %v9748_v30 = vld [vmem:[%s8165_s8 + $0x13c] sm:$0xff] }
 0x2b1   : > { %v708_v59 = vshll.u32 %v9696_v23, 16  ;;  %v709_v34 = vshrl.u32 %v9696_v23, 16  ;;  %v3700_v14 = vadd.f32 %v9711_v26, %v3660_v50  ;;  %v4023_v21 = vrot.slane %v9698_v19, 3  ;;  %v3342_v37 = vpop.f32.mrf.mxu3  ;;  %v9745_v18 = vld [vmem:[%s8165_s8 + $0x134] sm:$0xff] }
 0x2b2   : > { %v692_v15 = vadd.s32 %v691_v46, %v682_v16  ;;  %v710_v53 = vshll.u32 %v9700_v31, 16  ;;  %vm1320_vm12 = vcmp.ne.s32.totalorder %v666_v22, 0  ;;  %vm1356_vm13 = vcmp.lt.s32.totalorder %v666_v22, 0  ;;  %v3593_v16 = vpop.f32.mrf.mxu0  ;;  %v9751_v50 = vld [vmem:[%s8165_s8 + $0x135] sm:$0xff] }
 0x2b3   : > { %v1428_v44 = vadd.s32 18, %v666_v22  ;;  %v711_v45 = vshrl.u32 %v9700_v31, 16  ;;  %v3736_v55 = vmax.f32 %v3700_v14, 0.0  ;;  %v3165_v57 = vadd.f32 %v3094_v11, %v8777_v25  ;;  %vm1392_vm14 = vmand %vm1356_vm13, %vm1320_vm12 }
 0x2b4   : > { %v4024_v36 = vsel %vm4011_vm2, %v4021_v29, %v4023_v21  ;;  %v693_v40 = vshrl.u32 %v692_v15, 4  ;;  %vm712_vm15 = vc.u32 %v704_v62, %v708_v59  ;;  %v714_v25 = vadd.s32 %v708_v59, %v704_v62 }
 0x2b5   : > { %v1464_v12 = vsel %vm1392_vm14, %v1428_v44, %v666_v22  ;;  %7480 = vmatmul.msk.bf16.gmra.mxu1 %vm1634_vm1, %v4024_v36  ;;  %v3240_v48 = vpack.c.bf16 %v9720_v63, %v9717_v9  ;;  %v3772_v52 = vsel %vm9681_vm11, %v3736_v55, 0.0  ;;  %v3413_v29 = vadd.f32 %v3342_v37, %v3165_v57  ;;  %v9761_v22 = vld [vmem:[%s8165_s8 + $0x13d] sm:$0xff]  ;;  %v11886_v44 = vld [vmem:[#allocation10_spill] sm:$0xff] }
 0x2b6   : > { %vm9740_vm3 = vcmp.lt.s32.totalorder %v1464_v12, 16  ;;  %v694_v51 = vmul.u32 18, %v693_v40  ;;  %v3817_v46 = vpack.c.bf16 %v3772_v52, %v3772_v52  ;;  %v713_v3 = vsel %vm712_vm15, 1, %v11820_v39 }
 0x2b7   : > { %7403 = vmatmul.msk.bf16.gmra.mxu0 %vm1634_vm1, %v3487_v24  ;;  %vm716_vm4 = vc.u32 %v714_v25, %v710_v53  ;;  %v3488_v62 = vpack.c.bf16 %v9733_v38, %v9730_v54  ;;  %v3661_v59 = vadd.f32 %v9679_v4, %v3413_v29  ;;  %v715_v2 = vadd.s32 %v713_v3, %v707_v28 }
 0x2b8   : > { %7365 = vmatmul.msk.bf16.gmra.mxu2 %vm1634_vm1, %v2991_v5  ;;  %7384 = vmatmul.msk.bf16.gmra.mxu3 %vm1634_vm1, %v3239_v20  ;;  %v695_v43 = vsub.s32 %v9572_v58, %v694_v51  ;;  %v717_v24 = vsel %vm716_vm4, 1, %v11820_v39  ;;  %3853 = vst.msk [vmem:[#allocation2 + $0x40] sm:$0xf] %vm3796_vm7, %v3817_v46  ;;  %v9776_v14 = vadd.s32 128, %v8732_v27  ;;  %v9779_v4 = vadd.s32 136, %v8732_v27  ;;  %v3097_v13 = vpop.f32.mrf.mxu2 }
 0x2b9   : > { %v2993_v17 = vpack.c.bf16 %v9748_v30, %v9745_v18  ;;  %v3241_v7 = vpack.c.bf16 %v9761_v22, %v9751_v50  ;;  %v3701_v6 = vadd.f32 %v9711_v26, %v3661_v59  ;;  %v3345_v5 = vpop.f32.mrf.mxu3  ;;  %v719_v20 = vadd.s32 %v717_v24, %v715_v2 }
 0x2ba   : > { %vm1321_vm5 = vcmp.ne.s32.totalorder %v695_v43, 0  ;;  %vm1357_vm6 = vcmp.lt.s32.totalorder %v695_v43, 0  ;;  %v1429_v58 = vadd.s32 18, %v695_v43  ;;  %v730_v28 = vand.u32 65535, %v9776_v14  ;;  %v3595_v57 = vpop.f32.mrf.mxu0 }
 0x2bb   : > { %vm1393_vm8 = vmand %vm1357_vm6, %vm1321_vm5  ;;  %v731_v15 = vshrl.u32 %v9776_v14, 16  ;;  %v759_v53 = vand.u32 65535, %v9779_v4  ;;  %v3737_v11 = vmax.f32 %v3701_v6, 0.0  ;;  %v3166_v37 = vadd.f32 %v3097_v13, %v11886_v44 }
 0x2bc   : > { %v1465_v55 = vsel %vm1393_vm8, %v1429_v58, %v695_v43  ;;  %v760_v36 = vshrl.u32 %v9779_v4, 16  ;;  %v720_v12 = vadd.s32 %v719_v20, %v709_v34  ;;  %v733_v25 = vmul.u32 14564, %v730_v28 }
 0x2bd   : > { %vm9791_vm9 = vcmp.lt.s32.totalorder %v1465_v55, 16  ;;  %v734_v52 = vmul.u32 58254, %v730_v28  ;;  %v3773_v29 = vsel %vm9740_vm3, %v3737_v11, 0.0  ;;  %v3414_v51 = vadd.f32 %v3345_v5, %v3166_v37 }
 0x2be   : > { %v735_v46 = vmul.u32 14564, %v731_v15  ;;  %v736_v3 = vmul.u32 58254, %v731_v15  ;;  %v3818_v59 = vpack.c.bf16 %v3773_v29, %v3773_v29  ;;  %v721_v43 = vadd.s32 %v720_v12, %v711_v45 }
 0x2bf   : > { %v737_v2 = vshll.u32 %v734_v52, 16  ;;  %v738_v24 = vshrl.u32 %v734_v52, 16  ;;  %v3662_v6 = vadd.f32 %v3593_v16, %v3414_v51  ;;  %v9801_v58 = vld [vmem:[#allocation2 + $0x3c] sm:$0xff]  ;;  %v762_v34 = vmul.u32 14564, %v759_v53 }
 0x2c0   : > { %v739_v13 = vshll.u32 %v735_v46, 16  ;;  %v740_v23 = vshrl.u32 %v735_v46, 16  ;;  %3854 = vst.msk [vmem:[#allocation2 + $0x44] sm:$0xf] %vm3796_vm7, %v3818_v59  ;;  %v722_v20 = vshrl.u32 %v721_v43, 4  ;;  %v9804_v5 = vmul.u32 58254, %v759_v53  ;;  %v3099_v16 = vpop.f32.mrf.mxu2 }
 0x2c1   : > { %vm741_vm10 = vc.u32 %v733_v25, %v737_v2  ;;  %v743_v49 = vadd.s32 %v737_v2, %v733_v25  ;;  %v3702_v28 = vadd.f32 %v9711_v26, %v3662_v6  ;;  %v4025_v31 = vrot.slane %v9801_v58, 3  ;;  %v3347_v44 = vpop.f32.mrf.mxu3  ;;  %v9830_v2 = vld [vmem:[%s8165_s8 + $0x13e] sm:$0xff] }
 0x2c2   : > { %v742_v45 = vsel %vm741_vm10, 1, %v11820_v39  ;;  %v9809_v15 = vmul.u32 14564, %v760_v36  ;;  %v723_v11 = vmul.u32 18, %v722_v20  ;;  %v765_v55 = vmul.u32 58254, %v760_v36  ;;  %v3598_v25 = vpop.f32.mrf.mxu0 }
 0x2c3   : > { %v744_v37 = vadd.s32 %v742_v45, %v736_v3  ;;  %vm745_vm11 = vc.u32 %v743_v49, %v739_v13  ;;  %v3738_v12 = vmax.f32 %v3702_v28, 0.0  ;;  %v3167_v53 = vadd.f32 %v3099_v16, %v8781_v8  ;;  %v11891_v28 = vld [vmem:[#allocation11_spill] sm:$0xff] }
 0x2c4   : > { %v4026_v52 = vsel %vm4011_vm2, %v4023_v21, %v4025_v31  ;;  %v746_v29 = vsel %vm745_vm11, 1, %v11820_v39  ;;  %v724_v51 = vsub.s32 %v9676_v61, %v723_v11  ;;  %v766_v36 = vshll.u32 %v9804_v5, 16  ;;  %v9827_v21 = vld [vmem:[%s8165_s8 + $0x136] sm:$0xff] }
 0x2c5   : > { %7481 = vmatmul.msk.bf16.gmra.mxu1 %vm1634_vm1, %v4026_v52  ;;  %v748_v46 = vadd.s32 %v746_v29, %v744_v37  ;;  %v767_v3 = vshrl.u32 %v9804_v5, 16  ;;  %v3774_v8 = vsel %vm9791_vm9, %v3738_v12, 0.0  ;;  %v3415_v59 = vadd.f32 %v3347_v44, %v3167_v53 }
 0x2c6   : > { %v768_v43 = vshll.u32 %v9809_v15, 16  ;;  %v769_v19 = vshrl.u32 %v9809_v15, 16  ;;  %v3819_v61 = vpack.c.bf16 %v3774_v8, %v3774_v8  ;;  %vm1322_vm12 = vcmp.ne.s32.totalorder %v724_v51, 0 }
 0x2c7   : > { %vm1358_vm13 = vcmp.lt.s32.totalorder %v724_v51, 0  ;;  %v1430_v6 = vadd.s32 18, %v724_v51  ;;  %7404 = vmatmul.msk.bf16.gmra.mxu0 %vm1634_vm1, %v3488_v62  ;;  %v3663_v40 = vadd.f32 %v3595_v57, %v3415_v59  ;;  %v749_v13 = vadd.s32 %v748_v46, %v738_v24 }
 0x2c8   : > { %vm1394_vm14 = vmand %vm1358_vm13, %vm1322_vm12  ;;  %7366 = vmatmul.msk.bf16.gmra.mxu2 %vm1634_vm1, %v2992_v42  ;;  %7385 = vmatmul.msk.bf16.gmra.mxu3 %vm1634_vm1, %v3240_v48  ;;  %vm770_vm15 = vc.u32 %v762_v34, %v766_v36  ;;  %v9845_v20 = vadd.s32 144, %v8732_v27  ;;  %3855 = vst.msk [vmem:[#allocation2 + $0x48] sm:$0xf] %vm3796_vm7, %v3819_v61  ;;  %v772_v62 = vadd.s32 %v766_v36, %v762_v34  ;;  %v3102_v48 = vpop.f32.mrf.mxu2  ;;  %v9859_v34 = vadd.s32 152, %v8732_v27 }
 0x2c9   : > { %v1466_v54 = vsel %vm1394_vm14, %v1430_v6, %v724_v51  ;;  %v771_v38 = vsel %vm770_vm15, 1, %v11820_v39  ;;  %v3489_v10 = vpack.c.bf16 %v9830_v2, %v9827_v21  ;;  %v3703_v42 = vadd.f32 %v9711_v26, %v3663_v40  ;;  %v3350_v57 = vpop.f32.mrf.mxu3 }
 0x2ca   : > { %vm9851_vm3 = vcmp.lt.s32.totalorder %v1466_v54, 16  ;;  %v750_v9 = vadd.s32 %v749_v13, %v740_v23  ;;  %v773_v63 = vadd.s32 %v771_v38, %v765_v55  ;;  %vm774_vm4 = vc.u32 %v772_v62, %v768_v43  ;;  %v3600_v52 = vpop.f32.mrf.mxu0 }
 0x2cb   : > { %v788_v24 = vand.u32 65535, %v9845_v20  ;;  %v789_v49 = vshrl.u32 %v9845_v20, 16  ;;  %v3739_v5 = vmax.f32 %v3703_v42, 0.0  ;;  %v3168_v45 = vadd.f32 %v3102_v48, %v11891_v28 }
 0x2cc   : > { %v751_v15 = vshrl.u32 %v750_v9, 4  ;;  %v775_v16 = vsel %vm774_vm4, 1, %v11820_v39  ;;  %v817_v38 = vand.u32 65535, %v9859_v34  ;;  %vm4208_vm4 = vsmask.f32 5376 }
 0x2cd   : > { %v777_v11 = vadd.s32 %v775_v16, %v773_v63  ;;  %v791_v44 = vmul.u32 14564, %v788_v24  ;;  %v792_v23 = vmul.u32 58254, %v788_v24  ;;  %v9863_v37 = vmul.u32 14564, %v789_v49 }
 0x2ce   : > { %v3775_v55 = vsel %vm9851_vm3, %v3739_v5, 0.0  ;;  %v752_v12 = vmul.u32 18, %v751_v15  ;;  %v3416_v53 = vadd.f32 %v3350_v57, %v3168_v45  ;;  %v794_v29 = vmul.u32 58254, %v789_v49 }
 0x2cf   : > { %v3820_v51 = vpack.c.bf16 %v3775_v55, %v3775_v55  ;;  %v778_v46 = vadd.s32 %v777_v11, %v767_v3  ;;  %v795_v36 = vshll.u32 %v792_v23, 16  ;;  %v796_v8 = vshrl.u32 %v792_v23, 16  ;;  %v9868_v61 = vld [vmem:[#allocation2 + $0x44] sm:$0xff] }
 0x2d0   : > { %v753_v59 = vsub.s32 %v9776_v14, %v752_v12  ;;  %v3664_v43 = vadd.f32 %v3598_v25, %v3416_v53  ;;  %v797_v6 = vshll.u32 %v9863_v37, 16  ;;  %v798_v40 = vshrl.u32 %v9863_v37, 16  ;;  %v3104_v14 = vpop.f32.mrf.mxu2 }
 0x2d1   : > { %3856 = vst.msk [vmem:[#allocation2 + $0x4c] sm:$0xf] %vm3796_vm7, %v3820_v51  ;;  %v779_v13 = vadd.s32 %v778_v46, %v769_v19  ;;  %vm799_vm5 = vc.u32 %v791_v44, %v795_v36  ;;  %v801_v54 = vadd.s32 %v795_v36, %v791_v44  ;;  %v3352_v0 = vpop.f32.mrf.mxu3  ;;  %v4027_v42 = vrot.slane %v9868_v61, 3 }
 0x2d2   : > { %vm1323_vm6 = vcmp.ne.s32.totalorder %v753_v59, 0  ;;  %vm1359_vm8 = vcmp.lt.s32.totalorder %v753_v59, 0  ;;  %v1431_v3 = vadd.s32 18, %v753_v59  ;;  %v3704_v62 = vadd.f32 %v9711_v26, %v3664_v43  ;;  %v3603_v23 = vpop.f32.mrf.mxu0 }
 0x2d3   : > { %vm1395_vm9 = vmand %vm1359_vm8, %vm1323_vm6  ;;  %v780_v25 = vshrl.u32 %v779_v13, 4  ;;  %v800_v9 = vsel %vm799_vm5, 1, %v11820_v39  ;;  %vm803_vm10 = vc.u32 %v801_v54, %v797_v6  ;;  %v3169_v48 = vadd.f32 %v3104_v14, %v8786_v1 }
 0x2d4   : > { %v1467_v63 = vsel %vm1395_vm9, %v1431_v3, %v753_v59  ;;  %v3740_v19 = vmax.f32 %v3704_v62, 0.0  ;;  %v802_v57 = vadd.s32 %v800_v9, %v794_v29  ;;  %v4028_v49 = vsel %vm4011_vm2, %v4025_v31, %v4027_v42  ;;  %v11892_v29 = vld [vmem:[#allocation12_spill] sm:$0xff] }
 0x2d5   : > { %vm1503_vm11 = vcmp.lt.s32.totalorder %v1467_v63, 16  ;;  %v781_v24 = vmul.u32 18, %v780_v25  ;;  %v804_v5 = vsel %vm803_vm10, 1, %v11820_v39  ;;  %v3417_v45 = vadd.f32 %v3352_v0, %v3169_v48  ;;  %7482 = vmatmul.msk.bf16.gmra.mxu1 %vm1634_vm1, %v4028_v49  ;;  %v8076_v63 = vld [vmem:[#allocation2 + $0xc] sm:$0xff] }
 0x2d6   : > { %v3776_v28 = vsel %vm1503_vm11, %v3740_v19, 0.0  ;;  %v806_v15 = vadd.s32 %v804_v5, %v802_v57  ;;  %v818_v16 = vshrl.u32 %v9859_v34, 16  ;;  %v820_v58 = vmul.u32 14564, %v817_v38 }
 0x2d7   : > { %v3821_v11 = vpack.c.bf16 %v3776_v28, %v3776_v28  ;;  %v782_v1 = vsub.s32 %v9779_v4, %v781_v24  ;;  %7405 = vmatmul.msk.bf16.gmra.mxu0 %vm1634_vm1, %v3489_v10  ;;  %v821_v44 = vmul.u32 58254, %v817_v38  ;;  %v3665_v31 = vadd.f32 %v3600_v52, %v3417_v45 }
 0x2d8   : > { %7367 = vmatmul.msk.bf16.gmra.mxu2 %vm1634_vm1, %v2993_v17  ;;  %7386 = vmatmul.msk.bf16.gmra.mxu3 %vm1634_vm1, %v3241_v7  ;;  %v807_v4 = vadd.s32 %v806_v15, %v796_v8  ;;  %v9899_v37 = vmul.u32 14564, %v818_v16  ;;  %v823_v21 = vmul.u32 58254, %v818_v16  ;;  %v4210_v8 = vshrl.u32 %v9149_v35, 16 }
 0x2d9   : > { %3857 = vst.msk [vmem:[#allocation2 + $0x50] sm:$0xf] %vm3796_vm7, %v3821_v11  ;;  %vm1324_vm12 = vcmp.ne.s32.totalorder %v782_v1, 0  ;;  %vm1360_vm13 = vcmp.lt.s32.totalorder %v782_v1, 0  ;;  %v1432_v2 = vadd.s32 18, %v782_v1  ;;  %v824_v10 = vshll.u32 %v821_v44, 16  ;;  %v3107_v22 = vpop.f32.mrf.mxu2  ;;  %v3355_v7 = vpop.f32.mrf.mxu3 }
 0x2da   : > { %vm1396_vm14 = vmand %vm1360_vm13, %vm1324_vm12  ;;  %v3705_v18 = vadd.f32 %v9711_v26, %v3665_v31  ;;  %v808_v30 = vadd.s32 %v807_v4, %v798_v40  ;;  %v825_v17 = vshrl.u32 %v821_v44, 16  ;;  %v826_v55 = vshll.u32 %v9899_v37, 16  ;;  %v3605_v5 = vpop.f32.mrf.mxu0 }
 0x2db   : > { %v1468_v50 = vsel %vm1396_vm14, %v1432_v2, %v782_v1  ;;  %v827_v12 = vshrl.u32 %v9899_v37, 16  ;;  %vm828_vm15 = vc.u32 %v820_v58, %v824_v10  ;;  %v830_v53 = vadd.s32 %v824_v10, %v820_v58  ;;  %v7938_v2 = vld [vmem:[#allocation2 + $0xc] sm:$0x8]  ;;  %v8028_v10 = vld [vmem:[#allocation2 + $0xc] sm:$0xf0]  }
 0x2dc   : > { %vm1504_vm3 = vcmp.lt.s32.totalorder %v1468_v50, 16  ;;  %v3741_v52 = vmax.f32 %v3705_v18, 0.0  ;;  %v3170_v51 = vadd.f32 %v3107_v22, %v11892_v29  ;;  %v809_v46 = vshrl.u32 %v808_v30, 4  ;;  %v9925_v18 = vpop.f32.mrf.mxu1 }
 0x2dd   : > { %v829_v36 = vsel %vm828_vm15, 1, %v11820_v39  ;;  %vm832_vm5 = vc.u32 %v830_v53, %v826_v55  ;;  %v4213_v59 = vshll.u32 %v9149_v35, 16  ;;  %v4212_v3 = vrot.slane %v4210_v8, 2 }
 0x2de   : > { %v3777_v43 = vsel %vm1504_vm3, %v3741_v52, 0.0  ;;  %v810_v6 = vmul.u32 18, %v809_v46  ;;  %v3418_v40 = vadd.f32 %v3355_v7, %v3170_v51  ;;  %v831_v13 = vadd.s32 %v829_v36, %v823_v21 }
 0x2df   : > { %v3822_v54 = vpack.c.bf16 %v3777_v43, %v3777_v43  ;;  %v833_v38 = vsel %vm832_vm5, 1, %v11820_v39  ;;  %v4215_v62 = vrot.slane %v4213_v59, 3  ;;  %v4218_v19 = vshrl.u32 %v8076_v63, 16 }
 0x2e0   : > { %v811_v14 = vsub.s32 %v9845_v20, %v810_v6  ;;  %v3666_v25 = vadd.f32 %v3603_v23, %v3418_v40  ;;  %v835_v0 = vadd.s32 %v833_v38, %v831_v13  ;;  %v9911_v9 = vld [vmem:[#allocation2 + $0x4c] sm:$0xff]  ;;  %v4221_v48 = vshll.u32 %v8076_v63, 16  ;;  %v8030_v23 = vld [vmem:[#allocation2 + $0x14] sm:$0xff]  }
 0x2e1   : > { %3858 = vst.msk [vmem:[#allocation2 + $0x54] sm:$0xf] %vm3796_vm7, %v3822_v54  ;;  %v4216_v35 = vor.u32 %v4215_v62, %v4212_v3  ;;  %vm4541_vm6 = vsmask.f32 4352  ;;  %v4543_v57 = vshrl.u32 %v8938_v60, 16  ;;  %v3109_v20 = vpop.f32.mrf.mxu2  ;;  %v3357_v45 = vpop.f32.mrf.mxu3  ;;  %v4029_v15 = vrot.slane %v9911_v9, 3 }
 0x2e2   : > { %vm1325_vm8 = vcmp.ne.s32.totalorder %v811_v14, 0  ;;  %vm1361_vm9 = vcmp.lt.s32.totalorder %v811_v14, 0  ;;  %v1433_v24 = vadd.s32 18, %v811_v14  ;;  %v3706_v49 = vadd.f32 %v9711_v26, %v3666_v25 }
 0x2e3   : > { %vm1397_vm10 = vmand %vm1361_vm9, %vm1325_vm8  ;;  %v836_v28 = vadd.s32 %v835_v0, %v825_v17  ;;  %v4220_v16 = vrot.slane %v4218_v19, 2  ;;  %v4223_v11 = vrot.slane %v4221_v48, 3  ;;  %v3171_v44 = vadd.f32 %v3109_v20, %v8803_v32 }
 0x2e4   : > { %v1469_v1 = vsel %vm1397_vm10, %v1433_v24, %v811_v14  ;;  %v3742_v58 = vmax.f32 %v3706_v49, 0.0  ;;  %v4545_v31 = vrot.slane %v4543_v57, 3  ;;  %v4030_v37 = vsel %vm4011_vm2, %v4027_v42, %v4029_v15  ;;  %v11893_v24 = vld [vmem:[#allocation13_spill] sm:$0xff] }
 0x2e5   : > { %vm1505_vm11 = vcmp.lt.s32.totalorder %v1469_v1, 16  ;;  %v837_v4 = vadd.s32 %v836_v28, %v827_v12  ;;  %v9923_v21 = vor.u32 %v4223_v11, %v4220_v16  ;;  %v3419_v17 = vadd.f32 %v3357_v45, %v3171_v44  ;;  %7483 = vmatmul.msk.bf16.gmra.mxu1 %vm1634_vm1, %v4030_v37 }
 0x2e6   : > { %v3778_v30 = vsel %vm1505_vm11, %v3742_v58, 0.0  ;;  %v4546_v32 = vshll.u32 %v8938_v60, 16  ;;  %v4550_v55 = vrot.slane %v4218_v19, 3  ;;  %v4551_v7 = vrot.slane %v4221_v48, 4  ;;  %v3608_v19 = vpop.f32.mrf.mxu0  ;;  %v9950_v48 = vpop.f32.mrf.mxu1 }
 0x2e7   : > { %v3823_v50 = vpack.c.bf16 %v3778_v30, %v3778_v30  ;;  %v838_v22 = vshrl.u32 %v837_v4, 4  ;;  %v4225_v61 = vsel %vm4208_vm4, %v4216_v35, %v9923_v21  ;;  %v3667_v42 = vadd.f32 %v3605_v5, %v3419_v17 }
 0x2e8   : > { %7493 = vmatmul.msk.bf16.vlgmr.msrb.gmra.mxu2 %vm1634_vm1, %v4225_v61  ;;  %v4548_v12 = vrot.slane %v4546_v32, 4  ;;  %v7939_v53 = vor.u32 %v8028_v10, %v7938_v2  ;;  %v4960_v52 = vshrl.u32 %v8030_v23, 16  ;;  %v9933_v51 = vor.u32 %v4551_v7, %v4550_v55 }
 0x2e9   : > { %3859 = vst.msk [vmem:[#allocation2 + $0x58] sm:$0xf] %vm3796_vm7, %v3823_v50  ;;  %v839_v29 = vmul.u32 18, %v838_v22  ;;  %v4963_v46 = vshll.u32 %v8030_v23, 16  ;;  %v9936_v60 = vadd.s32 160, %v8732_v27  ;;  %v3707_v36 = vadd.f32 %v9711_v26, %v3667_v42  ;;  %v3112_v54 = vpop.f32.mrf.mxu2 }
 0x2ea   : > { %v4549_v8 = vor.u32 %v4548_v12, %v4545_v31  ;;  %v4952_v59 = vshrl.u32 %v7939_v53, 16  ;;  %v4955_v43 = vshll.u32 %v7939_v53, 16  ;;  %v4962_v40 = vrot.slane %v4960_v52, 3  ;;  %v3360_v3 = vpop.f32.mrf.mxu3 }
 0x2eb   : > { %v840_v6 = vsub.s32 %v9859_v34, %v839_v29  ;;  %v4965_v13 = vrot.slane %v4963_v46, 4  ;;  %v846_v38 = vand.u32 65535, %v9936_v60  ;;  %v3743_v62 = vmax.f32 %v3707_v36, 0.0 }
 0x2ec   : > { %v4553_v14 = vsel %vm4541_vm6, %v4549_v8, %v9933_v51  ;;  %v4954_v25 = vrot.slane %v4952_v59, 3  ;;  %v4957_v0 = vrot.slane %v4955_v43, 4  ;;  %v9948_v34 = vadd.f32 %v8797_v33, %v8832_v41  ;;  %v8077_v41 = vld [vmem:[#allocation2 + $0x14] sm:$0xff] }
 0x2ed   : > { %vm1326_vm12 = vcmp.ne.s32.totalorder %v840_v6, 0  ;;  %vm1362_vm13 = vcmp.lt.s32.totalorder %v840_v6, 0  ;;  %v1434_v63 = vadd.s32 18, %v840_v6  ;;  %7512 = vmatmul.msk.bf16.vlgmr.msrb.gmra.mxu3 %vm1634_vm1, %v4553_v14  ;;  %v9944_v35 = vor.u32 %v4965_v13, %v4962_v40  ;;  %v8032_v14 = vld [vmem:[#allocation2 + $0x1c] sm:$0xff]  }
 0x2ee   : > { %vm1398_vm14 = vmand %vm1362_vm13, %vm1326_vm12  ;;  %v4958_v57 = vor.u32 %v4957_v0, %v4954_v25  ;;  %v3172_v49 = vadd.f32 %v3112_v54, %v11893_v24  ;;  %v847_v5 = vshrl.u32 %v9936_v60, 16  ;;  %v849_v28 = vmul.u32 14564, %v846_v38  ;;  %v9972_v54 = vpop.f32.mrf.mxu1 }
 0x2ef   : > { %v1470_v20 = vsel %vm1398_vm14, %v1434_v63, %v840_v6  ;;  %v850_v45 = vmul.u32 58254, %v846_v38  ;;  %v9955_v16 = vadd.s32 168, %v8732_v27  ;;  %v4227_v1 = vshrl.u32 %v8077_v41, 16 }
 0x2f0   : > { %vm1506_vm15 = vcmp.lt.s32.totalorder %v1470_v20, 16  ;;  %v4967_v11 = vsel %vm4541_vm6, %v4958_v57, %v9944_v35  ;;  %v851_v33 = vmul.u32 14564, %v847_v5  ;;  %v852_v44 = vmul.u32 58254, %v847_v5  ;;  %v9965_v42 = vld [vmem:[#allocation2 + $0x54] sm:$0xff] }
 0x2f1   : > { %v3779_v58 = vsel %vm1506_vm15, %v3743_v62, 0.0  ;;  %7531 = vmatmul.msk.bf16.vlgmr.msrb.gmra.mxu0 %vm1634_vm1, %v4967_v11  ;;  %v853_v31 = vshll.u32 %v850_v45, 16  ;;  %v3420_v23 = vadd.f32 %v3360_v3, %v3172_v49  ;;  %v854_v37 = vshrl.u32 %v850_v45, 16  ;;  %v3114_v32 = vpop.f32.mrf.mxu2 }
 0x2f2   : > { %v3824_v4 = vpack.c.bf16 %v3779_v58, %v3779_v58  ;;  %v855_v2 = vshll.u32 %v851_v33, 16  ;;  %v875_v10 = vand.u32 65535, %v9955_v16  ;;  %v876_v55 = vshrl.u32 %v9955_v16, 16  ;;  %v3362_v29 = vpop.f32.mrf.mxu3 }
 0x2f3   : > { %vm857_vm3 = vc.u32 %v849_v28, %v853_v31  ;;  %v859_v30 = vadd.s32 %v853_v31, %v849_v28  ;;  %v3668_v17 = vadd.f32 %v3608_v19, %v3420_v23  ;;  %v3173_v22 = vadd.f32 %v3114_v32, %v8807_v47  ;;  %v3610_v47 = vpop.f32.mrf.mxu0 }
 0x2f4   : > { %3860 = vst.msk [vmem:[#allocation2 + $0x5c] sm:$0xf] %vm3796_vm7, %v3824_v4  ;;  %v858_v50 = vsel %vm857_vm3, 1, %v11820_v39  ;;  %v878_v61 = vmul.u32 14564, %v875_v10  ;;  %v879_v7 = vmul.u32 58254, %v875_v10  ;;  %v880_v52 = vmul.u32 14564, %v876_v55 }
 0x2f5   : > { %v860_v12 = vadd.s32 %v858_v50, %v852_v44  ;;  %vm861_vm5 = vc.u32 %v859_v30, %v855_v2  ;;  %v9968_v53 = vadd.f32 %v9711_v26, %v3668_v17  ;;  %v856_v46 = vshrl.u32 %v851_v33, 16 }
 0x2f6   : > { %v862_v36 = vsel %vm861_vm5, 1, %v11820_v39  ;;  %v881_v8 = vmul.u32 58254, %v876_v55  ;;  %v882_v59 = vshll.u32 %v879_v7, 16  ;;  %v883_v40 = vshrl.u32 %v879_v7, 16 }
 0x2f7   : > { %v864_v43 = vadd.s32 %v862_v36, %v860_v12  ;;  %v3744_v6 = vmax.f32 %v9968_v53, 0.0  ;;  %v884_v13 = vshll.u32 %v880_v52, 16  ;;  %v3421_v3 = vadd.f32 %v3362_v29, %v3173_v22 }
 0x2f8   : > { %vm886_vm8 = vc.u32 %v878_v61, %v882_v59  ;;  %v888_v38 = vadd.s32 %v882_v59, %v878_v61  ;;  %v4031_v62 = vrot.slane %v9965_v42, 3  ;;  %v4229_v63 = vrot.slane %v4227_v1, 2 }
 0x2f9   : > { %v865_v25 = vadd.s32 %v864_v43, %v854_v37  ;;  %v887_v0 = vsel %vm886_vm8, 1, %v11820_v39  ;;  %v4230_v19 = vshll.u32 %v8077_v41, 16  ;;  %v3669_v24 = vadd.f32 %v3610_v47, %v3421_v3  ;;  %v11894_v37 = vld [vmem:[#allocation14_spill] sm:$0xff]  ;;  %v10011_v43 = vpop.f32.mrf.mxu1 }
 0x2fa   : > { %v889_v57 = vadd.s32 %v887_v0, %v881_v8  ;;  %vm890_vm9 = vc.u32 %v888_v38, %v884_v13  ;;  %v4032_v49 = vsel %vm4011_vm2, %v4029_v15, %v4031_v62  ;;  %v4554_v45 = vrot.slane %v4227_v1, 3  ;;  %v3117_v11 = vpop.f32.mrf.mxu2 }
 0x2fb   : > { %v866_v5 = vadd.s32 %v865_v25, %v856_v46  ;;  %v891_v20 = vsel %vm890_vm9, 1, %v11820_v39  ;;  %7484 = vmatmul.msk.bf16.gmra.mxu1 %vm1634_vm1, %v4032_v49  ;;  %v4232_v28 = vrot.slane %v4230_v19, 3  ;;  %v885_v33 = vshrl.u32 %v880_v52, 16  ;;  %v3365_v50 = vpop.f32.mrf.mxu3  ;;  %v3613_v29 = vpop.f32.mrf.mxu0 }
 0x2fc   : > { %v893_v58 = vadd.s32 %v891_v20, %v889_v57  ;;  %v4555_v41 = vrot.slane %v4230_v19, 4  ;;  %v4969_v44 = vshrl.u32 %v8032_v14, 16  ;;  %v4972_v4 = vshll.u32 %v8032_v14, 16 }
 0x2fd   : > { %v867_v31 = vshrl.u32 %v866_v5, 4  ;;  %v9983_v23 = vor.u32 %v4232_v28, %v4229_v63  ;;  %v3174_v9 = vadd.f32 %v3117_v11, %v11894_v37  ;;  %v9987_v15 = vadd.f32 %v9711_v26, %v3669_v24 }
 0x2fe   : > { %v894_v2 = vadd.s32 %v893_v58, %v883_v40  ;;  %v9989_v10 = vor.u32 %v4555_v41, %v4554_v45  ;;  %v4971_v30 = vrot.slane %v4969_v44, 3  ;;  %v4974_v32 = vrot.slane %v4972_v4, 4 }
 0x2ff   : > { %v868_v17 = vmul.u32 18, %v867_v31  ;;  %v4234_v1 = vsel %vm4208_vm4, %v9923_v21, %v9983_v23  ;;  %v9995_v55 = vadd.s32 176, %v8732_v27  ;;  %v3422_v7 = vadd.f32 %v3365_v50, %v3174_v9  ;;  %v8034_v9 = vld [vmem:[#allocation2 + $0x24] sm:$0xff]  }
 0x300   : > { %v895_v22 = vadd.s32 %v894_v2, %v885_v33  ;;  %7494 = vmatmul.msk.bf16.gmra.mxu2 %vm1634_vm1, %v4234_v1  ;;  %v4557_v61 = vsel %vm4541_vm6, %v9933_v51, %v9989_v10  ;;  %v10002_v12 = vadd.s32 184, %v8732_v27  ;;  %v10006_v21 = vor.u32 %v4974_v32, %v4971_v30 }
 0x301   : > { %v869_v52 = vsub.s32 %v9936_v60, %v868_v17  ;;  %7513 = vmatmul.msk.bf16.gmra.mxu3 %vm1634_vm1, %v4557_v61  ;;  %v904_v46 = vand.u32 65535, %v9995_v55  ;;  %v905_v36 = vshrl.u32 %v9995_v55, 16  ;;  %v3745_v59 = vmax.f32 %v9987_v15, 0.0  ;;  %v10029_v30 = vpop.f32.mrf.mxu1 }
 0x302   : > { %v896_v8 = vshrl.u32 %v895_v22, 4  ;;  %v3670_v51 = vadd.f32 %v3613_v29, %v3422_v7  ;;  %v933_v47 = vand.u32 65535, %v10002_v12  ;;  %v4976_v40 = vsel %vm4541_vm6, %v9944_v35, %v10006_v21  ;;  %v3119_v13 = vpop.f32.mrf.mxu2  ;;  %11895 = vst [vmem:[#allocation6_spill] sm:$0xff] %v10029_v30 }
 0x303   : > { %vm1327_vm10 = vcmp.ne.s32.totalorder %v869_v52, 0  ;;  %vm1363_vm11 = vcmp.lt.s32.totalorder %v869_v52, 0  ;;  %v1435_v60 = vadd.s32 18, %v869_v52  ;;  %7532 = vmatmul.msk.bf16.gmra.mxu0 %vm1634_vm1, %v4976_v40  ;;  %v908_v3 = vmul.u32 58254, %v904_v46  ;;  %v3367_v37 = vpop.f32.mrf.mxu3  ;;  %v3615_v17 = vpop.f32.mrf.mxu0 }
 0x304   : > { %vm1399_vm12 = vmand %vm1363_vm11, %vm1327_vm10  ;;  %v897_v38 = vmul.u32 18, %v896_v8  ;;  %v909_v14 = vmul.u32 14564, %v905_v36  ;;  %v934_v25 = vshrl.u32 %v10002_v12, 16  ;;  %v907_v63 = vmul.u32 14564, %v904_v46  ;;  %v8078_v46 = vld [vmem:[#allocation2 + $0x1c] sm:$0xff] }
 0x305   : > { %v1471_v0 = vsel %vm1399_vm12, %v1435_v60, %v869_v52  ;;  %v910_v19 = vmul.u32 58254, %v905_v36  ;;  %v10020_v57 = vadd.f32 %v9711_v26, %v3670_v51  ;;  %v911_v49 = vshll.u32 %v908_v3, 16 }
 0x306   : > { %vm1507_vm13 = vcmp.lt.s32.totalorder %v1471_v0, 16  ;;  %v898_v24 = vsub.s32 %v9955_v16, %v897_v38  ;;  %v3175_v35 = vadd.f32 %v3119_v13, %v8811_v56  ;;  %v912_v20 = vshrl.u32 %v908_v3, 16 }
 0x307   : > { %v3780_v5 = vsel %vm1507_vm13, %v3744_v6, 0.0  ;;  %v913_v28 = vshll.u32 %v909_v14, 16  ;;  %v914_v45 = vshrl.u32 %v909_v14, 16  ;;  %vm915_vm5 = vc.u32 %v907_v63, %v911_v49 }
 0x308   : > { %v3825_v11 = vpack.c.bf16 %v3780_v5, %v3780_v5  ;;  %vm1328_vm14 = vcmp.ne.s32.totalorder %v898_v24, 0  ;;  %vm1364_vm15 = vcmp.lt.s32.totalorder %v898_v24, 0  ;;  %v1436_v33 = vadd.s32 18, %v898_v24 }
 0x309   : > { %vm1400_vm3 = vmand %vm1364_vm15, %vm1328_vm14  ;;  %v917_v58 = vadd.s32 %v911_v49, %v907_v63  ;;  %v936_v41 = vmul.u32 14564, %v933_v47  ;;  %v937_v44 = vmul.u32 58254, %v933_v47  ;;  %v916_v56 = vsel %vm915_vm5, 1, %v11820_v39 }
 0x30a   : > { %3861 = vst.msk [vmem:[#allocation2 + $0x60] sm:$0xf] %vm3796_vm7, %v3825_v11  ;;  %v1472_v16 = vsel %vm1400_vm3, %v1436_v33, %v898_v24  ;;  %v938_v31 = vmul.u32 14564, %v934_v25  ;;  %v939_v53 = vmul.u32 58254, %v934_v25  ;;  %v918_v6 = vadd.s32 %v916_v56, %v910_v19  ;;  %v3122_v60 = vpop.f32.mrf.mxu2 }
 0x30b   : > { %vm1508_vm8 = vcmp.lt.s32.totalorder %v1472_v16, 16  ;;  %vm919_vm9 = vc.u32 %v917_v58, %v913_v28  ;;  %v940_v4 = vshll.u32 %v937_v44, 16  ;;  %v941_v1 = vshrl.u32 %v937_v44, 16  ;;  %v11897_v44 = vld [vmem:[#allocation15_spill] sm:$0xff] }
 0x30c   : > { %v3781_v2 = vsel %vm1508_vm8, %v3745_v59, 0.0  ;;  %v920_v15 = vsel %vm919_vm9, 1, %v11820_v39  ;;  %v942_v32 = vshll.u32 %v938_v31, 16  ;;  %v943_v61 = vshrl.u32 %v938_v31, 16 }
 0x30d   : > { %v3826_v50 = vpack.c.bf16 %v3781_v2, %v3781_v2  ;;  %v922_v22 = vadd.s32 %v920_v15, %v918_v6  ;;  %vm944_vm10 = vc.u32 %v936_v41, %v940_v4  ;;  %v946_v52 = vadd.s32 %v940_v4, %v936_v41  ;;  %v10060_v4 = vpop.f32.mrf.mxu1 }
 0x30e   : > { %v945_v7 = vsel %vm944_vm10, 1, %v11820_v39  ;;  %v3423_v29 = vadd.f32 %v3367_v37, %v3175_v35  ;;  %v4236_v36 = vshrl.u32 %v8078_v46, 16  ;;  %v4239_v51 = vshll.u32 %v8078_v46, 16  ;;  %v3618_v37 = vpop.f32.mrf.mxu0 }
 0x30f   : > { %3862 = vst.msk [vmem:[#allocation2 + $0x64] sm:$0xf] %vm3796_vm7, %v3826_v50  ;;  %v923_v8 = vadd.s32 %v922_v22, %v912_v20  ;;  %v947_v59 = vadd.s32 %v945_v7, %v939_v53  ;;  %v4978_v47 = vshrl.u32 %v8034_v9, 16  ;;  %vm948_vm11 = vc.u32 %v946_v52, %v942_v32  ;;  %v3370_v53 = vpop.f32.mrf.mxu3 }
 0x310   : > { %v3671_v40 = vadd.f32 %v3615_v17, %v3423_v29  ;;  %v4238_v13 = vrot.slane %v4236_v36, 2  ;;  %v4558_v38 = vrot.slane %v4236_v36, 3  ;;  %v949_v14 = vsel %vm948_vm11, 1, %v11820_v39  ;;  %v8079_v29 = vld [vmem:[#allocation2 + $0x24] sm:$0xff] }
 0x311   : > { %v924_v3 = vadd.s32 %v923_v8, %v914_v45  ;;  %v10034_v25 = vld [vmem:[#allocation2 + $0x5c] sm:$0xff]  ;;  %v4241_v0 = vrot.slane %v4239_v51, 3  ;;  %v4559_v63 = vrot.slane %v4239_v51, 4  ;;  %v951_v19 = vadd.s32 %v949_v14, %v947_v59  ;;  %v11896_v45 = vld [vmem:[#allocation22_spill] sm:$0xff] }
 0x312   : > { %v10037_v24 = vadd.f32 %v9711_v26, %v3671_v40  ;;  %v4980_v49 = vrot.slane %v4978_v47, 3  ;;  %v4981_v35 = vshll.u32 %v8034_v9, 16  ;;  %v4033_v20 = vrot.slane %v10034_v25, 3  ;;  %v3124_v22 = vpop.f32.mrf.mxu2  ;;  %v10087_v14 = vld [vmem:[%s11733_s2] ss:$0 sm:$0xff] }
 0x313   : > { %v925_v5 = vshrl.u32 %v924_v3, 4  ;;  %v10040_v28 = vor.u32 %v4241_v0, %v4238_v13  ;;  %v10042_v11 = vor.u32 %v4559_v63, %v4558_v38  ;;  %v10046_v33 = vadd.f32 %v9925_v18, %v11896_v45 }
 0x314   : > { %v952_v58 = vadd.s32 %v951_v19, %v941_v1  ;;  %v4983_v41 = vrot.slane %v4981_v35, 4  ;;  %v3176_v16 = vadd.f32 %v3122_v60, %v11897_v44  ;;  %v4034_v26 = vsel %vm4011_vm2, %v4031_v62, %v4033_v20  ;;  %v11898_v60 = vld [vmem:[#allocation20_spill] sm:$0xff] }
 0x315   : > { %v926_v56 = vmul.u32 18, %v925_v5  ;;  %v4243_v31 = vsel %vm4208_vm4, %v9983_v23, %v10040_v28  ;;  %v4561_v18 = vsel %vm4541_vm6, %v9989_v10, %v10042_v11  ;;  %7485 = vmatmul.msk.bf16.gmra.mxu1 %vm1634_vm1, %v4034_v26  ;;  %v10067_v62 = vadd.s32 192, %v8732_v27 }
 0x316   : > { %v953_v6 = vadd.s32 %v952_v58, %v943_v61  ;;  %7495 = vmatmul.msk.bf16.gmra.mxu2 %vm1634_vm1, %v4243_v31  ;;  %v10064_v42 = vor.u32 %v4983_v41, %v4980_v49  ;;  %v3424_v9 = vadd.f32 %v3370_v53, %v3176_v16  ;;  %v3746_v2 = vmax.f32 %v10020_v57, 0.0  ;;  %7514 = vmatmul.msk.bf16.gmra.mxu3 %vm1634_vm1, %v4561_v18  ;;  %v10096_v41 = vpop.f32.mrf.mxu1  ;;  %v3620_v44 = vpop.f32.mrf.mxu0 }
 0x317   : > { %v927_v23 = vsub.s32 %v9995_v55, %v926_v56  ;;  %v3747_v10 = vmax.f32 %v10037_v24, 0.0  ;;  %v10074_v15 = vadd.s32 200, %v8732_v27  ;;  %v962_v32 = vand.u32 65535, %v10067_v62  ;;  %v3372_v35 = vpop.f32.mrf.mxu3  ;;  %11899 = vst [vmem:[#allocation7_spill] sm:$0xff] %v10096_v41 }
 0x318   : > { %v954_v17 = vshrl.u32 %v953_v6, 4  ;;  %v4985_v1 = vsel %vm4541_vm6, %v10006_v21, %v10064_v42  ;;  %v963_v50 = vshrl.u32 %v10067_v62, 16  ;;  %v3672_v57 = vadd.f32 %v3618_v37, %v3424_v9  ;;  %v8036_v37 = vld [vmem:[#allocation2 + $0x2c] sm:$0xff]  }
 0x319   : > { %vm1329_vm12 = vcmp.ne.s32.totalorder %v927_v23, 0  ;;  %vm1365_vm13 = vcmp.lt.s32.totalorder %v927_v23, 0  ;;  %v1437_v55 = vadd.s32 18, %v927_v23  ;;  %7533 = vmatmul.msk.bf16.gmra.mxu0 %vm1634_vm1, %v4985_v1  ;;  %v966_v7 = vmul.u32 58254, %v962_v32 }
 0x31a   : > { %vm1401_vm14 = vmand %vm1365_vm13, %vm1329_vm12  ;;  %v955_v61 = vmul.u32 18, %v954_v17  ;;  %v967_v52 = vmul.u32 14564, %v963_v50  ;;  %v4245_v46 = vshrl.u32 %v8079_v29, 16  ;;  %v965_v8 = vmul.u32 14564, %v962_v32 }
 0x31b   : > { %v1473_v36 = vsel %vm1401_vm14, %v1437_v55, %v927_v23  ;;  %v968_v21 = vmul.u32 58254, %v963_v50  ;;  %v4248_v59 = vshll.u32 %v8079_v29, 16  ;;  %v969_v47 = vshll.u32 %v966_v7, 16 }
 0x31c   : > { %vm1509_vm15 = vcmp.lt.s32.totalorder %v1473_v36, 16  ;;  %v956_v51 = vsub.s32 %v10002_v12, %v955_v61  ;;  %v3177_v40 = vadd.f32 %v3124_v22, %v11898_v60  ;;  %v970_v38 = vshrl.u32 %v966_v7, 16 }
 0x31d   : > { %v3782_v13 = vsel %vm1509_vm15, %v3746_v2, 0.0  ;;  %v971_v3 = vshll.u32 %v967_v52, 16  ;;  %v10090_v0 = vadd.f32 %v10087_v14, %v3672_v57  ;;  %vm973_vm9 = vc.u32 %v965_v8, %v969_v47  ;;  %v3127_v57 = vpop.f32.mrf.mxu2 }
 0x31e   : > { %v3827_v63 = vpack.c.bf16 %v3782_v13, %v3782_v13  ;;  %vm1330_vm3 = vcmp.ne.s32.totalorder %v956_v51, 0  ;;  %vm1366_vm5 = vcmp.lt.s32.totalorder %v956_v51, 0  ;;  %v1438_v19 = vadd.s32 18, %v956_v51 }
 0x31f   : > { %vm1402_vm8 = vmand %vm1366_vm5, %vm1330_vm3  ;;  %v975_v12 = vadd.s32 %v969_v47, %v965_v8  ;;  %v991_v24 = vand.u32 65535, %v10074_v15  ;;  %v992_v49 = vshrl.u32 %v10074_v15, 16  ;;  %v972_v45 = vshrl.u32 %v967_v52, 16 }
 0x320   : > { %3863 = vst.msk [vmem:[#allocation2 + $0x68] sm:$0xf] %vm3796_vm7, %v3827_v63  ;;  %v1474_v5 = vsel %vm1402_vm8, %v1438_v19, %v956_v51  ;;  %v974_v58 = vsel %vm973_vm9, 1, %v11820_v39  ;;  %v3425_v16 = vadd.f32 %v3372_v35, %v3177_v40  ;;  %v4247_v17 = vrot.slane %v4245_v46, 2 }
 0x321   : > { %vm1510_vm10 = vcmp.lt.s32.totalorder %v1474_v5, 16  ;;  %v976_v56 = vadd.s32 %v974_v58, %v968_v21  ;;  %vm977_vm11 = vc.u32 %v975_v12, %v971_v3  ;;  %v994_v26 = vmul.u32 14564, %v991_v24  ;;  %v10115_v12 = vpop.f32.mrf.mxu1  ;;  %v11900_v5 = vld [vmem:[#allocation16_spill] sm:$0xff] }
 0x322   : > { %v3783_v31 = vsel %vm1510_vm10, %v3747_v10, 0.0  ;;  %v978_v18 = vsel %vm977_vm11, 1, %v11820_v39  ;;  %v995_v53 = vmul.u32 58254, %v991_v24  ;;  %v996_v6 = vmul.u32 14564, %v992_v49  ;;  %v3623_v24 = vpop.f32.mrf.mxu0 }
 0x323   : > { %v3828_v9 = vpack.c.bf16 %v3783_v31, %v3783_v31  ;;  %v980_v23 = vadd.s32 %v978_v18, %v976_v56  ;;  %v3673_v2 = vadd.f32 %v3620_v44, %v3425_v16  ;;  %v997_v1 = vmul.u32 58254, %v992_v49  ;;  %v3375_v56 = vpop.f32.mrf.mxu3  ;;  %v10133_v18 = vld [vmem:[#allocation2 + $0x2c] sm:$0xff] }
 0x324   : > { %v998_v32 = vshll.u32 %v995_v53, 16  ;;  %v999_v50 = vshrl.u32 %v995_v53, 16  ;;  %v1000_v55 = vshll.u32 %v996_v6, 16  ;;  %v1001_v61 = vshrl.u32 %v996_v6, 16 }
 0x325   : > { %3864 = vst.msk [vmem:[#allocation2 + $0x6c] sm:$0xf] %vm3796_vm7, %v3828_v9  ;;  %v981_v22 = vadd.s32 %v980_v23, %v970_v38  ;;  %v4250_v7 = vrot.slane %v4248_v59, 3  ;;  %v4562_v10 = vrot.slane %v4245_v46, 3  ;;  %v4563_v29 = vrot.slane %v4248_v59, 4 }
 0x326   : > { %vm1002_vm12 = vc.u32 %v994_v26, %v998_v32  ;;  %v1004_v52 = vadd.s32 %v998_v32, %v994_v26  ;;  %v4987_v36 = vshrl.u32 %v8036_v37, 16  ;;  %v10102_v51 = vadd.f32 %v10087_v14, %v3673_v2 }
 0x327   : > { %v982_v8 = vadd.s32 %v981_v22, %v972_v45  ;;  %v1003_v21 = vsel %vm1002_vm12, 1, %v11820_v39  ;;  %v10104_v47 = vld [vmem:[#allocation2 + $0x64] sm:$0xff]  ;;  %v10106_v60 = vor.u32 %v4250_v7, %v4247_v17  ;;  %v10108_v13 = vor.u32 %v4563_v29, %v4562_v10  ;;  %v3129_v17 = vpop.f32.mrf.mxu2 }
 0x328   : > { %v1005_v40 = vadd.s32 %v1003_v21, %v997_v1  ;;  %vm1006_vm13 = vc.u32 %v1004_v52, %v1000_v55  ;;  %v4989_v38 = vrot.slane %v4987_v36, 3  ;;  %v4035_v59 = vrot.slane %v10104_v47, 3 }
 0x329   : > { %v983_v46 = vshrl.u32 %v982_v8, 4  ;;  %v1007_v3 = vsel %vm1006_vm13, 1, %v11820_v39  ;;  %v4252_v63 = vsel %vm4208_vm4, %v10040_v28, %v10106_v60  ;;  %v4565_v49 = vsel %vm4541_vm6, %v10042_v11, %v10108_v13 }
 0x32a   : > { %v1009_v19 = vadd.s32 %v1007_v3, %v1005_v40  ;;  %7496 = vmatmul.msk.bf16.gmra.mxu2 %vm1634_vm1, %v4252_v63  ;;  %v4990_v35 = vshll.u32 %v8036_v37, 16  ;;  %v3178_v45 = vadd.f32 %v3127_v57, %v11900_v5  ;;  %v3748_v44 = vmax.f32 %v10090_v0, 0.0  ;;  %7515 = vmatmul.msk.bf16.gmra.mxu3 %vm1634_vm1, %v4565_v49  ;;  %v10159_v63 = vpop.f32.mrf.mxu1 }
 0x32b   : > { %v984_v58 = vmul.u32 18, %v983_v46  ;;  %v4036_v28 = vsel %vm4011_vm2, %v4033_v20, %v4035_v59  ;;  %v10130_v16 = vadd.s32 208, %v8732_v27  ;;  %v4254_v0 = vshrl.u32 %v10133_v18, 16  ;;  %11902 = vst [vmem:[#allocation8_spill] sm:$0xff] %v10159_v63 }
 0x32c   : > { %v1010_v26 = vadd.s32 %v1009_v19, %v999_v50  ;;  %7486 = vmatmul.msk.bf16.gmra.mxu1 %vm1634_vm1, %v4036_v28  ;;  %v4992_v11 = vrot.slane %v4990_v35, 4  ;;  %v3426_v31 = vadd.f32 %v3375_v56, %v3178_v45  ;;  %v10140_v6 = vadd.s32 216, %v8732_v27  ;;  %v3625_v19 = vpop.f32.mrf.mxu0  ;;  %v3377_v56 = vpop.f32.mrf.mxu3 }
 0x32d   : > { %v985_v53 = vsub.s32 %v10067_v62, %v984_v58  ;;  %v1020_v25 = vand.u32 65535, %v10130_v16  ;;  %v1021_v20 = vshrl.u32 %v10130_v16, 16  ;;  %v3749_v9 = vmax.f32 %v10102_v51, 0.0 }
 0x32e   : > { %v1011_v37 = vadd.s32 %v1010_v26, %v1001_v61  ;;  %v10143_v23 = vor.u32 %v4992_v11, %v4989_v38  ;;  %v3674_v2 = vadd.f32 %v3623_v24, %v3426_v31  ;;  %v11901_v61 = vld [vmem:[#allocation5_spill] sm:$0xff]  ;;  %v1049_v10 = vand.u32 65535, %v10140_v6 }
 0x32f   : > { %vm1331_vm14 = vcmp.ne.s32.totalorder %v985_v53, 0  ;;  %vm1367_vm15 = vcmp.lt.s32.totalorder %v985_v53, 0  ;;  %v1439_v1 = vadd.s32 18, %v985_v53  ;;  %v1023_v32 = vmul.u32 14564, %v1020_v25 }
 0x330   : > { %vm1403_vm3 = vmand %vm1367_vm15, %vm1331_vm14  ;;  %v1012_v62 = vshrl.u32 %v1011_v37, 4  ;;  %v4994_v50 = vsel %vm4541_vm6, %v10064_v42, %v10143_v23  ;;  %v1024_v55 = vmul.u32 58254, %v1020_v25  ;;  %v1025_v57 = vmul.u32 14564, %v1021_v20 }
 0x331   : > { %v1475_v22 = vsel %vm1403_vm3, %v1439_v1, %v985_v53  ;;  %7534 = vmatmul.msk.bf16.gmra.mxu0 %vm1634_vm1, %v4994_v50  ;;  %v3179_v7 = vadd.f32 %v3129_v17, %v11901_v61  ;;  %v10153_v52 = vrot.slane %v4254_v0, 2  ;;  %v1026_v36 = vmul.u32 58254, %v1021_v20 }
 0x332   : > { %vm1511_vm5 = vcmp.lt.s32.totalorder %v1475_v22, 16  ;;  %v1013_v29 = vmul.u32 18, %v1012_v62  ;;  %v1027_v8 = vshll.u32 %v1024_v55, 16  ;;  %v1028_v51 = vshrl.u32 %v1024_v55, 16  ;;  %v3132_v22 = vpop.f32.mrf.mxu2 }
 0x333   : > { %v3784_v21 = vsel %vm1511_vm5, %v3748_v44, 0.0  ;;  %v1029_v42 = vshll.u32 %v1025_v57, 16  ;;  %v10156_v40 = vadd.f32 %v10087_v14, %v3674_v2  ;;  %v1050_v49 = vshrl.u32 %v10140_v6, 16 }
 0x334   : > { %v3829_v38 = vpack.c.bf16 %v3784_v21, %v3784_v21  ;;  %v1014_v46 = vsub.s32 %v10074_v15, %v1013_v29  ;;  %vm1031_vm8 = vc.u32 %v1023_v32, %v1027_v8  ;;  %v1033_v3 = vadd.s32 %v1027_v8, %v1023_v32  ;;  %v8038_v32 = vld [vmem:[#allocation2 + $0x34] sm:$0xff]  }
 0x335   : > { %v1032_v24 = vsel %vm1031_vm8, 1, %v11820_v39  ;;  %v1052_v35 = vmul.u32 14564, %v1049_v10  ;;  %v1053_v5 = vmul.u32 58254, %v1049_v10  ;;  %v1030_v44 = vshrl.u32 %v1025_v57, 16 }
 0x336   : > { %3865 = vst.msk [vmem:[#allocation2 + $0x70] sm:$0xf] %vm3796_vm7, %v3829_v38  ;;  %vm1332_vm9 = vcmp.ne.s32.totalorder %v1014_v46, 0  ;;  %vm1368_vm10 = vcmp.lt.s32.totalorder %v1014_v46, 0  ;;  %v1440_v45 = vadd.s32 18, %v1014_v46  ;;  %v1034_v58 = vadd.s32 %v1032_v24, %v1026_v36  ;;  %v10176_v38 = vpop.f32.mrf.mxu1 }
 0x337   : > { %vm1404_vm11 = vmand %vm1368_vm10, %vm1332_vm9  ;;  %vm1035_vm12 = vc.u32 %v1033_v3, %v1029_v42  ;;  %v1054_v15 = vmul.u32 14564, %v1050_v49  ;;  %v1056_v28 = vshll.u32 %v1053_v5, 16  ;;  %v1055_v31 = vmul.u32 58254, %v1050_v49 }
 0x338   : > { %v1476_v26 = vsel %vm1404_vm11, %v1440_v45, %v1014_v46  ;;  %v1036_v11 = vsel %vm1035_vm12, 1, %v11820_v39  ;;  %v3427_v53 = vadd.f32 %v3377_v56, %v3179_v7  ;;  %v1057_v20 = vshrl.u32 %v1053_v5, 16  ;;  %v3628_v46 = vpop.f32.mrf.mxu0 }
 0x339   : > { %vm1512_vm13 = vcmp.lt.s32.totalorder %v1476_v26, 16  ;;  %v1038_v25 = vadd.s32 %v1036_v11, %v1034_v58  ;;  %v1058_v37 = vshll.u32 %v1054_v15, 16  ;;  %vm1060_vm14 = vc.u32 %v1052_v35, %v1056_v28  ;;  %v11903_v58 = vld [vmem:[#allocation17_spill] sm:$0xff]  ;;  %v3380_v26 = vpop.f32.mrf.mxu3 }
 0x33a   : > { %v3785_v2 = vsel %vm1512_vm13, %v3749_v9, 0.0  ;;  %v1062_v17 = vadd.s32 %v1056_v28, %v1052_v35  ;;  %v3675_v1 = vadd.f32 %v3625_v19, %v3427_v53  ;;  %v1061_v55 = vsel %vm1060_vm14, 1, %v11820_v39 }
 0x33b   : > { %v3830_v62 = vpack.c.bf16 %v3785_v2, %v3785_v2  ;;  %v1039_v50 = vadd.s32 %v1038_v25, %v1028_v51  ;;  %v4257_v57 = vshll.u32 %v10133_v18, 16  ;;  %v1059_v61 = vshrl.u32 %v1054_v15, 16 }
 0x33c   : > { %v1063_v10 = vadd.s32 %v1061_v55, %v1055_v31  ;;  %vm1064_vm15 = vc.u32 %v1062_v17, %v1058_v37  ;;  %v4566_v7 = vrot.slane %v4254_v0, 3  ;;  %v10174_v42 = vadd.f32 %v10087_v14, %v3675_v1  ;;  %v3134_v1 = vpop.f32.mrf.mxu2  ;;  %v8082_v55 = vld [vmem:[#allocation2 + $0x34] sm:$0xff] }
 0x33d   : > { %3866 = vst.msk [vmem:[#allocation2 + $0x74] sm:$0xf] %vm3796_vm7, %v3830_v62  ;;  %v1040_v9 = vadd.s32 %v1039_v50, %v1030_v44  ;;  %v1065_v29 = vsel %vm1064_vm15, 1, %v11820_v39  ;;  %v10171_v36 = vld [vmem:[#allocation2 + $0x6c] sm:$0xff]  ;;  %v4259_v8 = vrot.slane %v4257_v57, 3  ;;  %v4567_v21 = vrot.slane %v4257_v57, 4 }
 0x33e   : > { %v1067_v51 = vadd.s32 %v1065_v29, %v1063_v10  ;;  %v4996_v3 = vshrl.u32 %v8038_v32, 16  ;;  %v4999_v19 = vshll.u32 %v8038_v32, 16  ;;  %v4037_v0 = vrot.slane %v10171_v36, 3  ;;  %v10217_v29 = vpop.f32.mrf.mxu1 }
 0x33f   : > { %v1041_v18 = vshrl.u32 %v1040_v9, 4  ;;  %v10180_v24 = vor.u32 %v4259_v8, %v10153_v52  ;;  %v10182_v49 = vor.u32 %v4567_v21, %v4566_v7  ;;  %v3180_v44 = vadd.f32 %v3132_v22, %v11903_v58  ;;  %11904 = vst [vmem:[#allocation9_spill] sm:$0xff] %v10217_v29  ;;  %v11905_v21 = vld [vmem:[#allocation4_spill] sm:$0xff] }
 0x340   : > { %v1068_v35 = vadd.s32 %v1067_v51, %v1057_v20  ;;  %v4998_v5 = vrot.slane %v4996_v3, 3  ;;  %v5001_v45 = vrot.slane %v4999_v19, 4  ;;  %v4038_v28 = vsel %vm4011_vm2, %v4035_v59, %v4037_v0  ;;  %v3630_v8 = vpop.f32.mrf.mxu0 }
 0x341   : > { %v1042_v15 = vmul.u32 18, %v1041_v18  ;;  %v4261_v56 = vsel %vm4208_vm4, %v10106_v60, %v10180_v24  ;;  %v4569_v52 = vsel %vm4541_vm6, %v10108_v13, %v10182_v49  ;;  %7487 = vmatmul.msk.bf16.gmra.mxu1 %vm1634_vm1, %v4038_v28  ;;  %v10201_v47 = vadd.s32 224, %v8732_v27  ;;  %v3382_v58 = vpop.f32.mrf.mxu3 }
 0x342   : > { %v1069_v11 = vadd.s32 %v1068_v35, %v1059_v61  ;;  %7497 = vmatmul.msk.bf16.gmra.mxu2 %vm1634_vm1, %v4261_v56  ;;  %v10198_v31 = vor.u32 %v5001_v45, %v4998_v5  ;;  %v3428_v59 = vadd.f32 %v3380_v26, %v3180_v44  ;;  %v3750_v60 = vmax.f32 %v10156_v40, 0.0  ;;  %7516 = vmatmul.msk.bf16.gmra.mxu3 %vm1634_vm1, %v4569_v52 }
 0x343   : > { %v1043_v53 = vsub.s32 %v10130_v16, %v1042_v15  ;;  %v3751_v25 = vmax.f32 %v10174_v42, 0.0  ;;  %v10208_v13 = vadd.s32 232, %v8732_v27  ;;  %v1078_v2 = vand.u32 65535, %v10201_v47 }
 0x344   : > { %v1070_v20 = vshrl.u32 %v1069_v11, 4  ;;  %v5003_v37 = vsel %vm4541_vm6, %v10143_v23, %v10198_v31  ;;  %v1079_v17 = vshrl.u32 %v10201_v47, 16  ;;  %v3676_v40 = vadd.f32 %v3628_v46, %v3428_v59 }
 0x345   : > { %vm1333_vm3 = vcmp.ne.s32.totalorder %v1043_v53, 0  ;;  %vm1369_vm5 = vcmp.lt.s32.totalorder %v1043_v53, 0  ;;  %v1441_v16 = vadd.s32 18, %v1043_v53  ;;  %7535 = vmatmul.msk.bf16.gmra.mxu0 %vm1634_vm1, %v5003_v37  ;;  %v1082_v62 = vmul.u32 58254, %v1078_v2 }
 0x346   : > { %vm1405_vm8 = vmand %vm1369_vm5, %vm1333_vm3  ;;  %v1071_v32 = vmul.u32 18, %v1070_v20  ;;  %v1083_v50 = vmul.u32 14564, %v1079_v17  ;;  %v4263_v57 = vshrl.u32 %v8082_v55, 16  ;;  %v1081_v61 = vmul.u32 14564, %v1078_v2  ;;  %v8040_v20 = vld [vmem:[#allocation2 + $0x3c] sm:$0xff]  }
 0x347   : > { %v1477_v22 = vsel %vm1405_vm8, %v1441_v16, %v1043_v53  ;;  %v1084_v23 = vmul.u32 58254, %v1079_v17  ;;  %v4266_v10 = vshll.u32 %v8082_v55, 16  ;;  %v1085_v9 = vshll.u32 %v1082_v62, 16 }
 0x348   : > { %vm1513_vm9 = vcmp.lt.s32.totalorder %v1477_v22, 16  ;;  %v1072_v7 = vsub.s32 %v10140_v6, %v1071_v32  ;;  %v3181_v51 = vadd.f32 %v3134_v1, %v11905_v21  ;;  %v1086_v46 = vshrl.u32 %v1082_v62, 16 }
 0x349   : > { %v3786_v42 = vsel %vm1513_vm9, %v3750_v60, 0.0  ;;  %v1087_v3 = vshll.u32 %v1083_v50, 16  ;;  %v10221_v19 = vadd.f32 %v10087_v14, %v3676_v40  ;;  %vm1089_vm13 = vc.u32 %v1081_v61, %v1085_v9 }
 0x34a   : > { %v3831_v18 = vpack.c.bf16 %v3786_v42, %v3786_v42  ;;  %vm1334_vm10 = vcmp.ne.s32.totalorder %v1072_v7, 0  ;;  %vm1370_vm11 = vcmp.lt.s32.totalorder %v1072_v7, 0  ;;  %v1442_v35 = vadd.s32 18, %v1072_v7 }
 0x34b   : > { %vm1406_vm12 = vmand %vm1370_vm11, %vm1334_vm10  ;;  %v1091_v5 = vadd.s32 %v1085_v9, %v1081_v61  ;;  %v1107_v6 = vand.u32 65535, %v10208_v13  ;;  %v1108_v45 = vshrl.u32 %v10208_v13, 16  ;;  %v1088_v15 = vshrl.u32 %v1083_v50, 16  ;;  %v3137_v50 = vpop.f32.mrf.mxu2  ;;  %v3633_v9 = vpop.f32.mrf.mxu0 }
 0x34c   : > { %3867 = vst.msk [vmem:[#allocation2 + $0x78] sm:$0xf] %vm3796_vm7, %v3831_v18  ;;  %v1478_v44 = vsel %vm1406_vm12, %v1442_v35, %v1072_v7  ;;  %v1090_v28 = vsel %vm1089_vm13, 1, %v11820_v39  ;;  %v3429_v56 = vadd.f32 %v3382_v58, %v3181_v51  ;;  %v4265_v16 = vrot.slane %v4263_v57, 2  ;;  %v10229_v7 = vpop.f32.mrf.mxu1 }
 0x34d   : > { %vm1514_vm14 = vcmp.lt.s32.totalorder %v1478_v44, 16  ;;  %v1092_v52 = vadd.s32 %v1090_v28, %v1084_v23  ;;  %vm1093_vm15 = vc.u32 %v1091_v5, %v1087_v3  ;;  %v1110_v26 = vmul.u32 14564, %v1107_v6 }
 0x34e   : > { %v3787_v11 = vsel %vm1514_vm14, %v3751_v25, 0.0  ;;  %v1094_v59 = vsel %vm1093_vm15, 1, %v11820_v39  ;;  %v1111_v53 = vmul.u32 58254, %v1107_v6  ;;  %v1112_v60 = vmul.u32 14564, %v1108_v45 }
 0x34f   : > { %v3832_v37 = vpack.c.bf16 %v3787_v11, %v3787_v11  ;;  %v1096_v2 = vadd.s32 %v1094_v59, %v1092_v52  ;;  %v3677_v17 = vadd.f32 %v3630_v8, %v3429_v56  ;;  %v1113_v40 = vmul.u32 58254, %v1108_v45  ;;  %v11906_v56 = vld [vmem:[#allocation18_spill] sm:$0xff] }
 0x350   : > { %v1114_v1 = vshll.u32 %v1111_v53, 16  ;;  %v1115_v32 = vshrl.u32 %v1111_v53, 16  ;;  %v1116_v62 = vshll.u32 %v1112_v60, 16  ;;  %v1117_v22 = vshrl.u32 %v1112_v60, 16  ;;  %v3385_v53 = vpop.f32.mrf.mxu3 }
 0x351   : > { %3868 = vst.msk [vmem:[#allocation2 + $0x7c] sm:$0xf] %vm3796_vm7, %v3832_v37  ;;  %v1097_v55 = vadd.s32 %v1096_v2, %v1086_v46  ;;  %v4268_v61 = vrot.slane %v4266_v10, 3  ;;  %v4570_v25 = vrot.slane %v4263_v57, 3  ;;  %v4571_v21 = vrot.slane %v4266_v10, 4  ;;  %v10262_v37 = vld [vmem:[#allocation2 + $0x3c] sm:$0xff] }
 0x352   : > { %vm1118_vm3 = vc.u32 %v1110_v26, %v1114_v1  ;;  %v1120_v23 = vadd.s32 %v1114_v1, %v1110_v26  ;;  %v5005_v51 = vshrl.u32 %v8040_v20, 16  ;;  %v10233_v3 = vadd.f32 %v10087_v14, %v3677_v17 }
 0x353   : > { %v1098_v8 = vadd.s32 %v1097_v55, %v1088_v15  ;;  %v1119_v42 = vsel %vm1118_vm3, 1, %v11820_v39  ;;  %v10235_v18 = vld [vmem:[#allocation2 + $0x74] sm:$0xff]  ;;  %v10237_v35 = vor.u32 %v4268_v61, %v4265_v16  ;;  %v10239_v57 = vor.u32 %v4571_v21, %v4570_v25 }
 0x354   : > { %v1121_v46 = vadd.s32 %v1119_v42, %v1113_v40  ;;  %vm1122_vm5 = vc.u32 %v1120_v23, %v1116_v62  ;;  %v5007_v5 = vrot.slane %v5005_v51, 3  ;;  %v4039_v10 = vrot.slane %v10235_v18, 3  ;;  %v3139_v62 = vpop.f32.mrf.mxu2  ;;  %v10277_v21 = vpop.f32.mrf.mxu1 }
 0x355   : > { %v1099_v6 = vshrl.u32 %v1098_v8, 4  ;;  %v1123_v45 = vsel %vm1122_vm5, 1, %v11820_v39  ;;  %v4270_v58 = vsel %vm4208_vm4, %v10180_v24, %v10237_v35  ;;  %v4573_v15 = vsel %vm4541_vm6, %v10182_v49, %v10239_v57  ;;  %11907 = vst [vmem:[#allocation10_spill] sm:$0xff] %v10277_v21 }
 0x356   : > { %v1125_v44 = vadd.s32 %v1123_v45, %v1121_v46  ;;  %7498 = vmatmul.msk.bf16.gmra.mxu2 %vm1634_vm1, %v4270_v58  ;;  %v5008_v28 = vshll.u32 %v8040_v20, 16  ;;  %v3182_v52 = vadd.f32 %v3137_v50, %v11906_v56  ;;  %v3752_v11 = vmax.f32 %v10221_v19, 0.0  ;;  %7517 = vmatmul.msk.bf16.gmra.mxu3 %vm1634_vm1, %v4573_v15 }
 0x357   : > { %v1100_v26 = vmul.u32 18, %v1099_v6  ;;  %v4040_v59 = vsel %vm4011_vm2, %v4037_v0, %v4039_v10  ;;  %v10259_v24 = vadd.s32 240, %v8732_v27  ;;  %v4272_v19 = vshrl.u32 %v10262_v37, 16 }
 0x358   : > { %v1126_v60 = vadd.s32 %v1125_v44, %v1115_v32  ;;  %7488 = vmatmul.msk.bf16.gmra.mxu1 %vm1634_vm1, %v4040_v59  ;;  %v5010_v49 = vrot.slane %v5008_v28, 4  ;;  %v3430_v20 = vadd.f32 %v3385_v53, %v3182_v52  ;;  %v10269_v17 = vadd.s32 248, %v8732_v27 }
 0x359   : > { %v1101_v2 = vsub.s32 %v10201_v47, %v1100_v26  ;;  %v1136_v36 = vand.u32 65535, %v10259_v24  ;;  %v1137_v0 = vshrl.u32 %v10259_v24, 16  ;;  %v3753_v40 = vmax.f32 %v10233_v3, 0.0 }
 0x35a   : > { %v1127_v16 = vadd.s32 %v1126_v60, %v1117_v22  ;;  %v10272_v1 = vor.u32 %v5010_v49, %v5007_v5  ;;  %v3678_v32 = vadd.f32 %v3633_v9, %v3430_v20  ;;  %v3635_v22 = vpop.f32.mrf.mxu0  ;;  %v11908_v9 = vld [vmem:[#allocation21_spill] sm:$0xff]  ;;  %v1165_v42 = vand.u32 65535, %v10269_v17  ;;  %v3387_v49 = vpop.f32.mrf.mxu3 }
 0x35b   : > { %vm1335_vm8 = vcmp.ne.s32.totalorder %v1101_v2, 0  ;;  %vm1371_vm9 = vcmp.lt.s32.totalorder %v1101_v2, 0  ;;  %v1443_v50 = vadd.s32 18, %v1101_v2  ;;  %v1139_v55 = vmul.u32 14564, %v1136_v36 }
 0x35c   : > { %vm1407_vm10 = vmand %vm1371_vm9, %vm1335_vm8  ;;  %v1128_v47 = vshrl.u32 %v1127_v16, 4  ;;  %v5012_v61 = vsel %vm4541_vm6, %v10198_v31, %v10272_v1  ;;  %v1140_v25 = vmul.u32 58254, %v1136_v36  ;;  %v1141_v23 = vmul.u32 14564, %v1137_v0 }
 0x35d   : > { %v1479_v51 = vsel %vm1407_vm10, %v1443_v50, %v1101_v2  ;;  %7536 = vmatmul.msk.bf16.gmra.mxu0 %vm1634_vm1, %v5012_v61  ;;  %v3183_v8 = vadd.f32 %v3139_v62, %v11908_v9  ;;  %v10284_v3 = vrot.slane %v4272_v19, 2  ;;  %v1142_v5 = vmul.u32 58254, %v1137_v0 }
 0x35e   : > { %vm1515_vm11 = vcmp.lt.s32.totalorder %v1479_v51, 16  ;;  %v1129_v46 = vmul.u32 18, %v1128_v47  ;;  %v1143_v31 = vshll.u32 %v1140_v25, 16  ;;  %v1144_v45 = vshrl.u32 %v1140_v25, 16  ;;  %v10294_v51 = vpop.f32.mrf.mxu1 }
 0x35f   : > { %v3788_v6 = vsel %vm1515_vm11, %v3752_v11, 0.0  ;;  %v1145_v58 = vshll.u32 %v1141_v23, 16  ;;  %v10287_v44 = vadd.f32 %v10087_v14, %v3678_v32  ;;  %v1166_v26 = vshrl.u32 %v10269_v17, 16 }
 0x360   : > { %v3833_v15 = vpack.c.bf16 %v3788_v6, %v3788_v6  ;;  %v1130_v28 = vsub.s32 %v10208_v13, %v1129_v46  ;;  %vm1147_vm12 = vc.u32 %v1139_v55, %v1143_v31  ;;  %v1149_v56 = vadd.s32 %v1143_v31, %v1139_v55  ;;  %v3142_v6 = vpop.f32.mrf.mxu2 }
 0x361   : > { %v1148_v52 = vsel %vm1147_vm12, 1, %v11820_v39  ;;  %v1168_v59 = vmul.u32 14564, %v1165_v42  ;;  %v1169_v53 = vmul.u32 58254, %v1165_v42  ;;  %v1146_v20 = vshrl.u32 %v1141_v23, 16  ;;  %v8042_v23 = vld [vmem:[#allocation2 + $0x44] sm:$0xff]  }
 0x362   : > { %3869 = vst.msk [vmem:[#allocation2 + $0x80] sm:$0xf] %vm3796_vm7, %v3833_v15  ;;  %vm1336_vm13 = vcmp.ne.s32.totalorder %v1130_v28, 0  ;;  %vm1372_vm14 = vcmp.lt.s32.totalorder %v1130_v28, 0  ;;  %v1444_v11 = vadd.s32 18, %v1130_v28  ;;  %v1150_v60 = vadd.s32 %v1148_v52, %v1142_v5  ;;  %v3638_v9 = vpop.f32.mrf.mxu0 }
 0x363   : > { %vm1408_vm15 = vmand %vm1372_vm14, %vm1336_vm13  ;;  %vm1151_vm3 = vc.u32 %v1149_v56, %v1145_v58  ;;  %v1170_v2 = vmul.u32 14564, %v1166_v26  ;;  %v1172_v13 = vshll.u32 %v1169_v53, 16  ;;  %v1171_v16 = vmul.u32 58254, %v1166_v26 }
 0x364   : > { %v1480_v36 = vsel %vm1408_vm15, %v1444_v11, %v1130_v28  ;;  %v1152_v0 = vsel %vm1151_vm3, 1, %v11820_v39  ;;  %v3431_v32 = vadd.f32 %v3387_v49, %v3183_v8  ;;  %v1173_v50 = vshrl.u32 %v1169_v53, 16 }
 0x365   : > { %vm1516_vm5 = vcmp.lt.s32.totalorder %v1480_v36, 16  ;;  %v1154_v62 = vadd.s32 %v1152_v0, %v1150_v60  ;;  %v1174_v55 = vshll.u32 %v1170_v2, 16  ;;  %vm1176_vm8 = vc.u32 %v1168_v59, %v1172_v13  ;;  %v3390_v0 = vpop.f32.mrf.mxu3 }
 0x366   : > { %v3789_v47 = vsel %vm1516_vm5, %v3753_v40, 0.0  ;;  %v1178_v61 = vadd.s32 %v1172_v13, %v1168_v59  ;;  %v3679_v25 = vadd.f32 %v3635_v22, %v3431_v32  ;;  %v1177_v5 = vsel %vm1176_vm8, 1, %v11820_v39  ;;  %v11909_v13 = vld [vmem:[#allocation19_spill] sm:$0xff] }
 0x367   : > { %v3834_v42 = vpack.c.bf16 %v3789_v47, %v3789_v47  ;;  %v1155_v46 = vadd.s32 %v1154_v62, %v1144_v45  ;;  %v4275_v31 = vshll.u32 %v10262_v37, 16  ;;  %v1175_v8 = vshrl.u32 %v1170_v2, 16 }
 0x368   : > { %v1179_v58 = vadd.s32 %v1177_v5, %v1171_v16  ;;  %vm1180_vm9 = vc.u32 %v1178_v61, %v1174_v55  ;;  %v4574_v40 = vrot.slane %v4272_v19, 3  ;;  %v10305_v26 = vadd.f32 %v10087_v14, %v3679_v25  ;;  %v10344_v5 = vpop.f32.mrf.mxu1 }
 0x369   : > { %3870 = vst.msk [vmem:[#allocation2 + $0x84] sm:$0xf] %vm3796_vm7, %v3834_v42  ;;  %v1156_v22 = vadd.s32 %v1155_v46, %v1146_v20  ;;  %v1181_v15 = vsel %vm1180_vm9, 1, %v11820_v39  ;;  %v10302_v28 = vld [vmem:[#allocation2 + $0x7c] sm:$0xff]  ;;  %v4277_v56 = vrot.slane %v4275_v31, 3  ;;  %v4575_v45 = vrot.slane %v4275_v31, 4 }
 0x36a   : > { %v1183_v52 = vadd.s32 %v1181_v15, %v1179_v58  ;;  %v5014_v59 = vshrl.u32 %v8042_v23, 16  ;;  %v5017_v53 = vshll.u32 %v8042_v23, 16  ;;  %v4041_v60 = vrot.slane %v10302_v28, 3 }
 0x36b   : > { %v1157_v11 = vshrl.u32 %v1156_v22, 4  ;;  %v10309_v37 = vor.u32 %v4277_v56, %v10284_v3  ;;  %v10311_v19 = vor.u32 %v4575_v45, %v4574_v40  ;;  %v3184_v36 = vadd.f32 %v3142_v6, %v11909_v13  ;;  %v3144_v6 = vpop.f32.mrf.mxu2  ;;  %v8084_v22 = vld [vmem:[#allocation2 + $0x44] sm:$0xff] }
 0x36c   : > { %v1184_v49 = vadd.s32 %v1183_v52, %v1173_v50  ;;  %v5016_v20 = vrot.slane %v5014_v59, 3  ;;  %v5019_v2 = vrot.slane %v5017_v53, 4  ;;  %v4042_v32 = vsel %vm4011_vm2, %v4039_v10, %v4041_v60 }
 0x36d   : > { %v1158_v16 = vmul.u32 18, %v1157_v11  ;;  %v4279_v3 = vsel %vm4208_vm4, %v10237_v35, %v10309_v37  ;;  %v4577_v62 = vsel %vm4541_vm6, %v10239_v57, %v10311_v19  ;;  %7489 = vmatmul.msk.bf16.gmra.mxu1 %vm1634_vm1, %v4042_v32  ;;  %v10330_v47 = vadd.s32 256, %v8732_v27 }
 0x36e   : > { %v1185_v50 = vadd.s32 %v1184_v49, %v1175_v8  ;;  %7499 = vmatmul.msk.bf16.gmra.mxu2 %vm1634_vm1, %v4279_v3  ;;  %v10327_v55 = vor.u32 %v5019_v2, %v5016_v20  ;;  %v3432_v18 = vadd.f32 %v3390_v0, %v3184_v36  ;;  %v3754_v61 = vmax.f32 %v10287_v44, 0.0  ;;  %7518 = vmatmul.msk.bf16.gmra.mxu3 %vm1634_vm1, %v4577_v62  ;;  %v3392_v36 = vpop.f32.mrf.mxu3 }
 0x36f   : > { %v1159_v10 = vsub.s32 %v10259_v24, %v1158_v16  ;;  %v3755_v35 = vmax.f32 %v10305_v26, 0.0  ;;  %v10337_v57 = vadd.s32 264, %v8732_v27  ;;  %v1194_v42 = vand.u32 65535, %v10330_v47  ;;  %v3640_v24 = vpop.f32.mrf.mxu0 }
 0x370   : > { %v1186_v25 = vshrl.u32 %v1185_v50, 4  ;;  %v5021_v23 = vsel %vm4541_vm6, %v10272_v1, %v10327_v55  ;;  %v1195_v46 = vshrl.u32 %v10330_v47, 16  ;;  %v3680_v31 = vadd.f32 %v3638_v9, %v3432_v18 }
 0x371   : > { %vm1337_vm10 = vcmp.ne.s32.totalorder %v1159_v10, 0  ;;  %vm1373_vm11 = vcmp.lt.s32.totalorder %v1159_v10, 0  ;;  %v1445_v44 = vadd.s32 18, %v1159_v10  ;;  %7537 = vmatmul.msk.bf16.gmra.mxu0 %vm1634_vm1, %v5021_v23  ;;  %v1198_v58 = vmul.u32 58254, %v1194_v42 }
 0x372   : > { %vm1409_vm12 = vmand %vm1373_vm11, %vm1337_vm10  ;;  %v1187_v8 = vmul.u32 18, %v1186_v25  ;;  %v1199_v40 = vmul.u32 14564, %v1195_v46  ;;  %v4281_v1 = vshrl.u32 %v8084_v22, 16  ;;  %v1197_v56 = vmul.u32 14564, %v1194_v42  ;;  %v10357_v42 = vpop.f32.mrf.mxu1 }
 0x373   : > { %v1481_v15 = vsel %vm1409_vm12, %v1445_v44, %v1159_v10  ;;  %v1200_v45 = vmul.u32 58254, %v1195_v46  ;;  %v4284_v52 = vshll.u32 %v8084_v22, 16  ;;  %v1201_v59 = vshll.u32 %v1198_v58, 16  ;;  %v8044_v44 = vld [vmem:[#allocation2 + $0x4c] sm:$0xff]  }
 0x374   : > { %vm1517_vm13 = vcmp.lt.s32.totalorder %v1481_v15, 16  ;;  %v1188_v26 = vsub.s32 %v10269_v17, %v1187_v8  ;;  %v3185_v53 = vadd.f32 %v3144_v6, %v9948_v34  ;;  %v1202_v49 = vshrl.u32 %v1198_v58, 16 }
 0x375   : > { %v3790_v11 = vsel %vm1517_vm13, %v3754_v61, 0.0  ;;  %v1203_v9 = vshll.u32 %v1199_v40, 16  ;;  %v10350_v20 = vadd.f32 %v10087_v14, %v3680_v31  ;;  %vm1205_vm5 = vc.u32 %v1197_v56, %v1201_v59 }
 0x376   : > { %v3835_v2 = vpack.c.bf16 %v3790_v11, %v3790_v11  ;;  %vm1338_vm14 = vcmp.ne.s32.totalorder %v1188_v26, 0  ;;  %vm1374_vm15 = vcmp.lt.s32.totalorder %v1188_v26, 0  ;;  %v1446_v13 = vadd.s32 18, %v1188_v26 }
 0x377   : > { %vm1410_vm3 = vmand %vm1374_vm15, %vm1338_vm14  ;;  %v1207_v0 = vadd.s32 %v1201_v59, %v1197_v56  ;;  %v1223_v16 = vand.u32 65535, %v10337_v57  ;;  %v1224_v17 = vshrl.u32 %v10337_v57, 16  ;;  %v1204_v32 = vshrl.u32 %v1199_v40, 16  ;;  %v3643_v46 = vpop.f32.mrf.mxu0  ;;  %v3147_v40 = vpop.f32.mrf.mxu2 }
 0x378   : > { %3871 = vst.msk [vmem:[#allocation2 + $0x88] sm:$0xf] %vm3796_vm7, %v3835_v2  ;;  %v1482_v34 = vsel %vm1410_vm3, %v1446_v13, %v1188_v26  ;;  %v1206_v3 = vsel %vm1205_vm5, 1, %v11820_v39  ;;  %v3433_v62 = vadd.f32 %v3392_v36, %v3185_v53  ;;  %v4283_v58 = vrot.slane %v4281_v1, 2 }
 0x379   : > { %vm1518_vm8 = vcmp.lt.s32.totalorder %v1482_v34, 16  ;;  %v1208_v50 = vadd.s32 %v1206_v3, %v1200_v45  ;;  %vm1209_vm9 = vc.u32 %v1207_v0, %v1203_v9  ;;  %v1226_v18 = vmul.u32 14564, %v1223_v16 }
 0x37a   : > { %v3791_v10 = vsel %vm1518_vm8, %v3755_v35, 0.0  ;;  %v1210_v61 = vsel %vm1209_vm9, 1, %v11820_v39  ;;  %v1227_v25 = vmul.u32 58254, %v1223_v16  ;;  %v1228_v23 = vmul.u32 14564, %v1224_v17 }
 0x37b   : > { %v3836_v31 = vpack.c.bf16 %v3791_v10, %v3791_v10  ;;  %v1212_v6 = vadd.s32 %v1210_v61, %v1208_v50  ;;  %v3681_v8 = vadd.f32 %v3640_v24, %v3433_v62  ;;  %v1229_v22 = vmul.u32 58254, %v1224_v17  ;;  %v11910_v10 = vld [vmem:[#allocation3_spill] sm:$0xff] }
 0x37c   : > { %v1230_v15 = vshll.u32 %v1227_v25, 16  ;;  %v1231_v56 = vshrl.u32 %v1227_v25, 16  ;;  %v1232_v45 = vshll.u32 %v1228_v23, 16  ;;  %v1233_v26 = vshrl.u32 %v1228_v23, 16 }
 0x37d   : > { %3872 = vst.msk [vmem:[#allocation2 + $0x8c] sm:$0xf] %vm3796_vm7, %v3836_v31  ;;  %v1213_v35 = vadd.s32 %v1212_v6, %v1202_v49  ;;  %v4286_v59 = vrot.slane %v4284_v52, 3  ;;  %v4578_v53 = vrot.slane %v4281_v1, 3  ;;  %v4579_v9 = vrot.slane %v4284_v52, 4  ;;  %v3395_v1 = vpop.f32.mrf.mxu3 }
 0x37e   : > { %vm1234_vm10 = vc.u32 %v1226_v18, %v1230_v15  ;;  %v1236_v11 = vadd.s32 %v1230_v15, %v1226_v18  ;;  %v5023_v2 = vshrl.u32 %v8044_v44, 16  ;;  %v10362_v24 = vadd.f32 %v10087_v14, %v3681_v8  ;;  %v10391_v8 = vpop.f32.mrf.mxu1 }
 0x37f   : > { %v1214_v13 = vadd.s32 %v1213_v35, %v1204_v32  ;;  %v1235_v36 = vsel %vm1234_vm10, 1, %v11820_v39  ;;  %v10364_v0 = vld [vmem:[#allocation2 + $0x84] sm:$0xff]  ;;  %v10366_v16 = vor.u32 %v4286_v59, %v4283_v58  ;;  %v10368_v49 = vor.u32 %v4579_v9, %v4578_v53  ;;  %v10393_v58 = vpop.f32.mrf.mxu0 }
 0x380   : > { %v1237_v17 = vadd.s32 %v1235_v36, %v1229_v22  ;;  %vm1238_vm11 = vc.u32 %v1236_v11, %v1232_v45  ;;  %v5025_v34 = vrot.slane %v5023_v2, 3  ;;  %v4043_v32 = vrot.slane %v10364_v0, 3  ;;  %v3149_v45 = vpop.f32.mrf.mxu2 }
 0x381   : > { %v1215_v3 = vshrl.u32 %v1214_v13, 4  ;;  %v1239_v52 = vsel %vm1238_vm11, 1, %v11820_v39  ;;  %v4288_v14 = vsel %vm4208_vm4, %v10309_v37, %v10366_v16  ;;  %v4581_v50 = vsel %vm4541_vm6, %v10311_v19, %v10368_v49 }
 0x382   : > { %v1241_v62 = vadd.s32 %v1239_v52, %v1237_v17  ;;  %7500 = vmatmul.msk.bf16.gmra.mxu2 %vm1634_vm1, %v4288_v14  ;;  %v5026_v18 = vshll.u32 %v8044_v44, 16  ;;  %v3186_v61 = vadd.f32 %v3147_v40, %v11910_v10  ;;  %v3756_v23 = vmax.f32 %v10350_v20, 0.0  ;;  %7519 = vmatmul.msk.bf16.gmra.mxu3 %vm1634_vm1, %v4581_v50  ;;  %v10395_v20 = vld [vmem:[#allocation2 + $0x4c] sm:$0xff]  ;;  %v8086_v50 = vld [vmem:[%s11733_s2] ss:$0 sm:$0xff] }
 0x383   : > { %v1216_v25 = vmul.u32 18, %v1215_v3  ;;  %v4044_v31 = vsel %vm4011_vm2, %v4041_v60, %v4043_v32  ;;  %v10388_v37 = vadd.s32 272, %v8732_v27  ;;  %v4290_v40 = vshrl.u32 %v10395_v20, 16 }
 0x384   : > { %v1242_v6 = vadd.s32 %v1241_v62, %v1231_v56  ;;  %7490 = vmatmul.msk.bf16.gmra.mxu1 %vm1634_vm1, %v4044_v31  ;;  %v5028_v19 = vrot.slane %v5026_v18, 4  ;;  %v3434_v44 = vadd.f32 %v3395_v1, %v3186_v61  ;;  %v10402_v56 = vadd.s32 280, %v8732_v27 }
 0x385   : > { %v1217_v60 = vsub.s32 %v10330_v47, %v1216_v25  ;;  %v1252_v22 = vand.u32 65535, %v10388_v37  ;;  %v1253_v15 = vshrl.u32 %v10388_v37, 16  ;;  %v3757_v59 = vmax.f32 %v10362_v24, 0.0  ;;  %v3397_v27 = vpop.f32.mrf.mxu3 }
 0x386   : > { %v1243_v35 = vadd.s32 %v1242_v6, %v1233_v26  ;;  %v10405_v53 = vor.u32 %v5028_v19, %v5025_v34  ;;  %v3682_v11 = vadd.f32 %v3643_v46, %v3434_v44  ;;  %v3187_v24 = vadd.f32 %v3149_v45, %v10046_v33  ;;  %v10426_v25 = vpop.f32.mrf.mxu1 }
 0x387   : > { %vm1339_vm12 = vcmp.ne.s32.totalorder %v1217_v60, 0  ;;  %vm1375_vm13 = vcmp.lt.s32.totalorder %v1217_v60, 0  ;;  %v1447_v9 = vadd.s32 18, %v1217_v60  ;;  %v1255_v2 = vmul.u32 14564, %v1252_v22  ;;  %v10428_v31 = vpop.f32.mrf.mxu0 }
 0x388   : > { %vm1411_vm14 = vmand %vm1375_vm13, %vm1339_vm12  ;;  %v1244_v47 = vshrl.u32 %v1243_v35, 4  ;;  %v5030_v13 = vsel %vm4541_vm6, %v10327_v55, %v10405_v53  ;;  %v1256_v36 = vmul.u32 58254, %v1252_v22  ;;  %v10410_v17 = vmul.u32 14564, %v1253_v15 }
 0x389   : > { %v1483_v26 = vsel %vm1411_vm14, %v1447_v9, %v1217_v60  ;;  %7538 = vmatmul.msk.bf16.gmra.mxu0 %vm1634_vm1, %v5030_v13  ;;  %v1281_v46 = vand.u32 65535, %v10402_v56  ;;  %v10417_v34 = vrot.slane %v4290_v40, 2  ;;  %v1258_v3 = vmul.u32 58254, %v1253_v15  ;;  %v4445_v60 = vpop.f32.mrf.mxu2 }
 0x38a   : > { %vm1519_vm15 = vcmp.lt.s32.totalorder %v1483_v26, 16  ;;  %v1245_v1 = vmul.u32 18, %v1244_v47  ;;  %v1259_v52 = vshll.u32 %v1256_v36, 16  ;;  %v1260_v14 = vshrl.u32 %v1256_v36, 16 }
 0x38b   : > { %v3792_v55 = vsel %vm1519_vm15, %v3756_v23, 0.0  ;;  %v1261_v62 = vshll.u32 %v10410_v17, 16  ;;  %v10423_v18 = vadd.f32 %v8086_v50, %v3682_v11  ;;  %v1282_v6 = vshrl.u32 %v10402_v56, 16 }
 0x38c   : > { %v3837_v33 = vpack.c.bf16 %v3792_v55, %v3792_v55  ;;  %v1246_v10 = vsub.s32 %v10337_v57, %v1245_v1  ;;  %vm1263_vm3 = vc.u32 %v1255_v2, %v1259_v52  ;;  %v1265_v61 = vadd.s32 %v1259_v52, %v1255_v2  ;;  %v8046_v55 = vld [vmem:[#allocation2 + $0x54] sm:$0xff]  }
 0x38d   : > { %v1264_v23 = vsel %vm1263_vm3, 1, %v11820_v39  ;;  %v1284_v19 = vmul.u32 14564, %v1281_v46  ;;  %v1285_v44 = vmul.u32 58254, %v1281_v46  ;;  %v1262_v57 = vshrl.u32 %v10410_v17, 16  ;;  %v4693_v13 = vpop.f32.mrf.mxu3 }
 0x38e   : > { %3873 = vst.msk [vmem:[#allocation2 + $0x90] sm:$0xf] %vm3796_vm7, %v3837_v33  ;;  %vm1340_vm5 = vcmp.ne.s32.totalorder %v1246_v10, 0  ;;  %vm1376_vm8 = vcmp.lt.s32.totalorder %v1246_v10, 0  ;;  %v1448_v22 = vadd.s32 18, %v1246_v10  ;;  %v1266_v15 = vadd.s32 %v1264_v23, %v1258_v3 }
 0x38f   : > { %vm1412_vm9 = vmand %vm1376_vm8, %vm1340_vm5  ;;  %vm1267_vm10 = vc.u32 %v1265_v61, %v1261_v62  ;;  %v1286_v45 = vmul.u32 14564, %v1282_v6  ;;  %v1288_v35 = vshll.u32 %v1285_v44, 16  ;;  %v1287_v2 = vmul.u32 58254, %v1282_v6 }
 0x390   : > { %v1484_v11 = vsel %vm1412_vm9, %v1448_v22, %v1246_v10  ;;  %v1268_v9 = vsel %vm1267_vm10, 1, %v11820_v39  ;;  %v3435_v47 = vadd.f32 %v3397_v27, %v3187_v24  ;;  %v1289_v26 = vshrl.u32 %v1285_v44, 16  ;;  %v10440_v24 = vpop.f32.mrf.mxu1 }
 0x391   : > { %vm1520_vm11 = vcmp.lt.s32.totalorder %v1484_v11, 16  ;;  %v1270_v36 = vadd.s32 %v1268_v9, %v1266_v15  ;;  %v1290_v46 = vshll.u32 %v1286_v45, 16  ;;  %vm1292_vm12 = vc.u32 %v1284_v19, %v1288_v35  ;;  %v4447_v22 = vpop.f32.mrf.mxu2 }
 0x392   : > { %v3793_v1 = vsel %vm1520_vm11, %v3757_v59, 0.0  ;;  %v1294_v52 = vadd.s32 %v1288_v35, %v1284_v19  ;;  %v3683_v3 = vadd.f32 %v10393_v58, %v3435_v47  ;;  %v1293_v33 = vsel %vm1292_vm12, 1, %v11820_v39  ;;  %v10442_v59 = vpop.f32.mrf.mxu0 }
 0x393   : > { %v3838_v17 = vpack.c.bf16 %v3793_v1, %v3793_v1  ;;  %v1271_v62 = vadd.s32 %v1270_v36, %v1260_v14  ;;  %v4293_v10 = vshll.u32 %v10395_v20, 16  ;;  %v1291_v61 = vshrl.u32 %v1286_v45, 16 }
 0x394   : > { %v1295_v23 = vadd.s32 %v1293_v33, %v1287_v2  ;;  %vm1296_vm13 = vc.u32 %v1294_v52, %v1290_v46  ;;  %v4582_v27 = vrot.slane %v4290_v40, 3  ;;  %v10448_v45 = vadd.f32 %v8086_v50, %v3683_v3  ;;  %v8048_v3 = vld [vmem:[#allocation2 + $0x5c] sm:$0xff]  }
 0x395   : > { %3874 = vst.msk [vmem:[#allocation2 + $0x94] sm:$0xf] %vm3796_vm7, %v3838_v17  ;;  %v1272_v58 = vadd.s32 %v1271_v62, %v1262_v57  ;;  %v1297_v6 = vsel %vm1296_vm13, 1, %v11820_v39  ;;  %v10446_v14 = vld [vmem:[#allocation2 + $0x8c] sm:$0xff]  ;;  %v4295_v19 = vrot.slane %v4293_v10, 3  ;;  %v4583_v44 = vrot.slane %v4293_v10, 4  ;;  %v4695_v46 = vpop.f32.mrf.mxu3 }
 0x396   : > { %v1299_v15 = vadd.s32 %v1297_v6, %v1295_v23  ;;  %v5032_v35 = vshrl.u32 %v8046_v55, 16  ;;  %v5035_v20 = vshll.u32 %v8046_v55, 16  ;;  %v4045_v11 = vrot.slane %v10446_v14, 3  ;;  %v8087_v17 = vld [vmem:[#allocation2 + $0x54] sm:$0xff] }
 0x397   : > { %v1273_v40 = vshrl.u32 %v1272_v58, 4  ;;  %v10452_v9 = vor.u32 %v4295_v19, %v10417_v34  ;;  %v10454_v2 = vor.u32 %v4583_v44, %v4582_v27  ;;  %v4446_v36 = vadd.f32 %v4445_v60, %v9950_v48 }
 0x398   : > { %v1300_v57 = vadd.s32 %v1299_v15, %v1289_v26  ;;  %v5034_v39 = vrot.slane %v5032_v35, 3  ;;  %v5037_v47 = vrot.slane %v5035_v20, 4  ;;  %v4046_v50 = vsel %vm4011_vm2, %v4043_v32, %v4045_v11  ;;  %v10481_v10 = vpop.f32.mrf.mxu1 }
 0x399   : > { %v1274_v1 = vmul.u32 18, %v1273_v40  ;;  %v4297_v34 = vsel %vm4208_vm4, %v10366_v16, %v10452_v9  ;;  %v4585_v26 = vsel %vm4541_vm6, %v10368_v49, %v10454_v2  ;;  %7491 = vmatmul.msk.bf16.gmra.mxu1 %vm1634_vm1, %v4046_v50  ;;  %v10472_v60 = vadd.f32 %v4693_v13, %v4446_v36  ;;  %v4450_v27 = vpop.f32.mrf.mxu2  ;;  %v7746_v50 = vld [vmem:[%s11734_s3 + $0x1c] sm:$0xf] }
 0x39a   : > { %v1301_v52 = vadd.s32 %v1300_v57, %v1291_v61  ;;  %7501 = vmatmul.msk.bf16.gmra.mxu2 %vm1634_vm1, %v4297_v34  ;;  %v10470_v48 = vor.u32 %v5037_v47, %v5034_v39  ;;  %v3758_v55 = vmax.f32 %v10423_v18, 0.0  ;;  %7520 = vmatmul.msk.bf16.gmra.mxu3 %vm1634_vm1, %v4585_v26  ;;  %v4448_v16 = vadd.f32 %v4447_v22, %v9972_v54  ;;  %v10483_v13 = vpop.f32.mrf.mxu0  ;;  %v7765_v26 = vld [vmem:[%s11734_s3 + $0x20] sm:$0xf] }
 0x39b   : > { %v1275_v32 = vsub.s32 %v10388_v37, %v1274_v1  ;;  %v4299_v49 = vshrl.u32 %v8087_v17, 16  ;;  %v4302_v23 = vshll.u32 %v8087_v17, 16  ;;  %v7568_v37 = vld [vmem:[%s11734_s3 + $0x14] sm:$0xf]  ;;  %v3759_v58 = vmax.f32 %v10448_v45, 0.0 }
 0x39c   : > { %v1302_v62 = vshrl.u32 %v1301_v52, 4  ;;  %v5039_v33 = vsel %vm4541_vm6, %v10405_v53, %v10470_v48  ;;  %v3913_v61 = vld [vmem:[#allocation2 + $0x94] sm:$0x7]  ;;  %v10489_v18 = vadd.f32 %v4695_v46, %v4448_v16  ;;  %v5041_v19 = vshrl.u32 %v8048_v3, 16  ;;  %v7659_v1 = vld [vmem:[%s11734_s3 + $0x18] sm:$0xf] }
 0x39d   : > { %vm1341_vm14 = vcmp.ne.s32.totalorder %v1275_v32, 0  ;;  %vm1377_vm15 = vcmp.lt.s32.totalorder %v1275_v32, 0  ;;  %v1449_v54 = vadd.s32 18, %v1275_v32  ;;  %7539 = vmatmul.msk.bf16.gmra.mxu0 %vm1634_vm1, %v5039_v33  ;;  %v3991_v6 = vunpack.c.l.b16 %v3913_v61  ;;  %v4698_v39 = vpop.f32.mrf.mxu3 }
 0x39e   : > { %vm1413_vm3 = vmand %vm1377_vm15, %vm1341_vm14  ;;  %v1303_v53 = vmul.u32 18, %v1302_v62  ;;  %v4301_v22 = vrot.slane %v4299_v49, 2  ;;  %v5044_v15 = vshll.u32 %v8048_v3, 16  ;;  %v5861_v35 = vsel %vm1689_vm0, %v7568_v37, 0 }
 0x39f   : > { %v1485_v44 = vsel %vm1413_vm3, %v1449_v54, %v1275_v32  ;;  %v4304_v40 = vrot.slane %v4302_v23, 3  ;;  %v4586_v57 = vrot.slane %v4299_v49, 3  ;;  %5870 = vmatpush.bf16.msra.mxu2 %v5861_v35  ;;  %v10494_v36 = vpack.c.b16 %v3991_v6, %v3991_v6 }
 0x3a0   : > { %vm1521_vm5 = vcmp.lt.s32.totalorder %v1485_v44, 16  ;;  %v1304_v20 = vsub.s32 %v10402_v56, %v1303_v53  ;;  %v4587_v46 = vrot.slane %v4302_v23, 4  ;;  %v4451_v45 = vadd.f32 %v4450_v27, %v10011_v43  ;;  %v10507_v32 = vpop.f32.mrf.mxu1 }
 0x3a1   : > { %v3794_v47 = vsel %vm1521_vm5, %v3758_v55, 0.0  ;;  %v5043_v52 = vrot.slane %v5041_v19, 3  ;;  %v5046_v3 = vrot.slane %v5044_v15, 4  ;;  %v6333_v16 = vsel %vm1689_vm0, %v7659_v1, 0  ;;  %v10516_v61 = vpop.f32.mrf.mxu2 }
 0x3a2   : > { %v3839_v34 = vpack.c.bf16 %v3794_v47, %v3794_v47  ;;  %vm1342_vm8 = vcmp.ne.s32.totalorder %v1304_v20, 0  ;;  %vm1378_vm9 = vcmp.lt.s32.totalorder %v1304_v20, 0  ;;  %v1450_v56 = vadd.s32 18, %v1304_v20  ;;  %v10512_v17 = vpop.f32.mrf.mxu0  ;;  %6342 = vmatpush.bf16.msra.mxu3 %v6333_v16  ;;  %11912 = vst [vmem:[#allocation12_spill] sm:$0xff] %v10516_v61 }
 0x3a3   : > { %vm1414_vm10 = vmand %vm1378_vm9, %vm1342_vm8  ;;  %v10509_v55 = vadd.f32 %v4698_v39, %v4451_v45  ;;  %11911 = vst [vmem:[#allocation11_spill] sm:$0xff] %v10512_v17  ;;  %v6569_v49 = vsel %vm1689_vm0, %v7746_v50, 0  ;;  %v4047_v62 = vrot.slane %v10494_v36, 3  ;;  %v4305_v33 = vor.u32 %v4304_v40, %v4301_v22 }
 0x3a4   : > { %3875 = vst.msk [vmem:[#allocation2 + $0x98] sm:$0xf] %vm3796_vm7, %v3839_v34  ;;  %v1486_v43 = vsel %vm1414_vm10, %v1450_v56, %v1304_v20  ;;  %6578 = vmatpush.bf16.msra.mxu0 %v6569_v49  ;;  %v6853_v23 = vsel %vm1689_vm0, %v7765_v26, 0  ;;  %v4588_v54 = vor.u32 %v4587_v46, %v4586_v57  ;;  %v5047_v53 = vor.u32 %v5046_v3, %v5043_v52  ;;  %v10542_v26 = vld [vmem:[#allocation2 + $0x20] sm:$0xff]  ;;  %v7934_v52 = vld [vmem:[#allocation2 + $0x18] sm:$0xe] }
 0x3a5   : > { %vm1522_vm11 = vcmp.lt.s32.totalorder %v1486_v43, 16  ;;  %6862 = vmatpush.bf16.msra.mxu1 %v6853_v23  ;;  %v10519_v6 = vpop.f32.mrf.mxu3  ;;  %v4048_v19 = vsel %vm4011_vm2, %v4045_v11, %v4047_v62  ;;  %v4306_v44 = vsel %vm4208_vm4, %v10452_v9, %v4305_v33  ;;  %v8050_v11 = vld [vmem:[#allocation2 + $0x64] sm:$0xff]   ;;  %v8088_v9 = vld [vmem:[#allocation2 + $0x5c] sm:$0xff]  ;;  %vm6712_vm0 = vsmask.f32 6400 }
 0x3a6   : > { %v3795_v37 = vsel %vm1522_vm11, %v3759_v58, 0.0  ;;  %11913 = vst [vmem:[#allocation13_spill] sm:$0xff] %v10519_v6  ;;  %v4589_v58 = vsel %vm4541_vm6, %v10454_v2, %v4588_v54  ;;  %v5048_v22 = vsel %vm4541_vm6, %v10470_v48, %v5047_v53  ;;  %v4308_v20 = vshrl.u32 %v8088_v9, 16  ;;  %v7933_v48 = vld [vmem:[#allocation2 + $0x18] sm:$0xf0] }
 0x3a7   : > { %v3840_v27 = vpack.c.bf16 %v3795_v37, %v3795_v37  ;;  %v4311_v40 = vshll.u32 %v8088_v9, 16  ;;  %v5050_v47 = vshrl.u32 %v8050_v11, 16  ;;  %v5053_v2 = vshll.u32 %v8050_v11, 16  ;;  %v7914_v9 = vld [vmem:[#allocation2 + $0x10] sm:$0xff]  }
 0x3a8   : > { %v10534_v15 = vpop.f32.mrf.mxu1  ;;  %v4310_v45 = vrot.slane %v4308_v20, 2  ;;  %v4590_v34 = vrot.slane %v4308_v20, 3  ;;  %vm6476_vm2 = vcmask 1046528  }
 0x3a9   : > { %3876 = vst.msk [vmem:[#allocation2 + $0x9c] sm:$0xf] %vm3796_vm7, %v3840_v27  ;;  %7492 = vmatmul.msk.bf16.gmra.mxu1 %vm1634_vm1, %v4048_v19  ;;  %v4455_v57 = vpop.f32.mrf.mxu2  ;;  %v4313_v1 = vrot.slane %v4311_v40, 3  ;;  %v4591_v56 = vrot.slane %v4311_v40, 4  ;;  %v5052_v3 = vrot.slane %v5050_v47, 3  ;;  %v5055_v43 = vrot.slane %v5053_v2, 4 }
 0x3aa   : > { %7502 = vmatmul.msk.bf16.gmra.mxu2 %vm1634_vm1, %v4306_v44  ;;  %7521 = vmatmul.msk.bf16.gmra.mxu3 %vm1634_vm1, %v4589_v58  ;;  %v10536_v35 = vpop.f32.mrf.mxu0  ;;  %v4456_v39 = vadd.f32 %v4455_v57, %v10060_v4  ;;  %v10548_v4 = vor.u32 %v7934_v52, %v7933_v48  ;;  %v11740_v27 = vshrl.u32 %v10542_v26, 16  ;;  %v11741_v58 = vshll.u32 %v10542_v26, 16  ;;  %v10561_v40 = vld [vmem:[#allocation2 + $0x28] sm:$0xff] }
 0x3ab   : > { %v4314_v62 = vor.u32 %v4313_v1, %v4310_v45  ;;  %v4592_v37 = vor.u32 %v4591_v56, %v4590_v34  ;;  %v10553_v19 = vor.u32 %v5055_v43, %v5052_v3  ;;  %v8052_v45 = vld [vmem:[#allocation2 + $0x6c] sm:$0xff]   ;;  %v11742_v1 = vshrl.u32 %v10561_v40, 16  ;;  %v8089_v34 = vld [vmem:[#allocation2 + $0x64] sm:$0xff] }
 0x3ac   : > { %v6717_v11 = vshll.u32 %v10548_v4, 16  ;;  %v4317_v56 = vshrl.u32 %v8089_v34, 16  ;;  %v4320_v52 = vshll.u32 %v8089_v34, 16  ;;  %v11743_v43 = vshll.u32 %v10561_v40, 16 }
 0x3ad   : > { %7540 = vmatmul.msk.bf16.gmra.mxu0 %vm1634_vm1, %v5048_v22  ;;  %v4703_v46 = vpop.f32.mrf.mxu3  ;;  %v6714_v22 = vshrl.u32 %v10548_v4, 16  ;;  %v4315_v20 = vsel %vm4208_vm4, %v4305_v33, %v4314_v62  ;;  %v4593_v57 = vsel %vm4541_vm6, %v4588_v54, %v4592_v37  ;;  %v5057_v2 = vsel %vm4541_vm6, %v5047_v53, %v10553_v19 }
 0x3ae   : > { %v10540_v50 = vadd.f32 %v4703_v46, %v4456_v39  ;;  %v6721_v39 = vrot.slane %v11740_v27, 1  ;;  %v6719_v48 = vrot.slane %v6717_v11, 2  ;;  %v6722_v54 = vrot.slane %v11741_v58, 2 }
 0x3af   : > { %v6716_v47 = vrot.slane %v6714_v22, 1  ;;  %v4319_v58 = vrot.slane %v4317_v56, 2  ;;  %v4322_v21 = vrot.slane %v4320_v52, 3  ;;  %v6726_v29 = vrot.slane %v11743_v43, 2  ;;  %v10601_v43 = vld [vmem:[#allocation2 + $0x18] sm:$0xff]  }
 0x3b0   : > { %v10544_v16 = vpop.f32.mrf.mxu1  ;;  %v4594_v63 = vrot.slane %v4317_v56, 3  ;;  %v10604_v56 = vld [vmem:[#allocation2 + $0x30] sm:$0xff]  ;;  %vm5657_vm7 = vsmask.f32 7424 }
 0x3b1   : > { %v10550_v23 = vpop.f32.mrf.mxu2  ;;  %v6720_v22 = vor.u32 %v6719_v48, %v6716_v47 }
 0x3b2   : > { %v10546_v49 = vpop.f32.mrf.mxu0  ;;  %11915 = vst [vmem:[#allocation22_spill] sm:$0xff] %v10550_v23 }
 0x3b3   : > { %11914 = vst [vmem:[#allocation14_spill] sm:$0xff] %v10546_v49 }
 0x3b5   : > { %v10555_v44 = vpop.f32.mrf.mxu3 }
 0x3b6   : > { %11916 = vst [vmem:[#allocation15_spill] sm:$0xff] %v10555_v44 }
 0x3b8   : > { %v10571_v46 = vpop.f32.mrf.mxu1 }
 0x3b9   : > { %7550 = vmatmul.msk.bf16.vlgmr.msrb.gmra.mxu1 %vm1634_vm1, %v7914_v9  ;;  %v4460_v3 = vpop.f32.mrf.mxu2  ;;  %v6723_v9 = vor.u32 %v6722_v54, %v6721_v39 }
 0x3ba   : > { %7503 = vmatmul.msk.bf16.gmra.mxu2 %vm1634_vm1, %v4315_v20  ;;  %7522 = vmatmul.msk.bf16.gmra.mxu3 %vm1634_vm1, %v4593_v57  ;;  %v10573_v33 = vpop.f32.mrf.mxu0  ;;  %v4461_v53 = vadd.f32 %v4460_v3, %v10115_v12  ;;  %v5059_v20 = vshrl.u32 %v8052_v45, 16  ;;  %v5062_v57 = vshll.u32 %v8052_v45, 16  ;;  %v4595_v12 = vrot.slane %v4320_v52, 4 }
 0x3bb   : > { %v10582_v11 = vsel %vm6712_vm0, %v6720_v22, %v6723_v9  ;;  %v4323_v3 = vor.u32 %v4322_v21, %v4319_v58  ;;  %v11744_v58 = vshrl.u32 %v10604_v56, 16 }
 0x3bc   : > { %11917 = vst [vmem:[#allocation20_spill] sm:$0xff] %v10582_v11  ;;  %v5061_v39 = vrot.slane %v5059_v20, 3  ;;  %v5064_v48 = vrot.slane %v5062_v57, 4  ;;  %v8054_v20 = vld [vmem:[#allocation2 + $0x74] sm:$0xff]   ;;  %v8090_v57 = vld [vmem:[#allocation2 + $0x6c] sm:$0xff] }
 0x3bd   : > { %7541 = vmatmul.msk.bf16.gmra.mxu0 %vm1634_vm1, %v5057_v2  ;;  %v4708_v27 = vpop.f32.mrf.mxu3  ;;  %v6725_v2 = vrot.slane %v11742_v1, 1  ;;  %v4596_v1 = vor.u32 %v4595_v12, %v4594_v63  ;;  %v11745_v63 = vshll.u32 %v10604_v56, 16  ;;  %v4329_v12 = vshll.u32 %v8090_v57, 16 }
 0x3be   : > { %v10586_v34 = vadd.f32 %v4708_v27, %v4461_v53  ;;  %v5065_v27 = vor.u32 %v5064_v48, %v5061_v39  ;;  %v6729_v48 = vrot.slane %v11744_v58, 1 }
 0x3bf   : > { %v6727_v47 = vor.u32 %v6726_v29, %v6725_v2  ;;  %v4324_v29 = vsel %vm4208_vm4, %v4314_v62, %v4323_v3  ;;  %v4597_v21 = vsel %vm4541_vm6, %v4592_v37, %v4596_v1  ;;  %v4326_v2 = vshrl.u32 %v8090_v57, 16 }
 0x3c0   : > { %v10590_v45 = vpop.f32.mrf.mxu1  ;;  %v5066_v52 = vsel %vm4541_vm6, %v10553_v19, %v5065_v27  ;;  %v5068_v19 = vshrl.u32 %v8054_v20, 16  ;;  %v4599_v11 = vrot.slane %v4329_v12, 4 }
 0x3c1   : > { %v10594_v22 = vpop.f32.mrf.mxu2  ;;  %v10597_v49 = vsel %vm6712_vm0, %v6723_v9, %v6727_v47 }
 0x3c2   : > { %v10592_v54 = vpop.f32.mrf.mxu0  ;;  %11919 = vst [vmem:[#allocation5_spill] sm:$0xff] %v10594_v22  ;;  %v4331_v22 = vrot.slane %v4329_v12, 3  ;;  %v10639_v12 = vld [vmem:[#allocation2 + $0x38] sm:$0xff] }
 0x3c3   : > { %11918 = vst [vmem:[#allocation16_spill] sm:$0xff] %v10592_v54 }
 0x3c4   : > { %11920 = vst [vmem:[#allocation17_spill] sm:$0xff] %v10597_v49  ;;  %v4328_v49 = vrot.slane %v4326_v2, 2 }
 0x3c5   : > { %v10599_v53 = vpop.f32.mrf.mxu3 }
 0x3c6   : > { %11921 = vst [vmem:[#allocation4_spill] sm:$0xff] %v10599_v53 }
 0x3c8   : > { %v10615_v9 = vpop.f32.mrf.mxu1 }
 0x3c9   : > { %7551 = vmatmul.msk.bf16.gmra.mxu1 %vm1634_vm1, %v10601_v43  ;;  %v4465_v37 = vpop.f32.mrf.mxu2 }
 0x3ca   : > { %7504 = vmatmul.msk.bf16.gmra.mxu2 %vm1634_vm1, %v4324_v29  ;;  %7523 = vmatmul.msk.bf16.gmra.mxu3 %vm1634_vm1, %v4597_v21  ;;  %v10617_v62 = vpop.f32.mrf.mxu0  ;;  %v4466_v39 = vadd.f32 %v4465_v37, %v10176_v38  ;;  %v6730_v29 = vrot.slane %v11745_v63, 2  ;;  %v5071_v21 = vshll.u32 %v8054_v20, 16  ;;  %v5070_v38 = vrot.slane %v5068_v19, 3  ;;  %v8056_v19 = vld [vmem:[#allocation2 + $0x7c] sm:$0xff]  }
 0x3cb   : > { %v4332_v63 = vor.u32 %v4331_v22, %v4328_v49  ;;  %v11747_v49 = vshll.u32 %v10639_v12, 16 }
 0x3cc   : > { %v6731_v53 = vor.u32 %v6730_v29, %v6729_v48  ;;  %v5073_v37 = vrot.slane %v5071_v21, 4 }
 0x3cd   : > { %7542 = vmatmul.msk.bf16.gmra.mxu0 %vm1634_vm1, %v5066_v52  ;;  %v4713_v54 = vpop.f32.mrf.mxu3  ;;  %v4598_v52 = vrot.slane %v4326_v2, 3  ;;  %v4333_v2 = vsel %vm4208_vm4, %v4323_v3, %v4332_v63  ;;  %v8091_v3 = vld [vmem:[#allocation2 + $0x74] sm:$0xff] }
 0x3ce   : > { %v10625_v44 = vadd.f32 %v4713_v54, %v4466_v39  ;;  %v10628_v57 = vsel %vm6712_vm0, %v6727_v47, %v6731_v53  ;;  %v5074_v48 = vor.u32 %v5073_v37, %v5070_v38  ;;  %v7916_v54 = vld [vmem:[#allocation2 + $0x20] sm:$0xff]   ;;  %v4335_v21 = vshrl.u32 %v8091_v3, 16 }
 0x3cf   : > { %11922 = vst [vmem:[#allocation18_spill] sm:$0xff] %v10628_v57  ;;  %v4600_v20 = vor.u32 %v4599_v11, %v4598_v52  ;;  %v11746_v11 = vshrl.u32 %v10639_v12, 16  ;;  %v4338_v52 = vshll.u32 %v8091_v3, 16 }
 0x3d0   : > { %v10630_v23 = vpop.f32.mrf.mxu1  ;;  %v5075_v22 = vsel %vm4541_vm6, %v5065_v27, %v5074_v48  ;;  %v5077_v27 = vshrl.u32 %v8056_v19, 16  ;;  %v4337_v57 = vrot.slane %v4335_v21, 2  ;;  %v4602_v3 = vrot.slane %v4335_v21, 3 }
 0x3d1   : > { %v10634_v41 = vpop.f32.mrf.mxu2  ;;  %v4601_v47 = vsel %vm4541_vm6, %v4596_v1, %v4600_v20  ;;  %v4603_v17 = vrot.slane %v4338_v52, 4 }
 0x3d2   : > { %v10632_v58 = vpop.f32.mrf.mxu0  ;;  %11924 = vst [vmem:[#allocation19_spill] sm:$0xff] %v10634_v41 }
 0x3d3   : > { %11923 = vst [vmem:[#allocation21_spill] sm:$0xff] %v10632_v58  ;;  %v4604_v30 = vor.u32 %v4603_v17, %v4602_v3 }
 0x3d5   : > { %v10636_v29 = vpop.f32.mrf.mxu3 }
 0x3d6   : > { %11925 = vst [vmem:[#allocation3_spill] sm:$0xff] %v10636_v29 }
 0x3d8   : > { %v10648_v39 = vpop.f32.mrf.mxu1 }
 0x3d9   : > { %7552 = vmatmul.msk.bf16.gmra.mxu1 %vm1634_vm1, %v7916_v54  ;;  %v4470_v38 = vpop.f32.mrf.mxu2  ;;  %v6733_v54 = vrot.slane %v11746_v11, 1 }
 0x3da   : > { %7505 = vmatmul.msk.bf16.gmra.mxu2 %vm1634_vm1, %v4333_v2  ;;  %7524 = vmatmul.msk.bf16.gmra.mxu3 %vm1634_vm1, %v4601_v47  ;;  %v10651_v37 = vpop.f32.mrf.mxu0  ;;  %v4471_v1 = vadd.f32 %v4470_v38, %v10229_v7  ;;  %v6734_v2 = vrot.slane %v11747_v49, 2  ;;  %v5080_v47 = vshll.u32 %v8056_v19, 16  ;;  %v5079_v7 = vrot.slane %v5077_v27, 3 }
 0x3db   : > { %11926 = vst [vmem:[#allocation23_spill] sm:$0xff] %v10651_v37  ;;  %v4347_v27 = vshll.u32 %v10302_v28, 16 }
 0x3dc   : > { %v6735_v29 = vor.u32 %v6734_v2, %v6733_v54  ;;  %v5082_v38 = vrot.slane %v5080_v47, 4  ;;  %v8058_v2 = vld [vmem:[#allocation2 + $0x84] sm:$0xff]  }
 0x3dd   : > { %7543 = vmatmul.msk.bf16.gmra.mxu0 %vm1634_vm1, %v5075_v22  ;;  %v4718_v58 = vpop.f32.mrf.mxu3  ;;  %v4340_v22 = vrot.slane %v4338_v52, 3  ;;  %v10672_v52 = vld [vmem:[#allocation2 + $0x40] sm:$0xff]  ;;  %v5086_v3 = vshrl.u32 %v8058_v2, 16 }
 0x3de   : > { %v10658_v41 = vadd.f32 %v4718_v58, %v4471_v1  ;;  %v10661_v6 = vsel %vm6712_vm0, %v6731_v53, %v6735_v29  ;;  %v5083_v19 = vor.u32 %v5082_v38, %v5079_v7  ;;  %v7917_v58 = vld [vmem:[#allocation2 + $0x28] sm:$0xff]   ;;  %11932 = vst [vmem:[#allocation29_spill] sm:$0xff] %v10672_v52  ;;  %v4605_v53 = vsel %vm4541_vm6, %v4600_v20, %v4604_v30 }
 0x3df   : > { %11928 = vst [vmem:[#allocation25_spill] sm:$0xff] %v10661_v6  ;;  %v4341_v61 = vor.u32 %v4340_v22, %v4337_v57  ;;  %v11749_v17 = vshll.u32 %v10672_v52, 16  ;;  %v11748_v57 = vshrl.u32 %v10672_v52, 16  ;;  %v5089_v7 = vshll.u32 %v8058_v2, 16 }
 0x3e0   : > { %11927 = vst [vmem:[#allocation24_spill] sm:$0xff] %v10658_v41  ;;  %v10663_v11 = vpop.f32.mrf.mxu1  ;;  %v5084_v1 = vsel %vm4541_vm6, %v5074_v48, %v5083_v19  ;;  %v4349_v48 = vrot.slane %v4347_v27, 3  ;;  %v5088_v6 = vrot.slane %v5086_v3, 3 }
 0x3e1   : > { %v10665_v49 = vpop.f32.mrf.mxu2  ;;  %v4342_v21 = vsel %vm4208_vm4, %v4332_v63, %v4341_v61  ;;  %v4344_v63 = vshrl.u32 %v10302_v28, 16  ;;  %v6737_v47 = vrot.slane %v11748_v57, 1  ;;  %v6738_v20 = vrot.slane %v11749_v17, 2 }
 0x3e2   : > { %11929 = vst [vmem:[#allocation26_spill] sm:$0xff] %v10665_v49  ;;  %v10667_v37 = vpop.f32.mrf.mxu0  ;;  %v5091_v17 = vrot.slane %v5089_v7, 4 }
 0x3e3   : > { %11930 = vst [vmem:[#allocation27_spill] sm:$0xff] %v10667_v37  ;;  %v6739_v38 = vor.u32 %v6738_v20, %v6737_v47  ;;  %v4607_v37 = vrot.slane %v4347_v27, 4  ;;  %v7918_v20 = vld [vmem:[#allocation2 + $0x30] sm:$0xff]   ;;  %v10705_v27 = vld [vmem:[#allocation2 + $0x48] sm:$0xff] }
 0x3e4   : > { %v5092_v47 = vor.u32 %v5091_v17, %v5088_v6  ;;  %v8060_v17 = vld [vmem:[#allocation2 + $0x8c] sm:$0xff]   ;;  %v11753_v3 = vshll.u32 %v10705_v27, 16 }
 0x3e5   : > { %v10669_v54 = vpop.f32.mrf.mxu3  ;;  %v10694_v57 = vsel %vm6712_vm0, %v6735_v29, %v6739_v38  ;;  %v5095_v7 = vshrl.u32 %v8060_v17, 16 }
 0x3e6   : > { %11931 = vst [vmem:[#allocation28_spill] sm:$0xff] %v10669_v54  ;;  %v5093_v6 = vsel %vm4541_vm6, %v5083_v19, %v5092_v47 }
 0x3e7   : > { %11935 = vst [vmem:[#allocation32_spill] sm:$0xff] %v10694_v57 }
 0x3e9   : > { %7553 = vmatmul.msk.bf16.gmra.mxu1 %vm1634_vm1, %v7917_v58  ;;  %v4346_v58 = vrot.slane %v4344_v63, 2 }
 0x3ea   : > { %7506 = vmatmul.msk.bf16.gmra.mxu2 %vm1634_vm1, %v4342_v21  ;;  %7525 = vmatmul.msk.bf16.gmra.mxu3 %vm1634_vm1, %v4605_v53  ;;  %v10688_v22 = vpop.f32.mrf.mxu1 }
 0x3eb   : > { %11933 = vst [vmem:[#allocation30_spill] sm:$0xff] %v10688_v22  ;;  %v4350_v41 = vor.u32 %v4349_v48, %v4346_v58  ;;  %v5098_v58 = vshll.u32 %v8060_v17, 16 }
 0x3ed   : > { %7544 = vmatmul.msk.bf16.gmra.mxu0 %vm1634_vm1, %v5084_v1  ;;  %v4606_v1 = vrot.slane %v4344_v63, 3  ;;  %v4351_v22 = vsel %vm4208_vm4, %v4341_v61, %v4350_v41 }
 0x3ee   : > { %v10690_v53 = vpop.f32.mrf.mxu0 }
 0x3ef   : > { %11934 = vst [vmem:[#allocation31_spill] sm:$0xff] %v10690_v53  ;;  %v4608_v2 = vor.u32 %v4607_v37, %v4606_v1  ;;  %v7919_v53 = vld [vmem:[#allocation2 + $0x38] sm:$0xff]  }
 0x3f1   : > { %v4475_v21 = vpop.f32.mrf.mxu2  ;;  %v4723_v54 = vpop.f32.mrf.mxu3 }
 0x3f2   : > { %v4476_v28 = vadd.f32 %v4475_v21, %v10294_v51  ;;  %v10699_v52 = vpop.f32.mrf.mxu1  ;;  %v4609_v51 = vsel %vm4541_vm6, %v4604_v30, %v4608_v2  ;;  %v4356_v30 = vshll.u32 %v10364_v0, 16 }
 0x3f4   : > { %v10696_v49 = vadd.f32 %v4723_v54, %v4476_v28  ;;  %v4358_v21 = vrot.slane %v4356_v30, 3  ;;  %v4611_v1 = vrot.slane %v4356_v30, 4 }
 0x3f6   : > { %v10709_v54 = vpop.f32.mrf.mxu0 }
 0x3f7   : > { %11936 = vst [vmem:[#allocation33_spill] sm:$0xff] %v10709_v54 }
 0x3f9   : > { %v4477_v63 = vpop.f32.mrf.mxu2  ;;  %7554 = vmatmul.msk.bf16.gmra.mxu1 %vm1634_vm1, %v7918_v20  ;;  %v4725_v37 = vpop.f32.mrf.mxu3 }
 0x3fa   : > { %7507 = vmatmul.msk.bf16.gmra.mxu2 %vm1634_vm1, %v4351_v22  ;;  %v4478_v29 = vadd.f32 %v4477_v63, %v10344_v5  ;;  %7526 = vmatmul.msk.bf16.gmra.mxu3 %vm1634_vm1, %v4609_v51  ;;  %v4353_v22 = vshrl.u32 %v10364_v0, 16  ;;  %v11752_v5 = vshrl.u32 %v10705_v27, 16  ;;  %v6742_v63 = vrot.slane %v11753_v3, 2 }
 0x3fb   : > { %v5097_v51 = vrot.slane %v5095_v7, 3  ;;  %v5100_v0 = vrot.slane %v5098_v58, 4  ;;  %v10733_v7 = vld [vmem:[#allocation2 + $0x50] sm:$0xff] }
 0x3fc   : > { %v10711_v61 = vadd.f32 %v4725_v37, %v4478_v29  ;;  %v4355_v48 = vrot.slane %v4353_v22, 2  ;;  %v4610_v19 = vrot.slane %v4353_v22, 3  ;;  %v6741_v28 = vrot.slane %v11752_v5, 1 }
 0x3fd   : > { %7545 = vmatmul.msk.bf16.gmra.mxu0 %vm1634_vm1, %v5093_v6  ;;  %v5101_v5 = vor.u32 %v5100_v0, %v5097_v51 }
 0x3fe   : > { %11937 = vst [vmem:[#allocation34_spill] sm:$0xff] %v10711_v61  ;;  %v4359_v29 = vor.u32 %v4358_v21, %v4355_v48  ;;  %v6743_v6 = vor.u32 %v6742_v63, %v6741_v28  ;;  %v4612_v17 = vor.u32 %v4611_v1, %v4610_v19  ;;  %v8061_v48 = vld [vmem:[#allocation2 + $0x94] sm:$0xff]  }
 0x3ff   : > { %v5104_v51 = vshrl.u32 %v8061_v48, 16  ;;  %v5107_v0 = vshll.u32 %v8061_v48, 16 }
 0x400   : > { %v10728_v30 = vsel %vm6712_vm0, %v6739_v38, %v6743_v6  ;;  %v4360_v3 = vsel %vm4208_vm4, %v4350_v41, %v4359_v29  ;;  %v4613_v58 = vsel %vm4541_vm6, %v4608_v2, %v4612_v17  ;;  %v11754_v38 = vshrl.u32 %v10733_v7, 16 }
 0x401   : > { %v10720_v20 = vpop.f32.mrf.mxu1  ;;  %11939 = vst [vmem:[#allocation36_spill] sm:$0xff] %v10728_v30 }
 0x402   : > { %v6745_v2 = vrot.slane %v11754_v38, 1  ;;  %v4535_v38 = vld [vmem:[#allocation2 + $0x94] sm:$0xf] }
 0x405   : > { %v4480_v37 = vpop.f32.mrf.mxu2  ;;  %v4728_v22 = vpop.f32.mrf.mxu3 }
 0x406   : > { %v10724_v57 = vpop.f32.mrf.mxu0  ;;  %v4481_v54 = vadd.f32 %v4480_v37, %v10357_v42  ;;  %v11755_v42 = vshll.u32 %v10733_v7, 16 }
 0x407   : > { %11938 = vst [vmem:[#allocation35_spill] sm:$0xff] %v10724_v57 }
 0x408   : > { %v10730_v61 = vadd.f32 %v4728_v22, %v4481_v54  ;;  %v5102_v54 = vsel %vm4541_vm6, %v5092_v47, %v5101_v5  ;;  %v6746_v1 = vrot.slane %v11755_v42, 2  ;;  %v10759_v42 = vld [vmem:[#allocation2 + $0x98] sm:$0xff]  }
 0x409   : > { %7555 = vmatmul.msk.bf16.gmra.mxu1 %vm1634_vm1, %v7919_v53  ;;  %v10743_v41 = vpop.f32.mrf.mxu1  ;;  %v4362_v53 = vshrl.u32 %v10446_v14, 16  ;;  %11944 = vst [vmem:[#allocation41_spill] sm:$0xff] %v10759_v42  ;;  %v7909_v48 = vunpack.c.h.b16 %v10759_v42 }
 0x40a   : > { %11940 = vst [vmem:[#allocation37_spill] sm:$0xff] %v10730_v61  ;;  %7508 = vmatmul.msk.bf16.gmra.mxu2 %vm1634_vm1, %v4360_v3  ;;  %7527 = vmatmul.msk.bf16.gmra.mxu3 %vm1634_vm1, %v4613_v58  ;;  %v4365_v3 = vshll.u32 %v10446_v14, 16  ;;  %v6747_v37 = vor.u32 %v6746_v1, %v6745_v2  ;;  %v7920_v2 = vld [vmem:[#allocation2 + $0x40] sm:$0xff]  }
 0x40b   : > { %v4364_v22 = vrot.slane %v4362_v53, 2 }
 0x40c   : > { %v4367_v58 = vrot.slane %v4365_v3, 3  ;;  %v4615_v14 = vrot.slane %v4365_v3, 4  ;;  %v10757_v30 = vsel %vm6712_vm0, %v6743_v6, %v6747_v37  ;;  %v10765_v3 = vld [vmem:[#allocation2 + $0x58] sm:$0xff] }
 0x40d   : > { %7546 = vmatmul.msk.bf16.gmra.mxu0 %vm1634_vm1, %v5102_v54  ;;  %v4482_v21 = vpop.f32.mrf.mxu2  ;;  %v4730_v28 = vpop.f32.mrf.mxu3  ;;  %v4614_v54 = vrot.slane %v4362_v53, 3  ;;  %11943 = vst [vmem:[#allocation40_spill] sm:$0xff] %v10757_v30 }
 0x40e   : > { %v4483_v19 = vadd.f32 %v4482_v21, %v10391_v8  ;;  %v10752_v47 = vpop.f32.mrf.mxu0  ;;  %v5106_v8 = vrot.slane %v5104_v51, 3  ;;  %v5109_v21 = vrot.slane %v5107_v0, 4  ;;  %v4368_v57 = vor.u32 %v4367_v58, %v4364_v22  ;;  %11945 = vst [vmem:[#allocation42_spill] sm:$0xff] %v10765_v3 }
 0x40f   : > { %11941 = vst [vmem:[#allocation38_spill] sm:$0xff] %v10752_v47  ;;  %v4616_v61 = vor.u32 %v4615_v14, %v4614_v54  ;;  %v4539_v47 = vunpack.c.l.b16 %v4535_v38  ;;  %v11760_v38 = vshll.u32 %v10765_v3, 16  ;;  %v11757_v0 = vshrl.u32 %v10765_v3, 16 }
 0x410   : > { %v10754_v63 = vadd.f32 %v4730_v28, %v4483_v19  ;;  %v5110_v28 = vor.u32 %v5109_v21, %v5106_v8  ;;  %v4369_v53 = vsel %vm4208_vm4, %v4359_v29, %v4368_v57  ;;  %v4950_v29 = vpack.c.b16 %v7909_v48, %v7909_v48 }
 0x411   : > { %v4617_v1 = vsel %vm4541_vm6, %v4612_v17, %v4616_v61  ;;  %v4540_v51 = vpack.c.b16 %v4539_v47, %v4539_v47  ;;  %v4371_v54 = vshrl.u32 %v10494_v36, 16  ;;  %v4374_v14 = vshll.u32 %v10494_v36, 16 }
 0x412   : > { %11942 = vst [vmem:[#allocation39_spill] sm:$0xff] %v10754_v63  ;;  %v5111_v22 = vsel %vm4541_vm6, %v5101_v5, %v5110_v28  ;;  %v6749_v17 = vrot.slane %v11757_v0, 1 }
 0x413   : > { %v4619_v21 = vshrl.u32 %v4540_v51, 16  ;;  %v4373_v42 = vrot.slane %v4371_v54, 2  ;;  %v4376_v36 = vrot.slane %v4374_v14, 3  ;;  %v7921_v14 = vld [vmem:[#allocation2 + $0x48] sm:$0xff]  }
 0x415   : > { %v4621_v0 = vrot.slane %v4619_v21, 3  ;;  %v10799_v21 = vld [vmem:[#allocation2 + $0x60] sm:$0xff] }
 0x416   : > { %v10761_v19 = vpop.f32.mrf.mxu1 }
 0x419   : > { %7556 = vmatmul.msk.bf16.gmra.mxu1 %vm1634_vm1, %v7920_v2  ;;  %v4622_v2 = vshll.u32 %v4540_v51, 16 }
 0x41a   : > { %v10767_v6 = vpop.f32.mrf.mxu0  ;;  %7509 = vmatmul.msk.bf16.gmra.mxu2 %vm1634_vm1, %v4369_v53  ;;  %7528 = vmatmul.msk.bf16.gmra.mxu3 %vm1634_vm1, %v4617_v1  ;;  %v6750_v53 = vrot.slane %v11760_v38, 2  ;;  %v5113_v1 = vshrl.u32 %v4950_v29, 16  ;;  %v4377_v38 = vor.u32 %v4376_v36, %v4373_v42 }
 0x41b   : > { %11946 = vst [vmem:[#allocation43_spill] sm:$0xff] %v10767_v6  ;;  %v4624_v63 = vrot.slane %v4622_v2, 4 }
 0x41c   : > { %v6751_v30 = vor.u32 %v6750_v53, %v6749_v17  ;;  %v5115_v51 = vrot.slane %v5113_v1, 3  ;;  %v4378_v17 = vsel %vm4208_vm4, %v4368_v57, %v4377_v38  ;;  %v10811_v38 = vld [vmem:[#allocation2 + $0x18] sm:$0xff] }
 0x41d   : > { %7547 = vmatmul.msk.bf16.gmra.mxu0 %vm1634_vm1, %v5111_v22  ;;  %v4485_v58 = vpop.f32.mrf.mxu2  ;;  %v4733_v8 = vpop.f32.mrf.mxu3  ;;  %v5116_v22 = vshll.u32 %v4950_v29, 16 }
 0x41e   : > { %v4486_v47 = vadd.f32 %v4485_v58, %v10426_v25  ;;  %v10784_v5 = vpop.f32.mrf.mxu1  ;;  %v10791_v25 = vsel %vm6712_vm0, %v6747_v37, %v6751_v30 }
 0x41f   : > { %11947 = vst [vmem:[#allocation44_spill] sm:$0xff] %v10784_v5  ;;  %v5118_v58 = vrot.slane %v5116_v22, 4 }
 0x420   : > { %v10786_v48 = vadd.f32 %v4733_v8, %v4486_v47  ;;  %11949 = vst [vmem:[#allocation46_spill] sm:$0xff] %v10791_v25  ;;  %v4625_v8 = vor.u32 %v4624_v63, %v4621_v0  ;;  %v11762_v63 = vshll.u32 %v10799_v21, 16 }
 0x421   : > { %v5119_v54 = vor.u32 %v5118_v58, %v5115_v51  ;;  %v5666_v58 = vshll.u32 %v10811_v38, 16 }
 0x422   : > { %11948 = vst [vmem:[#allocation45_spill] sm:$0xff] %v10786_v48  ;;  %v10788_v6 = vpop.f32.mrf.mxu0  ;;  %v4626_v42 = vsel %vm4541_vm6, %v4616_v61, %v4625_v8 }
 0x423   : > { %v5120_v0 = vsel %vm4541_vm6, %v5110_v28, %v5119_v54  ;;  %v6133_v28 = vshll.u32 %v10601_v43, 16 }
 0x425   : > { %v4487_v3 = vpop.f32.mrf.mxu2  ;;  %v4735_v47 = vpop.f32.mrf.mxu3  ;;  %v6135_v54 = vrot.slane %v6133_v28, 1 }
 0x426   : > { %v4488_v5 = vadd.f32 %v4487_v3, %v10440_v24  ;;  %v10794_v48 = vpop.f32.mrf.mxu1  ;;  %v7803_v24 = vld [vmem:[#allocation2 + $0x10] sm:$0xff]  ;;  %v11761_v3 = vshrl.u32 %v10799_v21, 16 }
 0x427   : > { %v5661_v22 = vshll.u32 %v7803_v24, 16 }
 0x428   : > { %v10796_v29 = vadd.f32 %v4735_v47, %v4488_v5  ;;  %v6753_v2 = vrot.slane %v11761_v3, 1  ;;  %v6754_v5 = vrot.slane %v11762_v63, 2 }
 0x429   : > { %7557 = vmatmul.msk.bf16.gmra.mxu1 %vm1634_vm1, %v7921_v14  ;;  %v5663_v8 = vrot.slane %v5661_v22, 1 }
 0x42a   : > { %7510 = vmatmul.msk.bf16.gmra.mxu2 %vm1634_vm1, %v4378_v17  ;;  %v10804_v37 = vpop.f32.mrf.mxu0  ;;  %7529 = vmatmul.msk.bf16.gmra.mxu3 %vm1634_vm1, %v4626_v42  ;;  %v6755_v51 = vor.u32 %v6754_v5, %v6753_v2  ;;  %v5659_v17 = vshrl.u32 %v7803_v24, 16  ;;  %v5668_v42 = vrot.slane %v5666_v58, 1  ;;  %v6131_v2 = vshrl.u32 %v10601_v43, 16  ;;  %v7922_v58 = vld [vmem:[#allocation2 + $0x50] sm:$0xff]  }
 0x42b   : > { %v6478_v24 = vrot.slane %v10542_v26, 1 }
 0x42c   : > { %v10825_v47 = vsel %vm6712_vm0, %v6751_v30, %v6755_v51  ;;  %v5664_v22 = vor.u32 %v5663_v8, %v5659_v17  ;;  %v6136_v63 = vor.u32 %v6135_v54, %v6131_v2 }
 0x42d   : > { %7548 = vmatmul.msk.bf16.gmra.mxu0 %vm1634_vm1, %v5120_v0  ;;  %v4490_v57 = vpop.f32.mrf.mxu2  ;;  %v4738_v53 = vpop.f32.mrf.mxu3  ;;  %11950 = vst [vmem:[#allocation47_spill] sm:$0xff] %v10825_v47 }
 0x42e   : > { %v4491_v61 = vadd.f32 %v4490_v57, %v10481_v10  ;;  %v10818_v1 = vpop.f32.mrf.mxu1 }
 0x430   : > { %v10820_v36 = vadd.f32 %v4738_v53, %v4491_v61  ;;  %v5277_v61 = vadd.f32 %v10428_v31, %v10472_v60  ;;  %v11951_v53 = vshll.u32 %v10542_v26, 16  ;;  %v6477_v60 = vrot.slane %v10548_v4, 1 }
 0x431   : > { %v5278_v4 = vadd.f32 %v10442_v59, %v10489_v18 }
 0x432   : > { %v10827_v10 = vpop.f32.mrf.mxu0  ;;  %v6140_v30 = vrot.slane %v11951_v53, 1  ;;  %v6479_v54 = vsel %vm6476_vm2, %v6477_v60, %v6478_v24 }
 0x434   : > { %v6141_v31 = vsel %vm5657_vm7, %v6136_v63, %v6140_v30 }
 0x435   : > { %v4492_v14 = vpop.f32.mrf.mxu2  ;;  %v4740_v57 = vpop.f32.mrf.mxu3 }
 0x436   : > { %v4493_v0 = vadd.f32 %v4492_v14, %v10507_v32  ;;  %v5399_v5 = vpop.f32.mrf.mxu1  ;;  %v5669_v32 = vsel %vm5657_vm7, %v5664_v22, %v5668_v42  ;;  %v10841_v14 = vld [vmem:[#allocation2 + $0x68] sm:$0xff] }
 0x437   : > { %v10837_v3 = vadd.f32 %v5399_v5, %v5277_v61  ;;  %v11764_v43 = vshll.u32 %v10841_v14, 16  ;;  %v11763_v8 = vshrl.u32 %v10841_v14, 16 }
 0x438   : > { %v10835_v28 = vadd.f32 %v4740_v57, %v4493_v0  ;;  %v7805_v0 = vld [vmem:[#allocation2 + $0x20] sm:$0xff] }
 0x439   : > { %7558 = vmatmul.msk.bf16.gmra.mxu1 %vm1634_vm1, %v7922_v58  ;;  %v6757_v57 = vrot.slane %v11763_v8, 1  ;;  %v6758_v2 = vrot.slane %v11764_v43, 2  ;;  %v5279_v8 = vadd.f32 %v10483_v13, %v10509_v55  ;;  %v10884_v13 = vld [vmem:[#allocation2 + $0x70] sm:$0xff] }
 0x43a   : > { %7641 = vmatmul.msk.bf16.vlgmr.msra.gmra.mxu2 %vm1634_vm1, %v5669_v32  ;;  %7728 = vmatmul.msk.bf16.vlgmr.msra.gmra.mxu3 %vm1634_vm1, %v6141_v31  ;;  %v10859_v53 = vpop.f32.mrf.mxu0  ;;  %v5674_v31 = vshll.u32 %v7805_v0, 16 }
 0x43b   : > { %v6759_v32 = vor.u32 %v6758_v2, %v6757_v57 }
 0x43d   : > { %7747 = vmatmul.msk.bf16.vlgmr.msra.gmra.mxu0 %vm1634_vm1, %v6479_v54  ;;  %v4495_v17 = vpop.f32.mrf.mxu2  ;;  %v4743_v63 = vpop.f32.mrf.mxu3  ;;  %v10866_v60 = vsel %vm6712_vm0, %v6755_v51, %v6759_v32  ;;  %v5670_v54 = vshrl.u32 %v10811_v38, 16  ;;  %v11954_v51 = vshrl.u32 %v10542_v26, 16  ;;  %v6480_v38 = vrot.slane %v10561_v40, 1 }
 0x43e   : > { %v4496_v61 = vadd.f32 %v4495_v17, %v10534_v15  ;;  %v5401_v5 = vpop.f32.mrf.mxu1  ;;  %11952 = vst [vmem:[#allocation48_spill] sm:$0xff] %v10866_v60  ;;  %v5676_v17 = vrot.slane %v5674_v31, 1  ;;  %v11766_v26 = vshll.u32 %v10884_v13, 16  ;;  %v11956_v60 = vshll.u32 %v10604_v56, 16 }
 0x43f   : > { %v10863_v58 = vadd.f32 %v5401_v5, %v5278_v4  ;;  %v5672_v5 = vor.u32 %v5670_v54, %v5668_v42  ;;  %v6144_v43 = vor.u32 %v11954_v51, %v6140_v30  ;;  %v11765_v42 = vshrl.u32 %v10884_v13, 16  ;;  %v7806_v54 = vld [vmem:[#allocation2 + $0x28] sm:$0xff] }
 0x440   : > { %v10861_v22 = vadd.f32 %v4743_v63, %v4496_v61  ;;  %v11953_v61 = vshll.u32 %v10561_v40, 16  ;;  %v6481_v30 = vsel %vm6476_vm2, %v6478_v24, %v6480_v38 }
 0x442   : > { %v6148_v63 = vrot.slane %v11953_v61, 1  ;;  %v10881_v31 = vpop.f32.mrf.mxu0 }
 0x444   : > { %v6149_v55 = vsel %vm5657_vm7, %v6144_v43, %v6148_v63  ;;  %v6762_v43 = vrot.slane %v11766_v26, 2  ;;  %v5281_v26 = vadd.f32 %v10536_v35, %v10540_v50 }
 0x445   : > { %v4497_v15 = vpop.f32.mrf.mxu2  ;;  %v4745_v18 = vpop.f32.mrf.mxu3 }
 0x446   : > { %v4498_v59 = vadd.f32 %v4497_v15, %v10544_v16  ;;  %v5404_v4 = vpop.f32.mrf.mxu1  ;;  %v7923_v16 = vld [vmem:[#allocation2 + $0x58] sm:$0xff]   ;;  %v5677_v15 = vsel %vm5657_vm7, %v5672_v5, %v5676_v17 }
 0x447   : > { %v10876_v2 = vadd.f32 %v5404_v4, %v5279_v8 }
 0x448   : > { %v10874_v57 = vadd.f32 %v4745_v18, %v4498_v59  ;;  %v6761_v59 = vrot.slane %v11765_v42, 1 }
 0x449   : > { %7559 = vmatmul.msk.bf16.gmra.mxu1 %vm1634_vm1, %v7923_v16  ;;  %v5682_v16 = vshll.u32 %v7806_v54, 16 }
 0x44a   : > { %7642 = vmatmul.msk.bf16.gmra.mxu2 %vm1634_vm1, %v5677_v15  ;;  %7729 = vmatmul.msk.bf16.gmra.mxu3 %vm1634_vm1, %v6149_v55  ;;  %v6763_v51 = vor.u32 %v6762_v43, %v6761_v59  ;;  %v10906_v15 = vpop.f32.mrf.mxu0 }
 0x44b   : > { %v5684_v42 = vrot.slane %v5682_v16, 1  ;;  %v7924_v16 = vld [vmem:[#allocation2 + $0x60] sm:$0xff]  }
 0x44c   : > { %v10904_v24 = vsel %vm6712_vm0, %v6759_v32, %v6763_v51 }
 0x44d   : > { %7748 = vmatmul.msk.bf16.gmra.mxu0 %vm1634_vm1, %v6481_v30  ;;  %v4500_v8 = vpop.f32.mrf.mxu2  ;;  %v4748_v61 = vpop.f32.mrf.mxu3  ;;  %11955 = vst [vmem:[#allocation49_spill] sm:$0xff] %v10904_v24  ;;  %v5678_v30 = vshrl.u32 %v7805_v0, 16  ;;  %v11957_v24 = vshrl.u32 %v10561_v40, 16  ;;  %v6482_v0 = vrot.slane %v10604_v56, 1 }
 0x44e   : > { %v4501_v18 = vadd.f32 %v4500_v8, %v10571_v46  ;;  %v10899_v4 = vpop.f32.mrf.mxu1 }
 0x44f   : > { %v5680_v59 = vor.u32 %v5678_v30, %v5676_v17  ;;  %v6152_v47 = vor.u32 %v11957_v24, %v6148_v63 }
 0x450   : > { %v10901_v5 = vadd.f32 %v4748_v61, %v4501_v18  ;;  %v6156_v18 = vrot.slane %v11956_v60, 1  ;;  %v6483_v60 = vsel %vm6476_vm2, %v6480_v38, %v6482_v0 }
 0x452   : > { %v6157_v35 = vsel %vm5657_vm7, %v6152_v47, %v6156_v18  ;;  %v10930_v17 = vpop.f32.mrf.mxu0 }
 0x453   : > { %11958 = vst [vmem:[#allocation50_spill] sm:$0xff] %v10930_v17 }
 0x455   : > { %v4502_v55 = vpop.f32.mrf.mxu2  ;;  %v4750_v8 = vpop.f32.mrf.mxu3 }
 0x456   : > { %v4503_v46 = vadd.f32 %v4502_v55, %v10590_v45  ;;  %v5409_v61 = vpop.f32.mrf.mxu1  ;;  %v5685_v45 = vsel %vm5657_vm7, %v5680_v59, %v5684_v42  ;;  %v10921_v55 = vld [vmem:[#allocation2 + $0x78] sm:$0xff] }
 0x457   : > { %v10915_v32 = vadd.f32 %v5409_v61, %v5281_v26  ;;  %v11768_v50 = vshll.u32 %v10921_v55, 16  ;;  %v11767_v40 = vshrl.u32 %v10921_v55, 16  ;;  %v7807_v26 = vld [vmem:[#allocation2 + $0x30] sm:$0xff] }
 0x458   : > { %v10913_v43 = vadd.f32 %v4750_v8, %v4503_v46  ;;  %v5690_v59 = vshll.u32 %v7807_v26, 16 }
 0x459   : > { %7560 = vmatmul.msk.bf16.gmra.mxu1 %vm1634_vm1, %v7924_v16  ;;  %v6765_v24 = vrot.slane %v11767_v40, 1  ;;  %v6766_v46 = vrot.slane %v11768_v50, 2 }
 0x45a   : > { %7643 = vmatmul.msk.bf16.gmra.mxu2 %vm1634_vm1, %v5685_v45  ;;  %7730 = vmatmul.msk.bf16.gmra.mxu3 %vm1634_vm1, %v6157_v35  ;;  %v5686_v35 = vshrl.u32 %v7806_v54, 16  ;;  %v10950_v17 = vpop.f32.mrf.mxu0  ;;  %v11962_v54 = vshrl.u32 %v10604_v56, 16 }
 0x45b   : > { %v6767_v38 = vor.u32 %v6766_v46, %v6765_v24 }
 0x45c   : > { %v5688_v24 = vor.u32 %v5686_v35, %v5684_v42  ;;  %v6160_v46 = vor.u32 %v11962_v54, %v6156_v18 }
 0x45d   : > { %7749 = vmatmul.msk.bf16.gmra.mxu0 %vm1634_vm1, %v6483_v60  ;;  %v4505_v63 = vpop.f32.mrf.mxu2  ;;  %v4753_v47 = vpop.f32.mrf.mxu3  ;;  %v10943_v16 = vsel %vm6712_vm0, %v6763_v51, %v6767_v38  ;;  %v5692_v60 = vrot.slane %v5690_v59, 1  ;;  %v7925_v59 = vld [vmem:[#allocation2 + $0x68] sm:$0xff]  }
 0x45e   : > { %v4506_v30 = vadd.f32 %v4505_v63, %v10615_v9  ;;  %v10938_v8 = vpop.f32.mrf.mxu1  ;;  %11959 = vst [vmem:[#allocation51_spill] sm:$0xff] %v10943_v16  ;;  %v5283_v9 = vadd.f32 %v10573_v33, %v10586_v34  ;;  %v11960_v63 = vshll.u32 %v10639_v12, 16  ;;  %v10960_v33 = vld [vmem:[#allocation2 + $0x80] sm:$0xff] }
 0x45f   : > { %v11769_v56 = vshrl.u32 %v10960_v33, 16  ;;  %v11965_v16 = vld [vmem:[#allocation29_spill] sm:$0xff] }
 0x460   : > { %v10940_v61 = vadd.f32 %v4753_v47, %v4506_v30  ;;  %v6164_v50 = vrot.slane %v11960_v63, 1 }
 0x461   : > { %v6769_v35 = vrot.slane %v11769_v56, 1 }
 0x462   : > { %v6165_v34 = vsel %vm5657_vm7, %v6160_v46, %v6164_v50 }
 0x465   : > { %v4507_v45 = vpop.f32.mrf.mxu2  ;;  %v4755_v25 = vpop.f32.mrf.mxu3 }
 0x466   : > { %v4508_v40 = vadd.f32 %v4507_v45, %v10630_v23  ;;  %v5414_v30 = vpop.f32.mrf.mxu1  ;;  %v6484_v23 = vrot.slane %v10639_v12, 1  ;;  %v5693_v45 = vsel %vm5657_vm7, %v5688_v24, %v5692_v60 }
 0x467   : > { %v10954_v51 = vadd.f32 %v5414_v30, %v5283_v9 }
 0x468   : > { %v10952_v47 = vadd.f32 %v4755_v25, %v4508_v40  ;;  %v11770_v25 = vshll.u32 %v10960_v33, 16  ;;  %v6485_v42 = vsel %vm6476_vm2, %v6482_v0, %v6484_v23  ;;  %v7808_v40 = vld [vmem:[#allocation2 + $0x38] sm:$0xff] }
 0x469   : > { %7561 = vmatmul.msk.bf16.gmra.mxu1 %vm1634_vm1, %v7925_v59  ;;  %v10979_v59 = vpop.f32.mrf.mxu0  ;;  %v5698_v0 = vshll.u32 %v7808_v40, 16 }
 0x46a   : > { %11961 = vst [vmem:[#allocation52_spill] sm:$0xff] %v10952_v47  ;;  %7644 = vmatmul.msk.bf16.gmra.mxu2 %vm1634_vm1, %v5693_v45  ;;  %7731 = vmatmul.msk.bf16.gmra.mxu3 %vm1634_vm1, %v6165_v34  ;;  %v6770_v30 = vrot.slane %v11770_v25, 2  ;;  %v5285_v25 = vadd.f32 %v10617_v62, %v10625_v44  ;;  %v11966_v47 = vshll.u32 %v11965_v16, 16 }
 0x46b   : > { %v5700_v56 = vrot.slane %v5698_v0, 1  ;;  %v7926_v0 = vld [vmem:[#allocation2 + $0x70] sm:$0xff]  }
 0x46c   : > { %v6771_v46 = vor.u32 %v6770_v30, %v6769_v35 }
 0x46d   : > { %7750 = vmatmul.msk.bf16.gmra.mxu0 %vm1634_vm1, %v6485_v42  ;;  %v4510_v18 = vpop.f32.mrf.mxu2  ;;  %v4758_v63 = vpop.f32.mrf.mxu3  ;;  %v5694_v42 = vshrl.u32 %v7807_v26, 16  ;;  %v6486_v26 = vrot.slane %v11965_v16, 1 }
 0x46e   : > { %v4511_v9 = vadd.f32 %v4510_v18, %v10648_v39  ;;  %v10975_v24 = vpop.f32.mrf.mxu1  ;;  %v10982_v45 = vsel %vm6712_vm0, %v6767_v38, %v6771_v46  ;;  %v11968_v38 = vshrl.u32 %v10639_v12, 16 }
 0x46f   : > { %11964 = vst [vmem:[#allocation54_spill] sm:$0xff] %v10982_v45  ;;  %v5696_v35 = vor.u32 %v5694_v42, %v5692_v60  ;;  %v6487_v60 = vsel %vm6476_vm2, %v6484_v23, %v6486_v26 }
 0x470   : > { %v10977_v54 = vadd.f32 %v4758_v63, %v4511_v9  ;;  %v6172_v9 = vrot.slane %v11966_v47, 1  ;;  %v6168_v45 = vor.u32 %v11968_v38, %v6164_v50 }
 0x471   : > { %v11002_v62 = vpop.f32.mrf.mxu0 }
 0x472   : > { %11963 = vst [vmem:[#allocation53_spill] sm:$0xff] %v10977_v54  ;;  %v6173_v44 = vsel %vm5657_vm7, %v6168_v45, %v6172_v9 }
 0x473   : > { %11970 = vst [vmem:[#allocation56_spill] sm:$0xff] %v11002_v62  ;;  %v11975_v62 = vld [vmem:[#allocation24_spill] sm:$0xff] }
 0x475   : > { %v4512_v34 = vpop.f32.mrf.mxu2  ;;  %v4760_v18 = vpop.f32.mrf.mxu3 }
 0x476   : > { %v4513_v39 = vadd.f32 %v4512_v34, %v10663_v11  ;;  %v5419_v63 = vpop.f32.mrf.mxu1  ;;  %v5701_v11 = vsel %vm5657_vm7, %v5696_v35, %v5700_v56  ;;  %v10997_v34 = vld [vmem:[#allocation2 + $0x88] sm:$0xff] }
 0x477   : > { %v10991_v54 = vadd.f32 %v5419_v63, %v5285_v25  ;;  %11969 = vst [vmem:[#allocation55_spill] sm:$0xff] %v10997_v34  ;;  %v11774_v12 = vshll.u32 %v10997_v34, 16  ;;  %v11771_v50 = vshrl.u32 %v10997_v34, 16  ;;  %v7809_v25 = vld [vmem:[#allocation2 + $0x40] sm:$0xff]  ;;  %v11976_v34 = vld [vmem:[#allocation23_spill] sm:$0xff] }
 0x478   : > { %v10989_v30 = vadd.f32 %v4760_v18, %v4513_v39  ;;  %v11971_v39 = vld [vmem:[#allocation30_spill] sm:$0xff] }
 0x479   : > { %7562 = vmatmul.msk.bf16.gmra.mxu1 %vm1634_vm1, %v7926_v0  ;;  %v6773_v42 = vrot.slane %v11771_v50, 1  ;;  %v6774_v63 = vrot.slane %v11774_v12, 2  ;;  %v5287_v12 = vadd.f32 %v11976_v34, %v11975_v62  ;;  %v11046_v62 = vld [vmem:[#allocation2 + $0x48] sm:$0xff] }
 0x47a   : > { %11967 = vst [vmem:[#allocation29_spill] sm:$0xff] %v10989_v30  ;;  %7645 = vmatmul.msk.bf16.gmra.mxu2 %vm1634_vm1, %v5701_v11  ;;  %7732 = vmatmul.msk.bf16.gmra.mxu3 %vm1634_vm1, %v6173_v44  ;;  %v5706_v11 = vshll.u32 %v7809_v25, 16  ;;  %v11021_v44 = vpop.f32.mrf.mxu0  ;;  %v5702_v30 = vshrl.u32 %v7808_v40, 16  ;;  %v6488_v40 = vrot.slane %v10705_v27, 1 }
 0x47b   : > { %v6775_v0 = vor.u32 %v6774_v63, %v6773_v42 }
 0x47c   : > { %v5708_v50 = vrot.slane %v5706_v11, 1  ;;  %v5704_v42 = vor.u32 %v5702_v30, %v5700_v56  ;;  %v7927_v11 = vld [vmem:[#allocation2 + $0x78] sm:$0xff]  }
 0x47d   : > { %7751 = vmatmul.msk.bf16.gmra.mxu0 %vm1634_vm1, %v6487_v60  ;;  %v4515_v47 = vpop.f32.mrf.mxu2  ;;  %v4763_v45 = vpop.f32.mrf.mxu3  ;;  %v11019_v23 = vsel %vm6712_vm0, %v6771_v46, %v6775_v0 }
 0x47e   : > { %v4516_v18 = vadd.f32 %v4515_v47, %v11971_v39  ;;  %v11014_v35 = vpop.f32.mrf.mxu1  ;;  %11974 = vst [vmem:[#allocation58_spill] sm:$0xff] %v11019_v23  ;;  %v11979_v23 = vshrl.u32 %v11965_v16, 16 }
 0x47f   : > { %11972 = vst [vmem:[#allocation30_spill] sm:$0xff] %v11014_v35  ;;  %v11977_v35 = vshll.u32 %v10705_v27, 16 }
 0x480   : > { %v11016_v38 = vadd.f32 %v4763_v45, %v4516_v18 }
 0x481   : > { %v6180_v18 = vrot.slane %v11977_v35, 1 }
 0x482   : > { %11973 = vst [vmem:[#allocation57_spill] sm:$0xff] %v11016_v38  ;;  %v6176_v38 = vor.u32 %v11979_v23, %v6172_v9  ;;  %v6489_v9 = vsel %vm6476_vm2, %v6486_v26, %v6488_v40 }
 0x484   : > { %v6181_v56 = vsel %vm5657_vm7, %v6176_v38, %v6180_v18 }
 0x485   : > { %v4517_v60 = vpop.f32.mrf.mxu2  ;;  %v4765_v39 = vpop.f32.mrf.mxu3 }
 0x486   : > { %v4518_v47 = vadd.f32 %v4517_v60, %v10699_v52  ;;  %v5424_v45 = vpop.f32.mrf.mxu1  ;;  %v5709_v52 = vsel %vm5657_vm7, %v5704_v42, %v5708_v50  ;;  %v11036_v60 = vld [vmem:[#allocation2 + $0x90] sm:$0xff]  ;;  %v5714_v42 = vshll.u32 %v11046_v62, 16 }
 0x487   : > { %v11030_v46 = vadd.f32 %v5424_v45, %v5287_v12  ;;  %11980 = vst [vmem:[#allocation23_spill] sm:$0xff] %v11036_v60  ;;  %v11776_v30 = vshll.u32 %v11036_v60, 16  ;;  %v11775_v16 = vshrl.u32 %v11036_v60, 16 }
 0x488   : > { %v11028_v63 = vadd.f32 %v4765_v39, %v4518_v47  ;;  %v11053_v47 = vpop.f32.mrf.mxu0 }
 0x489   : > { %7563 = vmatmul.msk.bf16.gmra.mxu1 %vm1634_vm1, %v7927_v11  ;;  %v6777_v12 = vrot.slane %v11775_v16, 1  ;;  %v6778_v38 = vrot.slane %v11776_v30, 2  ;;  %v11983_v16 = vld [vmem:[#allocation31_spill] sm:$0xff] }
 0x48a   : > { %11978 = vst [vmem:[#allocation24_spill] sm:$0xff] %v11028_v63  ;;  %7646 = vmatmul.msk.bf16.gmra.mxu2 %vm1634_vm1, %v5709_v52  ;;  %7733 = vmatmul.msk.bf16.gmra.mxu3 %vm1634_vm1, %v6181_v56  ;;  %v5710_v56 = vshrl.u32 %v7809_v25, 16  ;;  %v5289_v30 = vadd.f32 %v11983_v16, %v10696_v49  ;;  %v11984_v63 = vshll.u32 %v10733_v7, 16  ;;  %v6490_v25 = vrot.slane %v10733_v7, 1  ;;  %v11078_v49 = vld [vmem:[#allocation2 + $0x98] sm:$0xff] }
 0x48b   : > { %v6779_v26 = vor.u32 %v6778_v38, %v6777_v12  ;;  %11989 = vst [vmem:[#allocation63_spill] sm:$0xff] %v11078_v49 }
 0x48c   : > { %v6188_v60 = vrot.slane %v11984_v63, 1  ;;  %v11083_v63 = vld [vmem:[#allocation2 + $0xa0] sm:$0xff] }
 0x48d   : > { %7752 = vmatmul.msk.bf16.gmra.mxu0 %vm1634_vm1, %v6489_v9  ;;  %v4520_v34 = vpop.f32.mrf.mxu2  ;;  %v4768_v23 = vpop.f32.mrf.mxu3  ;;  %v11061_v11 = vsel %vm6712_vm0, %v6775_v0, %v6779_v26  ;;  %v5716_v9 = vrot.slane %v5714_v42, 1  ;;  %v11987_v0 = vshrl.u32 %v10705_v27, 16  ;;  %11990 = vst [vmem:[#allocation64_spill] sm:$0xff] %v11083_v63  ;;  %v6491_v27 = vsel %vm6476_vm2, %v6488_v40, %v6490_v25 }
 0x48e   : > { %v4521_v35 = vadd.f32 %v4520_v34, %v10720_v20  ;;  %v11055_v39 = vpop.f32.mrf.mxu1  ;;  %11982 = vst [vmem:[#allocation60_spill] sm:$0xff] %v11061_v11 }
 0x48f   : > { %v6184_v11 = vor.u32 %v11987_v0, %v6180_v18  ;;  %v11785_v0 = vshll.u32 %v11083_v63, 16 }
 0x490   : > { %v11057_v45 = vadd.f32 %v4768_v23, %v4521_v35  ;;  %v5712_v23 = vor.u32 %v5710_v56, %v5708_v50  ;;  %v11075_v42 = vpop.f32.mrf.mxu0  ;;  %v11779_v56 = vshrl.u32 %v11078_v49, 16 }
 0x491   : > { %11988 = vst [vmem:[#allocation62_spill] sm:$0xff] %v11075_v42  ;;  %v6189_v50 = vsel %vm5657_vm7, %v6184_v11, %v6188_v60 }
 0x492   : > { %11981 = vst [vmem:[#allocation59_spill] sm:$0xff] %v11057_v45  ;;  %v6781_v16 = vrot.slane %v11779_v56, 1 }
 0x495   : > { %v4522_v52 = vpop.f32.mrf.mxu2  ;;  %v4770_v34 = vpop.f32.mrf.mxu3 }
 0x496   : > { %v4523_v20 = vadd.f32 %v4522_v52, %v10743_v41  ;;  %v5429_v35 = vpop.f32.mrf.mxu1  ;;  %v7928_v41 = vld [vmem:[#allocation2 + $0x80] sm:$0xff]   ;;  %v5717_v52 = vsel %vm5657_vm7, %v5712_v23, %v5716_v9 }
 0x497   : > { %v11070_v38 = vadd.f32 %v5429_v35, %v5289_v30  ;;  %v7811_v30 = vld [vmem:[#allocation2 + $0x50] sm:$0xff]  ;;  %v11991_v35 = vld [vmem:[#allocation34_spill] sm:$0xff]  ;;  %v11992_v23 = vld [vmem:[#allocation33_spill] sm:$0xff] }
 0x498   : > { %v11068_v12 = vadd.f32 %v4770_v34, %v4523_v20  ;;  %v5290_v11 = vadd.f32 %v11992_v23, %v11991_v35  ;;  %v6786_v35 = vrot.slane %v11785_v0, 2  ;;  %v11107_v23 = vpop.f32.mrf.mxu0 }
 0x499   : > { %11986 = vst [vmem:[#allocation61_spill] sm:$0xff] %v11070_v38  ;;  %7564 = vmatmul.msk.bf16.gmra.mxu1 %vm1634_vm1, %v7928_v41  ;;  %v11782_v41 = vshrl.u32 %v11083_v63, 16  ;;  %v11995_v38 = vshll.u32 %v11078_v49, 16  ;;  %v11999_v49 = vld [vmem:[#allocation37_spill] sm:$0xff]  ;;  %v12001_v63 = vld [vmem:[#allocation42_spill] sm:$0xff] }
 0x49a   : > { %11985 = vst [vmem:[#allocation31_spill] sm:$0xff] %v11068_v12  ;;  %7647 = vmatmul.msk.bf16.gmra.mxu2 %vm1634_vm1, %v5717_v52  ;;  %7734 = vmatmul.msk.bf16.gmra.mxu3 %vm1634_vm1, %v6189_v50  ;;  %v12002_v0 = vshll.u32 %v12001_v63, 16 }
 0x49c   : > { %v6196_v42 = vrot.slane %v12002_v0, 1 }
 0x49d   : > { %7753 = vmatmul.msk.bf16.gmra.mxu0 %vm1634_vm1, %v6491_v27  ;;  %v4525_v18 = vpop.f32.mrf.mxu2  ;;  %v4773_v34 = vpop.f32.mrf.mxu3  ;;  %v5722_v27 = vshll.u32 %v7811_v30, 16 }
 0x49e   : > { %v4526_v20 = vadd.f32 %v4525_v18, %v10761_v19  ;;  %v5431_v52 = vpop.f32.mrf.mxu1  ;;  %v6782_v19 = vrot.slane %v11995_v38, 2  ;;  %v6785_v18 = vrot.slane %v11782_v41, 1  ;;  %v12000_v41 = vld [vmem:[#allocation35_spill] sm:$0xff] }
 0x49f   : > { %v11097_v50 = vadd.f32 %v5431_v52, %v5290_v11  ;;  %v5718_v11 = vshrl.u32 %v11046_v62, 16  ;;  %v5724_v52 = vrot.slane %v5722_v27, 1  ;;  %v5291_v45 = vadd.f32 %v12000_v41, %v11999_v49 }
 0x4a0   : > { %v11095_v40 = vadd.f32 %v4773_v34, %v4526_v20  ;;  %v6783_v12 = vor.u32 %v6782_v19, %v6781_v16  ;;  %v11109_v20 = vor.u32 %v6786_v35, %v6785_v18  ;;  %v6492_v35 = vrot.slane %v12001_v63, 1 }
 0x4a1   : > { %11994 = vst [vmem:[#allocation33_spill] sm:$0xff] %v11097_v50  ;;  %v11998_v50 = vld [vmem:[#allocation44_spill] sm:$0xff]  ;;  %v5720_v18 = vor.u32 %v5718_v11, %v5716_v9  ;;  %v12007_v11 = vld [vmem:[#allocation38_spill] sm:$0xff] }
 0x4a2   : > { %11993 = vst [vmem:[#allocation34_spill] sm:$0xff] %v11095_v40  ;;  %v11113_v56 = vsel %vm6712_vm0, %v6779_v26, %v6783_v12  ;;  %v11122_v16 = vsel %vm6712_vm0, %v6783_v12, %v11109_v20  ;;  %v12005_v26 = vshrl.u32 %v10733_v7, 16  ;;  %v6493_v9 = vsel %vm6476_vm2, %v6490_v25, %v6492_v35 }
 0x4a3   : > { %11996 = vst [vmem:[#allocation65_spill] sm:$0xff] %v11109_v20  ;;  %v5725_v49 = vsel %vm5657_vm7, %v5720_v18, %v5724_v52  ;;  %v5726_v25 = vshrl.u32 %v7811_v30, 16  ;;  %v12008_v20 = vld [vmem:[#allocation45_spill] sm:$0xff]  ;;  %v12011_v30 = vshrl.u32 %v12001_v63, 16 }
 0x4a4   : > { %11997 = vst [vmem:[#allocation66_spill] sm:$0xff] %v11113_v56  ;;  %v7813_v63 = vld [vmem:[#allocation2 + $0x60] sm:$0xff] }
 0x4a5   : > { %v4527_v34 = vpop.f32.mrf.mxu2  ;;  %v4775_v40 = vpop.f32.mrf.mxu3  ;;  %12003 = vst [vmem:[#allocation44_spill] sm:$0xff] %v11122_v16  ;;  %v12009_v16 = vld [vmem:[#allocation43_spill] sm:$0xff] }
 0x4a6   : > { %v4528_v38 = vadd.f32 %v4527_v34, %v11998_v50  ;;  %v5434_v19 = vpop.f32.mrf.mxu1  ;;  %v6192_v50 = vor.u32 %v12005_v26, %v6188_v60  ;;  %v7929_v34 = vld [vmem:[#allocation2 + $0x88] sm:$0xff]   ;;  %v7812_v60 = vld [vmem:[#allocation2 + $0x58] sm:$0xff]  ;;  %v5293_v56 = vadd.f32 %v12009_v16, %v12008_v20 }
 0x4a7   : > { %v11126_v27 = vadd.f32 %v5434_v19, %v5291_v45  ;;  %v11137_v45 = vpop.f32.mrf.mxu0 }
 0x4a8   : > { %v11124_v62 = vadd.f32 %v4775_v40, %v4528_v38  ;;  %v6197_v12 = vsel %vm5657_vm7, %v6192_v50, %v6196_v42  ;;  %v12006_v40 = vld [vmem:[#allocation39_spill] sm:$0xff]  ;;  %v5730_v50 = vshll.u32 %v7812_v60, 16 }
 0x4a9   : > { %12004 = vst [vmem:[#allocation37_spill] sm:$0xff] %v11126_v27  ;;  %7565 = vmatmul.msk.bf16.gmra.mxu1 %vm1634_vm1, %v7929_v34  ;;  %v5292_v38 = vadd.f32 %v12007_v11, %v12006_v40 }
 0x4aa   : > { %7648 = vmatmul.msk.bf16.gmra.mxu2 %vm1634_vm1, %v5725_v49  ;;  %7735 = vmatmul.msk.bf16.gmra.mxu3 %vm1634_vm1, %v6197_v12  ;;  %v5732_v49 = vrot.slane %v5730_v50, 1 }
 0x4ad   : > { %7754 = vmatmul.msk.bf16.gmra.mxu0 %vm1634_vm1, %v6493_v9  ;;  %v4530_v7 = vpop.f32.mrf.mxu2  ;;  %v4778_v41 = vpop.f32.mrf.mxu3 }
 0x4ae   : > { %v4531_v0 = vadd.f32 %v4530_v7, %v10794_v48  ;;  %v5436_v19 = vpop.f32.mrf.mxu1  ;;  %v12010_v48 = vshll.u32 %v10799_v21, 16 }
 0x4af   : > { %v11145_v26 = vadd.f32 %v5436_v19, %v5292_v38  ;;  %v11152_v27 = vpop.f32.mrf.mxu0  ;;  %v6200_v38 = vor.u32 %v12011_v30, %v6196_v42  ;;  %v7930_v19 = vld [vmem:[#allocation2 + $0x90] sm:$0xff]   ;;  %v5294_v42 = vadd.f32 %v10788_v6, %v10796_v29  ;;  %v12012_v29 = vshll.u32 %v10841_v14, 16 }
 0x4b0   : > { %v11143_v18 = vadd.f32 %v4778_v41, %v4531_v0  ;;  %v6204_v7 = vrot.slane %v12010_v48, 1  ;;  %v5728_v0 = vor.u32 %v5726_v25, %v5724_v52 }
 0x4b2   : > { %v5733_v50 = vsel %vm5657_vm7, %v5728_v0, %v5732_v49  ;;  %v6205_v20 = vsel %vm5657_vm7, %v6200_v38, %v6204_v7  ;;  %v5295_v38 = vadd.f32 %v10804_v37, %v10820_v36  ;;  %v12014_v37 = vld [vmem:[#allocation6_spill] sm:$0xff]  ;;  %v12015_v36 = vld [vmem:[#allocation12_spill] sm:$0xff] }
 0x4b5   : > { %v4532_v34 = vpop.f32.mrf.mxu2  ;;  %v4780_v9 = vpop.f32.mrf.mxu3 }
 0x4b6   : > { %v4533_v12 = vadd.f32 %v4532_v34, %v10818_v1  ;;  %v5439_v40 = vpop.f32.mrf.mxu1  ;;  %v6494_v1 = vrot.slane %v10799_v21, 1 }
 0x4b7   : > { %v11156_v11 = vadd.f32 %v5439_v40, %v5293_v56  ;;  %v11175_v48 = vpop.f32.mrf.mxu0  ;;  %v5738_v40 = vshll.u32 %v7813_v63, 16 }
 0x4b8   : > { %v11154_v41 = vadd.f32 %v4780_v9, %v4533_v12  ;;  %v6495_v52 = vsel %vm6476_vm2, %v6492_v35, %v6494_v1  ;;  %v5734_v35 = vshrl.u32 %v7812_v60, 16  ;;  %v6496_v60 = vrot.slane %v10841_v14, 1 }
 0x4b9   : > { %7566 = vmatmul.msk.bf16.gmra.mxu1 %vm1634_vm1, %v7930_v19  ;;  %v5740_v30 = vrot.slane %v5738_v40, 1 }
 0x4ba   : > { %7649 = vmatmul.msk.bf16.gmra.mxu2 %vm1634_vm1, %v5733_v50  ;;  %7736 = vmatmul.msk.bf16.gmra.mxu3 %vm1634_vm1, %v6205_v20  ;;  %v5736_v20 = vor.u32 %v5734_v35, %v5732_v49  ;;  %v12017_v35 = vld [vmem:[#allocation13_spill] sm:$0xff] }
 0x4bd   : > { %7755 = vmatmul.msk.bf16.gmra.mxu0 %vm1634_vm1, %v6495_v52  ;;  %v5872_v56 = vpop.f32.mrf.mxu2  ;;  %v6344_v34 = vpop.f32.mrf.mxu3 }
 0x4be   : > { %v5962_v16 = vadd.f32 %v5872_v56, %v10837_v3  ;;  %v5441_v25 = vpop.f32.mrf.mxu1  ;;  %v6212_v3 = vrot.slane %v12012_v29, 1 }
 0x4bf   : > { %v11171_v12 = vadd.f32 %v5441_v25, %v5294_v42  ;;  %v12013_v42 = vshrl.u32 %v10799_v21, 16  ;;  %v12016_v25 = vld [vmem:[#allocation41_spill] sm:$0xff]  ;;  %v11196_v40 = vpop.f32.mrf.mxu0  ;;  %v6497_v21 = vsel %vm6476_vm2, %v6494_v1, %v6496_v60 }
 0x4c0   : > { %v11173_v9 = vadd.f32 %v6344_v34, %v5962_v16  ;;  %v5741_v34 = vsel %vm5657_vm7, %v5736_v20, %v5740_v30 }
 0x4c1   : > { %v6208_v16 = vor.u32 %v12013_v42, %v6204_v7 }
 0x4c3   : > { %v6213_v49 = vsel %vm5657_vm7, %v6208_v16, %v6212_v3 }
 0x4c5   : > { %v5874_v0 = vpop.f32.mrf.mxu2  ;;  %v6346_v6 = vpop.f32.mrf.mxu3 }
 0x4c6   : > { %v5963_v19 = vadd.f32 %v5874_v0, %v10863_v58  ;;  %v5444_v50 = vpop.f32.mrf.mxu1  ;;  %v4453_v58 = vadd.f32 %v12015_v36, %v12014_v37  ;;  %v7814_v0 = vld [vmem:[#allocation2 + $0x68] sm:$0xff] }
 0x4c7   : > { %v11182_v52 = vadd.f32 %v5444_v50, %v5295_v38  ;;  %v5746_v16 = vshll.u32 %v7814_v0, 16  ;;  %v11211_v36 = vpop.f32.mrf.mxu0 }
 0x4c8   : > { %v11184_v56 = vadd.f32 %v6346_v6, %v5963_v19  ;;  %v4786_v38 = vadd.f32 %v12017_v35, %v4453_v58  ;;  %v5296_v19 = vadd.f32 %v10827_v10, %v10835_v28  ;;  %v5742_v58 = vshrl.u32 %v7813_v63, 16 }
 0x4c9   : > { %7567 = vmatmul.msk.bf16.gmra.mxu1 %vm1634_vm1, %v12016_v25  ;;  %v5297_v10 = vadd.f32 %v10859_v53, %v10861_v22  ;;  %v6498_v63 = vrot.slane %v10884_v13, 1  ;;  %v12022_v53 = vld [vmem:[#allocation22_spill] sm:$0xff] }
 0x4ca   : > { %7650 = vmatmul.msk.bf16.gmra.mxu2 %vm1634_vm1, %v5741_v34  ;;  %7737 = vmatmul.msk.bf16.gmra.mxu3 %vm1634_vm1, %v6213_v49  ;;  %v12018_v34 = vld [vmem:[#allocation11_spill] sm:$0xff]  ;;  %v5748_v49 = vrot.slane %v5746_v16, 1 }
 0x4cb   : > { %v5280_v1 = vadd.f32 %v12018_v34, %v4786_v38  ;;  %v12021_v16 = vld [vmem:[#allocation7_spill] sm:$0xff]  ;;  %v12023_v34 = vld [vmem:[#allocation20_spill] sm:$0xff] }
 0x4cc   : > { %v4458_v22 = vadd.f32 %v12022_v53, %v12021_v16  ;;  %v5750_v53 = vshrl.u32 %v7814_v0, 16  ;;  %v6500_v0 = vrot.slane %v10921_v55, 1 }
 0x4cd   : > { %7756 = vmatmul.msk.bf16.gmra.mxu0 %vm1634_vm1, %v6497_v21  ;;  %v5877_v7 = vpop.f32.mrf.mxu2  ;;  %v6349_v29 = vpop.f32.mrf.mxu3  ;;  %v5492_v37 = vadd.f32 %v10899_v4, %v5280_v1  ;;  %v12019_v21 = vshll.u32 %v10884_v13, 16  ;;  %v12020_v4 = vshrl.u32 %v10841_v14, 16  ;;  %v6499_v1 = vsel %vm6476_vm2, %v6496_v60, %v6498_v63 }
 0x4ce   : > { %v5964_v6 = vadd.f32 %v5877_v7, %v10876_v2  ;;  %v5446_v50 = vpop.f32.mrf.mxu1 }
 0x4cf   : > { %v11205_v20 = vadd.f32 %v5446_v50, %v5296_v19  ;;  %v6220_v7 = vrot.slane %v12019_v21, 1  ;;  %v5744_v19 = vor.u32 %v5742_v58, %v5740_v30  ;;  %v5298_v58 = vadd.f32 %v10881_v31, %v10874_v57 }
 0x4d0   : > { %v11207_v42 = vadd.f32 %v6349_v29, %v5964_v6  ;;  %v6216_v29 = vor.u32 %v12020_v4, %v6212_v3  ;;  %v7815_v3 = vld [vmem:[#allocation2 + $0x70] sm:$0xff]  ;;  %v12025_v4 = vld [vmem:[#allocation14_spill] sm:$0xff]  ;;  %v5299_v57 = vadd.f32 %v10906_v15, %v10901_v5  ;;  %v12028_v15 = vld [vmem:[#allocation8_spill] sm:$0xff] }
 0x4d1   : > { %v5749_v50 = vsel %vm5657_vm7, %v5744_v19, %v5748_v49  ;;  %v5754_v60 = vshll.u32 %v7815_v3, 16 }
 0x4d2   : > { %v6221_v30 = vsel %vm5657_vm7, %v6216_v29, %v6220_v7 }
 0x4d5   : > { %v5879_v25 = vpop.f32.mrf.mxu2  ;;  %v6351_v2 = vpop.f32.mrf.mxu3 }
 0x4d6   : > { %v5965_v28 = vadd.f32 %v5879_v25, %v5492_v37  ;;  %v5449_v35 = vpop.f32.mrf.mxu1  ;;  %v12024_v37 = vld [vmem:[#allocation15_spill] sm:$0xff] }
 0x4d7   : > { %v11217_v6 = vadd.f32 %v5449_v35, %v5297_v10  ;;  %v4788_v25 = vadd.f32 %v12024_v37, %v4458_v22  ;;  %v5756_v22 = vrot.slane %v5754_v60, 1  ;;  %v12030_v60 = vld [vmem:[#allocation17_spill] sm:$0xff] }
 0x4d8   : > { %v11219_v38 = vadd.f32 %v6351_v2, %v5965_v28  ;;  %v11238_v2 = vpop.f32.mrf.mxu0 }
 0x4d9   : > { %7766 = vmatmul.msk.bf16.vlgmr.msra.gmra.mxu1 %vm1634_vm1, %v12023_v34  ;;  %v5282_v29 = vadd.f32 %v12025_v4, %v4788_v25  ;;  %v12026_v34 = vshll.u32 %v10921_v55, 16  ;;  %v12027_v25 = vshrl.u32 %v10884_v13, 16  ;;  %v6501_v13 = vsel %vm6476_vm2, %v6498_v63, %v6500_v0  ;;  %v7816_v4 = vld [vmem:[#allocation2 + $0x78] sm:$0xff] }
 0x4da   : > { %7651 = vmatmul.msk.bf16.gmra.mxu2 %vm1634_vm1, %v5749_v50  ;;  %7738 = vmatmul.msk.bf16.gmra.mxu3 %vm1634_vm1, %v6221_v30 }
 0x4db   : > { %v5494_v50 = vadd.f32 %v10938_v8, %v5282_v29  ;;  %v6228_v30 = vrot.slane %v12026_v34, 1  ;;  %v6224_v8 = vor.u32 %v12027_v25, %v6220_v7  ;;  %v12031_v29 = vld [vmem:[#allocation4_spill] sm:$0xff] }
 0x4dc   : > { %v12033_v25 = vld [vmem:[#allocation16_spill] sm:$0xff] }
 0x4dd   : > { %7757 = vmatmul.msk.bf16.gmra.mxu0 %vm1634_vm1, %v6499_v1  ;;  %v5882_v14 = vpop.f32.mrf.mxu2  ;;  %v6354_v28 = vpop.f32.mrf.mxu3 }
 0x4de   : > { %v5966_v10 = vadd.f32 %v5882_v14, %v10915_v32  ;;  %v5451_v21 = vpop.f32.mrf.mxu1  ;;  %v5752_v14 = vor.u32 %v5750_v53, %v5748_v49  ;;  %v6229_v49 = vsel %vm5657_vm7, %v6224_v8, %v6228_v30 }
 0x4df   : > { %v11240_v35 = vadd.f32 %v5451_v21, %v5298_v58 }
 0x4e0   : > { %v11242_v19 = vadd.f32 %v6354_v28, %v5966_v10  ;;  %v11257_v10 = vpop.f32.mrf.mxu0  ;;  %v5757_v5 = vsel %vm5657_vm7, %v5752_v14, %v5756_v22  ;;  %v12029_v28 = vld [vmem:[#allocation5_spill] sm:$0xff]  ;;  %v5762_v14 = vshll.u32 %v7816_v4, 16 }
 0x4e1   : > { %v4463_v21 = vadd.f32 %v12029_v28, %v12028_v15  ;;  %v5758_v28 = vshrl.u32 %v7815_v3, 16  ;;  %v6502_v3 = vrot.slane %v10960_v33, 1 }
 0x4e5   : > { %v5884_v16 = vpop.f32.mrf.mxu2  ;;  %v6356_v32 = vpop.f32.mrf.mxu3 }
 0x4e6   : > { %v5967_v31 = vadd.f32 %v5884_v16, %v5494_v50  ;;  %v5454_v1 = vpop.f32.mrf.mxu1  ;;  %v4790_v50 = vadd.f32 %v12031_v29, %v4463_v21  ;;  %v12032_v16 = vld [vmem:[#allocation50_spill] sm:$0xff]  ;;  %v5764_v21 = vrot.slane %v5762_v14, 1  ;;  %v5760_v29 = vor.u32 %v5758_v28, %v5756_v22 }
 0x4e7   : > { %v11250_v37 = vadd.f32 %v5454_v1, %v5299_v57  ;;  %v5300_v53 = vadd.f32 %v12032_v16, %v10913_v43  ;;  %v5301_v43 = vadd.f32 %v10950_v17, %v10940_v61  ;;  %v12037_v17 = vld [vmem:[#allocation19_spill] sm:$0xff]  ;;  %v6503_v14 = vsel %vm6476_vm2, %v6500_v0, %v6502_v3 }
 0x4e8   : > { %v11252_v58 = vadd.f32 %v6356_v32, %v5967_v31  ;;  %v5284_v63 = vadd.f32 %v12033_v25, %v4790_v50  ;;  %v11278_v8 = vpop.f32.mrf.mxu0  ;;  %v7817_v25 = vld [vmem:[#allocation2 + $0x80] sm:$0xff] }
 0x4e9   : > { %7767 = vmatmul.msk.bf16.gmra.mxu1 %vm1634_vm1, %v12030_v60  ;;  %v5770_v0 = vshll.u32 %v7817_v25, 16 }
 0x4ea   : > { %7652 = vmatmul.msk.bf16.gmra.mxu2 %vm1634_vm1, %v5757_v5  ;;  %7739 = vmatmul.msk.bf16.gmra.mxu3 %vm1634_vm1, %v6229_v49  ;;  %v5496_v5 = vadd.f32 %v10975_v24, %v5284_v63  ;;  %v12034_v49 = vshll.u32 %v10960_v33, 16  ;;  %v12039_v63 = vld [vmem:[#allocation3_spill] sm:$0xff] }
 0x4ed   : > { %7758 = vmatmul.msk.bf16.gmra.mxu0 %vm1634_vm1, %v6501_v13  ;;  %v5887_v7 = vpop.f32.mrf.mxu2  ;;  %v6359_v31 = vpop.f32.mrf.mxu3  ;;  %v6236_v13 = vrot.slane %v12034_v49, 1 }
 0x4ee   : > { %v5968_v57 = vadd.f32 %v5887_v7, %v10954_v51  ;;  %v5456_v32 = vpop.f32.mrf.mxu1 }
 0x4ef   : > { %v11273_v34 = vadd.f32 %v5456_v32, %v5300_v53  ;;  %v12035_v53 = vshrl.u32 %v10921_v55, 16  ;;  %v12038_v32 = vld [vmem:[#allocation18_spill] sm:$0xff] }
 0x4f0   : > { %v11275_v1 = vadd.f32 %v6359_v31, %v5968_v57  ;;  %v5765_v57 = vsel %vm5657_vm7, %v5760_v29, %v5764_v21  ;;  %v12036_v31 = vld [vmem:[#allocation9_spill] sm:$0xff]  ;;  %v11301_v55 = vpop.f32.mrf.mxu0 }
 0x4f1   : > { %v6232_v24 = vor.u32 %v12035_v53, %v6228_v30  ;;  %v4468_v61 = vadd.f32 %v12037_v17, %v12036_v31  ;;  %v12041_v29 = vld [vmem:[#allocation21_spill] sm:$0xff]  ;;  %v5766_v17 = vshrl.u32 %v7816_v4, 16 }
 0x4f3   : > { %v6237_v22 = vsel %vm5657_vm7, %v6232_v24, %v6236_v13  ;;  %v12042_v24 = vld [vmem:[#allocation30_spill] sm:$0xff] }
 0x4f5   : > { %v5889_v15 = vpop.f32.mrf.mxu2  ;;  %v6361_v60 = vpop.f32.mrf.mxu3 }
 0x4f6   : > { %v5969_v51 = vadd.f32 %v5889_v15, %v5496_v5  ;;  %v5459_v7 = vpop.f32.mrf.mxu1  ;;  %v4792_v5 = vadd.f32 %v12039_v63, %v4468_v61  ;;  %v12040_v15 = vld [vmem:[#allocation52_spill] sm:$0xff]  ;;  %v12043_v61 = vld [vmem:[#allocation53_spill] sm:$0xff] }
 0x4f7   : > { %v11285_v16 = vadd.f32 %v5459_v7, %v5301_v43  ;;  %v5302_v28 = vadd.f32 %v10979_v59, %v12040_v15 }
 0x4f8   : > { %v11287_v50 = vadd.f32 %v6361_v60, %v5969_v51  ;;  %v5286_v53 = vadd.f32 %v12041_v29, %v4792_v5  ;;  %v12048_v29 = vshrl.u32 %v10960_v33, 16 }
 0x4f9   : > { %7768 = vmatmul.msk.bf16.gmra.mxu1 %vm1634_vm1, %v12038_v32  ;;  %v5772_v32 = vrot.slane %v5770_v0, 1 }
 0x4fa   : > { %7653 = vmatmul.msk.bf16.gmra.mxu2 %vm1634_vm1, %v5765_v57  ;;  %7740 = vmatmul.msk.bf16.gmra.mxu3 %vm1634_vm1, %v6237_v22  ;;  %v5498_v57 = vadd.f32 %v12042_v24, %v5286_v53  ;;  %v12044_v22 = vld [vmem:[#allocation56_spill] sm:$0xff]  ;;  %v6240_v4 = vor.u32 %v12048_v29, %v6236_v13  ;;  %v12049_v24 = vld [vmem:[#allocation10_spill] sm:$0xff] }
 0x4fb   : > { %v7818_v13 = vld [vmem:[#allocation2 + $0x88] sm:$0xff] }
 0x4fd   : > { %7759 = vmatmul.msk.bf16.gmra.mxu0 %vm1634_vm1, %v6503_v14  ;;  %v5892_v30 = vpop.f32.mrf.mxu2  ;;  %v6364_v51 = vpop.f32.mrf.mxu3  ;;  %v5303_v14 = vadd.f32 %v12044_v22, %v12043_v61  ;;  %v12051_v61 = vld [vmem:[#allocation25_spill] sm:$0xff]  ;;  %v12052_v22 = vld [vmem:[#allocation28_spill] sm:$0xff] }
 0x4fe   : > { %v5970_v43 = vadd.f32 %v5892_v30, %v10991_v54  ;;  %v5461_v60 = vpop.f32.mrf.mxu1  ;;  %v12045_v54 = vld [vmem:[#allocation55_spill] sm:$0xff] }
 0x4ff   : > { %v11308_v49 = vadd.f32 %v5461_v60, %v5302_v28  ;;  %v12046_v30 = vshll.u32 %v12045_v54, 16  ;;  %v11318_v28 = vpop.f32.mrf.mxu0  ;;  %v6504_v0 = vrot.slane %v12045_v54, 1 }
 0x500   : > { %v11310_v7 = vadd.f32 %v6364_v51, %v5970_v43  ;;  %v5768_v51 = vor.u32 %v5766_v17, %v5764_v21 }
 0x501   : > { %v6244_v15 = vrot.slane %v12046_v30, 1  ;;  %v6505_v17 = vsel %vm6476_vm2, %v6502_v3, %v6504_v0  ;;  %v5778_v3 = vshll.u32 %v7818_v13, 16 }
 0x502   : > { %v5773_v53 = vsel %vm5657_vm7, %v5768_v51, %v5772_v32 }
 0x503   : > { %v6245_v21 = vsel %vm5657_vm7, %v6240_v4, %v6244_v15 }
 0x505   : > { %v5894_v31 = vpop.f32.mrf.mxu2  ;;  %v6366_v63 = vpop.f32.mrf.mxu3 }
 0x506   : > { %v5971_v59 = vadd.f32 %v5894_v31, %v5498_v57  ;;  %v5464_v43 = vpop.f32.mrf.mxu1  ;;  %v12050_v57 = vld [vmem:[#allocation26_spill] sm:$0xff] }
 0x507   : > { %v11320_v60 = vadd.f32 %v5464_v43, %v5303_v14  ;;  %v4473_v31 = vadd.f32 %v12050_v57, %v12049_v24  ;;  %v12055_v24 = vld [vmem:[#allocation27_spill] sm:$0xff] }
 0x508   : > { %v11322_v5 = vadd.f32 %v6366_v63, %v5971_v59  ;;  %v12053_v59 = vld [vmem:[#allocation29_spill] sm:$0xff] }
 0x509   : > { %12047 = vst [vmem:[#allocation35_spill] sm:$0xff] %v11320_v60  ;;  %7769 = vmatmul.msk.bf16.gmra.mxu1 %vm1634_vm1, %v12051_v61  ;;  %v4794_v14 = vadd.f32 %v12052_v22, %v4473_v31  ;;  %v5304_v63 = vadd.f32 %v11021_v44, %v12053_v59  ;;  %v5774_v31 = vshrl.u32 %v7817_v25, 16  ;;  %v12056_v22 = vld [vmem:[#allocation57_spill] sm:$0xff] }
 0x50a   : > { %7654 = vmatmul.msk.bf16.gmra.mxu2 %vm1634_vm1, %v5773_v53  ;;  %7741 = vmatmul.msk.bf16.gmra.mxu3 %vm1634_vm1, %v6245_v21  ;;  %v11345_v53 = vpop.f32.mrf.mxu0  ;;  %v5305_v44 = vadd.f32 %v11053_v47, %v12056_v22 }
 0x50b   : > { %v5288_v57 = vadd.f32 %v12055_v24, %v4794_v14  ;;  %v12059_v14 = vshrl.u32 %v12045_v54, 16  ;;  %v12060_v24 = vld [vmem:[#allocation32_spill] sm:$0xff]  ;;  %v7819_v54 = vld [vmem:[#allocation2 + $0x90] sm:$0xff] }
 0x50d   : > { %7760 = vmatmul.msk.bf16.gmra.mxu0 %vm1634_vm1, %v6505_v17  ;;  %v5897_v33 = vpop.f32.mrf.mxu2  ;;  %v6369_v43 = vpop.f32.mrf.mxu3  ;;  %v5500_v61 = vadd.f32 %v11055_v39, %v5288_v57  ;;  %v5780_v17 = vrot.slane %v5778_v3, 1  ;;  %v6248_v39 = vor.u32 %v12059_v14, %v6244_v15  ;;  %v12061_v15 = vld [vmem:[#allocation24_spill] sm:$0xff]  ;;  %v12065_v14 = vld [vmem:[#allocation63_spill] sm:$0xff] }
 0x50e   : > { %v5972_v30 = vadd.f32 %v5897_v33, %v11030_v46  ;;  %v5466_v51 = vpop.f32.mrf.mxu1  ;;  %v12057_v33 = vld [vmem:[#allocation23_spill] sm:$0xff] }
 0x50f   : > { %v11341_v29 = vadd.f32 %v5466_v51, %v5304_v63  ;;  %v12058_v59 = vshll.u32 %v12057_v33, 16  ;;  %v6506_v25 = vrot.slane %v12057_v33, 1 }
 0x510   : > { %v11343_v4 = vadd.f32 %v6369_v43, %v5972_v30  ;;  %v5776_v43 = vor.u32 %v5774_v31, %v5772_v32 }
 0x511   : > { %12054 = vst [vmem:[#allocation42_spill] sm:$0xff] %v11341_v29  ;;  %v6252_v63 = vrot.slane %v12058_v59, 1  ;;  %v6507_v32 = vsel %vm6476_vm2, %v6504_v0, %v6506_v25  ;;  %v5782_v59 = vshrl.u32 %v7818_v13, 16 }
 0x512   : > { %v5781_v3 = vsel %vm5657_vm7, %v5776_v43, %v5780_v17  ;;  %v11365_v57 = vpop.f32.mrf.mxu0 }
 0x513   : > { %v6253_v47 = vsel %vm5657_vm7, %v6248_v39, %v6252_v63  ;;  %v12066_v39 = vshll.u32 %v12065_v14, 16 }
 0x515   : > { %v5899_v21 = vpop.f32.mrf.mxu2  ;;  %v6371_v30 = vpop.f32.mrf.mxu3  ;;  %v6260_v0 = vrot.slane %v12066_v39, 1  ;;  %v5790_v39 = vshrl.u32 %v7819_v54, 16 }
 0x516   : > { %v5973_v46 = vadd.f32 %v5899_v21, %v5500_v61  ;;  %v5469_v51 = vpop.f32.mrf.mxu1  ;;  %v12062_v61 = vld [vmem:[#allocation62_spill] sm:$0xff] }
 0x517   : > { %v11353_v29 = vadd.f32 %v5469_v51, %v5305_v44  ;;  %v5306_v21 = vadd.f32 %v12062_v61, %v12061_v15  ;;  %v5786_v44 = vshll.u32 %v7819_v54, 16  ;;  %v6508_v61 = vrot.slane %v12065_v14, 1 }
 0x518   : > { %v11355_v60 = vadd.f32 %v6371_v30, %v5973_v46  ;;  %v12064_v30 = vld [vmem:[#allocation59_spill] sm:$0xff] }
 0x519   : > { %7770 = vmatmul.msk.bf16.gmra.mxu1 %vm1634_vm1, %v12060_v24  ;;  %v5788_v51 = vrot.slane %v5786_v44, 1  ;;  %v5307_v43 = vadd.f32 %v11107_v23, %v12064_v30  ;;  %v5784_v24 = vor.u32 %v5782_v59, %v5780_v17  ;;  %v6509_v13 = vsel %vm6476_vm2, %v6506_v25, %v6508_v61  ;;  %v7820_v17 = vld [vmem:[#allocation2 + $0x98] sm:$0xff] }
 0x51a   : > { %7655 = vmatmul.msk.bf16.gmra.mxu2 %vm1634_vm1, %v5781_v3  ;;  %7742 = vmatmul.msk.bf16.gmra.mxu3 %vm1634_vm1, %v6253_v47  ;;  %v11374_v46 = vpop.f32.mrf.mxu0  ;;  %v12073_v25 = vshrl.u32 %v12065_v14, 16 }
 0x51d   : > { %7761 = vmatmul.msk.bf16.gmra.mxu0 %vm1634_vm1, %v6507_v32  ;;  %v12068_v32 = vshrl.u32 %v12057_v33, 16  ;;  %v12070_v33 = vld [vmem:[#allocation31_spill] sm:$0xff] }
 0x51e   : > { %v5471_v31 = vpop.f32.mrf.mxu1 }
 0x51f   : > { %v11372_v22 = vadd.f32 %v5471_v31, %v5306_v21  ;;  %v6256_v15 = vor.u32 %v12068_v32, %v6252_v63  ;;  %v5789_v21 = vsel %vm5657_vm7, %v5784_v24, %v5788_v51  ;;  %v12069_v31 = vld [vmem:[#allocation36_spill] sm:$0xff]  ;;  %v5308_v63 = vadd.f32 %v11137_v45, %v12070_v33  ;;  %v6034_v24 = vld [vmem:[#allocation2 + $0xa8] sm:$0x1] }
 0x520   : > { %v12072_v32 = vld [vmem:[#allocation34_spill] sm:$0xff]  ;;  %v5792_v33 = vor.u32 %v5790_v39, %v5788_v51 }
 0x521   : > { %12063 = vst [vmem:[#allocation39_spill] sm:$0xff] %v11372_v22  ;;  %v6261_v23 = vsel %vm5657_vm7, %v6256_v15, %v6260_v0  ;;  %v5309_v15 = vadd.f32 %v11152_v27, %v12072_v32  ;;  %v12076_v27 = vld [vmem:[#allocation40_spill] sm:$0xff] }
 0x522   : > { %v11395_v44 = vpop.f32.mrf.mxu0 }
 0x526   : > { %v5474_v3 = vpop.f32.mrf.mxu1 }
 0x527   : > { %v11380_v47 = vadd.f32 %v5474_v3, %v5307_v43  ;;  %v5794_v43 = vshll.u32 %v7820_v17, 16 }
 0x529   : > { %12067 = vst [vmem:[#allocation38_spill] sm:$0xff] %v11380_v47  ;;  %7771 = vmatmul.msk.bf16.gmra.mxu1 %vm1634_vm1, %v12069_v31  ;;  %v5796_v3 = vrot.slane %v5794_v43, 1  ;;  %v12074_v31 = vld [vmem:[#allocation64_spill] sm:$0xff]  ;;  %v5561_v47 = vld [vmem:[#allocation2 + $0xa0] sm:$0x1] }
 0x52a   : > { %7656 = vmatmul.msk.bf16.gmra.mxu2 %vm1634_vm1, %v5789_v21  ;;  %7743 = vmatmul.msk.bf16.gmra.mxu3 %vm1634_vm1, %v6261_v23  ;;  %v6264_v21 = vor.u32 %v12073_v25, %v6260_v0  ;;  %v12075_v23 = vshll.u32 %v12074_v31, 16  ;;  %v11408_v54 = vpop.f32.mrf.mxu0 }
 0x52b   : > { %v5797_v43 = vsel %vm5657_vm7, %v5792_v33, %v5796_v3 }
 0x52d   : > { %7762 = vmatmul.msk.bf16.gmra.mxu0 %vm1634_vm1, %v6509_v13  ;;  %v6268_v13 = vrot.slane %v12075_v23, 1 }
 0x52e   : > { %v5476_v59 = vpop.f32.mrf.mxu1 }
 0x52f   : > { %v11397_v30 = vadd.f32 %v5476_v59, %v5308_v63  ;;  %v6510_v63 = vrot.slane %v12074_v31, 1  ;;  %v6110_v59 = vunpack.c.l.b16 %v6034_v24  ;;  %v6269_v14 = vsel %vm5657_vm7, %v6264_v21, %v6268_v13 }
 0x530   : > { %v5310_v24 = vadd.f32 %v11175_v48, %v11124_v62  ;;  %v12077_v21 = vshrl.u32 %v12074_v31, 16 }
 0x531   : > { %12071 = vst [vmem:[#allocation45_spill] sm:$0xff] %v11397_v30  ;;  %v5637_v30 = vunpack.c.l.b16 %v5561_v47  ;;  %v6511_v51 = vsel %vm6476_vm2, %v6508_v61, %v6510_v63  ;;  %v6129_v0 = vpack.c.b16 %v6110_v59, %v6110_v59 }
 0x532   : > { %v11422_v23 = vpop.f32.mrf.mxu0  ;;  %v6272_v33 = vor.u32 %v12077_v21, %v6268_v13  ;;  %v6991_v21 = vld [vmem:[%s8165_s8 + $0x1b] sm:$0xff] }
 0x533   : > { %v5656_v39 = vpack.c.b16 %v5637_v30, %v5637_v30  ;;  %v5311_v30 = vadd.f32 %v11196_v40, %v11143_v18  ;;  %v5312_v40 = vadd.f32 %v11211_v36, %v11154_v41  ;;  %v6671_v36 = vadd.f32 %v11257_v10, %v11184_v56  ;;  %v6992_v56 = vld [vmem:[%s8165_s8 + $0x23] sm:$0xff] }
 0x535   : > { %v5802_v25 = vshll.u32 %v5656_v39, 16 }
 0x536   : > { %v5479_v45 = vpop.f32.mrf.mxu1 }
 0x537   : > { %v11405_v22 = vadd.f32 %v5479_v45, %v5309_v15  ;;  %v6274_v15 = vshll.u32 %v6129_v0, 16  ;;  %v5798_v45 = vshrl.u32 %v7820_v17, 16  ;;  %v5804_v59 = vrot.slane %v5802_v25, 1  ;;  %v12078_v17 = vld [vmem:[#allocation46_spill] sm:$0xff]  ;;  %v12079_v25 = vld [vmem:[#allocation47_spill] sm:$0xff] }
 0x539   : > { %7772 = vmatmul.msk.bf16.gmra.mxu1 %vm1634_vm1, %v12076_v27  ;;  %v5800_v61 = vor.u32 %v5798_v45, %v5796_v3  ;;  %v6512_v27 = vrot.slane %v6129_v0, 1  ;;  %v6670_v0 = vadd.f32 %v11238_v2, %v11173_v9 }
 0x53a   : > { %7657 = vmatmul.msk.bf16.gmra.mxu2 %vm1634_vm1, %v5797_v43  ;;  %7744 = vmatmul.msk.bf16.gmra.mxu3 %vm1634_vm1, %v6269_v14  ;;  %v6276_v43 = vrot.slane %v6274_v15, 1  ;;  %v11437_v18 = vpop.f32.mrf.mxu0 }
 0x53b   : > { %v6513_v3 = vsel %vm6476_vm2, %v6510_v63, %v6512_v27  ;;  %v11449_v63 = vld [vmem:[%s11735_s4] ss:$0 sm:$0xff] }
 0x53c   : > { %v6277_v48 = vsel %vm5657_vm7, %v6272_v33, %v6276_v43 }
 0x53d   : > { %7763 = vmatmul.msk.bf16.gmra.mxu0 %vm1634_vm1, %v6511_v51  ;;  %v5805_v51 = vsel %vm5657_vm7, %v5800_v61, %v5804_v59  ;;  %v6672_v59 = vadd.f32 %v11278_v8, %v11207_v42  ;;  %v6993_v8 = vld [vmem:[%s8165_s8 + $0x2b] sm:$0xff] }
 0x53e   : > { %v5481_v32 = vpop.f32.mrf.mxu1 }
 0x53f   : > { %v11420_v47 = vadd.f32 %v5481_v32, %v5310_v24  ;;  %v6990_v32 = vld [vmem:[%s8165_s8 + $0x13] sm:$0xff] }
 0x546   : > { %v5484_v14 = vpop.f32.mrf.mxu1 }
 0x547   : > { %v11428_v62 = vadd.f32 %v5484_v14, %v5311_v30  ;;  %v12080_v14 = vld [vmem:[#allocation48_spill] sm:$0xff] }
 0x549   : > { %7773 = vmatmul.msk.bf16.gmra.mxu1 %vm1634_vm1, %v12078_v17  ;;  %v6673_v17 = vadd.f32 %v11301_v55, %v11219_v38  ;;  %v12081_v55 = vld [vmem:[#allocation49_spill] sm:$0xff] }
 0x54a   : > { %7658 = vmatmul.msk.bf16.gmra.mxu2 %vm1634_vm1, %v5805_v51  ;;  %7745 = vmatmul.msk.bf16.gmra.mxu3 %vm1634_vm1, %v6277_v48 }
 0x54d   : > { %7764 = vmatmul.msk.bf16.gmra.mxu0 %vm1634_vm1, %v6513_v3 }
 0x54e   : > { %v5486_v31 = vpop.f32.mrf.mxu1 }
 0x54f   : > { %v11442_v13 = vadd.f32 %v5486_v31, %v5312_v40 }
 0x556   : > { %v6864_v39 = vpop.f32.mrf.mxu1 }
 0x557   : > { %v6954_v24 = vadd.f32 %v6864_v39, %v6670_v0  ;;  %v6674_v39 = vadd.f32 %v11318_v28, %v11242_v19 }
 0x559   : > { %v7030_v15 = vadd.f32 %v11449_v63, %v6954_v24  ;;  %7774 = vmatmul.msk.bf16.gmra.mxu1 %vm1634_vm1, %v12079_v25 }
 0x55b   : > { %v7066_v41 = vadd.f32 %v7030_v15, %v6990_v32  ;;  %v6994_v15 = vld [vmem:[%s8165_s8 + $0x33] sm:$0xff] }
 0x55d   : > { %v7102_v9 = vmax.f32 %v7066_v41, 0.0  ;;  %v11489_v41 = vpop.f32.mrf.mxu2 }
 0x55e   : > { %v6866_v2 = vpop.f32.mrf.mxu1 }
 0x55f   : > { %7138 = vst.msk [vmem:[%s11459_s28] sm:$0xff] %vm1634_vm1, %v7102_v9  ;;  %v6955_v45 = vadd.f32 %v6866_v2, %v6671_v36  ;;  %v6675_v36 = vadd.f32 %v11345_v53, %v11252_v58  ;;  %v6995_v2 = vld [vmem:[%s8165_s8 + $0x3b] sm:$0xff] }
 0x561   : > { %v7031_v33 = vadd.f32 %v11449_v63, %v6955_v45 }
 0x563   : > { %v7067_v43 = vadd.f32 %v7031_v33, %v6991_v21  ;;  %v11497_v21 = vpop.f32.mrf.mxu3 }
 0x565   : > { %v7103_v61 = vmax.f32 %v7067_v43, 0.0  ;;  %v11499_v43 = vpop.f32.mrf.mxu0 }
 0x566   : > { %v6869_v30 = vpop.f32.mrf.mxu1 }
 0x567   : > { %7139 = vst.msk [vmem:[%s11459_s28 + $0x8] sm:$0xff] %vm1634_vm1, %v7103_v61  ;;  %v6956_v27 = vadd.f32 %v6869_v30, %v6672_v59  ;;  %v6676_v59 = vadd.f32 %v11365_v57, %v11275_v1  ;;  %v11503_v30 = vpop.f32.mrf.mxu2  ;;  %v6677_v1 = vadd.f32 %v11374_v46, %v11287_v50 }
 0x569   : > { %v7032_v10 = vadd.f32 %v11449_v63, %v6956_v27  ;;  %7775 = vmatmul.msk.bf16.gmra.mxu1 %vm1634_vm1, %v12080_v14  ;;  %v6996_v27 = vld [vmem:[%s8165_s8 + $0x43] sm:$0xff] }
 0x56b   : > { %v7068_v48 = vadd.f32 %v7032_v10, %v6992_v56  ;;  %v12082_v10 = vld [vmem:[#allocation51_spill] sm:$0xff] }
 0x56d   : > { %v7104_v51 = vmax.f32 %v7068_v48, 0.0  ;;  %v11511_v48 = vpop.f32.mrf.mxu3 }
 0x56e   : > { %v6871_v3 = vpop.f32.mrf.mxu1 }
 0x56f   : > { %7140 = vst.msk [vmem:[%s11459_s28 + $0x10] sm:$0xff] %vm1634_vm1, %v7104_v51  ;;  %v6957_v42 = vadd.f32 %v6871_v3, %v6673_v17  ;;  %v11515_v17 = vpop.f32.mrf.mxu0 }
 0x571   : > { %v7033_v40 = vadd.f32 %v11449_v63, %v6957_v42  ;;  %v11519_v42 = vpop.f32.mrf.mxu2 }
 0x573   : > { %v7069_v31 = vadd.f32 %v7033_v40, %v6993_v8  ;;  %v6997_v8 = vld [vmem:[%s8165_s8 + $0x4b] sm:$0xff] }
 0x575   : > { %v7105_v0 = vmax.f32 %v7069_v31, 0.0 }
 0x576   : > { %v6874_v24 = vpop.f32.mrf.mxu1 }
 0x577   : > { %7141 = vst.msk [vmem:[%s11459_s28 + $0x18] sm:$0xff] %vm1634_vm1, %v7105_v0  ;;  %v6958_v32 = vadd.f32 %v6874_v24, %v6674_v39  ;;  %v6678_v39 = vadd.f32 %v11395_v44, %v11310_v7  ;;  %v11525_v24 = vpop.f32.mrf.mxu3  ;;  %v6679_v7 = vadd.f32 %v11408_v54, %v11322_v5 }
 0x579   : > { %v7034_v38 = vadd.f32 %v11449_v63, %v6958_v32  ;;  %7776 = vmatmul.msk.bf16.gmra.mxu1 %vm1634_vm1, %v12081_v55  ;;  %v6998_v32 = vld [vmem:[%s8165_s8 + $0x53] sm:$0xff]  ;;  %v12083_v55 = vld [vmem:[#allocation54_spill] sm:$0xff] }
 0x57b   : > { %v7070_v25 = vadd.f32 %v7034_v38, %v6994_v15  ;;  %v11530_v15 = vpop.f32.mrf.mxu0 }
 0x57d   : > { %v7106_v9 = vmax.f32 %v7070_v25, 0.0  ;;  %v5909_v25 = vpop.f32.mrf.mxu2 }
 0x57e   : > { %v6876_v19 = vpop.f32.mrf.mxu1 }
 0x57f   : > { %7142 = vst.msk [vmem:[%s11459_s28 + $0x20] sm:$0xff] %vm1634_vm1, %v7106_v9  ;;  %v6959_v28 = vadd.f32 %v6876_v19, %v6675_v36 }
 0x581   : > { %v7035_v45 = vadd.f32 %v11449_v63, %v6959_v28  ;;  %v11539_v28 = vpop.f32.mrf.mxu3 }
 0x583   : > { %v7071_v33 = vadd.f32 %v7035_v45, %v6995_v2  ;;  %v6999_v2 = vld [vmem:[%s8165_s8 + $0x5b] sm:$0xff] }
 0x585   : > { %v7107_v61 = vmax.f32 %v7071_v33, 0.0  ;;  %v11543_v33 = vpop.f32.mrf.mxu0 }
 0x586   : > { %v6879_v58 = vpop.f32.mrf.mxu1 }
 0x587   : > { %7143 = vst.msk [vmem:[%s11459_s28 + $0x28] sm:$0xff] %vm1634_vm1, %v7107_v61  ;;  %v6960_v53 = vadd.f32 %v6879_v58, %v6676_v59  ;;  %v11545_v59 = vpop.f32.mrf.mxu2 }
 0x589   : > { %v7036_v56 = vadd.f32 %v11449_v63, %v6960_v53  ;;  %7777 = vmatmul.msk.bf16.gmra.mxu1 %vm1634_vm1, %v12082_v10  ;;  %v6680_v53 = vadd.f32 %v11422_v23, %v11343_v4  ;;  %v12084_v10 = vld [vmem:[#allocation58_spill] sm:$0xff]  ;;  %v6681_v23 = vadd.f32 %v11437_v18, %v11355_v60 }
 0x58b   : > { %v7072_v14 = vadd.f32 %v7036_v56, %v6996_v27  ;;  %v7000_v27 = vld [vmem:[%s8165_s8 + $0x63] sm:$0xff] }
 0x58d   : > { %v7108_v51 = vmax.f32 %v7072_v14, 0.0  ;;  %v11555_v14 = vpop.f32.mrf.mxu3 }
 0x58e   : > { %v6881_v57 = vpop.f32.mrf.mxu1 }
 0x58f   : > { %7144 = vst.msk [vmem:[%s11459_s28 + $0x30] sm:$0xff] %vm1634_vm1, %v7108_v51  ;;  %v6961_v3 = vadd.f32 %v6881_v57, %v6677_v1  ;;  %v12085_v1 = vld [vmem:[#allocation61_spill] sm:$0xff] }
 0x590   : > { %v5974_v57 = vadd.f32 %v11489_v41, %v12085_v1  ;;  %v5977_v1 = vadd.f32 %v5909_v25, %v11145_v26 }
 0x591   : > { %v7037_v40 = vadd.f32 %v11449_v63, %v6961_v3  ;;  %v11559_v3 = vpop.f32.mrf.mxu0 }
 0x593   : > { %v7073_v31 = vadd.f32 %v7037_v40, %v6997_v8  ;;  %v5914_v8 = vpop.f32.mrf.mxu2 }
 0x595   : > { %v7109_v0 = vmax.f32 %v7073_v31, 0.0  ;;  %v11568_v41 = vpop.f32.mrf.mxu3 }
 0x596   : > { %v6884_v50 = vpop.f32.mrf.mxu1 }
 0x597   : > { %7145 = vst.msk [vmem:[%s11459_s28 + $0x38] sm:$0xff] %vm1634_vm1, %v7109_v0  ;;  %v6962_v46 = vadd.f32 %v6884_v50, %v6678_v39  ;;  %v7001_v0 = vld [vmem:[%s8165_s8 + $0x6b] sm:$0xff]  ;;  %v6446_v39 = vadd.f32 %v11497_v21, %v5974_v57 }
 0x599   : > { %v7038_v38 = vadd.f32 %v11449_v63, %v6962_v46  ;;  %7778 = vmatmul.msk.bf16.gmra.mxu1 %vm1634_vm1, %v12083_v55  ;;  %v6682_v60 = vadd.f32 %v11499_v43, %v6446_v39  ;;  %v12088_v43 = vld [vmem:[#allocation37_spill] sm:$0xff]  ;;  %v12089_v39 = vld [vmem:[#allocation66_spill] sm:$0xff] }
 0x59b   : > { %v7074_v9 = vadd.f32 %v7038_v38, %v6998_v32  ;;  %v12086_v32 = vld [vmem:[#allocation33_spill] sm:$0xff]  ;;  %v11577_v21 = vpop.f32.mrf.mxu2 }
 0x59c   : > { %v5975_v38 = vadd.f32 %v11503_v30, %v12086_v32 }
 0x59d   : > { %v7110_v36 = vmax.f32 %v7074_v9, 0.0  ;;  %v11573_v9 = vpop.f32.mrf.mxu0 }
 0x59e   : > { %v6886_v44 = vpop.f32.mrf.mxu1 }
 0x59f   : > { %7146 = vst.msk [vmem:[%s11459_s28 + $0x40] sm:$0xff] %vm1634_vm1, %v7110_v36  ;;  %v6963_v19 = vadd.f32 %v6886_v44, %v6679_v7  ;;  %v7002_v7 = vld [vmem:[%s8165_s8 + $0x73] sm:$0xff]  ;;  %v6447_v44 = vadd.f32 %v11511_v48, %v5975_v38 }
 0x5a1   : > { %v7039_v45 = vadd.f32 %v11449_v63, %v6963_v19 }
 0x5a3   : > { %v7075_v61 = vadd.f32 %v7039_v45, %v6999_v2  ;;  %v12087_v2 = vld [vmem:[#allocation60_spill] sm:$0xff]  ;;  %v5976_v45 = vadd.f32 %v11519_v42, %v12088_v43 }
 0x5a5   : > { %v7111_v58 = vmax.f32 %v7075_v61, 0.0 }
 0x5a6   : > { %v6889_v5 = vpop.f32.mrf.mxu1 }
 0x5a7   : > { %7147 = vst.msk [vmem:[%s11459_s28 + $0x48] sm:$0xff] %vm1634_vm1, %v7111_v58  ;;  %v6964_v54 = vadd.f32 %v6889_v5, %v6680_v53  ;;  %v6683_v58 = vadd.f32 %v11515_v17, %v6447_v44  ;;  %v11587_v53 = vpop.f32.mrf.mxu3 }
 0x5a9   : > { %v7040_v56 = vadd.f32 %v11449_v63, %v6964_v54  ;;  %7779 = vmatmul.msk.bf16.gmra.mxu1 %vm1634_vm1, %v12084_v10  ;;  %v7003_v54 = vld [vmem:[%s8165_s8 + $0x7b] sm:$0xff] }
 0x5ab   : > { %v7076_v51 = vadd.f32 %v7040_v56, %v7000_v27  ;;  %v6448_v27 = vadd.f32 %v11525_v24, %v5976_v45  ;;  %v11593_v56 = vpop.f32.mrf.mxu0  ;;  %v6449_v24 = vadd.f32 %v11539_v28, %v5977_v1 }
 0x5ad   : > { %v7112_v4 = vmax.f32 %v7076_v51, 0.0  ;;  %v5919_v51 = vpop.f32.mrf.mxu2  ;;  %v6684_v17 = vadd.f32 %v11530_v15, %v6448_v27  ;;  %v5978_v15 = vadd.f32 %v11545_v59, %v11156_v11  ;;  %v6685_v32 = vadd.f32 %v11543_v33, %v6449_v24 }
 0x5ae   : > { %v6891_v40 = vpop.f32.mrf.mxu1  ;;  %v5979_v11 = vadd.f32 %v5914_v8, %v11171_v12  ;;  %v5980_v27 = vadd.f32 %v11577_v21, %v11182_v52  ;;  %v5981_v21 = vadd.f32 %v5919_v51, %v11205_v20 }
 0x5af   : > { %7148 = vst.msk [vmem:[%s11459_s28 + $0x50] sm:$0xff] %vm1634_vm1, %v7112_v4  ;;  %v6965_v31 = vadd.f32 %v6891_v40, %v6681_v23  ;;  %v6391_v40 = vpop.f32.mrf.mxu3 }
 0x5b0   : > { %v6452_v24 = vadd.f32 %v11587_v53, %v5980_v27  ;;  %v7008_v53 = vld [vmem:[%s8165_s8 + $0xa3] sm:$0xff] }
 0x5b1   : > { %v7041_v50 = vadd.f32 %v11449_v63, %v6965_v31  ;;  %v7004_v31 = vld [vmem:[%s8165_s8 + $0x83] sm:$0xff] }
 0x5b3   : > { %v7077_v46 = vadd.f32 %v7041_v50, %v7001_v0  ;;  %v11605_v50 = vpop.f32.mrf.mxu0 }
 0x5b5   : > { %v7113_v55 = vmax.f32 %v7077_v46, 0.0  ;;  %v5922_v25 = vpop.f32.mrf.mxu2 }
 0x5b6   : > { %v6894_v18 = vpop.f32.mrf.mxu1 }
 0x5b7   : > { %7149 = vst.msk [vmem:[%s11459_s28 + $0x58] sm:$0xff] %vm1634_vm1, %v7113_v55  ;;  %v6966_v36 = vadd.f32 %v6894_v18, %v6682_v60  ;;  %v6706_v55 = vld [vmem:[#allocation2 + $0xa8] sm:$0x3]  ;;  %v7005_v60 = vld [vmem:[%s8165_s8 + $0x8b] sm:$0xff]  ;;  %v6450_v18 = vadd.f32 %v11555_v14, %v5978_v15  ;;  %v6451_v14 = vadd.f32 %v11568_v41, %v5979_v11 }
 0x5b8   : > { %v6710_v44 = vunpack.c.l.b16 %v6706_v55  ;;  %v6453_v55 = vadd.f32 %v6391_v40, %v5981_v21  ;;  %v7009_v40 = vld [vmem:[%s8165_s8 + $0xab] sm:$0xff]  ;;  %v7012_v21 = vld [vmem:[%s8165_s8 + $0xc3] sm:$0xff] }
 0x5b9   : > { %v7042_v19 = vadd.f32 %v11449_v63, %v6966_v36  ;;  %7780 = vmatmul.msk.bf16.gmra.mxu1 %vm1634_vm1, %v12087_v2  ;;  %v6686_v33 = vadd.f32 %v11559_v3, %v6450_v18 }
 0x5ba   : > { %v6711_v45 = vpack.c.b16 %v6710_v44, %v6710_v44  ;;  %v6689_v44 = vadd.f32 %v11605_v50, %v6453_v55  ;;  %v7013_v55 = vld [vmem:[%s8165_s8 + $0xcb] sm:$0xff] }
 0x5bb   : > { %v7078_v30 = vadd.f32 %v7042_v19, %v7002_v7  ;;  %v6394_v7 = vpop.f32.mrf.mxu3  ;;  %v6630_v59 = vpop.f32.mrf.mxu0 }
 0x5bc   : > { %v6790_v12 = vshrl.u32 %v6711_v45, 16  ;;  %v6793_v8 = vshll.u32 %v6711_v45, 16 }
 0x5bd   : > { %v7114_v61 = vmax.f32 %v7078_v30, 0.0  ;;  %v5924_v30 = vpop.f32.mrf.mxu2 }
 0x5be   : > { %v6896_v5 = vpop.f32.mrf.mxu1 }
 0x5bf   : > { %7150 = vst.msk [vmem:[%s11459_s28 + $0x60] sm:$0xff] %vm1634_vm1, %v7114_v61  ;;  %v6967_v48 = vadd.f32 %v6896_v5, %v6683_v58  ;;  %v7006_v58 = vld [vmem:[%s8165_s8 + $0x93] sm:$0xff] }
 0x5c1   : > { %v7043_v10 = vadd.f32 %v11449_v63, %v6967_v48  ;;  %v12090_v48 = vld [vmem:[#allocation44_spill] sm:$0xff] }
 0x5c3   : > { %v7079_v42 = vadd.f32 %v7043_v10, %v7003_v54  ;;  %v6396_v3 = vpop.f32.mrf.mxu3  ;;  %v6632_v41 = vpop.f32.mrf.mxu0 }
 0x5c5   : > { %v7115_v57 = vmax.f32 %v7079_v42, 0.0  ;;  %v6687_v42 = vadd.f32 %v11573_v9, %v6451_v14  ;;  %v5983_v14 = vadd.f32 %v5924_v30, %v11240_v35 }
 0x5c6   : > { %v6899_v4 = vpop.f32.mrf.mxu1 }
 0x5c7   : > { %7151 = vst.msk [vmem:[%s11459_s28 + $0x68] sm:$0xff] %vm1634_vm1, %v7115_v57  ;;  %v6968_v23 = vadd.f32 %v6899_v4, %v6684_v17  ;;  %v6792_v57 = vrot.slane %v6790_v12, 1  ;;  %v6795_v17 = vrot.slane %v6793_v8, 2  ;;  %v6455_v12 = vadd.f32 %v6396_v3, %v5983_v14  ;;  %v12092_v14 = vld [vmem:[#allocation35_spill] sm:$0xff] }
 0x5c9   : > { %v7044_v0 = vadd.f32 %v11449_v63, %v6968_v23  ;;  %7781 = vmatmul.msk.bf16.gmra.mxu1 %vm1634_vm1, %v12089_v39  ;;  %v5927_v23 = vpop.f32.mrf.mxu2  ;;  %v6796_v39 = vor.u32 %v6795_v17, %v6792_v57  ;;  %v6691_v35 = vadd.f32 %v6632_v41, %v6455_v12  ;;  %v7011_v57 = vld [vmem:[%s8165_s8 + $0xbb] sm:$0xff] }
 0x5ca   : > { %v5984_v27 = vadd.f32 %v5927_v23, %v11250_v37 }
 0x5cb   : > { %v7080_v26 = vadd.f32 %v7044_v0, %v7004_v31  ;;  %v7007_v31 = vld [vmem:[%s8165_s8 + $0x9b] sm:$0xff]  ;;  %v6399_v15 = vpop.f32.mrf.mxu3 }
 0x5cc   : > { %v6456_v17 = vadd.f32 %v6399_v15, %v5984_v27  ;;  %v12093_v27 = vld [vmem:[#allocation42_spill] sm:$0xff] }
 0x5cd   : > { %v7116_v46 = vmax.f32 %v7080_v26, 0.0  ;;  %v6688_v26 = vadd.f32 %v11593_v56, %v6452_v24  ;;  %v5982_v56 = vadd.f32 %v5922_v25, %v11217_v6 }
 0x5ce   : > { %v6901_v38 = vpop.f32.mrf.mxu1 }
 0x5cf   : > { %7152 = vst.msk [vmem:[%s11459_s28 + $0x70] sm:$0xff] %vm1634_vm1, %v7116_v46  ;;  %v6969_v28 = vadd.f32 %v6901_v38, %v6685_v32  ;;  %v12091_v32 = vld [vmem:[#allocation65_spill] sm:$0xff] }
 0x5d0   : > { %v6797_v38 = vsel %vm6712_vm0, %v12091_v32, %v6796_v39 }
 0x5d1   : > { %v7045_v36 = vadd.f32 %v11449_v63, %v6969_v28  ;;  %v5929_v20 = vpop.f32.mrf.mxu2 }
 0x5d2   : > { %v5985_v24 = vadd.f32 %v5929_v20, %v11273_v34 }
 0x5d3   : > { %v7081_v19 = vadd.f32 %v7045_v36, %v7005_v60  ;;  %v6635_v60 = vpop.f32.mrf.mxu0 }
 0x5d4   : > { %v6692_v37 = vadd.f32 %v6635_v60, %v6456_v17  ;;  %v7016_v17 = vld [vmem:[%s8165_s8 + $0xe3] sm:$0xff] }
 0x5d5   : > { %v7117_v2 = vmax.f32 %v7081_v19, 0.0 }
 0x5d6   : > { %v6904_v43 = vpop.f32.mrf.mxu1 }
 0x5d7   : > { %7153 = vst.msk [vmem:[%s11459_s28 + $0x78] sm:$0xff] %vm1634_vm1, %v7117_v2  ;;  %v6970_v61 = vadd.f32 %v6904_v43, %v6686_v33  ;;  %v6401_v2 = vpop.f32.mrf.mxu3  ;;  %v6454_v33 = vadd.f32 %v6394_v7, %v5982_v56 }
 0x5d9   : > { %v7046_v5 = vadd.f32 %v11449_v63, %v6970_v61  ;;  %7782 = vmatmul.msk.bf16.gmra.mxu1 %vm1634_vm1, %v12090_v48  ;;  %v6690_v25 = vadd.f32 %v6630_v59, %v6454_v33  ;;  %v7010_v48 = vld [vmem:[%s8165_s8 + $0xb3] sm:$0xff] }
 0x5db   : > { %v7082_v54 = vadd.f32 %v7046_v5, %v7006_v58  ;;  %v6637_v45 = vpop.f32.mrf.mxu0  ;;  %v5932_v58 = vpop.f32.mrf.mxu2 }
 0x5dd   : > { %v7118_v10 = vmax.f32 %v7082_v54, 0.0 }
 0x5de   : > { %v6906_v1 = vpop.f32.mrf.mxu1 }
 0x5df   : > { %7154 = vst.msk [vmem:[%s11459_s28 + $0x80] sm:$0xff] %vm1634_vm1, %v7118_v10  ;;  %v6971_v4 = vadd.f32 %v6906_v1, %v6687_v42  ;;  %v6404_v7 = vpop.f32.mrf.mxu3 }
 0x5e1   : > { %v7047_v0 = vadd.f32 %v11449_v63, %v6971_v4 }
 0x5e3   : > { %v7083_v52 = vadd.f32 %v7047_v0, %v7007_v31  ;;  %v6640_v10 = vpop.f32.mrf.mxu0  ;;  %v5934_v30 = vpop.f32.mrf.mxu2 }
 0x5e5   : > { %v7119_v9 = vmax.f32 %v7083_v52, 0.0 }
 0x5e6   : > { %v6909_v46 = vpop.f32.mrf.mxu1 }
 0x5e7   : > { %7155 = vst.msk [vmem:[%s11459_s28 + $0x88] sm:$0xff] %vm1634_vm1, %v7119_v9  ;;  %v6972_v28 = vadd.f32 %v6909_v46, %v6688_v26  ;;  %v6406_v31 = vpop.f32.mrf.mxu3  ;;  %v6457_v9 = vadd.f32 %v6401_v2, %v5985_v24  ;;  %v5986_v46 = vadd.f32 %v5932_v58, %v11285_v16 }
 0x5e9   : > { %v7048_v18 = vadd.f32 %v11449_v63, %v6972_v28  ;;  %7783 = vmatmul.msk.bf16.gmra.mxu1 %vm1634_vm1, %v6797_v38  ;;  %v6693_v34 = vadd.f32 %v6637_v45, %v6457_v9  ;;  %v6458_v60 = vadd.f32 %v6404_v7, %v5986_v46  ;;  %v7017_v9 = vld [vmem:[%s8165_s8 + $0xeb] sm:$0xff] }
 0x5eb   : > { %v7084_v51 = vadd.f32 %v7048_v18, %v7008_v53  ;;  %v6642_v41 = vpop.f32.mrf.mxu0  ;;  %v5937_v52 = vpop.f32.mrf.mxu2  ;;  %v6694_v16 = vadd.f32 %v6640_v10, %v6458_v60  ;;  %v7018_v60 = vld [vmem:[%s8165_s8 + $0xf3] sm:$0xff] }
 0x5ed   : > { %v7120_v36 = vmax.f32 %v7084_v51, 0.0 }
 0x5ee   : > { %v6911_v19 = vpop.f32.mrf.mxu1 }
 0x5ef   : > { %7156 = vst.msk [vmem:[%s11459_s28 + $0x90] sm:$0xff] %vm1634_vm1, %v7120_v36  ;;  %v6973_v11 = vadd.f32 %v6911_v19, %v6689_v44  ;;  %v6409_v38 = vpop.f32.mrf.mxu3  ;;  %v5987_v36 = vadd.f32 %v5934_v30, %v11308_v49 }
 0x5f1   : > { %v7049_v43 = vadd.f32 %v11449_v63, %v6973_v11  ;;  %v6459_v33 = vadd.f32 %v6406_v31, %v5987_v36 }
 0x5f3   : > { %v7085_v61 = vadd.f32 %v7049_v43, %v7009_v40  ;;  %v6645_v18 = vpop.f32.mrf.mxu0  ;;  %v5939_v51 = vpop.f32.mrf.mxu2  ;;  %v7014_v40 = vld [vmem:[%s8165_s8 + $0xd3] sm:$0xff]  ;;  %v6695_v49 = vadd.f32 %v6642_v41, %v6459_v33 }
 0x5f4   : > { %v5989_v10 = vadd.f32 %v5939_v51, %v12093_v27 }
 0x5f5   : > { %v7121_v6 = vmax.f32 %v7085_v61, 0.0 }
 0x5f6   : > { %v6914_v5 = vpop.f32.mrf.mxu1 }
 0x5f7   : > { %7157 = vst.msk [vmem:[%s11459_s28 + $0x98] sm:$0xff] %vm1634_vm1, %v7121_v6  ;;  %v6974_v50 = vadd.f32 %v6914_v5, %v6690_v25  ;;  %v6411_v2 = vpop.f32.mrf.mxu3  ;;  %v5988_v6 = vadd.f32 %v5937_v52, %v12092_v14 }
 0x5f9   : > { %v7050_v8 = vadd.f32 %v11449_v63, %v6974_v50  ;;  %v6460_v12 = vadd.f32 %v6409_v38, %v5988_v6 }
 0x5fb   : > { %v7086_v54 = vadd.f32 %v7050_v8, %v7010_v48  ;;  %v6647_v45 = vpop.f32.mrf.mxu0  ;;  %v5942_v58 = vpop.f32.mrf.mxu2  ;;  %v7015_v48 = vld [vmem:[%s8165_s8 + $0xdb] sm:$0xff]  ;;  %v6696_v30 = vadd.f32 %v6645_v18, %v6460_v12 }
 0x5fd   : > { %v7122_v42 = vmax.f32 %v7086_v54, 0.0 }
 0x5fe   : > { %v6916_v1 = vpop.f32.mrf.mxu1 }
 0x5ff   : > { %7158 = vst.msk [vmem:[%s11459_s28 + $0xa0] sm:$0xff] %vm1634_vm1, %v7122_v42  ;;  %v6975_v59 = vadd.f32 %v6916_v1, %v6691_v35  ;;  %v6414_v7 = vpop.f32.mrf.mxu3 }
 0x601   : > { %v7051_v3 = vadd.f32 %v11449_v63, %v6975_v59 }
 0x603   : > { %v7087_v4 = vadd.f32 %v7051_v3, %v7011_v57  ;;  %v6650_v42 = vpop.f32.mrf.mxu0  ;;  %v5944_v1 = vpop.f32.mrf.mxu2  ;;  %v6461_v3 = vadd.f32 %v6411_v2, %v5989_v10 }
 0x605   : > { %v7123_v0 = vmax.f32 %v7087_v4, 0.0 }
 0x606   : > { %v6919_v23 = vpop.f32.mrf.mxu1 }
 0x607   : > { %7159 = vst.msk [vmem:[%s11459_s28 + $0xa8] sm:$0xff] %vm1634_vm1, %v7123_v0  ;;  %v6976_v39 = vadd.f32 %v6919_v23, %v6692_v37  ;;  %v6416_v24 = vpop.f32.mrf.mxu3  ;;  %v5990_v0 = vadd.f32 %v5942_v58, %v11353_v29  ;;  %v6697_v23 = vadd.f32 %v6647_v45, %v6461_v3  ;;  %v7021_v3 = vld [vmem:[%s8165_s8 + $0x10b] sm:$0xff] }
 0x609   : > { %v7052_v26 = vadd.f32 %v11449_v63, %v6976_v39 }
 0x60b   : > { %v7088_v15 = vadd.f32 %v7052_v26, %v7012_v21  ;;  %v6652_v39 = vpop.f32.mrf.mxu0  ;;  %v5947_v21 = vpop.f32.mrf.mxu2  ;;  %v6462_v26 = vadd.f32 %v6414_v7, %v5990_v0 }
 0x60d   : > { %v7124_v32 = vmax.f32 %v7088_v15, 0.0  ;;  %v6698_v29 = vadd.f32 %v6650_v42, %v6462_v26 }
 0x60e   : > { %v6921_v28 = vpop.f32.mrf.mxu1 }
 0x60f   : > { %7160 = vst.msk [vmem:[%s11459_s28 + $0xb0] sm:$0xff] %vm1634_vm1, %v7124_v32  ;;  %v6977_v53 = vadd.f32 %v6921_v28, %v6693_v34  ;;  %v12094_v32 = vld [vmem:[#allocation39_spill] sm:$0xff]  ;;  %v6419_v28 = vpop.f32.mrf.mxu3 }
 0x610   : > { %v5991_v34 = vadd.f32 %v5944_v1, %v12094_v32 }
 0x611   : > { %v7053_v20 = vadd.f32 %v11449_v63, %v6977_v53 }
 0x612   : > { %v6463_v18 = vadd.f32 %v6416_v24, %v5991_v34 }
 0x613   : > { %v7089_v56 = vadd.f32 %v7053_v20, %v7013_v55  ;;  %v6655_v20 = vpop.f32.mrf.mxu0 }
 0x615   : > { %v7125_v44 = vmax.f32 %v7089_v56, 0.0  ;;  %v5949_v56 = vpop.f32.mrf.mxu2 }
 0x616   : > { %v6924_v19 = vpop.f32.mrf.mxu1 }
 0x617   : > { %7161 = vst.msk [vmem:[%s11459_s28 + $0xb8] sm:$0xff] %vm1634_vm1, %v7125_v44  ;;  %v6978_v11 = vadd.f32 %v6924_v19, %v6694_v16  ;;  %v12095_v44 = vld [vmem:[#allocation38_spill] sm:$0xff]  ;;  %v6421_v33 = vpop.f32.mrf.mxu3 }
 0x618   : > { %v5992_v16 = vadd.f32 %v5947_v21, %v12095_v44 }
 0x619   : > { %v7054_v43 = vadd.f32 %v11449_v63, %v6978_v11  ;;  %v6699_v11 = vadd.f32 %v6652_v39, %v6463_v18 }
 0x61a   : > { %v6464_v45 = vadd.f32 %v6419_v28, %v5992_v16 }
 0x61b   : > { %v7090_v61 = vadd.f32 %v7054_v43, %v7014_v40  ;;  %v7019_v43 = vld [vmem:[%s8165_s8 + $0xfb] sm:$0xff]  ;;  %v6657_v58 = vpop.f32.mrf.mxu0 }
 0x61d   : > { %v7126_v25 = vmax.f32 %v7090_v61, 0.0  ;;  %v5952_v6 = vpop.f32.mrf.mxu2 }
 0x61e   : > { %v6926_v5 = vpop.f32.mrf.mxu1 }
 0x61f   : > { %7162 = vst.msk [vmem:[%s11459_s28 + $0xc0] sm:$0xff] %vm1634_vm1, %v7126_v25  ;;  %v6979_v50 = vadd.f32 %v6926_v5, %v6695_v49  ;;  %v12096_v25 = vld [vmem:[#allocation45_spill] sm:$0xff]  ;;  %v6424_v27 = vpop.f32.mrf.mxu3 }
 0x620   : > { %v5993_v49 = vadd.f32 %v5949_v56, %v12096_v25 }
 0x621   : > { %v7055_v8 = vadd.f32 %v11449_v63, %v6979_v50  ;;  %v6700_v50 = vadd.f32 %v6655_v20, %v6464_v45 }
 0x622   : > { %v6465_v7 = vadd.f32 %v6421_v33, %v5993_v49 }
 0x623   : > { %v7091_v54 = vadd.f32 %v7055_v8, %v7015_v48  ;;  %v7020_v8 = vld [vmem:[%s8165_s8 + $0x103] sm:$0xff]  ;;  %v6660_v42 = vpop.f32.mrf.mxu0 }
 0x624   : > { %v6701_v1 = vadd.f32 %v6657_v58, %v6465_v7 }
 0x625   : > { %v7127_v35 = vmax.f32 %v7091_v54, 0.0 }
 0x626   : > { %v6929_v59 = vpop.f32.mrf.mxu1 }
 0x627   : > { %7163 = vst.msk [vmem:[%s11459_s28 + $0xc8] sm:$0xff] %vm1634_vm1, %v7127_v35  ;;  %v6980_v57 = vadd.f32 %v6929_v59, %v6696_v30  ;;  %v5994_v35 = vadd.f32 %v5952_v6, %v11405_v22  ;;  %v5954_v59 = vpop.f32.mrf.mxu2  ;;  %v6426_v0 = vpop.f32.mrf.mxu3 }
 0x629   : > { %v7056_v4 = vadd.f32 %v11449_v63, %v6980_v57 }
 0x62b   : > { %v7092_v31 = vadd.f32 %v7056_v4, %v7016_v17  ;;  %v6466_v4 = vadd.f32 %v6424_v27, %v5994_v35 }
 0x62d   : > { %v7128_v37 = vmax.f32 %v7092_v31, 0.0  ;;  %v6702_v22 = vadd.f32 %v6660_v42, %v6466_v4 }
 0x62e   : > { %v6931_v41 = vpop.f32.mrf.mxu1 }
 0x62f   : > { %7164 = vst.msk [vmem:[%s11459_s28 + $0xd0] sm:$0xff] %vm1634_vm1, %v7128_v37  ;;  %v6981_v52 = vadd.f32 %v6931_v41, %v6697_v23  ;;  %v5995_v37 = vadd.f32 %v5954_v59, %v11420_v47  ;;  %v5957_v21 = vpop.f32.mrf.mxu2  ;;  %v6429_v32 = vpop.f32.mrf.mxu3 }
 0x630   : > { %v5996_v34 = vadd.f32 %v5957_v21, %v11428_v62 }
 0x631   : > { %v7057_v15 = vadd.f32 %v11449_v63, %v6981_v52  ;;  %v6662_v52 = vpop.f32.mrf.mxu0  ;;  %v6467_v26 = vadd.f32 %v6426_v0, %v5995_v37 }
 0x633   : > { %v7093_v46 = vadd.f32 %v7057_v15, %v7017_v9  ;;  %v7022_v9 = vld [vmem:[%s8165_s8 + $0x113] sm:$0xff]  ;;  %v6703_v47 = vadd.f32 %v6662_v52, %v6467_v26 }
 0x635   : > { %v7129_v38 = vmax.f32 %v7093_v46, 0.0 }
 0x636   : > { %v6934_v53 = vpop.f32.mrf.mxu1 }
 0x637   : > { %7165 = vst.msk [vmem:[%s11459_s28 + $0xd8] sm:$0xff] %vm1634_vm1, %v7129_v38  ;;  %v6982_v55 = vadd.f32 %v6934_v53, %v6698_v29  ;;  %v5959_v20 = vpop.f32.mrf.mxu2  ;;  %v6431_v44 = vpop.f32.mrf.mxu3 }
 0x639   : > { %v7058_v51 = vadd.f32 %v11449_v63, %v6982_v55  ;;  %v6665_v53 = vpop.f32.mrf.mxu0  ;;  %v7023_v55 = vld [vmem:[%s8165_s8 + $0x11b] sm:$0xff] }
 0x63b   : > { %v7094_v36 = vadd.f32 %v7058_v51, %v7018_v60  ;;  %v6468_v60 = vadd.f32 %v6429_v32, %v5996_v34 }
 0x63d   : > { %v7130_v19 = vmax.f32 %v7094_v36, 0.0  ;;  %v6704_v56 = vadd.f32 %v6665_v53, %v6468_v60  ;;  %v5997_v36 = vadd.f32 %v5959_v20, %v11442_v13 }
 0x63e   : > { %v6936_v2 = vpop.f32.mrf.mxu1 }
 0x63f   : > { %7166 = vst.msk [vmem:[%s11459_s28 + $0xe0] sm:$0xff] %vm1634_vm1, %v7130_v19  ;;  %v6983_v40 = vadd.f32 %v6936_v2, %v6699_v11  ;;  %v7024_v11 = vld [vmem:[%s8165_s8 + $0x123] sm:$0xff]  ;;  %v6469_v2 = vadd.f32 %v6431_v44, %v5997_v36 }
 0x641   : > { %v7059_v61 = vadd.f32 %v11449_v63, %v6983_v40  ;;  %v6667_v33 = vpop.f32.mrf.mxu0 }
 0x642   : > { %v6705_v45 = vadd.f32 %v6667_v33, %v6469_v2 }
 0x643   : > { %v7095_v14 = vadd.f32 %v7059_v61, %v7019_v43 }
 0x645   : > { %v7131_v5 = vmax.f32 %v7095_v14, 0.0  ;;  %v7025_v14 = vld [vmem:[%s8165_s8 + $0x12b] sm:$0xff] }
 0x646   : > { %v6939_v48 = vpop.f32.mrf.mxu1 }
 0x647   : > { %7167 = vst.msk [vmem:[%s11459_s28 + $0xe8] sm:$0xff] %vm1634_vm1, %v7131_v5  ;;  %v6984_v12 = vadd.f32 %v6939_v48, %v6700_v50 }
 0x649   : > { %v7060_v54 = vadd.f32 %v11449_v63, %v6984_v12 }
 0x64b   : > { %v7096_v10 = vadd.f32 %v7060_v54, %v7020_v8 }
 0x64d   : > { %v7132_v30 = vmax.f32 %v7096_v10, 0.0 }
 0x64e   : > { %v6941_v57 = vpop.f32.mrf.mxu1 }
 0x64f   : > { %7168 = vst.msk [vmem:[%s11459_s28 + $0xf0] sm:$0xff] %vm1634_vm1, %v7132_v30  ;;  %v6985_v17 = vadd.f32 %v6941_v57, %v6701_v1 }
 0x651   : > { %v7061_v31 = vadd.f32 %v11449_v63, %v6985_v17 }
 0x653   : > { %v7097_v24 = vadd.f32 %v7061_v31, %v7021_v3 }
 0x655   : > { %v7133_v23 = vmax.f32 %v7097_v24, 0.0 }
 0x656   : > { %v6944_v41 = vpop.f32.mrf.mxu1 }
 0x657   : > { %7169 = vst.msk [vmem:[%s11459_s28 + $0xf8] sm:$0xff] %vm1634_vm1, %v7133_v23  ;;  %v6986_v39 = vadd.f32 %v6944_v41, %v6702_v22 }
 0x659   : > { %v7062_v15 = vadd.f32 %v11449_v63, %v6986_v39 }
 0x65b   : > { %v7098_v46 = vadd.f32 %v7062_v15, %v7022_v9 }
 0x65d   : > { %v7134_v38 = vmax.f32 %v7098_v46, 0.0 }
 0x65e   : > { %v6946_v29 = vpop.f32.mrf.mxu1 }
 0x65f   : > { %7170 = vst.msk [vmem:[%s11459_s28 + $0x100] sm:$0xff] %vm1634_vm1, %v7134_v38  ;;  %v6987_v28 = vadd.f32 %v6946_v29, %v6703_v47 }
 0x661   : > { %v7063_v18 = vadd.f32 %v11449_v63, %v6987_v28 }
 0x663   : > { %v7099_v51 = vadd.f32 %v7063_v18, %v7023_v55 }
 0x665   : > { %v7135_v62 = vmax.f32 %v7099_v51, 0.0 }
 0x666   : > { %v6949_v16 = vpop.f32.mrf.mxu1 }
 0x667   : > { %7171 = vst.msk [vmem:[%s11459_s28 + $0x108] sm:$0xff] %vm1634_vm1, %v7135_v62  ;;  %v6988_v19 = vadd.f32 %v6949_v16, %v6704_v56 }
 0x669   : > { %v7064_v40 = vadd.f32 %v11449_v63, %v6988_v19 }
 0x66b   : > { %v7100_v43 = vadd.f32 %v7064_v40, %v7024_v11 }
 0x66d   : > { %v7136_v61 = vmax.f32 %v7100_v43, 0.0 }
 0x66e   : > { %v6951_v58 = vpop.f32.mrf.mxu1 }
 0x66f   : > { %7172 = vst.msk [vmem:[%s11459_s28 + $0x110] sm:$0xff] %vm1634_vm1, %v7136_v61  ;;  %v6989_v13 = vadd.f32 %v6951_v58, %v6705_v45 }
 0x671   : > { %v7065_v6 = vadd.f32 %v11449_v63, %v6989_v13 }
 0x673   : > { %v7101_v25 = vadd.f32 %v7065_v6, %v7025_v14 }
 0x675   : > { %v7137_v49 = vmax.f32 %v7101_v25, 0.0 }
 0x677   : > { %7173 = vst.msk [vmem:[%s11459_s28 + $0x118] sm:$0xff] %vm1634_vm1, %v7137_v49 }
 0x678 PF: > { %s15_s18 = sadd.s32 1, %s8098_s18  }
 0x679   : > { %p12_p4 = scmp.ge.s32.totalorder %s15_s18, 4  }
 0x67b   :  { %14 = sbr.rel (!%p12_p4) target bundleno = 1 (0x1), region = 86 }

</bundles_post_ra>
